<compile_context>
chip_gen: v7x
topology: tpu7x:2x2x1
jax: 0.10.0
libtpu: 0.0.40
codegen_flags: <defaults>
</compile_context>

<pallas_src>
import functools

import jax
import jax.numpy as jnp
from jax.experimental import pallas as pl
from jax.experimental.pallas import tpu as pltpu


# ----------------------------------------------------------------------------
# Helpers
# ----------------------------------------------------------------------------
def _round_up(x, m):
    return ((x + m - 1) // m) * m


def _default_block_n():
    """256-wide Cout tiles on v6e/v7x (full MXU width), 128 on v5-class chips."""
    try:
        kind = jax.devices()[0].device_kind.lower()
    except Exception:
        return 256
    return 128 if "v5" in kind else 256


def _pick_tile(nout, preferred):
    for cand in (preferred, 256, 128):
        if nout % cand == 0:
            return cand
    # TODO(synk): a non-128-multiple Cout would need masked lane stores.
    return nout


_VMEM_LIMIT = 32 * 1024 * 1024  # lifts v5e's 16 MiB scoped default; == v6e/v7x default


# ----------------------------------------------------------------------------
# Kernel A: conv1 (im2col matmul) + bias + ReLU + fused MaxPool2d(2, 2).
# Patch rows arrive ordered (pool-quadrant, n, hp, wp), quadrants padded to
# `group` rows, so the 2x2 pool is a max over four aligned row slices.
# ----------------------------------------------------------------------------
def _conv1_relu_pool_kernel(a_ref, w_ref, b_ref, o_ref, *, group):
    acc = jnp.dot(a_ref[...], w_ref[...], preferred_element_type=jnp.float32)
    acc = jnp.maximum(acc + b_ref[...], 0.0)                 # bias + ReLU, f32 VPU
    p01 = jnp.maximum(acc[0 * group:1 * group], acc[1 * group:2 * group])
    p23 = jnp.maximum(acc[2 * group:3 * group], acc[3 * group:4 * group])
    o_ref[...] = jnp.maximum(p01, p23).astype(o_ref.dtype)   # MaxPool2d(2,2)


def _im2col_pool_rows(x_nhwc, k):
    """Valid kxk stride-1 patches, rows ordered (hr*2+wr, n, hp, wp), each pooling
    quadrant padded to a 16-aligned group. Returns ([4*group, k*k*Cin], group)."""
    N, H, W, Cin = x_nhwc.shape
    Ho, Wo = H - k + 1, W - k + 1
    assert Ho % 2 == 0 and Wo % 2 == 0
    Hp, Wp = Ho // 2, Wo // 2
    kkc = k * k * Cin
    cols = [x_nhwc[:, kh:kh + Ho, kw:kw + Wo, :] for kh in range(k) for kw in range(k)]
    p = jnp.concatenate(cols, axis=-1)                       # [N, Ho, Wo, k*k*Cin]
    p = p.reshape(N, Hp, 2, Wp, 2, kkc).transpose(2, 4, 0, 1, 3, 5)
    p = p.reshape(4, N * Hp * Wp, kkc)                       # (quadrant, n*hp*wp, :)
    group = _round_up(N * Hp * Wp, 16)                       # bf16-friendly row tiles
    p = jnp.pad(p, ((0, 0), (0, group - N * Hp * Wp), (0, 0)))
    return p.reshape(4 * group, kkc), group


def conv1_relu_pool_pallas(x_nhwc, w_oihw, b, *, block_n):
    """MaxPool2d(2,2)(ReLU(Conv2d(k=5, s=1)(x))) as one fused Pallas kernel (NHWC)."""
    N, H, W, Cin = x_nhwc.shape
    Cout, Cin2, K, K2 = w_oihw.shape
    assert Cin == Cin2 and K == K2
    Ho, Wo = H - K + 1, W - K + 1
    Hp, Wp = Ho // 2, Wo // 2
    kkc = K * K * Cin

    a, group = _im2col_pool_rows(x_nhwc.astype(jnp.bfloat16), K)      # bf16 patches
    w2 = jnp.transpose(w_oihw, (2, 3, 1, 0)).reshape(kkc, Cout).astype(jnp.bfloat16)
    tn = _pick_tile(Cout, block_n)
    M = 4 * group

    out = pl.pallas_call(
        functools.partial(_conv1_relu_pool_kernel, group=group),
        out_shape=jax.ShapeDtypeStruct((group, Cout), jnp.bfloat16),
        grid_spec=pltpu.PrefetchScalarGridSpec(
            num_scalar_prefetch=0,
            grid=(Cout // tn,),                              # Cout tiles only
            in_specs=[
                # Patches stay VMEM-resident (constant block index -> DMA'd once).
                pl.BlockSpec((M, kkc), lambda j: (0, 0)),
                # One lane-dense weight column tile per grid step.
                pl.BlockSpec((kkc, tn), lambda j: (0, j)),
                pl.BlockSpec((1, tn), lambda j: (0, j)),
            ],
            out_specs=pl.BlockSpec((group, tn), lambda j: (0, j)),
        ),
        compiler_params=pltpu.CompilerParams(
            dimension_semantics=("parallel",),               # shards over v7x's 2 TCs
            vmem_limit_bytes=_VMEM_LIMIT,
        ),
    )(a, w2, b.reshape(1, Cout))

    return out[: N * Hp * Wp].reshape(N, Hp, Wp, Cout)       # pooled NHWC (bf16)


# ----------------------------------------------------------------------------
# Kernel B: conv2 (5x5 over a 5x5 map -> single matmul) + bias + ReLU, then the
# FC head (Linear(512,64)+ReLU+Linear(64,1)) fused into the last grid step.
# ----------------------------------------------------------------------------
def _conv2_fc_kernel(a_ref, w_ref, b_ref, w1_ref, b1_ref, w2r_ref, b2_ref,
                     o_ref, h_ref, *, tn, ntiles):
    j = pl.program_id(0)
    h = jnp.dot(a_ref[...], w_ref[...], preferred_element_type=jnp.float32)  # [N, tn]
    h = jnp.maximum(h + b_ref[...], 0.0)

    # Accumulate this Cout tile into the persistent [N, 512] VMEM scratch
    # (static lane slices, selected by pl.when on the grid index).
    for jj in range(ntiles):
        @pl.when(j == jj)
        def _write(jj=jj):
            h_ref[:, jj * tn:(jj + 1) * tn] = h

    @pl.when(j == ntiles - 1)
    def _finalize():
        z = jnp.dot(h_ref[...], w1_ref[...], preferred_element_type=jnp.float32)
        z = jnp.maximum(z + b1_ref[...], 0.0)
        # Final Linear(64, 1): width-1 output -> elementwise multiply + lane reduce.
        o = jnp.sum(z * w2r_ref[...], axis=1, keepdims=True) + b2_ref[...]
        o_ref[...] = o.astype(o_ref.dtype)


def conv2_fc_head_pallas(x_pooled_nhwc, w_oihw, b, fc1_w, fc1_b, fc2_w, fc2_b,
                         *, block_n):
    """squeeze-free FC head: fc2(ReLU(fc1(flatten(ReLU(conv2(x)))))) -> [N]."""
    N, Hp, Wp, Cin = x_pooled_nhwc.shape
    Cout, Cin2, K, K2 = w_oihw.shape
    assert Cin == Cin2 and K == K2
    # conv2's output is 1x1 for the WasteClassifier (5x5 map, k=5, valid), so its
    # im2col is just the NHWC flatten in (kh, kw, ci) order.
    assert Hp == K and Wp == K
    kkc = K * K * Cin

    a = x_pooled_nhwc.reshape(N, kkc).astype(jnp.bfloat16)
    w2 = jnp.transpose(w_oihw, (2, 3, 1, 0)).reshape(kkc, Cout).astype(jnp.bfloat16)
    D1 = fc1_w.shape[0]
    w1 = jnp.transpose(fc1_w).astype(jnp.float32)            # [512, 64], tiny -> f32

    tn = _pick_tile(Cout, block_n)
    ntiles = Cout // tn
    kernel = functools.partial(_conv2_fc_kernel, tn=tn, ntiles=ntiles)

    out = pl.pallas_call(
        kernel,
        out_shape=jax.ShapeDtypeStruct((N, 1), jnp.float32),
        grid_spec=pltpu.PrefetchScalarGridSpec(
            num_scalar_prefetch=0,
            grid=(ntiles,),
            in_specs=[
                pl.BlockSpec((N, kkc), lambda j: (0, 0)),     # resident activations
                pl.BlockSpec((kkc, tn), lambda j: (0, j)),    # streamed weight tiles
                pl.BlockSpec((1, tn), lambda j: (0, j)),
                pl.BlockSpec((Cout, D1), lambda j: (0, 0)),   # resident FC params
                pl.BlockSpec((1, D1), lambda j: (0, 0)),
                pl.BlockSpec((1, D1), lambda j: (0, 0)),
                pl.BlockSpec((1, 1), lambda j: (0, 0)),
            ],
            out_specs=pl.BlockSpec((N, 1), lambda j: (0, 0)),
            scratch_shapes=[pltpu.VMEM((N, Cout), jnp.float32)],
        ),
        compiler_params=pltpu.CompilerParams(
            # Cross-step scratch carry -> this axis must stay "arbitrary".
            dimension_semantics=("arbitrary",),
            vmem_limit_bytes=_VMEM_LIMIT,
        ),
    )(a, w2, b.reshape(1, Cout), w1, fc1_b.reshape(1, D1),
      fc2_w.reshape(1, D1), fc2_b.reshape(1, 1))
    return out[:, 0]                                          # squeeze(1)


# ----------------------------------------------------------------------------
# Full forward pass of the WasteClassifier head (everything after resnet18[:-3]).
# ----------------------------------------------------------------------------
def waste_classifier_forward_pallas(feat_nchw, params, *, block_n=None):
    """feat_nchw: [N, 256, 14, 14] frozen resnet18 layer3 features (NCHW)."""
    if block_n is None:
        block_n = _default_block_n()
    x = jnp.transpose(feat_nchw, (0, 2, 3, 1))                # NHWC internally
    # conv1 + ReLU + MaxPool2d(2,2), fused:                   # [N, 5, 5, 512] bf16
    x = conv1_relu_pool_pallas(x, params["conv1_w"], params["conv1_b"],
                               block_n=block_n)
    # nn.Dropout() is the identity at inference.
    # TODO(synk): training-mode dropout would use pltpu.prng_seed / prng_random_bits.
    # conv2 + ReLU + flatten + fc1 + ReLU + fc2 + squeeze, fused:
    return conv2_fc_head_pallas(x, params["conv2_w"], params["conv2_b"],
                                params["fc1_w"], params["fc1_b"],
                                params["fc2_w"], params["fc2_b"],
                                block_n=block_n)              # [N]


if __name__ == "__main__":
    N = 2
    CIN, CMID = 256, 512      # resnet18 layer3 channels; WasteClassifier conv channels
    HF = WF = 14              # resnet18 layer3 spatial size for 224x224 inputs
    K = 5
    FC1, FC2 = 64, 1

    key = jax.random.PRNGKey(0)
    keys = jax.random.split(key, 9)

    def _uniform(k, shape, fan_in):
        bound = 1.0 / (fan_in ** 0.5)
        return jax.random.uniform(k, shape, jnp.float32, -bound, bound)

    feat = jax.random.normal(keys[0], (N, CIN, HF, WF), dtype=jnp.float32)
    params = {
        # PyTorch parameter conventions: Conv2d [Cout, Cin, k, k], Linear [out, in].
        "conv1_w": _uniform(keys[1], (CMID, CIN, K, K), CIN * K * K),
        "conv1_b": _uniform(keys[2], (CMID,), CIN * K * K),
        "conv2_w": _uniform(keys[3], (CMID, CMID, K, K), CMID * K * K),
        "conv2_b": _uniform(keys[4], (CMID,), CMID * K * K),
        "fc1_w": _uniform(keys[5], (FC1, CMID), CMID),
        "fc1_b": _uniform(keys[6], (FC1,), CMID),
        "fc2_w": _uniform(keys[7], (FC2, FC1), FC1),
        "fc2_b": _uniform(keys[8], (FC2,), FC1),
    }

    out = waste_classifier_forward_pallas(feat, params)
    out = jax.block_until_ready(out)
    assert out.shape == (N,)

    # Pure-JAX (XLA) reference of the same head, in f32.
    def reference(x, p):
        h = jax.lax.conv_general_dilated(
            x, p["conv1_w"], (1, 1), "VALID",
            dimension_numbers=("NCHW", "OIHW", "NCHW"))
        h = jnp.maximum(h + p["conv1_b"][None, :, None, None], 0.0)
        h = jax.lax.reduce_window(h, -jnp.inf, jax.lax.max,
                                  (1, 1, 2, 2), (1, 1, 2, 2), "VALID")
        h = jax.lax.conv_general_dilated(
            h, p["conv2_w"], (1, 1), "VALID",
            dimension_numbers=("NCHW", "OIHW", "NCHW"))
        h = jnp.maximum(h + p["conv2_b"][None, :, None, None], 0.0)
        h = h.reshape(h.shape[0], -1)
        h = jnp.maximum(h @ p["fc1_w"].T + p["fc1_b"], 0.0)
        h = h @ p["fc2_w"].T + p["fc2_b"]
        return h[:, 0]

    ref = jax.block_until_ready(reference(feat, params))
    assert jnp.allclose(out, ref, rtol=5e-2, atol=1e-2), (out, ref)

    print("KERNEL_OK")
</pallas_src>

<mosaic_0001>
module attributes {stable_mosaic.version = 11 : i64} {
  func.func @_conv1_relu_pool_kernel(%arg0: i32, %arg1: memref<256x6400xbf16, #tpu.memory_space<vmem>>, %arg2: memref<6400x256xbf16, #tpu.memory_space<vmem>>, %arg3: memref<1x256xf32, #tpu.memory_space<vmem>>, %arg4: memref<64x256xbf16, #tpu.memory_space<vmem>>) attributes {dimension_semantics = [#tpu.dimension_semantics<parallel>], iteration_bounds = array<i64: 2>, scalar_prefetch = 0 : i64, scratch_operands = 0 : i64, tpu.core_type = #tpu.core_type<tc>, window_params = [{pipeline_mode = #tpu.pipeline_mode<synchronous>, transform_indices = @transform_0, window_bounds = array<i64: 256, 6400>}, {transform_indices = @transform_1, window_bounds = array<i64: 6400, 256>}, {transform_indices = @transform_2, window_bounds = array<i64: 1, 256>}, {transform_indices = @transform_3, window_bounds = array<i64: 64, 256>}]} {
    %c0 = arith.constant 0 : index
    %c0_0 = arith.constant 0 : index
    %0 = vector.load %arg1[%c0, %c0_0] : memref<256x6400xbf16, #tpu.memory_space<vmem>>, vector<256x6400xbf16>
    %c0_1 = arith.constant 0 : index
    %c0_2 = arith.constant 0 : index
    %1 = vector.load %arg2[%c0_1, %c0_2] : memref<6400x256xbf16, #tpu.memory_space<vmem>>, vector<6400x256xbf16>
    %cst = arith.constant dense<0.000000e+00> : vector<256x256xf32>
    %2 = tpu.matmul %0, %1, %cst {dimension_numbers = #tpu.dot_dimension_numbers<[1], [0], [0], [1], [0, 0, 1, 1], [], []>} : vector<256x6400xbf16>, vector<6400x256xbf16>, vector<256x256xf32> -> vector<256x256xf32>
    %c0_3 = arith.constant 0 : index
    %c0_4 = arith.constant 0 : index
    %3 = vector.load %arg3[%c0_3, %c0_4] : memref<1x256xf32, #tpu.memory_space<vmem>>, vector<1x256xf32>
    %4 = vector.broadcast %3 : vector<1x256xf32> to vector<256x256xf32>
    %5 = arith.addf %2, %4 : vector<256x256xf32>
    %cst_5 = arith.constant 0.000000e+00 : f32
    %6 = vector.broadcast %cst_5 : f32 to vector<256x256xf32>
    %7 = arith.maximumf %5, %6 : vector<256x256xf32>
    %8 = vector.extract_strided_slice %7 {offsets = [0, 0], sizes = [64, 256], strides = [1, 1]} : vector<256x256xf32> to vector<64x256xf32>
    %9 = vector.extract_strided_slice %7 {offsets = [64, 0], sizes = [64, 256], strides = [1, 1]} : vector<256x256xf32> to vector<64x256xf32>
    %10 = arith.maximumf %8, %9 : vector<64x256xf32>
    %11 = vector.extract_strided_slice %7 {offsets = [128, 0], sizes = [64, 256], strides = [1, 1]} : vector<256x256xf32> to vector<64x256xf32>
    %12 = vector.extract_strided_slice %7 {offsets = [192, 0], sizes = [64, 256], strides = [1, 1]} : vector<256x256xf32> to vector<64x256xf32>
    %13 = arith.maximumf %11, %12 : vector<64x256xf32>
    %14 = arith.maximumf %10, %13 : vector<64x256xf32>
    %15 = arith.truncf %14 : vector<64x256xf32> to vector<64x256xbf16>
    %c0_6 = arith.constant 0 : index
    %c0_7 = arith.constant 0 : index
    %16 = vector.load %arg4[%c0_6, %c0_7] : memref<64x256xbf16, #tpu.memory_space<vmem>>, vector<64x256xbf16>
    tpu.vector_store %arg4[%c0_6, %c0_7], %15 {strides = array<i32>} : memref<64x256xbf16, #tpu.memory_space<vmem>>, vector<64x256xbf16>,
    return
  }
  func.func @transform_0(%arg0: i32) -> (i32, i32) {
    %c0_i32 = arith.constant 0 : i32
    %c0_i32_0 = arith.constant 0 : i32
    %c0_i32_1 = arith.constant 0 : i32
    return %c0_i32, %c0_i32_0 : i32, i32
  }
  func.func @transform_1(%arg0: i32) -> (i32, i32) {
    %c0_i32 = arith.constant 0 : i32
    %c0_i32_0 = arith.constant 0 : i32
    return %c0_i32, %arg0 : i32, i32
  }
  func.func @transform_2(%arg0: i32) -> (i32, i32) {
    %c0_i32 = arith.constant 0 : i32
    %c0_i32_0 = arith.constant 0 : i32
    return %c0_i32, %arg0 : i32, i32
  }
  func.func @transform_3(%arg0: i32) -> (i32, i32) {
    %c0_i32 = arith.constant 0 : i32
    %c0_i32_0 = arith.constant 0 : i32
    return %c0_i32, %arg0 : i32, i32
  }
}

</mosaic_0001>

<bundles_post_ra>
// kernel: tpu_custom_call.1
= control target key start
LH: loop header
LB: loop body
LE: loop exit
PB: predicated region body
PF: predicated region fallthrough
CT: control target
= control target key end

     0   :  { %8 = vsyncpa [#allocation3], 0  ;;  %s22286_s0 = inlined_call_operand.hbm [shape: bf16[256,6400], index: 0, kind: input, shape index: {}]   ;;  %s22287_s1 = inlined_call_operand.hbm [shape: bf16[6400,512], index: 1, kind: input, shape index: {}]   ;;  %s22288_s2 = inlined_call_operand.hbm [shape: f32[1,512], index: 2, kind: input, shape index: {}]   ;;  %s22289_s3 = inlined_call_operand.hbm [shape: bf16[64,512], index: 3, kind: output, shape index: {}]  }
   0x1   :  { %9 = vsyncpa [#allocation6], 0 }
   0x2   :  { %11 = vsyncpa [#allocation6 + $0x1], 0 }
   0x3   :  { %12 = vsyncpa [#allocation4], 0 }
   0x4   :  { %14 = vsyncpa [#allocation4 + $0x1], 0  ;;  %s20931_s12 = smov 0   ;;  %s20933_s13 = smov 0  }
   0x5   :  { %s20935_s14 = smov 0   ;;  %s20937_s15 = smov 0  }
   0x6 LB: > { %s20952_s16 = sadd.s32 1, %s20897_s15   ;;  %s48_s17 = sadd.s32 1, %s20893_s14  ;;  %s20897_s15 = sphi %s20937_s15, %s22316_s15   ;;  %s20893_s14 = sphi %s20935_s14, %s22315_s14   ;;  %s20889_s13 = sphi %s20933_s13, %s22314_s13   ;;  %s20885_s12 = sphi %s20931_s12, %s22313_s12  }
   0x7   : > { %s45_s18 = ssub.s32 %s20897_s15, %s20952_s16  ;;  %p55_p0 = scmp.ne.s32.totalorder %s20893_s14, %s20889_s13 }
   0x8   : > { %p46_p1 = scmp.eq.s32.totalorder %s45_s18, 0  ;;  %p56_p2 = scmp.eq.s32.totalorder %s20897_s15, 0 }
   0x9   : > { %p18263_p4 = scmp.lt.s32.totalorder %s20897_s15, 2  ;;  %s150_s20 = sand.u32 1, %s20897_s15  }
   0xa   : > { %s20963_s19 = scalar_select %p46_p1, %s20893_s14, %s48_s17  }
   0xb   : > { %p57_p5 = por %p56_p2, %p55_p0  ;;  %s152_s21 = sand.u32 1, %s20893_s14  }
   0xc   : > { %s18235_s22 = smul.u32 6400, %s152_s21  ;;  %s16592_s23 = sshll.u32 %s20897_s15, 7 }
   0xd   : > { %s20976_s26 = scalar_lea.hbm %s22287_s1, %s16592_s23  ;;  %p20978_p6 = pnand %p18263_p4, %p57_p5 }
   0xe   : > { %s154_s28 = scalar_lea.vmem [#allocation5], %s18235_s22  ;;  %s20984_s30 = scalar_lea.sflag [#allocation6], %s150_s20 }
   0xf   : > { %s22297_s27 = scalar_select %p20978_p6, 1, 0 }
  0x10   : > { %s161_s29 = sshll.u32 %s154_s28, 4  ;;  %s20739_s4 = scalar_lea.hbm %s20976_s26, 102400  ;;  %s20982_s29 = int_to_ptr.vmem [resolvable:$true] %s161_s29 }
  0x11   : > { %p20740_p7 = scmp.ne.s32.totalorder %s20976_s26, %s20739_s4  ;;  %p22291_p8 = pneg %p20978_p6 }
  0x12   : > { %s20744_s7 = scalar_lea.hbm %s22287_s1, 204800  ;;  %p20745_p11 = scmp.lt.u32.totalorder %s20976_s26, %s22287_s1 }
  0x13   : > { %p20742_p9 = pnand %p22291_p8, %p20740_p7  ;;  %p20746_p12 = scmp.lt.u32.totalorder %s20744_s7, %s20739_s4 }
  0x14   : > { %p20748_p1 = scmp.lt.u32.totalorder %s20739_s4, %s20976_s26 }
  0x15   : > { %p20743_p10 = pneg %p20742_p9  ;;  %p20747_p13 = por %p20746_p12, %p20745_p11 }
  0x17   : > { %p20749_p2 = por %p20748_p1, %p20747_p13 }
  0x19   : > { %p20750_p4 = pnand %p20749_p2, %p20743_p10 }
  0x1b   : > { %20753 = shalt.err (!%p20750_p4)
}
  0x1c   : > { %s20754_s10 = scalar_lea.vmem %s20982_s29, 102400  ;;  %s20899_s11 = smov [#allocation5]  }
  0x1d   : > { %p20755_p5 = scmp.ne.s32.totalorder %s20982_s29, %s20754_s10  ;;  %s20759_s17 = sshll.u32 %s20899_s11, 4  ;;  %s20760_s17 = int_to_ptr.vmem [resolvable:$false] %s20759_s17 }
  0x1e   : > { %s20761_s18 = scalar_lea.vmem %s20760_s17, 204800  ;;  %p20762_p3 = scmp.lt.s32.totalorder %s20982_s29, %s20760_s17 }
  0x1f   : > { %p20757_p7 = pnand %p20755_p5, %p22291_p8  ;;  %p20763_p11 = scmp.lt.s32.totalorder %s20761_s18, %s20754_s10 }
  0x21   : > { %p20758_p9 = pneg %p20757_p7  ;;  %p20764_p12 = por %p20763_p11, %p20762_p3 }
  0x23   : > { %p20765_p13 = pnand %p20764_p12, %p20758_p9 }
  0x25   : > { %20768 = shalt.err (!%p20765_p13)
}
  0x26   : > { %s20900_s20 = smov 256   ;;  %s20901_s22 = smov 128  }
  0x27   : > { %s20902_s23 = smov 8   ;;  %s21013_s24 = sadd.s32 4294967295, %s20897_s15  }
  0x28   : > { %18254 = dma.hbm_to_vmem [thread:$0]  (!%p20978_p6), %s20976_s26, 102400, %s20982_s29, %s20984_s30, %s20900_s20, %s20901_s22, %s20902_s23  }
  0x29   : > { %s14966_s25 = sadd.s32 4294967294, %s20897_s15   ;;  %p61_p3 = scmp.ne.s32.totalorder %s20889_s13, %s20885_s12 }
  0x2a   : > { %p22290_p10 = scmp.eq.s32.totalorder %s21013_s24, 0  ;;  %p111_p1 = scmp.eq.s32.totalorder %s21013_s24, 1 }
  0x2b   : > { %p117_p2 = scmp.eq.s32.totalorder %s14966_s25, 1  ;;  %p14967_p4 = scmp.ge.s32.totalorder %s20897_s15, 1 }
  0x2c   : > { %p21023_p5 = por %p22290_p10, %p61_p3  ;;  %p21030_p7 = por %p111_p1, %p55_p0 }
  0x2d   : > { %p21034_p9 = por %p117_p2, %p61_p3  ;;  %p124_p11 = scmp.lt.s32.totalorder %s20897_s15, 3 }
  0x2e   : > { %s22298_s28 = scalar_select %p21023_p5, 1, 0 }
  0x2f   : > { %s22299_s26 = scalar_select %p21030_p7, 1, 0 }
  0x30   : > { %s22300_s29 = scalar_select %p21034_p9, 1, 0 }
  0x31   : > { %p21039_p12 = pnand %p14967_p4, %p124_p11  ;;  %s20903_s5 = smov [#allocation2]  }
  0x32   : > { %s136_s6 = sshll.u32 %s20903_s5, 4  ;;  %s14972_s7 = sshll.u32 %s152_s21, 1  ;;  %s21043_s6 = int_to_ptr.vmem [resolvable:$true] %s136_s6 }
  0x33   : > { %s22301_s4 = scalar_select %p21039_p12, 1, 0 }
  0x34   : > { %p18247_p13 = pneg %p21039_p12  ;;  %s16593_s8 = sshll.u32 %s20897_s15, 5 }
  0x35   : > { %s21059_s17 = scalar_lea.hbm %s22288_s2, %s16593_s8  ;;  %s175_s18 = scalar_lea.vmem [#allocation7], %s14972_s7 }
  0x36   : > { %p21052_p0 = pnand %p18247_p13, %p22290_p10  ;;  %s183_s20 = sshll.u32 %s175_s18, 4  ;;  %s21061_s20 = int_to_ptr.vmem [resolvable:$true] %s183_s20 }
  0x37   : > { %s20769_s21 = scalar_lea.hbm %s22286_s0, 102400 }
  0x38   : > { %p20770_p3 = scmp.ne.s32.totalorder %s22286_s0, %s20769_s21  ;;  %p20771_p1 = pneg %p21052_p0 }
  0x39   : > { %p20776_p11 = scmp.lt.u32.totalorder %s20769_s21, %s22286_s0 }
  0x3a   : > { %p20772_p2 = pnand %p20771_p1, %p20770_p3 }
  0x3c   : > { %p20773_p4 = pneg %p20772_p2 }
  0x3e   : > { %p20778_p13 = pnand %p20776_p11, %p20773_p4 }
  0x40   : > { %20781 = shalt.err (!%p20778_p13)
}
  0x41   : > { %s20782_s7 = scalar_lea.vmem %s21043_s6, 102400  ;;  %p20790_p7 = scmp.lt.s32.totalorder %s21043_s6, %s21043_s6 }
  0x42   : > { %p20783_p10 = scmp.ne.s32.totalorder %s21043_s6, %s20782_s7  ;;  %p20791_p5 = scmp.lt.s32.totalorder %s20782_s7, %s20782_s7 }
  0x44   : > { %p20785_p8 = pnand %p20783_p10, %p20771_p1  ;;  %p20792_p12 = por %p20791_p5, %p20790_p7 }
  0x46   : > { %p20786_p9 = pneg %p20785_p8 }
  0x48   : > { %p20793_p6 = pnand %p20792_p12, %p20786_p9 }
  0x4a   : > { %20796 = shalt.err (!%p20793_p6)
}
  0x4b   : > { %s20904_s8 = smov 3200   ;;  %s20905_s18 = smov 200  }
  0x4c   : > { %18250 = dma.hbm_to_vmem [thread:$0]  (!%p21052_p0), %s22286_s0, 102400, %s21043_s6, [#allocation3], %s20904_s8, %s20904_s8, %s20905_s18  }
  0x4d   : > { %s20797_s21 = scalar_lea.hbm %s21059_s17, 32  ;;  %p22303_p10 = scmp.ne.s32.totalorder %s22297_s27, 0 }
  0x4e   : > { %p20798_p8 = scmp.ne.s32.totalorder %s21059_s17, %s20797_s21  ;;  %s20802_s10 = scalar_lea.hbm %s22288_s2, 64 }
  0x4f   : > { %p22304_p5 = pneg %p22303_p10  ;;  %p20803_p9 = scmp.lt.u32.totalorder %s21059_s17, %s22288_s2 }
  0x50   : > { %p20804_p12 = scmp.lt.u32.totalorder %s20802_s10, %s20797_s21  ;;  %p20806_p1 = scmp.lt.u32.totalorder %s20797_s21, %s21059_s17 }
  0x51   : > { %p20800_p7 = pnand %p20798_p8, %p22304_p5 }
  0x52   : > { %p20805_p3 = por %p20804_p12, %p20803_p9 }
  0x53   : > { %p20801_p6 = pneg %p20800_p7 }
  0x54   : > { %p20807_p2 = por %p20806_p1, %p20805_p3 }
  0x56   : > { %p20808_p4 = pnand %p20807_p2, %p20801_p6 }
  0x58   : > { %20811 = shalt.err (!%p20808_p4)
}
  0x59   : > { %s20812_s6 = scalar_lea.vmem %s21061_s20, 32  ;;  %p22305_p11 = pmov %p22304_p5 }
  0x5a   : > { %p20813_p0 = scmp.ne.s32.totalorder %s21061_s20, %s20812_s6  ;;  %s20906_s9 = smov [#allocation7]  }
  0x5b   : > { %s20817_s8 = sshll.u32 %s20906_s9, 4  ;;  %s20818_s8 = int_to_ptr.vmem [resolvable:$false] %s20817_s8 }
  0x5c   : > { %p20815_p13 = pnand %p20813_p0, %p22305_p11  ;;  %s20819_s18 = scalar_lea.vmem %s20818_s8, 64 }
  0x5d   : > { %p20820_p5 = scmp.lt.s32.totalorder %s21061_s20, %s20818_s8  ;;  %p20821_p7 = scmp.lt.s32.totalorder %s20819_s18, %s20812_s6 }
  0x5e   : > { %p20816_p8 = pneg %p20815_p13 }
  0x5f   : > { %p20822_p9 = por %p20821_p7, %p20820_p5 }
  0x61   : > { %p20823_p12 = pnand %p20822_p9, %p20816_p8 }
  0x63   : > { %20826 = shalt.err (!%p20823_p12)
}
  0x64   : > { %18257 = dma.hbm_to_vmem [thread:$0]  (!%p22303_p10), %s21059_s17, 32, %s21061_s20, %s20984_s30  }
  0x65   : > { %p22306_p6 = scmp.ne.s32.totalorder %s22301_s4, 0 }
  0x66   : > { %p22307_p3 = scmp.eq.s32.totalorder (!%p22306_p6), %s21013_s24, 0 }
  0x67   : > { %192 = sbr.rel (%p22306_p6) target bundleno = 2016 (0x7e0), region = 32 }
  0x6e   : > { %20872 = dma.done.wait (%p22307_p3), [#allocation3], 102400   ;;  %p22308_p1 = pmov %p22307_p3 }
  0x6f   : > { %s198_s22 = sand.u32 1, %s21013_s24   ;;  %s21116_s23 = sand.u32 1, %s20889_s13  }
  0x70   : > { %20874 = vsyncadd (%p22308_p1), [#allocation3], 4294864896  ;;  %s18236_s27 = smul.u32 6400, %s21116_s23  ;;  %s199_s21 = scalar_lea.sflag [#allocation6], %s198_s22 }
  0x71   : > { %p22309_p10 = scmp.ne.s32.totalorder %s22298_s28, 0 }
  0x72   : > { %s21119_s25 = scalar_lea.vmem [#allocation5], %s18236_s27 }
  0x73   : > { %20876 = dma.done.wait (%p22309_p10), %s199_s21, 102432  }
  0x74   : > { %20878 = vsyncadd (%p22309_p10), %s199_s21, 4294864864  ;;  %v18307_v0 = vld [vmem:[%s21119_s25 + $0x4] ss:$8 sps:$4 sm:$0xff]   ;;  %v18311_v2 = vld [vmem:[%s21119_s25] ss:$8 sps:$4 sm:$0xff]   ;;  %s14977_s30 = sshll.u32 %s21116_s23, 1 }
  0x75   : > { %v18309_v1 = vld [vmem:[%s21119_s25 + $0xc04] ss:$8 sps:$4 sm:$0xff]   ;;  %9854 = vmatprep.subr.bf16.mxu1 %v18307_v0  ;;  %v18312_v3 = vld [vmem:[%s21119_s25 + $0xc00] ss:$8 sps:$4 sm:$0xff]   ;;  %v18313_v4 = vld [vmem:[%s21119_s25 + $0x14] ss:$8 sps:$4 sm:$0xff]  }
  0x76   : > { %12170 = vmatprep.subr.bf16.mxu0 %v18309_v1  ;;  %9855 = vmatpush1.bf16.msra.mxu1 %v18311_v2  ;;  %v18315_v5 = vld [vmem:[%s21119_s25 + $0xc14] ss:$8 sps:$4 sm:$0xff]   ;;  %v18317_v6 = vld [vmem:[%s21119_s25 + $0x10] ss:$8 sps:$4 sm:$0xff]   ;;  %v18319_v8 = vld [vmem:[%s21119_s25 + $0x24] ss:$8 sps:$4 sm:$0xff]  }
  0x77   : > { %12171 = vmatpush1.bf16.msra.mxu0 %v18312_v3  ;;  %9856 = vmatprep.subr.bf16.mxu1 %v18313_v4  ;;  %v18318_v7 = vld [vmem:[%s21119_s25 + $0xc10] ss:$8 sps:$4 sm:$0xff]   ;;  %v18321_v9 = vld [vmem:[%s21119_s25 + $0xc24] ss:$8 sps:$4 sm:$0xff]   ;;  %v18323_v10 = vld [vmem:[%s21119_s25 + $0x20] ss:$8 sps:$4 sm:$0xff]  }
  0x78   : > { %12172 = vmatprep.subr.bf16.mxu0 %v18315_v5  ;;  %v18324_v11 = vld [vmem:[%s21119_s25 + $0xc20] ss:$8 sps:$4 sm:$0xff]   ;;  %v18325_v12 = vld [vmem:[%s21119_s25 + $0x34] ss:$8 sps:$4 sm:$0xff]   ;;  %v18329_v14 = vld [vmem:[%s21119_s25 + $0x30] ss:$8 sps:$4 sm:$0xff]  }
  0x79   : > { %v18327_v13 = vld [vmem:[%s21119_s25 + $0xc34] ss:$8 sps:$4 sm:$0xff]   ;;  %v18330_v15 = vld [vmem:[%s21119_s25 + $0xc30] ss:$8 sps:$4 sm:$0xff]   ;;  %v18331_v16 = vld [vmem:[%s21119_s25 + $0x44] ss:$8 sps:$4 sm:$0xff]  }
  0x7a   : > { %9857 = vmatpush1.bf16.msra.mxu1 %v18317_v6  ;;  %v18333_v17 = vld [vmem:[%s21119_s25 + $0xc44] ss:$8 sps:$4 sm:$0xff]   ;;  %v18335_v18 = vld [vmem:[%s21119_s25 + $0x40] ss:$8 sps:$4 sm:$0xff]   ;;  %v18337_v20 = vld [vmem:[%s21119_s25 + $0x54] ss:$8 sps:$4 sm:$0xff]  }
  0x7b   : > { %12173 = vmatpush1.bf16.msra.mxu0 %v18318_v7  ;;  %9858 = vmatprep.subr.bf16.mxu1 %v18319_v8  ;;  %v18336_v19 = vld [vmem:[%s21119_s25 + $0xc40] ss:$8 sps:$4 sm:$0xff]   ;;  %v18339_v21 = vld [vmem:[%s21119_s25 + $0xc54] ss:$8 sps:$4 sm:$0xff]   ;;  %v18341_v22 = vld [vmem:[%s21119_s25 + $0x50] ss:$8 sps:$4 sm:$0xff]  }
  0x7c   : > { %12174 = vmatprep.subr.bf16.mxu0 %v18321_v9  ;;  %v18342_v23 = vld [vmem:[%s21119_s25 + $0xc50] ss:$8 sps:$4 sm:$0xff]   ;;  %v18343_v24 = vld [vmem:[%s21119_s25 + $0x64] ss:$8 sps:$4 sm:$0xff]   ;;  %v18347_v26 = vld [vmem:[%s21119_s25 + $0x60] ss:$8 sps:$4 sm:$0xff]  }
  0x7d   : > { %v18345_v25 = vld [vmem:[%s21119_s25 + $0xc64] ss:$8 sps:$4 sm:$0xff]   ;;  %v18348_v27 = vld [vmem:[%s21119_s25 + $0xc60] ss:$8 sps:$4 sm:$0xff]   ;;  %v18349_v28 = vld [vmem:[%s21119_s25 + $0x74] ss:$8 sps:$4 sm:$0xff]  }
  0x7e   : > { %9859 = vmatpush1.bf16.msra.mxu1 %v18323_v10  ;;  %v18351_v29 = vld [vmem:[%s21119_s25 + $0xc74] ss:$8 sps:$4 sm:$0xff]   ;;  %v18353_v30 = vld [vmem:[%s21119_s25 + $0x70] ss:$8 sps:$4 sm:$0xff]   ;;  %v18355_v32 = vld [vmem:[%s21119_s25 + $0x84] ss:$8 sps:$4 sm:$0xff]  }
  0x7f   : > { %12175 = vmatpush1.bf16.msra.mxu0 %v18324_v11  ;;  %9860 = vmatprep.subr.bf16.mxu1 %v18325_v12  ;;  %v18354_v31 = vld [vmem:[%s21119_s25 + $0xc70] ss:$8 sps:$4 sm:$0xff]   ;;  %v18357_v33 = vld [vmem:[%s21119_s25 + $0xc84] ss:$8 sps:$4 sm:$0xff]   ;;  %v18359_v34 = vld [vmem:[%s21119_s25 + $0x80] ss:$8 sps:$4 sm:$0xff]  }
  0x80   : > { %12176 = vmatprep.subr.bf16.mxu0 %v18327_v13  ;;  %v18360_v35 = vld [vmem:[%s21119_s25 + $0xc80] ss:$8 sps:$4 sm:$0xff]   ;;  %v18361_v36 = vld [vmem:[%s21119_s25 + $0x94] ss:$8 sps:$4 sm:$0xff]   ;;  %v18365_v38 = vld [vmem:[%s21119_s25 + $0x90] ss:$8 sps:$4 sm:$0xff]  }
  0x81   : > { %v18363_v37 = vld [vmem:[%s21119_s25 + $0xc94] ss:$8 sps:$4 sm:$0xff]   ;;  %v18366_v39 = vld [vmem:[%s21119_s25 + $0xc90] ss:$8 sps:$4 sm:$0xff]   ;;  %v18367_v40 = vld [vmem:[%s21119_s25 + $0xa4] ss:$8 sps:$4 sm:$0xff]  }
  0x82   : > { %9861 = vmatpush1.bf16.msra.mxu1 %v18329_v14  ;;  %v18369_v41 = vld [vmem:[%s21119_s25 + $0xca4] ss:$8 sps:$4 sm:$0xff]   ;;  %v18371_v42 = vld [vmem:[%s21119_s25 + $0xa0] ss:$8 sps:$4 sm:$0xff]   ;;  %v18373_v44 = vld [vmem:[%s21119_s25 + $0xb4] ss:$8 sps:$4 sm:$0xff]  }
  0x83   : > { %12177 = vmatpush1.bf16.msra.mxu0 %v18330_v15  ;;  %9862 = vmatprep.subr.bf16.mxu1 %v18331_v16  ;;  %v18372_v43 = vld [vmem:[%s21119_s25 + $0xca0] ss:$8 sps:$4 sm:$0xff]   ;;  %v18375_v45 = vld [vmem:[%s21119_s25 + $0xcb4] ss:$8 sps:$4 sm:$0xff]   ;;  %v18377_v46 = vld [vmem:[%s21119_s25 + $0xb0] ss:$8 sps:$4 sm:$0xff]  }
  0x84   : > { %12178 = vmatprep.subr.bf16.mxu0 %v18333_v17  ;;  %v18378_v47 = vld [vmem:[%s21119_s25 + $0xcb0] ss:$8 sps:$4 sm:$0xff]   ;;  %v18379_v48 = vld [vmem:[%s21119_s25 + $0xc4] ss:$8 sps:$4 sm:$0xff]   ;;  %v18383_v52 = vld [vmem:[%s21119_s25 + $0xc0] ss:$8 sps:$4 sm:$0xff]  }
  0x85   : > { %v18405_v49 = vld [vmem:[#allocation2 + $0x4] ss:$200 sps:$4 sm:$0xff]   ;;  %v18384_v53 = vld [vmem:[%s21119_s25 + $0xcc0] ss:$8 sps:$4 sm:$0xff]   ;;  %v18385_v54 = vld [vmem:[%s21119_s25 + $0xd4] ss:$8 sps:$4 sm:$0xff]  }
  0x86   : > { %9863 = vmatpush1.bf16.msra.mxu1 %v18335_v18  ;;  %v18381_v50 = vld [vmem:[%s21119_s25 + $0xcc4] ss:$8 sps:$4 sm:$0xff]   ;;  %9886 = vmatprep.mubr.bf16.mxu1 %v18405_v49  ;;  %v18387_v55 = vld [vmem:[%s21119_s25 + $0xcd4] ss:$8 sps:$4 sm:$0xff]   ;;  %v18389_v56 = vld [vmem:[%s21119_s25 + $0xd0] ss:$8 sps:$4 sm:$0xff]  }
  0x87   : > { %12179 = vmatpush1.bf16.msra.mxu0 %v18336_v19  ;;  %9864 = vmatprep.subr.bf16.mxu1 %v18337_v20  ;;  %v18408_v51 = vld [vmem:[#allocation2 + $0x64] ss:$200 sps:$4 sm:$0xff]   ;;  %v18390_v57 = vld [vmem:[%s21119_s25 + $0xcd0] ss:$8 sps:$4 sm:$0xff]   ;;  %v18395_v60 = vld [vmem:[%s21119_s25 + $0xe0] ss:$8 sps:$4 sm:$0xff]  }
  0x88   : > { %12180 = vmatprep.subr.bf16.mxu0 %v18339_v21  ;;  %12202 = vmatprep.mubr.bf16.mxu0 %v18408_v51  ;;  %v18391_v58 = vld [vmem:[%s21119_s25 + $0xe4] ss:$8 sps:$4 sm:$0xff]   ;;  %v18396_v61 = vld [vmem:[%s21119_s25 + $0xce0] ss:$8 sps:$4 sm:$0xff]   ;;  %v18397_v62 = vld [vmem:[%s21119_s25 + $0xf4] ss:$8 sps:$4 sm:$0xff]  }
  0x89   : > { %v18393_v59 = vld [vmem:[%s21119_s25 + $0xce4] ss:$8 sps:$4 sm:$0xff]   ;;  %v18399_v63 = vld [vmem:[%s21119_s25 + $0xcf4] ss:$8 sps:$4 sm:$0xff]   ;;  %v18401_v0 = vld [vmem:[%s21119_s25 + $0xf0] ss:$8 sps:$4 sm:$0xff]  }
  0x8a   : > { %9865 = vmatpush1.bf16.msra.mxu1 %v18341_v22  ;;  %v18402_v1 = vld [vmem:[%s21119_s25 + $0xcf0] ss:$8 sps:$4 sm:$0xff]   ;;  %v18411_v2 = vld [vmem:[%s21119_s25 + $0x104] ss:$8 sps:$4 sm:$0xff]   ;;  %v18403_v4 = vld [vmem:[#allocation2] ss:$200 sps:$4 sm:$0xff]  }
  0x8b   : > { %12181 = vmatpush1.bf16.msra.mxu0 %v18342_v23  ;;  %9866 = vmatprep.subr.bf16.mxu1 %v18343_v24  ;;  %v18414_v3 = vld [vmem:[%s21119_s25 + $0xd04] ss:$8 sps:$4 sm:$0xff]   ;;  %v18406_v5 = vld [vmem:[#allocation2 + $0x60] ss:$200 sps:$4 sm:$0xff]   ;;  %v18417_v8 = vld [vmem:[%s21119_s25 + $0xd14] ss:$8 sps:$4 sm:$0xff]  }
  0x8c   : > { %12182 = vmatprep.subr.bf16.mxu0 %v18345_v25  ;;  %v18409_v6 = vld [vmem:[%s21119_s25 + $0x100] ss:$8 sps:$4 sm:$0xff]   ;;  %v18418_v9 = vld [vmem:[#allocation2 + $0x194] ss:$200 sps:$4 sm:$0xff]   ;;  %v18415_v12 = vld [vmem:[%s21119_s25 + $0xd10] ss:$8 sps:$4 sm:$0xff]  }
  0x8d   : > { %v18412_v7 = vld [vmem:[%s21119_s25 + $0xd00] ss:$8 sps:$4 sm:$0xff]   ;;  %v18420_v10 = vld [vmem:[#allocation2 + $0x1f4] ss:$200 sps:$4 sm:$0xff]   ;;  %v18423_v13 = vld [vmem:[%s21119_s25 + $0x110] ss:$8 sps:$4 sm:$0xff]  }
  0x8e   : > { %9867 = vmatpush1.bf16.msra.mxu1 %v18347_v26  ;;  %v18425_v11 = vld [vmem:[%s21119_s25 + $0x114] ss:$8 sps:$4 sm:$0xff]   ;;  %v18429_v14 = vld [vmem:[%s21119_s25 + $0xd24] ss:$8 sps:$4 sm:$0xff]   ;;  %v18422_v16 = vld [vmem:[#allocation2 + $0x190] ss:$200 sps:$4 sm:$0xff]  }
  0x8f   : > { %12183 = vmatpush1.bf16.msra.mxu0 %v18348_v27  ;;  %9868 = vmatprep.subr.bf16.mxu1 %v18349_v28  ;;  %v18440_v15 = vld [vmem:[%s21119_s25 + $0x124] ss:$8 sps:$4 sm:$0xff]   ;;  %v18426_v17 = vld [vmem:[#allocation2 + $0x1f0] ss:$200 sps:$4 sm:$0xff]   ;;  %v18427_v18 = vld [vmem:[%s21119_s25 + $0xd20] ss:$8 sps:$4 sm:$0xff]  }
  0x90   : > { %12184 = vmatprep.subr.bf16.mxu0 %v18351_v29  ;;  %v18432_v19 = vld [vmem:[%s21119_s25 + $0xd34] ss:$8 sps:$4 sm:$0xff]   ;;  %v18433_v20 = vld [vmem:[#allocation2 + $0x324] ss:$200 sps:$4 sm:$0xff]   ;;  %v18438_v22 = vld [vmem:[%s21119_s25 + $0x120] ss:$8 sps:$4 sm:$0xff]  }
  0x91   : > { %v18435_v21 = vld [vmem:[#allocation2 + $0x384] ss:$200 sps:$4 sm:$0xff]   ;;  %v18455_v23 = vld [vmem:[%s21119_s25 + $0x134] ss:$8 sps:$4 sm:$0xff]   ;;  %v18430_v24 = vld [vmem:[%s21119_s25 + $0xd30] ss:$8 sps:$4 sm:$0xff]  }
  0x92   : > { %9869 = vmatpush1.bf16.msra.mxu1 %v18353_v30  ;;  %v18437_v25 = vld [vmem:[#allocation2 + $0x320] ss:$200 sps:$4 sm:$0xff]   ;;  %v18444_v26 = vld [vmem:[%s21119_s25 + $0xd44] ss:$8 sps:$4 sm:$0xff]   ;;  %v18453_v27 = vld [vmem:[%s21119_s25 + $0x130] ss:$8 sps:$4 sm:$0xff]  }
  0x93   : > { %12185 = vmatpush1.bf16.msra.mxu0 %v18354_v31  ;;  %9870 = vmatprep.subr.bf16.mxu1 %v18355_v32  ;;  %v18441_v28 = vld [vmem:[#allocation2 + $0x380] ss:$200 sps:$4 sm:$0xff]   ;;  %v18447_v30 = vld [vmem:[%s21119_s25 + $0xd54] ss:$8 sps:$4 sm:$0xff]   ;;  %s211_s28 = scalar_lea.vmem [#allocation7], %s14977_s30  ;;  %s14978_s4 = sshll.u32 %s21116_s23, 6 }
  0x94   : > { %12186 = vmatprep.subr.bf16.mxu0 %v18357_v33  ;;  %v18442_v29 = vld [vmem:[%s21119_s25 + $0xd40] ss:$8 sps:$4 sm:$0xff]   ;;  %v18448_v31 = vld [vmem:[#allocation2 + $0x4b4] ss:$200 sps:$4 sm:$0xff]   ;;  %v18470_v33 = vld [vmem:[%s21119_s25 + $0x144] ss:$8 sps:$4 sm:$0xff]  }
  0x95   : > { %v18450_v32 = vld [vmem:[#allocation2 + $0x514] ss:$200 sps:$4 sm:$0xff]   ;;  %v18471_v49 = vld [vmem:[#allocation2 + $0x6a0] ss:$200 sps:$4 sm:$0xff]   ;;  %s22195_s17 = scalar_lea.vmem [#allocation8], %s14978_s4  ;;  %s16602_s5 = sshll.u32 %s21013_s24, 7 }
  0x96   : > { %9871 = vmatpush1.bf16.msra.mxu1 %v18359_v34  ;;  %v18468_v34 = vld [vmem:[%s21119_s25 + $0x140] ss:$8 sps:$4 sm:$0xff]   ;;  %s14861_s20 = sshll.u32 %s22195_s17, 4  ;;  %s22240_s7 = scalar_lea.hbm %s22289_s3, %s16602_s5  ;;  %s22234_s20 = int_to_ptr.vmem [resolvable:$true] %s14861_s20 }
  0x97   : > { %12187 = vmatpush1.bf16.msra.mxu0 %v18360_v35  ;;  %9872 = vmatprep.subr.bf16.mxu1 %v18361_v36  ;;  %v18445_v35 = vld [vmem:[%s21119_s25 + $0xd50] ss:$8 sps:$4 sm:$0xff]   ;;  %v18485_v36 = vld [vmem:[%s21119_s25 + $0x154] ss:$8 sps:$4 sm:$0xff]   ;;  %v18472_v51 = vld [vmem:[%s21119_s25 + $0xd80] ss:$8 sps:$4 sm:$0xff]  }
  0x98   : > { %12188 = vmatprep.subr.bf16.mxu0 %v18363_v37  ;;  %v18459_v37 = vld [vmem:[%s21119_s25 + $0xd64] ss:$8 sps:$4 sm:$0xff]   ;;  %s14848_s6 = scalar_lea.sflag [#allocation4], %s21116_s23  ;;  %s20827_s24 = scalar_lea.vmem %s22234_s20, 1024 }
  0x99   : > { %p20828_p2 = scmp.ne.s32.totalorder %s22234_s20, %s20827_s24  ;;  %p22310_p4 = scmp.ne.s32.totalorder %s22299_s26, 0 }
  0x9a   : > { %9873 = vmatpush1.bf16.msra.mxu1 %v18365_v38  ;;  %v18452_v38 = vld [vmem:[#allocation2 + $0x4b0] ss:$200 sps:$4 sm:$0xff]   ;;  %s20907_s9 = smov [#allocation8]  }
  0x9b   : > { %12189 = vmatpush1.bf16.msra.mxu0 %v18366_v39  ;;  %9874 = vmatprep.subr.bf16.mxu1 %v18367_v40  ;;  %v18456_v39 = vld [vmem:[#allocation2 + $0x510] ss:$200 sps:$4 sm:$0xff]   ;;  %v18457_v40 = vld [vmem:[%s21119_s25 + $0xd60] ss:$8 sps:$4 sm:$0xff]   ;;  %p20829_p0 = pnand %p20828_p2, %p22310_p4  ;;  %s20831_s8 = sshll.u32 %s20907_s9, 4  ;;  %s20832_s8 = int_to_ptr.vmem [resolvable:$false] %s20831_s8 }
  0x9c   : > { %12190 = vmatprep.subr.bf16.mxu0 %v18369_v41  ;;  %v18462_v41 = vld [vmem:[%s21119_s25 + $0xd74] ss:$8 sps:$4 sm:$0xff]   ;;  %s20833_s18 = scalar_lea.vmem %s20832_s8, 2048  ;;  %p20834_p13 = scmp.lt.s32.totalorder %s22234_s20, %s20832_s8 }
  0x9d   : > { %p20830_p11 = pneg %p20829_p0  ;;  %p20835_p8 = scmp.lt.s32.totalorder %s20833_s18, %s20827_s24 }
  0x9e   : > { %9875 = vmatpush1.bf16.msra.mxu1 %v18371_v42  ;;  %v18463_v42 = vld [vmem:[#allocation2 + $0x644] ss:$200 sps:$4 sm:$0xff]  }
  0x9f   : > { %12191 = vmatpush1.bf16.msra.mxu0 %v18372_v43  ;;  %9876 = vmatprep.subr.bf16.mxu1 %v18373_v44  ;;  %v18465_v43 = vld [vmem:[#allocation2 + $0x6a4] ss:$200 sps:$4 sm:$0xff]   ;;  %v18483_v44 = vld [vmem:[%s21119_s25 + $0x150] ss:$8 sps:$4 sm:$0xff]   ;;  %p20836_p5 = por %p20835_p8, %p20834_p13 }
  0xa0   : > { %12192 = vmatprep.subr.bf16.mxu0 %v18375_v45  ;;  %v18500_v45 = vld [vmem:[%s21119_s25 + $0x164] ss:$8 sps:$4 sm:$0xff]  }
  0xa1   : > { %p20837_p7 = pnand %p20836_p5, %p20830_p11 }
  0xa2   : > { %9877 = vmatpush1.bf16.msra.mxu1 %v18377_v46  ;;  %v18460_v46 = vld [vmem:[%s21119_s25 + $0xd70] ss:$8 sps:$4 sm:$0xff]  }
  0xa3   : > { %12193 = vmatpush1.bf16.msra.mxu0 %v18378_v47  ;;  %9878 = vmatprep.subr.bf16.mxu1 %v18379_v48  ;;  %v18467_v47 = vld [vmem:[#allocation2 + $0x640] ss:$200 sps:$4 sm:$0xff]   ;;  %v18474_v48 = vld [vmem:[%s21119_s25 + $0xd84] ss:$8 sps:$4 sm:$0xff]  }
  0xa4   : > { %12194 = vmatprep.subr.bf16.mxu0 %v18381_v50  ;;  %v18498_v50 = vld [vmem:[%s21119_s25 + $0x160] ss:$8 sps:$4 sm:$0xff]  }
  0xa6   : > { %9879 = vmatpush1.bf16.msra.mxu1 %v18383_v52  ;;  %v18477_v52 = vld [vmem:[%s21119_s25 + $0xd94] ss:$8 sps:$4 sm:$0xff]  }
  0xa7   : > { %12195 = vmatpush1.bf16.msra.mxu0 %v18384_v53  ;;  %9880 = vmatprep.subr.bf16.mxu1 %v18385_v54  ;;  %v18478_v53 = vld [vmem:[#allocation2 + $0x7d4] ss:$200 sps:$4 sm:$0xff]  }
  0xa8   : > { %12196 = vmatprep.subr.bf16.mxu0 %v18387_v55  ;;  %v18480_v54 = vld [vmem:[#allocation2 + $0x834] ss:$200 sps:$4 sm:$0xff]  }
  0xa9   : > { %v18515_v55 = vld [vmem:[%s21119_s25 + $0x174] ss:$8 sps:$4 sm:$0xff]  }
  0xaa   : > { %9881 = vmatpush1.bf16.msra.mxu1 %v18389_v56  ;;  %v18475_v56 = vld [vmem:[%s21119_s25 + $0xd90] ss:$8 sps:$4 sm:$0xff]  }
  0xab   : > { %12197 = vmatpush1.bf16.msra.mxu0 %v18390_v57  ;;  %9882 = vmatprep.subr.bf16.mxu1 %v18391_v58  ;;  %v18513_v57 = vld [vmem:[%s21119_s25 + $0x170] ss:$8 sps:$4 sm:$0xff]   ;;  %v18531_v58 = vld [vmem:[%s21119_s25 + $0x184] ss:$8 sps:$4 sm:$0xff]  }
  0xac   : > { %12198 = vmatprep.subr.bf16.mxu0 %v18393_v59  ;;  %v18489_v59 = vld [vmem:[%s21119_s25 + $0xda4] ss:$8 sps:$4 sm:$0xff]  }
  0xae   : > { %9883 = vmatpush1.bf16.msra.mxu1 %v18395_v60  ;;  %v18482_v60 = vld [vmem:[#allocation2 + $0x7d0] ss:$200 sps:$4 sm:$0xff]  }
  0xaf   : > { %12199 = vmatpush1.bf16.msra.mxu0 %v18396_v61  ;;  %9884 = vmatprep.subr.bf16.mxu1 %v18397_v62  ;;  %v18486_v61 = vld [vmem:[#allocation2 + $0x830] ss:$200 sps:$4 sm:$0xff]   ;;  %v18487_v62 = vld [vmem:[%s21119_s25 + $0xda0] ss:$8 sps:$4 sm:$0xff]  }
  0xb0   : > { %12200 = vmatprep.subr.bf16.mxu0 %v18399_v63  ;;  %v18492_v63 = vld [vmem:[%s21119_s25 + $0xdb4] ss:$8 sps:$4 sm:$0xff]  }
  0xb2   : > { %9885 = vmatpush1.bf16.msra.mxu1 %v18401_v0  ;;  %v18493_v0 = vld [vmem:[#allocation2 + $0x964] ss:$200 sps:$4 sm:$0xff]  }
  0xb3   : > { %12201 = vmatpush1.bf16.msra.mxu0 %v18402_v1  ;;  %10047 = vmatprep.subr.bf16.mxu1 %v18411_v2  ;;  %v18495_v1 = vld [vmem:[#allocation2 + $0x9c4] ss:$200 sps:$4 sm:$0xff]   ;;  %v18529_v2 = vld [vmem:[%s21119_s25 + $0x180] ss:$8 sps:$4 sm:$0xff]  }
  0xb4   : > { %12363 = vmatprep.subr.bf16.mxu0 %v18414_v3  ;;  %v18542_v3 = vld [vmem:[%s21119_s25 + $0x194] ss:$8 sps:$4 sm:$0xff]  }
  0xb5   : > { %9887 = vmatmul.mubr.bf16.vlgmr.msra.gmra.mrb[0].mxu1 %v18403_v4  ;;  %v18490_v4 = vld [vmem:[%s21119_s25 + $0xdb0] ss:$8 sps:$4 sm:$0xff]  }
  0xb6   : > { %12203 = vmatmul.mubr.bf16.vlgmr.msra.gmra.mrb[0].mxu0 %v18406_v5  ;;  %10048 = vmatpush1.bf16.msra.mxu1 %v18409_v6  ;;  %v18497_v5 = vld [vmem:[#allocation2 + $0x960] ss:$200 sps:$4 sm:$0xff]   ;;  %v18504_v6 = vld [vmem:[%s21119_s25 + $0xdc4] ss:$8 sps:$4 sm:$0xff]  }
  0xb7   : > { %12364 = vmatpush1.bf16.msra.mxu0 %v18412_v7  ;;  %9896 = vmatprep.mubr.bf16.mxu1 %v18418_v9  ;;  %v18501_v7 = vld [vmem:[#allocation2 + $0x9c0] ss:$200 sps:$4 sm:$0xff]  }
  0xb8   : > { %12365 = vmatprep.subr.bf16.mxu0 %v18417_v8  ;;  %12212 = vmatprep.mubr.bf16.mxu0 %v18420_v10  ;;  %v18540_v8 = vld [vmem:[%s21119_s25 + $0x190] ss:$8 sps:$4 sm:$0xff]   ;;  %v18502_v9 = vld [vmem:[%s21119_s25 + $0xdc0] ss:$8 sps:$4 sm:$0xff]   ;;  %v18507_v10 = vld [vmem:[%s21119_s25 + $0xdd4] ss:$8 sps:$4 sm:$0xff]  }
  0xb9   : > { %10049 = vmatprep.subr.bf16.mxu1 %v18425_v11  ;;  %v18508_v11 = vld [vmem:[#allocation2 + $0xaf4] ss:$200 sps:$4 sm:$0xff]  }
  0xba   : > { %10050 = vmatpush1.bf16.msra.mxu1 %v18423_v13  ;;  %v18554_v13 = vld [vmem:[%s21119_s25 + $0x1a4] ss:$8 sps:$4 sm:$0xff]  }
  0xbb   : > { %12366 = vmatpush1.bf16.msra.mxu0 %v18415_v12  ;;  %10051 = vmatprep.subr.bf16.mxu1 %v18440_v15  ;;  %v18510_v12 = vld [vmem:[#allocation2 + $0xb54] ss:$200 sps:$4 sm:$0xff]   ;;  %v18552_v15 = vld [vmem:[%s21119_s25 + $0x1a0] ss:$8 sps:$4 sm:$0xff]  }
  0xbc   : > { %12367 = vmatprep.subr.bf16.mxu0 %v18429_v14  ;;  %v18505_v14 = vld [vmem:[%s21119_s25 + $0xdd0] ss:$8 sps:$4 sm:$0xff]  }
  0xbd   : > { %9897 = vmatmul.mubr.bf16.gmra.mrb[4].mxu1 %v18422_v16  ;;  %v18566_v16 = vld [vmem:[%s21119_s25 + $0x1b4] ss:$8 sps:$4 sm:$0xff]  }
  0xbe   : > { %12213 = vmatmul.mubr.bf16.gmra.mrb[4].mxu0 %v18426_v17  ;;  %9906 = vmatprep.mubr.bf16.mxu1 %v18433_v20  ;;  %v18519_v17 = vld [vmem:[%s21119_s25 + $0xde4] ss:$8 sps:$4 sm:$0xff]   ;;  %v18517_v20 = vld [vmem:[%s21119_s25 + $0xde0] ss:$8 sps:$4 sm:$0xff]  }
  0xbf   : > { %12368 = vmatpush1.bf16.msra.mxu0 %v18427_v18  ;;  %12222 = vmatprep.mubr.bf16.mxu0 %v18435_v21  ;;  %v18512_v18 = vld [vmem:[#allocation2 + $0xaf0] ss:$200 sps:$4 sm:$0xff]   ;;  %v18522_v21 = vld [vmem:[%s21119_s25 + $0xdf4] ss:$8 sps:$4 sm:$0xff]  }
  0xc0   : > { %12369 = vmatprep.subr.bf16.mxu0 %v18432_v19  ;;  %10052 = vmatpush1.bf16.msra.mxu1 %v18438_v22  ;;  %v18516_v19 = vld [vmem:[#allocation2 + $0xb50] ss:$200 sps:$4 sm:$0xff]   ;;  %v18523_v22 = vld [vmem:[#allocation2 + $0xc84] ss:$200 sps:$4 sm:$0xff]  }
  0xc1   : > { %10053 = vmatprep.subr.bf16.mxu1 %v18455_v23  ;;  %v18527_v23 = vld [vmem:[#allocation2 + $0x6c] ss:$200 sps:$4 sm:$0xff]  }
  0xc3   : > { %12370 = vmatpush1.bf16.msra.mxu0 %v18430_v24  ;;  %v18564_v24 = vld [vmem:[%s21119_s25 + $0x1b0] ss:$8 sps:$4 sm:$0xff]  }
  0xc4   : > { %12371 = vmatprep.subr.bf16.mxu0 %v18444_v26  ;;  %10054 = vmatpush1.bf16.msra.mxu1 %v18453_v27  ;;  %v18520_v26 = vld [vmem:[%s21119_s25 + $0xdf0] ss:$8 sps:$4 sm:$0xff]  }
  0xc5   : > { %9907 = vmatmul.mubr.bf16.gmra.mrb[8].mxu1 %v18437_v25  ;;  %10055 = vmatprep.subr.bf16.mxu1 %v18470_v33  ;;  %v18578_v25 = vld [vmem:[%s21119_s25 + $0x1c4] ss:$8 sps:$4 sm:$0xff]   ;;  %v18525_v27 = vld [vmem:[#allocation2 + $0x68] ss:$200 sps:$4 sm:$0xff]  }
  0xc6   : > { %12223 = vmatmul.mubr.bf16.gmra.mrb[8].mxu0 %v18441_v28  ;;  %9916 = vmatprep.mubr.bf16.mxu1 %v18448_v31  ;;  %v18534_v28 = vld [vmem:[%s21119_s25 + $0xe04] ss:$8 sps:$4 sm:$0xff]   ;;  %v18532_v31 = vld [vmem:[%s21119_s25 + $0xe00] ss:$8 sps:$4 sm:$0xff]  }
  0xc7   : > { %12372 = vmatpush1.bf16.msra.mxu0 %v18442_v29  ;;  %12232 = vmatprep.mubr.bf16.mxu0 %v18450_v32  ;;  %v18528_v29 = vld [vmem:[#allocation2 + $0xc80] ss:$200 sps:$4 sm:$0xff]   ;;  %v18535_v32 = vld [vmem:[#allocation2 + $0xe14] ss:$200 sps:$4 sm:$0xff]  }
  0xc8   : > { %12373 = vmatprep.subr.bf16.mxu0 %v18447_v30  ;;  %10056 = vmatpush1.bf16.msra.mxu1 %v18468_v34  ;;  %v18576_v30 = vld [vmem:[%s21119_s25 + $0x1c0] ss:$8 sps:$4 sm:$0xff]   ;;  %v18537_v33 = vld [vmem:[#allocation2 + $0x1fc] ss:$200 sps:$4 sm:$0xff]  }
  0xc9   : > { %10057 = vmatprep.subr.bf16.mxu1 %v18485_v36  ;;  %v18546_v34 = vld [vmem:[%s21119_s25 + $0xe14] ss:$8 sps:$4 sm:$0xff]   ;;  %v18544_v36 = vld [vmem:[%s21119_s25 + $0xe10] ss:$8 sps:$4 sm:$0xff]  }
  0xcb   : > { %12374 = vmatpush1.bf16.msra.mxu0 %v18445_v35  ;;  %v18590_v35 = vld [vmem:[%s21119_s25 + $0x1d4] ss:$8 sps:$4 sm:$0xff]  }
  0xcc   : > { %12375 = vmatprep.subr.bf16.mxu0 %v18459_v37  ;;  %10058 = vmatpush1.bf16.msra.mxu1 %v18483_v44  ;;  %v18588_v37 = vld [vmem:[%s21119_s25 + $0x1d0] ss:$8 sps:$4 sm:$0xff]   ;;  %v18556_v44 = vld [vmem:[%s21119_s25 + $0xe20] ss:$8 sps:$4 sm:$0xff]  }
  0xcd   : > { %9917 = vmatmul.mubr.bf16.gmra.mrb[12].mxu1 %v18452_v38  ;;  %10059 = vmatprep.subr.bf16.mxu1 %v18500_v45  ;;  %v18602_v38 = vld [vmem:[%s21119_s25 + $0x1e4] ss:$8 sps:$4 sm:$0xff]   ;;  %v18600_v45 = vld [vmem:[%s21119_s25 + $0x1e0] ss:$8 sps:$4 sm:$0xff]  }
  0xce   : > { %12233 = vmatmul.mubr.bf16.gmra.mrb[12].mxu0 %v18456_v39  ;;  %9926 = vmatprep.mubr.bf16.mxu1 %v18463_v42  ;;  %v18558_v39 = vld [vmem:[%s21119_s25 + $0xe24] ss:$8 sps:$4 sm:$0xff]  }
  0xcf   : > { %12376 = vmatpush1.bf16.msra.mxu0 %v18457_v40  ;;  %12242 = vmatprep.mubr.bf16.mxu0 %v18465_v43  ;;  %v18539_v40 = vld [vmem:[#allocation2 + $0xe10] ss:$200 sps:$4 sm:$0xff]   ;;  %v18547_v42 = vld [vmem:[#allocation2 + $0xfa4] ss:$200 sps:$4 sm:$0xff]  }
  0xd0   : > { %12377 = vmatprep.subr.bf16.mxu0 %v18462_v41  ;;  %10060 = vmatpush1.bf16.msra.mxu1 %v18498_v50  ;;  %v18543_v41 = vld [vmem:[#allocation2 + $0x1f8] ss:$200 sps:$4 sm:$0xff]   ;;  %v18549_v43 = vld [vmem:[#allocation2 + $0x38c] ss:$200 sps:$4 sm:$0xff]  }
  0xd1   : > { %10061 = vmatprep.subr.bf16.mxu1 %v18515_v55  ;;  %v18612_v50 = vld [vmem:[%s21119_s25 + $0x1f0] ss:$8 sps:$4 sm:$0xff]   ;;  %v18561_v55 = vld [vmem:[#allocation2 + $0x51c] ss:$200 sps:$4 sm:$0xff]  }
  0xd3   : > { %12378 = vmatpush1.bf16.msra.mxu0 %v18460_v46  ;;  %v18570_v46 = vld [vmem:[%s21119_s25 + $0xe34] ss:$8 sps:$4 sm:$0xff]  }
  0xd4   : > { %12379 = vmatprep.subr.bf16.mxu0 %v18474_v48  ;;  %10062 = vmatpush1.bf16.msra.mxu1 %v18513_v57  ;;  %v18568_v48 = vld [vmem:[%s21119_s25 + $0xe30] ss:$8 sps:$4 sm:$0xff]   ;;  %v18594_v57 = vld [vmem:[%s21119_s25 + $0xe54] ss:$8 sps:$4 sm:$0xff]  }
  0xd5   : > { %9927 = vmatmul.mubr.bf16.gmra.mrb[16].mxu1 %v18467_v47  ;;  %10063 = vmatprep.subr.bf16.mxu1 %v18531_v58  ;;  %v18614_v47 = vld [vmem:[%s21119_s25 + $0x1f4] ss:$8 sps:$4 sm:$0xff]   ;;  %v18592_v58 = vld [vmem:[%s21119_s25 + $0xe50] ss:$8 sps:$4 sm:$0xff]  }
  0xd6   : > { %12243 = vmatmul.mubr.bf16.gmra.mrb[16].mxu0 %v18471_v49  ;;  %9936 = vmatprep.mubr.bf16.mxu1 %v18478_v53  ;;  %v18551_v49 = vld [vmem:[#allocation2 + $0xfa0] ss:$200 sps:$4 sm:$0xff]  }
  0xd7   : > { %12380 = vmatpush1.bf16.msra.mxu0 %v18472_v51  ;;  %12252 = vmatprep.mubr.bf16.mxu0 %v18480_v54  ;;  %v18582_v51 = vld [vmem:[%s21119_s25 + $0xe44] ss:$8 sps:$4 sm:$0xff]   ;;  %v18555_v53 = vld [vmem:[#allocation2 + $0x388] ss:$200 sps:$4 sm:$0xff]   ;;  %v18559_v54 = vld [vmem:[#allocation2 + $0x1134] ss:$200 sps:$4 sm:$0xff]  }
  0xd8   : > { %12381 = vmatprep.subr.bf16.mxu0 %v18477_v52  ;;  %10064 = vmatpush1.bf16.msra.mxu1 %v18529_v2  ;;  %v18626_v52 = vld [vmem:[%s21119_s25 + $0x204] ss:$8 sps:$4 sm:$0xff]   ;;  %v18616_v2 = vld [vmem:[%s21119_s25 + $0xe70] ss:$8 sps:$4 sm:$0xff]  }
  0xd9   : > { %10065 = vmatprep.subr.bf16.mxu1 %v18542_v3  ;;  %v18575_v3 = vld [vmem:[#allocation2 + $0x12c0] ss:$200 sps:$4 sm:$0xff]  }
  0xdb   : > { %12382 = vmatpush1.bf16.msra.mxu0 %v18475_v56  ;;  %v18580_v56 = vld [vmem:[%s21119_s25 + $0xe40] ss:$8 sps:$4 sm:$0xff]  }
  0xdc   : > { %12383 = vmatprep.subr.bf16.mxu0 %v18489_v59  ;;  %10066 = vmatpush1.bf16.msra.mxu1 %v18540_v8  ;;  %v18606_v59 = vld [vmem:[%s21119_s25 + $0xe64] ss:$8 sps:$4 sm:$0xff]   ;;  %v18628_v8 = vld [vmem:[%s21119_s25 + $0xe80] ss:$8 sps:$4 sm:$0xff]  }
  0xdd   : > { %9937 = vmatmul.mubr.bf16.gmra.mrb[20].mxu1 %v18482_v60  ;;  %10067 = vmatprep.subr.bf16.mxu1 %v18554_v13  ;;  %v18563_v60 = vld [vmem:[#allocation2 + $0x1130] ss:$200 sps:$4 sm:$0xff]  }
  0xde   : > { %12253 = vmatmul.mubr.bf16.gmra.mrb[20].mxu0 %v18486_v61  ;;  %9946 = vmatprep.mubr.bf16.mxu1 %v18493_v0  ;;  %v18567_v61 = vld [vmem:[#allocation2 + $0x518] ss:$200 sps:$4 sm:$0xff]  }
  0xdf   : > { %12384 = vmatpush1.bf16.msra.mxu0 %v18487_v62  ;;  %12262 = vmatprep.mubr.bf16.mxu0 %v18495_v1  ;;  %v18571_v62 = vld [vmem:[#allocation2 + $0x12c4] ss:$200 sps:$4 sm:$0xff]   ;;  %v18604_v0 = vld [vmem:[%s21119_s25 + $0xe60] ss:$8 sps:$4 sm:$0xff]   ;;  %v18618_v1 = vld [vmem:[%s21119_s25 + $0xe74] ss:$8 sps:$4 sm:$0xff]  }
  0xe0   : > { %12385 = vmatprep.subr.bf16.mxu0 %v18492_v63  ;;  %10068 = vmatpush1.bf16.msra.mxu1 %v18552_v15  ;;  %v18573_v63 = vld [vmem:[#allocation2 + $0x6ac] ss:$200 sps:$4 sm:$0xff]   ;;  %v18591_v13 = vld [vmem:[#allocation2 + $0x838] ss:$200 sps:$4 sm:$0xff]  }
  0xe1   : > { %10069 = vmatprep.subr.bf16.mxu1 %v18566_v16  ;;  %v18597_v15 = vld [vmem:[#allocation2 + $0x9cc] ss:$200 sps:$4 sm:$0xff]   ;;  %v18652_v16 = vld [vmem:[%s21119_s25 + $0xea0] ss:$8 sps:$4 sm:$0xff]  }
  0xe3   : > { %12386 = vmatpush1.bf16.msra.mxu0 %v18490_v4  ;;  %v18630_v4 = vld [vmem:[%s21119_s25 + $0xe84] ss:$8 sps:$4 sm:$0xff]  }
  0xe4   : > { %12387 = vmatprep.subr.bf16.mxu0 %v18504_v6  ;;  %10070 = vmatpush1.bf16.msra.mxu1 %v18564_v24  ;;  %v18583_v6 = vld [vmem:[#allocation2 + $0x1454] ss:$200 sps:$4 sm:$0xff]   ;;  %v18676_v24 = vld [vmem:[%s21119_s25 + $0xec0] ss:$8 sps:$4 sm:$0xff]  }
  0xe5   : > { %9947 = vmatmul.mubr.bf16.gmra.mrb[24].mxu1 %v18497_v5  ;;  %10071 = vmatprep.subr.bf16.mxu1 %v18578_v25  ;;  %v18579_v5 = vld [vmem:[#allocation2 + $0x6a8] ss:$200 sps:$4 sm:$0xff]   ;;  %v18690_v25 = vld [vmem:[%s21119_s25 + $0xed4] ss:$8 sps:$4 sm:$0xff]  }
  0xe6   : > { %12263 = vmatmul.mubr.bf16.gmra.mrb[24].mxu0 %v18501_v7  ;;  %9956 = vmatprep.mubr.bf16.mxu1 %v18508_v11  ;;  %v18585_v7 = vld [vmem:[#allocation2 + $0x83c] ss:$200 sps:$4 sm:$0xff]  }
  0xe7   : > { %12388 = vmatpush1.bf16.msra.mxu0 %v18502_v9  ;;  %12272 = vmatprep.mubr.bf16.mxu0 %v18510_v12  ;;  %v18642_v9 = vld [vmem:[%s21119_s25 + $0xe94] ss:$8 sps:$4 sm:$0xff]   ;;  %v18654_v11 = vld [vmem:[%s21119_s25 + $0xea4] ss:$8 sps:$4 sm:$0xff]   ;;  %v18587_v12 = vld [vmem:[#allocation2 + $0x1450] ss:$200 sps:$4 sm:$0xff]  }
  0xe8   : > { %12389 = vmatprep.subr.bf16.mxu0 %v18507_v10  ;;  %10072 = vmatpush1.bf16.msra.mxu1 %v18576_v30  ;;  %v18640_v10 = vld [vmem:[%s21119_s25 + $0xe90] ss:$8 sps:$4 sm:$0xff]   ;;  %v18621_v30 = vld [vmem:[#allocation2 + $0xc] ss:$200 sps:$4 sm:$0xff]  }
  0xe9   : > { %10073 = vmatprep.subr.bf16.mxu1 %v18590_v35  ;;  %v18712_v35 = vld [vmem:[%s21119_s25 + $0xef0] ss:$8 sps:$4 sm:$0xff]  }
  0xeb   : > { %12390 = vmatpush1.bf16.msra.mxu0 %v18505_v14  ;;  %v18595_v14 = vld [vmem:[#allocation2 + $0x15e4] ss:$200 sps:$4 sm:$0xff]  }
  0xec   : > { %12391 = vmatprep.subr.bf16.mxu0 %v18519_v17  ;;  %10074 = vmatpush1.bf16.msra.mxu1 %v18588_v37  ;;  %v18666_v17 = vld [vmem:[%s21119_s25 + $0xeb4] ss:$8 sps:$4 sm:$0xff]   ;;  %v18726_v37 = vld [vmem:[%s21119_s25 + $0xf04] ss:$8 sps:$4 sm:$0xff]  }
  0xed   : > { %9957 = vmatmul.mubr.bf16.gmra.mrb[28].mxu1 %v18512_v18  ;;  %10075 = vmatprep.subr.bf16.mxu1 %v18602_v38  ;;  %v18664_v18 = vld [vmem:[%s21119_s25 + $0xeb0] ss:$8 sps:$4 sm:$0xff]  }
  0xee   : > { %12273 = vmatmul.mubr.bf16.gmra.mrb[28].mxu0 %v18516_v19  ;;  %9966 = vmatprep.mubr.bf16.mxu1 %v18523_v22  ;;  %v18599_v19 = vld [vmem:[#allocation2 + $0x15e0] ss:$200 sps:$4 sm:$0xff]   ;;  %v18607_v22 = vld [vmem:[#allocation2 + $0x1774] ss:$200 sps:$4 sm:$0xff]  }
  0xef   : > { %12392 = vmatpush1.bf16.msra.mxu0 %v18517_v20  ;;  %12395 = vmatprep.mubr.bf16.mxu0 %v18527_v23  ;;  %v18678_v20 = vld [vmem:[%s21119_s25 + $0xec4] ss:$8 sps:$4 sm:$0xff]   ;;  %v18627_v38 = vld [vmem:[#allocation2 + $0xce8] ss:$200 sps:$4 sm:$0xff]  }
  0xf0   : > { %12393 = vmatprep.subr.bf16.mxu0 %v18522_v21  ;;  %10076 = vmatpush1.bf16.msra.mxu1 %v18600_v45  ;;  %v18603_v21 = vld [vmem:[#allocation2 + $0x9c8] ss:$200 sps:$4 sm:$0xff]   ;;  %v18609_v23 = vld [vmem:[#allocation2 + $0xb5c] ss:$200 sps:$4 sm:$0xff]   ;;  %v18639_v45 = vld [vmem:[#allocation2 + $0xe78] ss:$200 sps:$4 sm:$0xff]  }
  0xf1   : > { %10077 = vmatprep.subr.bf16.mxu1 %v18614_v47  ;;  %v18645_v47 = vld [vmem:[#allocation2 + $0x100c] ss:$200 sps:$4 sm:$0xff]  }
  0xf3   : > { %12394 = vmatpush1.bf16.msra.mxu0 %v18520_v26  ;;  %v18688_v26 = vld [vmem:[%s21119_s25 + $0xed0] ss:$8 sps:$4 sm:$0xff]  }
  0xf4   : > { %12556 = vmatprep.subr.bf16.mxu0 %v18534_v28  ;;  %10078 = vmatpush1.bf16.msra.mxu1 %v18612_v50  ;;  %v18611_v28 = vld [vmem:[#allocation2 + $0x1770] ss:$200 sps:$4 sm:$0xff]  }
  0xf5   : > { %9967 = vmatmul.mubr.bf16.gmra.mrb[32].mxu1 %v18528_v29  ;;  %10240 = vmatprep.subr.bf16.mxu1 %v18626_v52  ;;  %v18615_v29 = vld [vmem:[#allocation2 + $0xb58] ss:$200 sps:$4 sm:$0xff]   ;;  %v18674_v52 = vld [vmem:[%s21119_s25 + $0x244] ss:$8 sps:$4 sm:$0xff]  }
  0xf6   : > { %12396 = vmatmul.mubr.bf16.vlgmr.msra.gmra.mrb[0].mxu0 %v18525_v27  ;;  %9976 = vmatprep.mubr.bf16.mxu1 %v18535_v32  ;;  %v18702_v27 = vld [vmem:[%s21119_s25 + $0xee4] ss:$8 sps:$4 sm:$0xff]   ;;  %v18700_v32 = vld [vmem:[%s21119_s25 + $0xee0] ss:$8 sps:$4 sm:$0xff]   ;;  %v18660_v50 = vld [vmem:[%s21119_s25 + $0x230] ss:$8 sps:$4 sm:$0xff]  }
  0xf7   : > { %12557 = vmatpush1.bf16.msra.mxu0 %v18532_v31  ;;  %12405 = vmatprep.mubr.bf16.mxu0 %v18537_v33  ;;  %v18622_v31 = vld [vmem:[#allocation2 + $0xcec] ss:$200 sps:$4 sm:$0xff]  }
  0xf8   : > { %12558 = vmatprep.subr.bf16.mxu0 %v18546_v34  ;;  %v18714_v33 = vld [vmem:[%s21119_s25 + $0xef4] ss:$8 sps:$4 sm:$0xff]   ;;  %v18619_v34 = vld [vmem:[#allocation2 + $0x8] ss:$200 sps:$4 sm:$0xff]  }
  0xfb   : > { %12559 = vmatpush1.bf16.msra.mxu0 %v18544_v36  ;;  %v18624_v36 = vld [vmem:[%s21119_s25 + $0x200] ss:$8 sps:$4 sm:$0xff]  }
  0xfc   : > { %12560 = vmatprep.subr.bf16.mxu0 %v18558_v39  ;;  %v18631_v39 = vld [vmem:[#allocation2 + $0x19c] ss:$200 sps:$4 sm:$0xff]  }
  0xfd   : > { %9977 = vmatmul.mubr.bf16.gmra.mrb[36].mxu1 %v18539_v40  ;;  %v18633_v40 = vld [vmem:[#allocation2 + $0xe7c] ss:$200 sps:$4 sm:$0xff]  }
  0xfe   : > { %12406 = vmatmul.mubr.bf16.gmra.mrb[4].mxu0 %v18543_v41  ;;  %9986 = vmatprep.mubr.bf16.mxu1 %v18547_v42  ;;  %v18638_v41 = vld [vmem:[%s21119_s25 + $0x214] ss:$8 sps:$4 sm:$0xff]   ;;  %v18636_v42 = vld [vmem:[%s21119_s25 + $0x210] ss:$8 sps:$4 sm:$0xff]  }
  0xff   : > { %12415 = vmatprep.mubr.bf16.mxu0 %v18549_v43  ;;  %12561 = vmatpush1.bf16.msra.mxu0 %v18556_v44  ;;  %v18650_v43 = vld [vmem:[%s21119_s25 + $0x224] ss:$8 sps:$4 sm:$0xff]   ;;  %v18635_v44 = vld [vmem:[#allocation2 + $0x198] ss:$200 sps:$4 sm:$0xff]  }
 0x100   : > { %12562 = vmatprep.subr.bf16.mxu0 %v18570_v46  ;;  %v18643_v46 = vld [vmem:[#allocation2 + $0x32c] ss:$200 sps:$4 sm:$0xff]  }
 0x103   : > { %12563 = vmatpush1.bf16.msra.mxu0 %v18568_v48  ;;  %v18648_v48 = vld [vmem:[%s21119_s25 + $0x220] ss:$8 sps:$4 sm:$0xff]  }
 0x104   : > { %12564 = vmatprep.subr.bf16.mxu0 %v18582_v51  ;;  %v18647_v51 = vld [vmem:[#allocation2 + $0x328] ss:$200 sps:$4 sm:$0xff]  }
 0x105   : > { %9987 = vmatmul.mubr.bf16.gmra.mrb[40].mxu1 %v18551_v49  ;;  %v18662_v49 = vld [vmem:[%s21119_s25 + $0x234] ss:$8 sps:$4 sm:$0xff]  }
 0x106   : > { %12416 = vmatmul.mubr.bf16.gmra.mrb[8].mxu0 %v18555_v53  ;;  %9996 = vmatprep.mubr.bf16.mxu1 %v18559_v54  ;;  %v18651_v53 = vld [vmem:[#allocation2 + $0x1008] ss:$200 sps:$4 sm:$0xff]   ;;  %v18655_v54 = vld [vmem:[#allocation2 + $0x4bc] ss:$200 sps:$4 sm:$0xff]  }
 0x107   : > { %12425 = vmatprep.mubr.bf16.mxu0 %v18561_v55  ;;  %12565 = vmatpush1.bf16.msra.mxu0 %v18580_v56  ;;  %v18657_v55 = vld [vmem:[#allocation2 + $0x119c] ss:$200 sps:$4 sm:$0xff]   ;;  %v18672_v56 = vld [vmem:[%s21119_s25 + $0x240] ss:$8 sps:$4 sm:$0xff]  }
 0x108   : > { %12566 = vmatprep.subr.bf16.mxu0 %v18594_v57  ;;  %v18686_v57 = vld [vmem:[%s21119_s25 + $0x254] ss:$8 sps:$4 sm:$0xff]  }
 0x10b   : > { %12567 = vmatpush1.bf16.msra.mxu0 %v18592_v58  ;;  %v18684_v58 = vld [vmem:[%s21119_s25 + $0x250] ss:$8 sps:$4 sm:$0xff]  }
 0x10c   : > { %12568 = vmatprep.subr.bf16.mxu0 %v18606_v59  ;;  %v18698_v59 = vld [vmem:[%s21119_s25 + $0x264] ss:$8 sps:$4 sm:$0xff]  }
 0x10d   : > { %9997 = vmatmul.mubr.bf16.gmra.mrb[44].mxu1 %v18563_v60  ;;  %v18659_v60 = vld [vmem:[#allocation2 + $0x4b8] ss:$200 sps:$4 sm:$0xff]  }
 0x10e   : > { %12426 = vmatmul.mubr.bf16.gmra.mrb[12].mxu0 %v18567_v61  ;;  %10006 = vmatprep.mubr.bf16.mxu1 %v18571_v62  ;;  %v18663_v61 = vld [vmem:[#allocation2 + $0x1198] ss:$200 sps:$4 sm:$0xff]   ;;  %v18667_v62 = vld [vmem:[#allocation2 + $0x64c] ss:$200 sps:$4 sm:$0xff]  }
 0x10f   : > { %12435 = vmatprep.mubr.bf16.mxu0 %v18573_v63  ;;  %12569 = vmatpush1.bf16.msra.mxu0 %v18604_v0  ;;  %v18669_v63 = vld [vmem:[#allocation2 + $0x132c] ss:$200 sps:$4 sm:$0xff]   ;;  %v18696_v0 = vld [vmem:[%s21119_s25 + $0x260] ss:$8 sps:$4 sm:$0xff]  }
 0x110   : > { %12570 = vmatprep.subr.bf16.mxu0 %v18618_v1  ;;  %v18710_v1 = vld [vmem:[%s21119_s25 + $0x274] ss:$8 sps:$4 sm:$0xff]  }
 0x113   : > { %12571 = vmatpush1.bf16.msra.mxu0 %v18616_v2  ;;  %v18708_v2 = vld [vmem:[%s21119_s25 + $0x270] ss:$8 sps:$4 sm:$0xff]  }
 0x114   : > { %12572 = vmatprep.subr.bf16.mxu0 %v18630_v4  ;;  %v18723_v4 = vld [vmem:[%s21119_s25 + $0x284] ss:$8 sps:$4 sm:$0xff]  }
 0x115   : > { %10007 = vmatmul.mubr.bf16.gmra.mrb[48].mxu1 %v18575_v3  ;;  %v18671_v3 = vld [vmem:[#allocation2 + $0x648] ss:$200 sps:$4 sm:$0xff]  }
 0x116   : > { %12436 = vmatmul.mubr.bf16.gmra.mrb[16].mxu0 %v18579_v5  ;;  %10016 = vmatprep.mubr.bf16.mxu1 %v18583_v6  ;;  %v18675_v5 = vld [vmem:[#allocation2 + $0x1328] ss:$200 sps:$4 sm:$0xff]   ;;  %v18679_v6 = vld [vmem:[#allocation2 + $0x7dc] ss:$200 sps:$4 sm:$0xff]  }
 0x117   : > { %12445 = vmatprep.mubr.bf16.mxu0 %v18585_v7  ;;  %12573 = vmatpush1.bf16.msra.mxu0 %v18628_v8  ;;  %v18681_v7 = vld [vmem:[#allocation2 + $0x14bc] ss:$200 sps:$4 sm:$0xff]   ;;  %v18721_v8 = vld [vmem:[%s21119_s25 + $0x280] ss:$8 sps:$4 sm:$0xff]  }
 0x118   : > { %12574 = vmatprep.subr.bf16.mxu0 %v18642_v9  ;;  %v18734_v9 = vld [vmem:[%s21119_s25 + $0x294] ss:$8 sps:$4 sm:$0xff]  }
 0x11b   : > { %12575 = vmatpush1.bf16.msra.mxu0 %v18640_v10  ;;  %v18732_v10 = vld [vmem:[%s21119_s25 + $0x290] ss:$8 sps:$4 sm:$0xff]  }
 0x11c   : > { %12576 = vmatprep.subr.bf16.mxu0 %v18654_v11  ;;  %v18746_v11 = vld [vmem:[%s21119_s25 + $0x2a4] ss:$8 sps:$4 sm:$0xff]  }
 0x11d   : > { %10017 = vmatmul.mubr.bf16.gmra.mrb[52].mxu1 %v18587_v12  ;;  %v18683_v12 = vld [vmem:[#allocation2 + $0x7d8] ss:$200 sps:$4 sm:$0xff]  }
 0x11e   : > { %12446 = vmatmul.mubr.bf16.gmra.mrb[20].mxu0 %v18591_v13  ;;  %10026 = vmatprep.mubr.bf16.mxu1 %v18595_v14  ;;  %v18687_v13 = vld [vmem:[#allocation2 + $0x14b8] ss:$200 sps:$4 sm:$0xff]   ;;  %v18691_v14 = vld [vmem:[#allocation2 + $0x96c] ss:$200 sps:$4 sm:$0xff]  }
 0x11f   : > { %12455 = vmatprep.mubr.bf16.mxu0 %v18597_v15  ;;  %12577 = vmatpush1.bf16.msra.mxu0 %v18652_v16  ;;  %v18693_v15 = vld [vmem:[#allocation2 + $0x164c] ss:$200 sps:$4 sm:$0xff]   ;;  %v18744_v16 = vld [vmem:[%s21119_s25 + $0x2a0] ss:$8 sps:$4 sm:$0xff]  }
 0x120   : > { %12578 = vmatprep.subr.bf16.mxu0 %v18666_v17  ;;  %v18758_v17 = vld [vmem:[%s21119_s25 + $0x2b4] ss:$8 sps:$4 sm:$0xff]  }
 0x123   : > { %12579 = vmatpush1.bf16.msra.mxu0 %v18664_v18  ;;  %v18756_v18 = vld [vmem:[%s21119_s25 + $0x2b0] ss:$8 sps:$4 sm:$0xff]  }
 0x124   : > { %12580 = vmatprep.subr.bf16.mxu0 %v18678_v20  ;;  %v18770_v20 = vld [vmem:[%s21119_s25 + $0x2c4] ss:$8 sps:$4 sm:$0xff]  }
 0x125   : > { %10027 = vmatmul.mubr.bf16.gmra.mrb[56].mxu1 %v18599_v19  ;;  %v18695_v19 = vld [vmem:[#allocation2 + $0x968] ss:$200 sps:$4 sm:$0xff]  }
 0x126   : > { %12456 = vmatmul.mubr.bf16.gmra.mrb[24].mxu0 %v18603_v21  ;;  %10036 = vmatprep.mubr.bf16.mxu1 %v18607_v22  ;;  %v18699_v21 = vld [vmem:[#allocation2 + $0x1648] ss:$200 sps:$4 sm:$0xff]   ;;  %v18703_v22 = vld [vmem:[#allocation2 + $0xafc] ss:$200 sps:$4 sm:$0xff]  }
 0x127   : > { %12465 = vmatprep.mubr.bf16.mxu0 %v18609_v23  ;;  %12581 = vmatpush1.bf16.msra.mxu0 %v18676_v24  ;;  %v18705_v23 = vld [vmem:[#allocation2 + $0x17dc] ss:$200 sps:$4 sm:$0xff]   ;;  %v18768_v24 = vld [vmem:[%s21119_s25 + $0x2c0] ss:$8 sps:$4 sm:$0xff]  }
 0x128   : > { %12582 = vmatprep.subr.bf16.mxu0 %v18690_v25  ;;  %v18782_v25 = vld [vmem:[%s21119_s25 + $0x2d4] ss:$8 sps:$4 sm:$0xff]  }
 0x12b   : > { %12583 = vmatpush1.bf16.msra.mxu0 %v18688_v26  ;;  %v18780_v26 = vld [vmem:[%s21119_s25 + $0x2d0] ss:$8 sps:$4 sm:$0xff]  }
 0x12c   : > { %12584 = vmatprep.subr.bf16.mxu0 %v18702_v27  ;;  %v18794_v27 = vld [vmem:[%s21119_s25 + $0x2e4] ss:$8 sps:$4 sm:$0xff]  }
 0x12d   : > { %10037 = vmatmul.mubr.bf16.gmra.mrb[60].mxu1 %v18611_v28  ;;  %v18707_v28 = vld [vmem:[#allocation2 + $0xaf8] ss:$200 sps:$4 sm:$0xff]  }
 0x12e   : > { %12466 = vmatmul.mubr.bf16.gmra.mrb[28].mxu0 %v18615_v29  ;;  %10079 = vmatprep.mubr.bf16.mxu1 %v18621_v30  ;;  %v18711_v29 = vld [vmem:[#allocation2 + $0x17d8] ss:$200 sps:$4 sm:$0xff]   ;;  %v18715_v30 = vld [vmem:[#allocation2 + $0xc8c] ss:$200 sps:$4 sm:$0xff]  }
 0x12f   : > { %12475 = vmatprep.mubr.bf16.mxu0 %v18622_v31  ;;  %12585 = vmatpush1.bf16.msra.mxu0 %v18700_v32  ;;  %v18719_v31 = vld [vmem:[#allocation2 + $0x74] ss:$200 sps:$4 sm:$0xff]   ;;  %v18792_v32 = vld [vmem:[%s21119_s25 + $0x2e0] ss:$8 sps:$4 sm:$0xff]  }
 0x130   : > { %12586 = vmatprep.subr.bf16.mxu0 %v18714_v33  ;;  %v18806_v33 = vld [vmem:[%s21119_s25 + $0x2f4] ss:$8 sps:$4 sm:$0xff]  }
 0x133   : > { %12587 = vmatpush1.bf16.msra.mxu0 %v18712_v35  ;;  %v18804_v35 = vld [vmem:[%s21119_s25 + $0x2f0] ss:$8 sps:$4 sm:$0xff]  }
 0x134   : > { %12749 = vmatprep.subr.bf16.mxu0 %v18726_v37  ;;  %v18818_v37 = vld [vmem:[%s21119_s25 + $0x304] ss:$8 sps:$4 sm:$0xff]  }
 0x135   : > { %10080 = vmatmul.mubr.bf16.vlgmr.msra.gmra.mrb[0].mxu1 %v18619_v34  ;;  %v18717_v34 = vld [vmem:[#allocation2 + $0x70] ss:$200 sps:$4 sm:$0xff]  }
 0x136   : > { %12476 = vmatmul.mubr.bf16.gmra.mrb[32].mxu0 %v18627_v38  ;;  %10241 = vmatpush1.bf16.msra.mxu1 %v18624_v36  ;;  %v18720_v36 = vld [vmem:[#allocation2 + $0xc88] ss:$200 sps:$4 sm:$0xff]  }
 0x137   : > { %10089 = vmatprep.mubr.bf16.mxu1 %v18631_v39  ;;  %12485 = vmatprep.mubr.bf16.mxu0 %v18633_v40  ;;  %v18724_v38 = vld [vmem:[%s21119_s25 + $0xf00] ss:$8 sps:$4 sm:$0xff]   ;;  %v18727_v39 = vld [vmem:[#allocation2 + $0xe1c] ss:$200 sps:$4 sm:$0xff]  }
 0x138   : > { %10242 = vmatprep.subr.bf16.mxu1 %v18638_v41  ;;  %v18729_v40 = vld [vmem:[#allocation2 + $0x204] ss:$200 sps:$4 sm:$0xff]   ;;  %v18738_v41 = vld [vmem:[%s21119_s25 + $0xf14] ss:$8 sps:$4 sm:$0xff]  }
 0x13a   : > { %10243 = vmatpush1.bf16.msra.mxu1 %v18636_v42  ;;  %v18736_v42 = vld [vmem:[%s21119_s25 + $0xf10] ss:$8 sps:$4 sm:$0xff]  }
 0x13b   : > { %10244 = vmatprep.subr.bf16.mxu1 %v18650_v43  ;;  %v18750_v43 = vld [vmem:[%s21119_s25 + $0xf24] ss:$8 sps:$4 sm:$0xff]  }
 0x13d   : > { %10090 = vmatmul.mubr.bf16.gmra.mrb[4].mxu1 %v18635_v44  ;;  %v18731_v44 = vld [vmem:[#allocation2 + $0xe18] ss:$200 sps:$4 sm:$0xff]  }
 0x13e   : > { %12486 = vmatmul.mubr.bf16.gmra.mrb[36].mxu0 %v18639_v45  ;;  %10099 = vmatprep.mubr.bf16.mxu1 %v18643_v46  ;;  %v18735_v45 = vld [vmem:[#allocation2 + $0x200] ss:$200 sps:$4 sm:$0xff]   ;;  %v18739_v46 = vld [vmem:[#allocation2 + $0xfac] ss:$200 sps:$4 sm:$0xff]  }
 0x13f   : > { %12495 = vmatprep.mubr.bf16.mxu0 %v18645_v47  ;;  %10245 = vmatpush1.bf16.msra.mxu1 %v18648_v48  ;;  %v18741_v47 = vld [vmem:[#allocation2 + $0x394] ss:$200 sps:$4 sm:$0xff]   ;;  %v18748_v48 = vld [vmem:[%s21119_s25 + $0xf20] ss:$8 sps:$4 sm:$0xff]  }
 0x140   : > { %10246 = vmatprep.subr.bf16.mxu1 %v18662_v49  ;;  %v18762_v49 = vld [vmem:[%s21119_s25 + $0xf34] ss:$8 sps:$4 sm:$0xff]  }
 0x143   : > { %10247 = vmatpush1.bf16.msra.mxu1 %v18660_v50  ;;  %v18760_v50 = vld [vmem:[%s21119_s25 + $0xf30] ss:$8 sps:$4 sm:$0xff]  }
 0x144   : > { %10248 = vmatprep.subr.bf16.mxu1 %v18674_v52  ;;  %v18774_v52 = vld [vmem:[%s21119_s25 + $0xf44] ss:$8 sps:$4 sm:$0xff]  }
 0x145   : > { %10100 = vmatmul.mubr.bf16.gmra.mrb[8].mxu1 %v18647_v51  ;;  %v18743_v51 = vld [vmem:[#allocation2 + $0xfa8] ss:$200 sps:$4 sm:$0xff]  }
 0x146   : > { %12496 = vmatmul.mubr.bf16.gmra.mrb[40].mxu0 %v18651_v53  ;;  %10109 = vmatprep.mubr.bf16.mxu1 %v18655_v54  ;;  %v18747_v53 = vld [vmem:[#allocation2 + $0x390] ss:$200 sps:$4 sm:$0xff]   ;;  %v18751_v54 = vld [vmem:[#allocation2 + $0x113c] ss:$200 sps:$4 sm:$0xff]  }
 0x147   : > { %12505 = vmatprep.mubr.bf16.mxu0 %v18657_v55  ;;  %10249 = vmatpush1.bf16.msra.mxu1 %v18672_v56  ;;  %v18753_v55 = vld [vmem:[#allocation2 + $0x524] ss:$200 sps:$4 sm:$0xff]   ;;  %v18772_v56 = vld [vmem:[%s21119_s25 + $0xf40] ss:$8 sps:$4 sm:$0xff]  }
 0x148   : > { %10250 = vmatprep.subr.bf16.mxu1 %v18686_v57  ;;  %v18786_v57 = vld [vmem:[%s21119_s25 + $0xf54] ss:$8 sps:$4 sm:$0xff]  }
 0x14b   : > { %10251 = vmatpush1.bf16.msra.mxu1 %v18684_v58  ;;  %v18784_v58 = vld [vmem:[%s21119_s25 + $0xf50] ss:$8 sps:$4 sm:$0xff]  }
 0x14c   : > { %10252 = vmatprep.subr.bf16.mxu1 %v18698_v59  ;;  %v18798_v59 = vld [vmem:[%s21119_s25 + $0xf64] ss:$8 sps:$4 sm:$0xff]  }
 0x14d   : > { %10110 = vmatmul.mubr.bf16.gmra.mrb[12].mxu1 %v18659_v60  ;;  %v18755_v60 = vld [vmem:[#allocation2 + $0x1138] ss:$200 sps:$4 sm:$0xff]  }
 0x14e   : > { %12506 = vmatmul.mubr.bf16.gmra.mrb[44].mxu0 %v18663_v61  ;;  %10119 = vmatprep.mubr.bf16.mxu1 %v18667_v62  ;;  %v18759_v61 = vld [vmem:[#allocation2 + $0x520] ss:$200 sps:$4 sm:$0xff]   ;;  %v18763_v62 = vld [vmem:[#allocation2 + $0x12cc] ss:$200 sps:$4 sm:$0xff]  }
 0x14f   : > { %12515 = vmatprep.mubr.bf16.mxu0 %v18669_v63  ;;  %10253 = vmatpush1.bf16.msra.mxu1 %v18696_v0  ;;  %v18765_v63 = vld [vmem:[#allocation2 + $0x6b4] ss:$200 sps:$4 sm:$0xff]   ;;  %v18796_v0 = vld [vmem:[%s21119_s25 + $0xf60] ss:$8 sps:$4 sm:$0xff]  }
 0x150   : > { %10254 = vmatprep.subr.bf16.mxu1 %v18710_v1  ;;  %v18810_v1 = vld [vmem:[%s21119_s25 + $0xf74] ss:$8 sps:$4 sm:$0xff]  }
 0x153   : > { %10255 = vmatpush1.bf16.msra.mxu1 %v18708_v2  ;;  %v18808_v2 = vld [vmem:[%s21119_s25 + $0xf70] ss:$8 sps:$4 sm:$0xff]  }
 0x154   : > { %10256 = vmatprep.subr.bf16.mxu1 %v18723_v4  ;;  %v18822_v4 = vld [vmem:[%s21119_s25 + $0xf84] ss:$8 sps:$4 sm:$0xff]  }
 0x155   : > { %10120 = vmatmul.mubr.bf16.gmra.mrb[16].mxu1 %v18671_v3  ;;  %v18767_v3 = vld [vmem:[#allocation2 + $0x12c8] ss:$200 sps:$4 sm:$0xff]  }
 0x156   : > { %12516 = vmatmul.mubr.bf16.gmra.mrb[48].mxu0 %v18675_v5  ;;  %10129 = vmatprep.mubr.bf16.mxu1 %v18679_v6  ;;  %v18771_v5 = vld [vmem:[#allocation2 + $0x6b0] ss:$200 sps:$4 sm:$0xff]   ;;  %v18775_v6 = vld [vmem:[#allocation2 + $0x145c] ss:$200 sps:$4 sm:$0xff]  }
 0x157   : > { %12525 = vmatprep.mubr.bf16.mxu0 %v18681_v7  ;;  %10257 = vmatpush1.bf16.msra.mxu1 %v18721_v8  ;;  %v18777_v7 = vld [vmem:[#allocation2 + $0x844] ss:$200 sps:$4 sm:$0xff]   ;;  %v18820_v8 = vld [vmem:[%s21119_s25 + $0xf80] ss:$8 sps:$4 sm:$0xff]  }
 0x158   : > { %10258 = vmatprep.subr.bf16.mxu1 %v18734_v9  ;;  %v18834_v9 = vld [vmem:[%s21119_s25 + $0xf94] ss:$8 sps:$4 sm:$0xff]  }
 0x15b   : > { %10259 = vmatpush1.bf16.msra.mxu1 %v18732_v10  ;;  %v18779_v10 = vld [vmem:[#allocation2 + $0x1458] ss:$200 sps:$4 sm:$0xff]  }
 0x15c   : > { %10260 = vmatprep.subr.bf16.mxu1 %v18746_v11  ;;  %v18783_v11 = vld [vmem:[#allocation2 + $0x840] ss:$200 sps:$4 sm:$0xff]  }
 0x15d   : > { %10130 = vmatmul.mubr.bf16.gmra.mrb[20].mxu1 %v18683_v12  ;;  %v18832_v12 = vld [vmem:[%s21119_s25 + $0xf90] ss:$8 sps:$4 sm:$0xff]  }
 0x15e   : > { %12526 = vmatmul.mubr.bf16.gmra.mrb[52].mxu0 %v18687_v13  ;;  %10139 = vmatprep.mubr.bf16.mxu1 %v18691_v14  ;;  %v18787_v13 = vld [vmem:[#allocation2 + $0x15ec] ss:$200 sps:$4 sm:$0xff]  }
 0x15f   : > { %12535 = vmatprep.mubr.bf16.mxu0 %v18693_v15  ;;  %10261 = vmatpush1.bf16.msra.mxu1 %v18744_v16  ;;  %v18846_v14 = vld [vmem:[%s21119_s25 + $0xfa4] ss:$8 sps:$4 sm:$0xff]   ;;  %v18789_v15 = vld [vmem:[#allocation2 + $0x9d4] ss:$200 sps:$4 sm:$0xff]   ;;  %v18844_v16 = vld [vmem:[%s21119_s25 + $0xfa0] ss:$8 sps:$4 sm:$0xff]  }
 0x160   : > { %10262 = vmatprep.subr.bf16.mxu1 %v18758_v17  ;;  %v18858_v17 = vld [vmem:[%s21119_s25 + $0xfb4] ss:$8 sps:$4 sm:$0xff]  }
 0x163   : > { %10263 = vmatpush1.bf16.msra.mxu1 %v18756_v18  ;;  %v18856_v18 = vld [vmem:[%s21119_s25 + $0xfb0] ss:$8 sps:$4 sm:$0xff]  }
 0x164   : > { %10264 = vmatprep.subr.bf16.mxu1 %v18770_v20  ;;  %v18795_v20 = vld [vmem:[#allocation2 + $0x9d0] ss:$200 sps:$4 sm:$0xff]  }
 0x165   : > { %10140 = vmatmul.mubr.bf16.gmra.mrb[24].mxu1 %v18695_v19  ;;  %v18791_v19 = vld [vmem:[#allocation2 + $0x15e8] ss:$200 sps:$4 sm:$0xff]  }
 0x166   : > { %12536 = vmatmul.mubr.bf16.gmra.mrb[56].mxu0 %v18699_v21  ;;  %10149 = vmatprep.mubr.bf16.mxu1 %v18703_v22  ;;  %v18870_v21 = vld [vmem:[%s21119_s25 + $0xfc4] ss:$8 sps:$4 sm:$0xff]  }
 0x167   : > { %12545 = vmatprep.mubr.bf16.mxu0 %v18705_v23  ;;  %10265 = vmatpush1.bf16.msra.mxu1 %v18768_v24  ;;  %v18799_v22 = vld [vmem:[#allocation2 + $0x177c] ss:$200 sps:$4 sm:$0xff]   ;;  %v18868_v24 = vld [vmem:[%s21119_s25 + $0xfc0] ss:$8 sps:$4 sm:$0xff]  }
 0x168   : > { %10266 = vmatprep.subr.bf16.mxu1 %v18782_v25  ;;  %v18801_v23 = vld [vmem:[#allocation2 + $0xb64] ss:$200 sps:$4 sm:$0xff]   ;;  %v18882_v25 = vld [vmem:[%s21119_s25 + $0xfd4] ss:$8 sps:$4 sm:$0xff]  }
 0x16b   : > { %10267 = vmatpush1.bf16.msra.mxu1 %v18780_v26  ;;  %v18880_v26 = vld [vmem:[%s21119_s25 + $0xfd0] ss:$8 sps:$4 sm:$0xff]  }
 0x16c   : > { %10268 = vmatprep.subr.bf16.mxu1 %v18794_v27  ;;  %v18803_v27 = vld [vmem:[#allocation2 + $0x1778] ss:$200 sps:$4 sm:$0xff]  }
 0x16d   : > { %10150 = vmatmul.mubr.bf16.gmra.mrb[28].mxu1 %v18707_v28  ;;  %v18807_v28 = vld [vmem:[#allocation2 + $0xb60] ss:$200 sps:$4 sm:$0xff]  }
 0x16e   : > { %12546 = vmatmul.mubr.bf16.gmra.mrb[60].mxu0 %v18711_v29  ;;  %10159 = vmatprep.mubr.bf16.mxu1 %v18715_v30  ;;  %v18894_v29 = vld [vmem:[%s21119_s25 + $0xfe4] ss:$8 sps:$4 sm:$0xff]   ;;  %v18813_v30 = vld [vmem:[#allocation2 + $0x14] ss:$200 sps:$4 sm:$0xff]  }
 0x16f   : > { %12588 = vmatprep.mubr.bf16.mxu0 %v18719_v31  ;;  %10269 = vmatpush1.bf16.msra.mxu1 %v18792_v32  ;;  %v18814_v31 = vld [vmem:[#allocation2 + $0xcf4] ss:$200 sps:$4 sm:$0xff]   ;;  %v18892_v32 = vld [vmem:[%s21119_s25 + $0xfe0] ss:$8 sps:$4 sm:$0xff]  }
 0x170   : > { %10270 = vmatprep.subr.bf16.mxu1 %v18806_v33  ;;  %v18906_v33 = vld [vmem:[%s21119_s25 + $0xff4] ss:$8 sps:$4 sm:$0xff]  }
 0x173   : > { %10271 = vmatpush1.bf16.msra.mxu1 %v18804_v35  ;;  %v18811_v35 = vld [vmem:[#allocation2 + $0x10] ss:$200 sps:$4 sm:$0xff]  }
 0x174   : > { %10433 = vmatprep.subr.bf16.mxu1 %v18818_v37  ;;  %v18918_v37 = vld [vmem:[%s21119_s25 + $0x1004] ss:$8 sps:$4 sm:$0xff]  }
 0x175   : > { %10160 = vmatmul.mubr.bf16.gmra.mrb[32].mxu1 %v18720_v36  ;;  %v18819_v36 = vld [vmem:[#allocation2 + $0xcf0] ss:$200 sps:$4 sm:$0xff]  }
 0x176   : > { %12589 = vmatmul.mubr.bf16.vlgmr.msra.gmra.mrb[0].mxu0 %v18717_v34  ;;  %10169 = vmatprep.mubr.bf16.mxu1 %v18727_v39  ;;  %v18904_v34 = vld [vmem:[%s21119_s25 + $0xff0] ss:$8 sps:$4 sm:$0xff]   ;;  %v18823_v39 = vld [vmem:[#allocation2 + $0x1a4] ss:$200 sps:$4 sm:$0xff]  }
 0x177   : > { %12750 = vmatpush1.bf16.msra.mxu0 %v18724_v38  ;;  %12598 = vmatprep.mubr.bf16.mxu0 %v18729_v40  ;;  %v18816_v38 = vld [vmem:[%s21119_s25 + $0x300] ss:$8 sps:$4 sm:$0xff]   ;;  %v18825_v40 = vld [vmem:[#allocation2 + $0xe84] ss:$200 sps:$4 sm:$0xff]  }
 0x178   : > { %12751 = vmatprep.subr.bf16.mxu0 %v18738_v41  ;;  %v18830_v41 = vld [vmem:[%s21119_s25 + $0x314] ss:$8 sps:$4 sm:$0xff]  }
 0x17b   : > { %12752 = vmatpush1.bf16.msra.mxu0 %v18736_v42  ;;  %v18828_v42 = vld [vmem:[%s21119_s25 + $0x310] ss:$8 sps:$4 sm:$0xff]  }
 0x17c   : > { %12753 = vmatprep.subr.bf16.mxu0 %v18750_v43  ;;  %v18827_v43 = vld [vmem:[#allocation2 + $0x1a0] ss:$200 sps:$4 sm:$0xff]  }
 0x17d   : > { %10170 = vmatmul.mubr.bf16.gmra.mrb[36].mxu1 %v18731_v44  ;;  %v18831_v44 = vld [vmem:[#allocation2 + $0xe80] ss:$200 sps:$4 sm:$0xff]  }
 0x17e   : > { %12599 = vmatmul.mubr.bf16.gmra.mrb[4].mxu0 %v18735_v45  ;;  %10179 = vmatprep.mubr.bf16.mxu1 %v18739_v46  ;;  %v18842_v45 = vld [vmem:[%s21119_s25 + $0x324] ss:$8 sps:$4 sm:$0xff]   ;;  %v18835_v46 = vld [vmem:[#allocation2 + $0x334] ss:$200 sps:$4 sm:$0xff]  }
 0x17f   : > { %12608 = vmatprep.mubr.bf16.mxu0 %v18741_v47  ;;  %12754 = vmatpush1.bf16.msra.mxu0 %v18748_v48  ;;  %v18837_v47 = vld [vmem:[#allocation2 + $0x1014] ss:$200 sps:$4 sm:$0xff]   ;;  %v18840_v48 = vld [vmem:[%s21119_s25 + $0x320] ss:$8 sps:$4 sm:$0xff]  }
 0x180   : > { %12755 = vmatprep.subr.bf16.mxu0 %v18762_v49  ;;  %v18854_v49 = vld [vmem:[%s21119_s25 + $0x334] ss:$8 sps:$4 sm:$0xff]  }
 0x183   : > { %12756 = vmatpush1.bf16.msra.mxu0 %v18760_v50  ;;  %v18852_v50 = vld [vmem:[%s21119_s25 + $0x330] ss:$8 sps:$4 sm:$0xff]  }
 0x184   : > { %12757 = vmatprep.subr.bf16.mxu0 %v18774_v52  ;;  %v18843_v52 = vld [vmem:[#allocation2 + $0x1010] ss:$200 sps:$4 sm:$0xff]  }
 0x185   : > { %10180 = vmatmul.mubr.bf16.gmra.mrb[40].mxu1 %v18743_v51  ;;  %v18839_v51 = vld [vmem:[#allocation2 + $0x330] ss:$200 sps:$4 sm:$0xff]  }
 0x186   : > { %12609 = vmatmul.mubr.bf16.gmra.mrb[8].mxu0 %v18747_v53  ;;  %10189 = vmatprep.mubr.bf16.mxu1 %v18751_v54  ;;  %v18866_v53 = vld [vmem:[%s21119_s25 + $0x344] ss:$8 sps:$4 sm:$0xff]  }
 0x187   : > { %12618 = vmatprep.mubr.bf16.mxu0 %v18753_v55  ;;  %12758 = vmatpush1.bf16.msra.mxu0 %v18772_v56  ;;  %v18847_v54 = vld [vmem:[#allocation2 + $0x4c4] ss:$200 sps:$4 sm:$0xff]   ;;  %v18864_v56 = vld [vmem:[%s21119_s25 + $0x340] ss:$8 sps:$4 sm:$0xff]  }
 0x188   : > { %12759 = vmatprep.subr.bf16.mxu0 %v18786_v57  ;;  %v18849_v55 = vld [vmem:[#allocation2 + $0x11a4] ss:$200 sps:$4 sm:$0xff]   ;;  %v18878_v57 = vld [vmem:[%s21119_s25 + $0x354] ss:$8 sps:$4 sm:$0xff]  }
 0x18b   : > { %12760 = vmatpush1.bf16.msra.mxu0 %v18784_v58  ;;  %v18876_v58 = vld [vmem:[%s21119_s25 + $0x350] ss:$8 sps:$4 sm:$0xff]  }
 0x18c   : > { %12761 = vmatprep.subr.bf16.mxu0 %v18798_v59  ;;  %v18851_v59 = vld [vmem:[#allocation2 + $0x4c0] ss:$200 sps:$4 sm:$0xff]  }
 0x18d   : > { %10190 = vmatmul.mubr.bf16.gmra.mrb[44].mxu1 %v18755_v60  ;;  %v18855_v60 = vld [vmem:[#allocation2 + $0x11a0] ss:$200 sps:$4 sm:$0xff]  }
 0x18e   : > { %12619 = vmatmul.mubr.bf16.gmra.mrb[12].mxu0 %v18759_v61  ;;  %10199 = vmatprep.mubr.bf16.mxu1 %v18763_v62  ;;  %v18890_v61 = vld [vmem:[%s21119_s25 + $0x364] ss:$8 sps:$4 sm:$0xff]   ;;  %v18859_v62 = vld [vmem:[#allocation2 + $0x654] ss:$200 sps:$4 sm:$0xff]  }
 0x18f   : > { %12628 = vmatprep.mubr.bf16.mxu0 %v18765_v63  ;;  %12762 = vmatpush1.bf16.msra.mxu0 %v18796_v0  ;;  %v18861_v63 = vld [vmem:[#allocation2 + $0x1334] ss:$200 sps:$4 sm:$0xff]   ;;  %v18888_v0 = vld [vmem:[%s21119_s25 + $0x360] ss:$8 sps:$4 sm:$0xff]  }
 0x190   : > { %12763 = vmatprep.subr.bf16.mxu0 %v18810_v1  ;;  %v18902_v1 = vld [vmem:[%s21119_s25 + $0x374] ss:$8 sps:$4 sm:$0xff]  }
 0x193   : > { %12764 = vmatpush1.bf16.msra.mxu0 %v18808_v2  ;;  %v18900_v2 = vld [vmem:[%s21119_s25 + $0x370] ss:$8 sps:$4 sm:$0xff]  }
 0x194   : > { %12765 = vmatprep.subr.bf16.mxu0 %v18822_v4  ;;  %v18867_v4 = vld [vmem:[#allocation2 + $0x1330] ss:$200 sps:$4 sm:$0xff]  }
 0x195   : > { %10200 = vmatmul.mubr.bf16.gmra.mrb[48].mxu1 %v18767_v3  ;;  %v18863_v3 = vld [vmem:[#allocation2 + $0x650] ss:$200 sps:$4 sm:$0xff]  }
 0x196   : > { %12629 = vmatmul.mubr.bf16.gmra.mrb[16].mxu0 %v18771_v5  ;;  %10209 = vmatprep.mubr.bf16.mxu1 %v18775_v6  ;;  %v18915_v5 = vld [vmem:[%s21119_s25 + $0x384] ss:$8 sps:$4 sm:$0xff]  }
 0x197   : > { %12638 = vmatprep.mubr.bf16.mxu0 %v18777_v7  ;;  %12766 = vmatpush1.bf16.msra.mxu0 %v18820_v8  ;;  %v18871_v6 = vld [vmem:[#allocation2 + $0x7e4] ss:$200 sps:$4 sm:$0xff]   ;;  %v18913_v8 = vld [vmem:[%s21119_s25 + $0x380] ss:$8 sps:$4 sm:$0xff]  }
 0x198   : > { %12767 = vmatprep.subr.bf16.mxu0 %v18834_v9  ;;  %v18873_v7 = vld [vmem:[#allocation2 + $0x14c4] ss:$200 sps:$4 sm:$0xff]   ;;  %v18926_v9 = vld [vmem:[%s21119_s25 + $0x394] ss:$8 sps:$4 sm:$0xff]  }
 0x19b   : > { %12768 = vmatpush1.bf16.msra.mxu0 %v18832_v12  ;;  %v18879_v12 = vld [vmem:[#allocation2 + $0x14c0] ss:$200 sps:$4 sm:$0xff]  }
 0x19c   : > { %12769 = vmatprep.subr.bf16.mxu0 %v18846_v14  ;;  %v18883_v14 = vld [vmem:[#allocation2 + $0x974] ss:$200 sps:$4 sm:$0xff]  }
 0x19d   : > { %10210 = vmatmul.mubr.bf16.gmra.mrb[52].mxu1 %v18779_v10  ;;  %v18924_v10 = vld [vmem:[%s21119_s25 + $0x390] ss:$8 sps:$4 sm:$0xff]  }
 0x19e   : > { %12639 = vmatmul.mubr.bf16.gmra.mrb[20].mxu0 %v18783_v11  ;;  %10219 = vmatprep.mubr.bf16.mxu1 %v18787_v13  ;;  %v18875_v11 = vld [vmem:[#allocation2 + $0x7e0] ss:$200 sps:$4 sm:$0xff]   ;;  %v18938_v13 = vld [vmem:[%s21119_s25 + $0x3a4] ss:$8 sps:$4 sm:$0xff]  }
 0x19f   : > { %12648 = vmatprep.mubr.bf16.mxu0 %v18789_v15  ;;  %12770 = vmatpush1.bf16.msra.mxu0 %v18844_v16  ;;  %v18885_v15 = vld [vmem:[#allocation2 + $0x1654] ss:$200 sps:$4 sm:$0xff]   ;;  %v18936_v16 = vld [vmem:[%s21119_s25 + $0x3a0] ss:$8 sps:$4 sm:$0xff]  }
 0x1a0   : > { %12771 = vmatprep.subr.bf16.mxu0 %v18858_v17  ;;  %v18950_v17 = vld [vmem:[%s21119_s25 + $0x3b4] ss:$8 sps:$4 sm:$0xff]  }
 0x1a3   : > { %12772 = vmatpush1.bf16.msra.mxu0 %v18856_v18  ;;  %v18948_v18 = vld [vmem:[%s21119_s25 + $0x3b0] ss:$8 sps:$4 sm:$0xff]  }
 0x1a4   : > { %12773 = vmatprep.subr.bf16.mxu0 %v18870_v21  ;;  %v18962_v21 = vld [vmem:[%s21119_s25 + $0x3c4] ss:$8 sps:$4 sm:$0xff]  }
 0x1a5   : > { %10220 = vmatmul.mubr.bf16.gmra.mrb[56].mxu1 %v18791_v19  ;;  %v18887_v19 = vld [vmem:[#allocation2 + $0x970] ss:$200 sps:$4 sm:$0xff]  }
 0x1a6   : > { %12649 = vmatmul.mubr.bf16.gmra.mrb[24].mxu0 %v18795_v20  ;;  %10229 = vmatprep.mubr.bf16.mxu1 %v18799_v22  ;;  %v18891_v20 = vld [vmem:[#allocation2 + $0x1650] ss:$200 sps:$4 sm:$0xff]   ;;  %v18895_v22 = vld [vmem:[#allocation2 + $0xb04] ss:$200 sps:$4 sm:$0xff]  }
 0x1a7   : > { %12658 = vmatprep.mubr.bf16.mxu0 %v18801_v23  ;;  %12774 = vmatpush1.bf16.msra.mxu0 %v18868_v24  ;;  %v18897_v23 = vld [vmem:[#allocation2 + $0x17e4] ss:$200 sps:$4 sm:$0xff]   ;;  %v18960_v24 = vld [vmem:[%s21119_s25 + $0x3c0] ss:$8 sps:$4 sm:$0xff]  }
 0x1a8   : > { %12775 = vmatprep.subr.bf16.mxu0 %v18882_v25  ;;  %v18974_v25 = vld [vmem:[%s21119_s25 + $0x3d4] ss:$8 sps:$4 sm:$0xff]  }
 0x1ab   : > { %12776 = vmatpush1.bf16.msra.mxu0 %v18880_v26  ;;  %v18972_v26 = vld [vmem:[%s21119_s25 + $0x3d0] ss:$8 sps:$4 sm:$0xff]  }
 0x1ac   : > { %12777 = vmatprep.subr.bf16.mxu0 %v18894_v29  ;;  %v18986_v29 = vld [vmem:[%s21119_s25 + $0x3e4] ss:$8 sps:$4 sm:$0xff]  }
 0x1ad   : > { %10230 = vmatmul.mubr.bf16.gmra.mrb[60].mxu1 %v18803_v27  ;;  %v18899_v27 = vld [vmem:[#allocation2 + $0xb00] ss:$200 sps:$4 sm:$0xff]  }
 0x1ae   : > { %12659 = vmatmul.mubr.bf16.gmra.mrb[28].mxu0 %v18807_v28  ;;  %10272 = vmatprep.mubr.bf16.mxu1 %v18813_v30  ;;  %v18903_v28 = vld [vmem:[#allocation2 + $0x17e0] ss:$200 sps:$4 sm:$0xff]   ;;  %v18907_v30 = vld [vmem:[#allocation2 + $0xc94] ss:$200 sps:$4 sm:$0xff]  }
 0x1af   : > { %12668 = vmatprep.mubr.bf16.mxu0 %v18814_v31  ;;  %12778 = vmatpush1.bf16.msra.mxu0 %v18892_v32  ;;  %v18911_v31 = vld [vmem:[#allocation2 + $0x7c] ss:$200 sps:$4 sm:$0xff]   ;;  %v18984_v32 = vld [vmem:[%s21119_s25 + $0x3e0] ss:$8 sps:$4 sm:$0xff]  }
 0x1b0   : > { %12779 = vmatprep.subr.bf16.mxu0 %v18906_v33  ;;  %v18998_v33 = vld [vmem:[%s21119_s25 + $0x3f4] ss:$8 sps:$4 sm:$0xff]  }
 0x1b3   : > { %12780 = vmatpush1.bf16.msra.mxu0 %v18904_v34  ;;  %v18909_v34 = vld [vmem:[#allocation2 + $0x78] ss:$200 sps:$4 sm:$0xff]  }
 0x1b4   : > { %12942 = vmatprep.subr.bf16.mxu0 %v18918_v37  ;;  %v19010_v37 = vld [vmem:[%s21119_s25 + $0x404] ss:$8 sps:$4 sm:$0xff]  }
 0x1b5   : > { %10273 = vmatmul.mubr.bf16.vlgmr.msra.gmra.mrb[0].mxu1 %v18811_v35  ;;  %v18912_v35 = vld [vmem:[#allocation2 + $0xc90] ss:$200 sps:$4 sm:$0xff]  }
 0x1b6   : > { %12669 = vmatmul.mubr.bf16.gmra.mrb[32].mxu0 %v18819_v36  ;;  %10434 = vmatpush1.bf16.msra.mxu1 %v18816_v38  ;;  %v18996_v36 = vld [vmem:[%s21119_s25 + $0x3f0] ss:$8 sps:$4 sm:$0xff]   ;;  %v18916_v38 = vld [vmem:[%s21119_s25 + $0x1000] ss:$8 sps:$4 sm:$0xff]  }
 0x1b7   : > { %10282 = vmatprep.mubr.bf16.mxu1 %v18823_v39  ;;  %12678 = vmatprep.mubr.bf16.mxu0 %v18825_v40  ;;  %v18919_v39 = vld [vmem:[#allocation2 + $0xe24] ss:$200 sps:$4 sm:$0xff]  }
 0x1b8   : > { %10435 = vmatprep.subr.bf16.mxu1 %v18830_v41  ;;  %v18921_v40 = vld [vmem:[#allocation2 + $0x20c] ss:$200 sps:$4 sm:$0xff]  }
 0x1b9   : > { %v18930_v41 = vld [vmem:[%s21119_s25 + $0x1014] ss:$8 sps:$4 sm:$0xff]  }
 0x1ba   : > { %10436 = vmatpush1.bf16.msra.mxu1 %v18828_v42  ;;  %v18928_v42 = vld [vmem:[%s21119_s25 + $0x1010] ss:$8 sps:$4 sm:$0xff]  }
 0x1bb   : > { %10437 = vmatprep.subr.bf16.mxu1 %v18842_v45  ;;  %v18942_v45 = vld [vmem:[%s21119_s25 + $0x1024] ss:$8 sps:$4 sm:$0xff]  }
 0x1bd   : > { %10283 = vmatmul.mubr.bf16.gmra.mrb[4].mxu1 %v18827_v43  ;;  %v18923_v43 = vld [vmem:[#allocation2 + $0xe20] ss:$200 sps:$4 sm:$0xff]  }
 0x1be   : > { %12679 = vmatmul.mubr.bf16.gmra.mrb[36].mxu0 %v18831_v44  ;;  %10292 = vmatprep.mubr.bf16.mxu1 %v18835_v46  ;;  %v18927_v44 = vld [vmem:[#allocation2 + $0x208] ss:$200 sps:$4 sm:$0xff]   ;;  %v18931_v46 = vld [vmem:[#allocation2 + $0xfb4] ss:$200 sps:$4 sm:$0xff]  }
 0x1bf   : > { %12688 = vmatprep.mubr.bf16.mxu0 %v18837_v47  ;;  %10438 = vmatpush1.bf16.msra.mxu1 %v18840_v48  ;;  %v18933_v47 = vld [vmem:[#allocation2 + $0x39c] ss:$200 sps:$4 sm:$0xff]   ;;  %v18940_v48 = vld [vmem:[%s21119_s25 + $0x1020] ss:$8 sps:$4 sm:$0xff]  }
 0x1c0   : > { %10439 = vmatprep.subr.bf16.mxu1 %v18854_v49  ;;  %v18954_v49 = vld [vmem:[%s21119_s25 + $0x1034] ss:$8 sps:$4 sm:$0xff]  }
 0x1c3   : > { %10440 = vmatpush1.bf16.msra.mxu1 %v18852_v50  ;;  %v18952_v50 = vld [vmem:[%s21119_s25 + $0x1030] ss:$8 sps:$4 sm:$0xff]  }
 0x1c4   : > { %10441 = vmatprep.subr.bf16.mxu1 %v18866_v53  ;;  %v18966_v53 = vld [vmem:[%s21119_s25 + $0x1044] ss:$8 sps:$4 sm:$0xff]  }
 0x1c5   : > { %10293 = vmatmul.mubr.bf16.gmra.mrb[8].mxu1 %v18839_v51  ;;  %v18935_v51 = vld [vmem:[#allocation2 + $0xfb0] ss:$200 sps:$4 sm:$0xff]  }
 0x1c6   : > { %12689 = vmatmul.mubr.bf16.gmra.mrb[40].mxu0 %v18843_v52  ;;  %10302 = vmatprep.mubr.bf16.mxu1 %v18847_v54  ;;  %v18939_v52 = vld [vmem:[#allocation2 + $0x398] ss:$200 sps:$4 sm:$0xff]   ;;  %v18943_v54 = vld [vmem:[#allocation2 + $0x1144] ss:$200 sps:$4 sm:$0xff]  }
 0x1c7   : > { %12698 = vmatprep.mubr.bf16.mxu0 %v18849_v55  ;;  %10442 = vmatpush1.bf16.msra.mxu1 %v18864_v56  ;;  %v18945_v55 = vld [vmem:[#allocation2 + $0x52c] ss:$200 sps:$4 sm:$0xff]   ;;  %v18964_v56 = vld [vmem:[%s21119_s25 + $0x1040] ss:$8 sps:$4 sm:$0xff]  }
 0x1c8   : > { %10443 = vmatprep.subr.bf16.mxu1 %v18878_v57  ;;  %v18978_v57 = vld [vmem:[%s21119_s25 + $0x1054] ss:$8 sps:$4 sm:$0xff]  }
 0x1cb   : > { %10444 = vmatpush1.bf16.msra.mxu1 %v18876_v58  ;;  %v18976_v58 = vld [vmem:[%s21119_s25 + $0x1050] ss:$8 sps:$4 sm:$0xff]  }
 0x1cc   : > { %10445 = vmatprep.subr.bf16.mxu1 %v18890_v61  ;;  %v18990_v61 = vld [vmem:[%s21119_s25 + $0x1064] ss:$8 sps:$4 sm:$0xff]  }
 0x1cd   : > { %10303 = vmatmul.mubr.bf16.gmra.mrb[12].mxu1 %v18851_v59  ;;  %v18947_v59 = vld [vmem:[#allocation2 + $0x1140] ss:$200 sps:$4 sm:$0xff]  }
 0x1ce   : > { %12699 = vmatmul.mubr.bf16.gmra.mrb[44].mxu0 %v18855_v60  ;;  %10312 = vmatprep.mubr.bf16.mxu1 %v18859_v62  ;;  %v18951_v60 = vld [vmem:[#allocation2 + $0x528] ss:$200 sps:$4 sm:$0xff]   ;;  %v18955_v62 = vld [vmem:[#allocation2 + $0x12d4] ss:$200 sps:$4 sm:$0xff]  }
 0x1cf   : > { %12708 = vmatprep.mubr.bf16.mxu0 %v18861_v63  ;;  %10446 = vmatpush1.bf16.msra.mxu1 %v18888_v0  ;;  %v18957_v63 = vld [vmem:[#allocation2 + $0x6bc] ss:$200 sps:$4 sm:$0xff]   ;;  %v18988_v0 = vld [vmem:[%s21119_s25 + $0x1060] ss:$8 sps:$4 sm:$0xff]  }
 0x1d0   : > { %10447 = vmatprep.subr.bf16.mxu1 %v18902_v1  ;;  %v19002_v1 = vld [vmem:[%s21119_s25 + $0x1074] ss:$8 sps:$4 sm:$0xff]  }
 0x1d3   : > { %10448 = vmatpush1.bf16.msra.mxu1 %v18900_v2  ;;  %v19000_v2 = vld [vmem:[%s21119_s25 + $0x1070] ss:$8 sps:$4 sm:$0xff]  }
 0x1d4   : > { %10449 = vmatprep.subr.bf16.mxu1 %v18915_v5  ;;  %v19014_v5 = vld [vmem:[%s21119_s25 + $0x1084] ss:$8 sps:$4 sm:$0xff]  }
 0x1d5   : > { %10313 = vmatmul.mubr.bf16.gmra.mrb[16].mxu1 %v18863_v3  ;;  %v18959_v3 = vld [vmem:[#allocation2 + $0x12d0] ss:$200 sps:$4 sm:$0xff]  }
 0x1d6   : > { %12709 = vmatmul.mubr.bf16.gmra.mrb[48].mxu0 %v18867_v4  ;;  %10322 = vmatprep.mubr.bf16.mxu1 %v18871_v6  ;;  %v18963_v4 = vld [vmem:[#allocation2 + $0x6b8] ss:$200 sps:$4 sm:$0xff]   ;;  %v18967_v6 = vld [vmem:[#allocation2 + $0x1464] ss:$200 sps:$4 sm:$0xff]  }
 0x1d7   : > { %12718 = vmatprep.mubr.bf16.mxu0 %v18873_v7  ;;  %10450 = vmatpush1.bf16.msra.mxu1 %v18913_v8  ;;  %v18969_v7 = vld [vmem:[#allocation2 + $0x84c] ss:$200 sps:$4 sm:$0xff]   ;;  %v19012_v8 = vld [vmem:[%s21119_s25 + $0x1080] ss:$8 sps:$4 sm:$0xff]  }
 0x1d8   : > { %10451 = vmatprep.subr.bf16.mxu1 %v18926_v9  ;;  %v19026_v9 = vld [vmem:[%s21119_s25 + $0x1094] ss:$8 sps:$4 sm:$0xff]  }
 0x1db   : > { %10452 = vmatpush1.bf16.msra.mxu1 %v18924_v10  ;;  %v19024_v10 = vld [vmem:[%s21119_s25 + $0x1090] ss:$8 sps:$4 sm:$0xff]  }
 0x1dc   : > { %10453 = vmatprep.subr.bf16.mxu1 %v18938_v13  ;;  %v19038_v13 = vld [vmem:[%s21119_s25 + $0x10a4] ss:$8 sps:$4 sm:$0xff]  }
 0x1dd   : > { %10323 = vmatmul.mubr.bf16.gmra.mrb[20].mxu1 %v18875_v11  ;;  %v18971_v11 = vld [vmem:[#allocation2 + $0x1460] ss:$200 sps:$4 sm:$0xff]  }
 0x1de   : > { %12719 = vmatmul.mubr.bf16.gmra.mrb[52].mxu0 %v18879_v12  ;;  %10332 = vmatprep.mubr.bf16.mxu1 %v18883_v14  ;;  %v18975_v12 = vld [vmem:[#allocation2 + $0x848] ss:$200 sps:$4 sm:$0xff]   ;;  %v18979_v14 = vld [vmem:[#allocation2 + $0x15f4] ss:$200 sps:$4 sm:$0xff]  }
 0x1df   : > { %12728 = vmatprep.mubr.bf16.mxu0 %v18885_v15  ;;  %10454 = vmatpush1.bf16.msra.mxu1 %v18936_v16  ;;  %v18981_v15 = vld [vmem:[#allocation2 + $0x9dc] ss:$200 sps:$4 sm:$0xff]   ;;  %v19036_v16 = vld [vmem:[%s21119_s25 + $0x10a0] ss:$8 sps:$4 sm:$0xff]  }
 0x1e0   : > { %10455 = vmatprep.subr.bf16.mxu1 %v18950_v17  ;;  %v19050_v17 = vld [vmem:[%s21119_s25 + $0x10b4] ss:$8 sps:$4 sm:$0xff]  }
 0x1e3   : > { %10456 = vmatpush1.bf16.msra.mxu1 %v18948_v18  ;;  %v19048_v18 = vld [vmem:[%s21119_s25 + $0x10b0] ss:$8 sps:$4 sm:$0xff]  }
 0x1e4   : > { %10457 = vmatprep.subr.bf16.mxu1 %v18962_v21  ;;  %v19062_v21 = vld [vmem:[%s21119_s25 + $0x10c4] ss:$8 sps:$4 sm:$0xff]  }
 0x1e5   : > { %10333 = vmatmul.mubr.bf16.gmra.mrb[24].mxu1 %v18887_v19  ;;  %v18983_v19 = vld [vmem:[#allocation2 + $0x15f0] ss:$200 sps:$4 sm:$0xff]  }
 0x1e6   : > { %12729 = vmatmul.mubr.bf16.gmra.mrb[56].mxu0 %v18891_v20  ;;  %10342 = vmatprep.mubr.bf16.mxu1 %v18895_v22  ;;  %v18987_v20 = vld [vmem:[#allocation2 + $0x9d8] ss:$200 sps:$4 sm:$0xff]   ;;  %v18991_v22 = vld [vmem:[#allocation2 + $0x1784] ss:$200 sps:$4 sm:$0xff]  }
 0x1e7   : > { %12738 = vmatprep.mubr.bf16.mxu0 %v18897_v23  ;;  %10458 = vmatpush1.bf16.msra.mxu1 %v18960_v24  ;;  %v18993_v23 = vld [vmem:[#allocation2 + $0xb6c] ss:$200 sps:$4 sm:$0xff]   ;;  %v19060_v24 = vld [vmem:[%s21119_s25 + $0x10c0] ss:$8 sps:$4 sm:$0xff]  }
 0x1e8   : > { %10459 = vmatprep.subr.bf16.mxu1 %v18974_v25  ;;  %v19074_v25 = vld [vmem:[%s21119_s25 + $0x10d4] ss:$8 sps:$4 sm:$0xff]  }
 0x1eb   : > { %10460 = vmatpush1.bf16.msra.mxu1 %v18972_v26  ;;  %v19072_v26 = vld [vmem:[%s21119_s25 + $0x10d0] ss:$8 sps:$4 sm:$0xff]  }
 0x1ec   : > { %10461 = vmatprep.subr.bf16.mxu1 %v18986_v29  ;;  %v19086_v29 = vld [vmem:[%s21119_s25 + $0x10e4] ss:$8 sps:$4 sm:$0xff]  }
 0x1ed   : > { %10343 = vmatmul.mubr.bf16.gmra.mrb[28].mxu1 %v18899_v27  ;;  %v18995_v27 = vld [vmem:[#allocation2 + $0x1780] ss:$200 sps:$4 sm:$0xff]  }
 0x1ee   : > { %12739 = vmatmul.mubr.bf16.gmra.mrb[60].mxu0 %v18903_v28  ;;  %10352 = vmatprep.mubr.bf16.mxu1 %v18907_v30  ;;  %v18999_v28 = vld [vmem:[#allocation2 + $0xb68] ss:$200 sps:$4 sm:$0xff]   ;;  %v19005_v30 = vld [vmem:[#allocation2 + $0x1c] ss:$200 sps:$4 sm:$0xff]  }
 0x1ef   : > { %12781 = vmatprep.mubr.bf16.mxu0 %v18911_v31  ;;  %10462 = vmatpush1.bf16.msra.mxu1 %v18984_v32  ;;  %v19006_v31 = vld [vmem:[#allocation2 + $0xcfc] ss:$200 sps:$4 sm:$0xff]   ;;  %v19084_v32 = vld [vmem:[%s21119_s25 + $0x10e0] ss:$8 sps:$4 sm:$0xff]  }
 0x1f0   : > { %10463 = vmatprep.subr.bf16.mxu1 %v18998_v33  ;;  %v19098_v33 = vld [vmem:[%s21119_s25 + $0x10f4] ss:$8 sps:$4 sm:$0xff]  }
 0x1f3   : > { %10464 = vmatpush1.bf16.msra.mxu1 %v18996_v36  ;;  %v19011_v36 = vld [vmem:[#allocation2 + $0xcf8] ss:$200 sps:$4 sm:$0xff]  }
 0x1f4   : > { %10626 = vmatprep.subr.bf16.mxu1 %v19010_v37  ;;  %v19110_v37 = vld [vmem:[%s21119_s25 + $0x1104] ss:$8 sps:$4 sm:$0xff]  }
 0x1f5   : > { %10353 = vmatmul.mubr.bf16.gmra.mrb[32].mxu1 %v18912_v35  ;;  %v19003_v35 = vld [vmem:[#allocation2 + $0x18] ss:$200 sps:$4 sm:$0xff]  }
 0x1f6   : > { %12782 = vmatmul.mubr.bf16.vlgmr.msra.gmra.mrb[0].mxu0 %v18909_v34  ;;  %10362 = vmatprep.mubr.bf16.mxu1 %v18919_v39  ;;  %v19096_v34 = vld [vmem:[%s21119_s25 + $0x10f0] ss:$8 sps:$4 sm:$0xff]   ;;  %v19015_v39 = vld [vmem:[#allocation2 + $0x1ac] ss:$200 sps:$4 sm:$0xff]  }
 0x1f7   : > { %12943 = vmatpush1.bf16.msra.mxu0 %v18916_v38  ;;  %12791 = vmatprep.mubr.bf16.mxu0 %v18921_v40  ;;  %v19008_v38 = vld [vmem:[%s21119_s25 + $0x400] ss:$8 sps:$4 sm:$0xff]   ;;  %v19017_v40 = vld [vmem:[#allocation2 + $0xe8c] ss:$200 sps:$4 sm:$0xff]  }
 0x1f8   : > { %12944 = vmatprep.subr.bf16.mxu0 %v18930_v41  ;;  %v19022_v41 = vld [vmem:[%s21119_s25 + $0x414] ss:$8 sps:$4 sm:$0xff]  }
 0x1fb   : > { %12945 = vmatpush1.bf16.msra.mxu0 %v18928_v42  ;;  %v19020_v42 = vld [vmem:[%s21119_s25 + $0x410] ss:$8 sps:$4 sm:$0xff]  }
 0x1fc   : > { %12946 = vmatprep.subr.bf16.mxu0 %v18942_v45  ;;  %v19034_v45 = vld [vmem:[%s21119_s25 + $0x424] ss:$8 sps:$4 sm:$0xff]  }
 0x1fd   : > { %10363 = vmatmul.mubr.bf16.gmra.mrb[36].mxu1 %v18923_v43  ;;  %v19019_v43 = vld [vmem:[#allocation2 + $0x1a8] ss:$200 sps:$4 sm:$0xff]  }
 0x1fe   : > { %12792 = vmatmul.mubr.bf16.gmra.mrb[4].mxu0 %v18927_v44  ;;  %10372 = vmatprep.mubr.bf16.mxu1 %v18931_v46  ;;  %v19023_v44 = vld [vmem:[#allocation2 + $0xe88] ss:$200 sps:$4 sm:$0xff]   ;;  %v19027_v46 = vld [vmem:[#allocation2 + $0x33c] ss:$200 sps:$4 sm:$0xff]  }
 0x1ff   : > { %12801 = vmatprep.mubr.bf16.mxu0 %v18933_v47  ;;  %12947 = vmatpush1.bf16.msra.mxu0 %v18940_v48  ;;  %v19029_v47 = vld [vmem:[#allocation2 + $0x101c] ss:$200 sps:$4 sm:$0xff]   ;;  %v19032_v48 = vld [vmem:[%s21119_s25 + $0x420] ss:$8 sps:$4 sm:$0xff]  }
 0x200   : > { %12948 = vmatprep.subr.bf16.mxu0 %v18954_v49  ;;  %v19046_v49 = vld [vmem:[%s21119_s25 + $0x434] ss:$8 sps:$4 sm:$0xff]  }
 0x203   : > { %12949 = vmatpush1.bf16.msra.mxu0 %v18952_v50  ;;  %v19044_v50 = vld [vmem:[%s21119_s25 + $0x430] ss:$8 sps:$4 sm:$0xff]  }
 0x204   : > { %12950 = vmatprep.subr.bf16.mxu0 %v18966_v53  ;;  %v19058_v53 = vld [vmem:[%s21119_s25 + $0x444] ss:$8 sps:$4 sm:$0xff]  }
 0x205   : > { %10373 = vmatmul.mubr.bf16.gmra.mrb[40].mxu1 %v18935_v51  ;;  %v19031_v51 = vld [vmem:[#allocation2 + $0x338] ss:$200 sps:$4 sm:$0xff]  }
 0x206   : > { %12802 = vmatmul.mubr.bf16.gmra.mrb[8].mxu0 %v18939_v52  ;;  %10382 = vmatprep.mubr.bf16.mxu1 %v18943_v54  ;;  %v19035_v52 = vld [vmem:[#allocation2 + $0x1018] ss:$200 sps:$4 sm:$0xff]   ;;  %v19039_v54 = vld [vmem:[#allocation2 + $0x4cc] ss:$200 sps:$4 sm:$0xff]  }
 0x207   : > { %12811 = vmatprep.mubr.bf16.mxu0 %v18945_v55  ;;  %12951 = vmatpush1.bf16.msra.mxu0 %v18964_v56  ;;  %v19041_v55 = vld [vmem:[#allocation2 + $0x11ac] ss:$200 sps:$4 sm:$0xff]   ;;  %v19056_v56 = vld [vmem:[%s21119_s25 + $0x440] ss:$8 sps:$4 sm:$0xff]  }
 0x208   : > { %12952 = vmatprep.subr.bf16.mxu0 %v18978_v57  ;;  %v19070_v57 = vld [vmem:[%s21119_s25 + $0x454] ss:$8 sps:$4 sm:$0xff]  }
 0x20b   : > { %12953 = vmatpush1.bf16.msra.mxu0 %v18976_v58  ;;  %v19068_v58 = vld [vmem:[%s21119_s25 + $0x450] ss:$8 sps:$4 sm:$0xff]  }
 0x20c   : > { %12954 = vmatprep.subr.bf16.mxu0 %v18990_v61  ;;  %v19082_v61 = vld [vmem:[%s21119_s25 + $0x464] ss:$8 sps:$4 sm:$0xff]  }
 0x20d   : > { %10383 = vmatmul.mubr.bf16.gmra.mrb[44].mxu1 %v18947_v59  ;;  %v19043_v59 = vld [vmem:[#allocation2 + $0x4c8] ss:$200 sps:$4 sm:$0xff]  }
 0x20e   : > { %12812 = vmatmul.mubr.bf16.gmra.mrb[12].mxu0 %v18951_v60  ;;  %10392 = vmatprep.mubr.bf16.mxu1 %v18955_v62  ;;  %v19047_v60 = vld [vmem:[#allocation2 + $0x11a8] ss:$200 sps:$4 sm:$0xff]   ;;  %v19051_v62 = vld [vmem:[#allocation2 + $0x65c] ss:$200 sps:$4 sm:$0xff]  }
 0x20f   : > { %12821 = vmatprep.mubr.bf16.mxu0 %v18957_v63  ;;  %12955 = vmatpush1.bf16.msra.mxu0 %v18988_v0  ;;  %v19053_v63 = vld [vmem:[#allocation2 + $0x133c] ss:$200 sps:$4 sm:$0xff]   ;;  %v19080_v0 = vld [vmem:[%s21119_s25 + $0x460] ss:$8 sps:$4 sm:$0xff]  }
 0x210   : > { %12956 = vmatprep.subr.bf16.mxu0 %v19002_v1  ;;  %v19094_v1 = vld [vmem:[%s21119_s25 + $0x474] ss:$8 sps:$4 sm:$0xff]  }
 0x213   : > { %12957 = vmatpush1.bf16.msra.mxu0 %v19000_v2  ;;  %v19092_v2 = vld [vmem:[%s21119_s25 + $0x470] ss:$8 sps:$4 sm:$0xff]  }
 0x214   : > { %12958 = vmatprep.subr.bf16.mxu0 %v19014_v5  ;;  %v19107_v5 = vld [vmem:[%s21119_s25 + $0x484] ss:$8 sps:$4 sm:$0xff]  }
 0x215   : > { %10393 = vmatmul.mubr.bf16.gmra.mrb[48].mxu1 %v18959_v3  ;;  %v19055_v3 = vld [vmem:[#allocation2 + $0x658] ss:$200 sps:$4 sm:$0xff]  }
 0x216   : > { %12822 = vmatmul.mubr.bf16.gmra.mrb[16].mxu0 %v18963_v4  ;;  %10402 = vmatprep.mubr.bf16.mxu1 %v18967_v6  ;;  %v19059_v4 = vld [vmem:[#allocation2 + $0x1338] ss:$200 sps:$4 sm:$0xff]   ;;  %v19063_v6 = vld [vmem:[#allocation2 + $0x7ec] ss:$200 sps:$4 sm:$0xff]  }
 0x217   : > { %12831 = vmatprep.mubr.bf16.mxu0 %v18969_v7  ;;  %12959 = vmatpush1.bf16.msra.mxu0 %v19012_v8  ;;  %v19065_v7 = vld [vmem:[#allocation2 + $0x14cc] ss:$200 sps:$4 sm:$0xff]   ;;  %v19105_v8 = vld [vmem:[%s21119_s25 + $0x480] ss:$8 sps:$4 sm:$0xff]  }
 0x218   : > { %12960 = vmatprep.subr.bf16.mxu0 %v19026_v9  ;;  %v19118_v9 = vld [vmem:[%s21119_s25 + $0x494] ss:$8 sps:$4 sm:$0xff]  }
 0x21b   : > { %12961 = vmatpush1.bf16.msra.mxu0 %v19024_v10  ;;  %v19116_v10 = vld [vmem:[%s21119_s25 + $0x490] ss:$8 sps:$4 sm:$0xff]  }
 0x21c   : > { %12962 = vmatprep.subr.bf16.mxu0 %v19038_v13  ;;  %v19130_v13 = vld [vmem:[%s21119_s25 + $0x4a4] ss:$8 sps:$4 sm:$0xff]  }
 0x21d   : > { %10403 = vmatmul.mubr.bf16.gmra.mrb[52].mxu1 %v18971_v11  ;;  %v19067_v11 = vld [vmem:[#allocation2 + $0x7e8] ss:$200 sps:$4 sm:$0xff]  }
 0x21e   : > { %12832 = vmatmul.mubr.bf16.gmra.mrb[20].mxu0 %v18975_v12  ;;  %10412 = vmatprep.mubr.bf16.mxu1 %v18979_v14  ;;  %v19071_v12 = vld [vmem:[#allocation2 + $0x14c8] ss:$200 sps:$4 sm:$0xff]   ;;  %v19075_v14 = vld [vmem:[#allocation2 + $0x97c] ss:$200 sps:$4 sm:$0xff]  }
 0x21f   : > { %12841 = vmatprep.mubr.bf16.mxu0 %v18981_v15  ;;  %12963 = vmatpush1.bf16.msra.mxu0 %v19036_v16  ;;  %v19077_v15 = vld [vmem:[#allocation2 + $0x165c] ss:$200 sps:$4 sm:$0xff]   ;;  %v19128_v16 = vld [vmem:[%s21119_s25 + $0x4a0] ss:$8 sps:$4 sm:$0xff]  }
 0x220   : > { %12964 = vmatprep.subr.bf16.mxu0 %v19050_v17  ;;  %v19142_v17 = vld [vmem:[%s21119_s25 + $0x4b4] ss:$8 sps:$4 sm:$0xff]  }
 0x223   : > { %12965 = vmatpush1.bf16.msra.mxu0 %v19048_v18  ;;  %v19140_v18 = vld [vmem:[%s21119_s25 + $0x4b0] ss:$8 sps:$4 sm:$0xff]  }
 0x224   : > { %12966 = vmatprep.subr.bf16.mxu0 %v19062_v21  ;;  %v19154_v21 = vld [vmem:[%s21119_s25 + $0x4c4] ss:$8 sps:$4 sm:$0xff]  }
 0x225   : > { %10413 = vmatmul.mubr.bf16.gmra.mrb[56].mxu1 %v18983_v19  ;;  %v19079_v19 = vld [vmem:[#allocation2 + $0x978] ss:$200 sps:$4 sm:$0xff]  }
 0x226   : > { %12842 = vmatmul.mubr.bf16.gmra.mrb[24].mxu0 %v18987_v20  ;;  %10422 = vmatprep.mubr.bf16.mxu1 %v18991_v22  ;;  %v19083_v20 = vld [vmem:[#allocation2 + $0x1658] ss:$200 sps:$4 sm:$0xff]   ;;  %v19087_v22 = vld [vmem:[#allocation2 + $0xb0c] ss:$200 sps:$4 sm:$0xff]  }
 0x227   : > { %12851 = vmatprep.mubr.bf16.mxu0 %v18993_v23  ;;  %12967 = vmatpush1.bf16.msra.mxu0 %v19060_v24  ;;  %v19089_v23 = vld [vmem:[#allocation2 + $0x17ec] ss:$200 sps:$4 sm:$0xff]   ;;  %v19152_v24 = vld [vmem:[%s21119_s25 + $0x4c0] ss:$8 sps:$4 sm:$0xff]  }
 0x228   : > { %12968 = vmatprep.subr.bf16.mxu0 %v19074_v25  ;;  %v19166_v25 = vld [vmem:[%s21119_s25 + $0x4d4] ss:$8 sps:$4 sm:$0xff]  }
 0x22b   : > { %12969 = vmatpush1.bf16.msra.mxu0 %v19072_v26  ;;  %v19164_v26 = vld [vmem:[%s21119_s25 + $0x4d0] ss:$8 sps:$4 sm:$0xff]  }
 0x22c   : > { %12970 = vmatprep.subr.bf16.mxu0 %v19086_v29  ;;  %v19178_v29 = vld [vmem:[%s21119_s25 + $0x4e4] ss:$8 sps:$4 sm:$0xff]  }
 0x22d   : > { %10423 = vmatmul.mubr.bf16.gmra.mrb[60].mxu1 %v18995_v27  ;;  %v19091_v27 = vld [vmem:[#allocation2 + $0xb08] ss:$200 sps:$4 sm:$0xff]  }
 0x22e   : > { %12852 = vmatmul.mubr.bf16.gmra.mrb[28].mxu0 %v18999_v28  ;;  %10465 = vmatprep.mubr.bf16.mxu1 %v19005_v30  ;;  %v19095_v28 = vld [vmem:[#allocation2 + $0x17e8] ss:$200 sps:$4 sm:$0xff]   ;;  %v19099_v30 = vld [vmem:[#allocation2 + $0xc9c] ss:$200 sps:$4 sm:$0xff]  }
 0x22f   : > { %12861 = vmatprep.mubr.bf16.mxu0 %v19006_v31  ;;  %12971 = vmatpush1.bf16.msra.mxu0 %v19084_v32  ;;  %v19103_v31 = vld [vmem:[#allocation2 + $0x84] ss:$200 sps:$4 sm:$0xff]   ;;  %v19176_v32 = vld [vmem:[%s21119_s25 + $0x4e0] ss:$8 sps:$4 sm:$0xff]  }
 0x230   : > { %12972 = vmatprep.subr.bf16.mxu0 %v19098_v33  ;;  %v19190_v33 = vld [vmem:[%s21119_s25 + $0x4f4] ss:$8 sps:$4 sm:$0xff]  }
 0x233   : > { %12973 = vmatpush1.bf16.msra.mxu0 %v19096_v34  ;;  %v19101_v34 = vld [vmem:[#allocation2 + $0x80] ss:$200 sps:$4 sm:$0xff]  }
 0x234   : > { %13135 = vmatprep.subr.bf16.mxu0 %v19110_v37  ;;  %v19202_v37 = vld [vmem:[%s21119_s25 + $0x504] ss:$8 sps:$4 sm:$0xff]  }
 0x235   : > { %10466 = vmatmul.mubr.bf16.vlgmr.msra.gmra.mrb[0].mxu1 %v19003_v35  ;;  %v19104_v35 = vld [vmem:[#allocation2 + $0xc98] ss:$200 sps:$4 sm:$0xff]  }
 0x236   : > { %12862 = vmatmul.mubr.bf16.gmra.mrb[32].mxu0 %v19011_v36  ;;  %10627 = vmatpush1.bf16.msra.mxu1 %v19008_v38  ;;  %v19188_v36 = vld [vmem:[%s21119_s25 + $0x4f0] ss:$8 sps:$4 sm:$0xff]   ;;  %v19108_v38 = vld [vmem:[%s21119_s25 + $0x1100] ss:$8 sps:$4 sm:$0xff]  }
 0x237   : > { %10475 = vmatprep.mubr.bf16.mxu1 %v19015_v39  ;;  %12871 = vmatprep.mubr.bf16.mxu0 %v19017_v40  ;;  %v19111_v39 = vld [vmem:[#allocation2 + $0xe2c] ss:$200 sps:$4 sm:$0xff]  }
 0x238   : > { %10628 = vmatprep.subr.bf16.mxu1 %v19022_v41  ;;  %v19113_v40 = vld [vmem:[#allocation2 + $0x214] ss:$200 sps:$4 sm:$0xff]  }
 0x239   : > { %v19122_v41 = vld [vmem:[%s21119_s25 + $0x1114] ss:$8 sps:$4 sm:$0xff]  }
 0x23a   : > { %10629 = vmatpush1.bf16.msra.mxu1 %v19020_v42  ;;  %v19120_v42 = vld [vmem:[%s21119_s25 + $0x1110] ss:$8 sps:$4 sm:$0xff]  }
 0x23b   : > { %10630 = vmatprep.subr.bf16.mxu1 %v19034_v45  ;;  %v19134_v45 = vld [vmem:[%s21119_s25 + $0x1124] ss:$8 sps:$4 sm:$0xff]  }
 0x23d   : > { %10476 = vmatmul.mubr.bf16.gmra.mrb[4].mxu1 %v19019_v43  ;;  %v19115_v43 = vld [vmem:[#allocation2 + $0xe28] ss:$200 sps:$4 sm:$0xff]  }
 0x23e   : > { %12872 = vmatmul.mubr.bf16.gmra.mrb[36].mxu0 %v19023_v44  ;;  %10485 = vmatprep.mubr.bf16.mxu1 %v19027_v46  ;;  %v19119_v44 = vld [vmem:[#allocation2 + $0x210] ss:$200 sps:$4 sm:$0xff]   ;;  %v19123_v46 = vld [vmem:[#allocation2 + $0xfbc] ss:$200 sps:$4 sm:$0xff]  }
 0x23f   : > { %12881 = vmatprep.mubr.bf16.mxu0 %v19029_v47  ;;  %10631 = vmatpush1.bf16.msra.mxu1 %v19032_v48  ;;  %v19125_v47 = vld [vmem:[#allocation2 + $0x3a4] ss:$200 sps:$4 sm:$0xff]   ;;  %v19132_v48 = vld [vmem:[%s21119_s25 + $0x1120] ss:$8 sps:$4 sm:$0xff]  }
 0x240   : > { %10632 = vmatprep.subr.bf16.mxu1 %v19046_v49  ;;  %v19146_v49 = vld [vmem:[%s21119_s25 + $0x1134] ss:$8 sps:$4 sm:$0xff]  }
 0x243   : > { %10633 = vmatpush1.bf16.msra.mxu1 %v19044_v50  ;;  %v19144_v50 = vld [vmem:[%s21119_s25 + $0x1130] ss:$8 sps:$4 sm:$0xff]  }
 0x244   : > { %10634 = vmatprep.subr.bf16.mxu1 %v19058_v53  ;;  %v19158_v53 = vld [vmem:[%s21119_s25 + $0x1144] ss:$8 sps:$4 sm:$0xff]  }
 0x245   : > { %10486 = vmatmul.mubr.bf16.gmra.mrb[8].mxu1 %v19031_v51  ;;  %v19127_v51 = vld [vmem:[#allocation2 + $0xfb8] ss:$200 sps:$4 sm:$0xff]  }
 0x246   : > { %12882 = vmatmul.mubr.bf16.gmra.mrb[40].mxu0 %v19035_v52  ;;  %10495 = vmatprep.mubr.bf16.mxu1 %v19039_v54  ;;  %v19131_v52 = vld [vmem:[#allocation2 + $0x3a0] ss:$200 sps:$4 sm:$0xff]   ;;  %v19135_v54 = vld [vmem:[#allocation2 + $0x114c] ss:$200 sps:$4 sm:$0xff]  }
 0x247   : > { %12891 = vmatprep.mubr.bf16.mxu0 %v19041_v55  ;;  %10635 = vmatpush1.bf16.msra.mxu1 %v19056_v56  ;;  %v19137_v55 = vld [vmem:[#allocation2 + $0x534] ss:$200 sps:$4 sm:$0xff]   ;;  %v19156_v56 = vld [vmem:[%s21119_s25 + $0x1140] ss:$8 sps:$4 sm:$0xff]  }
 0x248   : > { %10636 = vmatprep.subr.bf16.mxu1 %v19070_v57  ;;  %v19170_v57 = vld [vmem:[%s21119_s25 + $0x1154] ss:$8 sps:$4 sm:$0xff]  }
 0x24b   : > { %10637 = vmatpush1.bf16.msra.mxu1 %v19068_v58  ;;  %v19168_v58 = vld [vmem:[%s21119_s25 + $0x1150] ss:$8 sps:$4 sm:$0xff]  }
 0x24c   : > { %10638 = vmatprep.subr.bf16.mxu1 %v19082_v61  ;;  %v19182_v61 = vld [vmem:[%s21119_s25 + $0x1164] ss:$8 sps:$4 sm:$0xff]  }
 0x24d   : > { %10496 = vmatmul.mubr.bf16.gmra.mrb[12].mxu1 %v19043_v59  ;;  %v19139_v59 = vld [vmem:[#allocation2 + $0x1148] ss:$200 sps:$4 sm:$0xff]  }
 0x24e   : > { %12892 = vmatmul.mubr.bf16.gmra.mrb[44].mxu0 %v19047_v60  ;;  %10505 = vmatprep.mubr.bf16.mxu1 %v19051_v62  ;;  %v19143_v60 = vld [vmem:[#allocation2 + $0x530] ss:$200 sps:$4 sm:$0xff]   ;;  %v19147_v62 = vld [vmem:[#allocation2 + $0x12dc] ss:$200 sps:$4 sm:$0xff]  }
 0x24f   : > { %12901 = vmatprep.mubr.bf16.mxu0 %v19053_v63  ;;  %10639 = vmatpush1.bf16.msra.mxu1 %v19080_v0  ;;  %v19149_v63 = vld [vmem:[#allocation2 + $0x6c4] ss:$200 sps:$4 sm:$0xff]   ;;  %v19180_v0 = vld [vmem:[%s21119_s25 + $0x1160] ss:$8 sps:$4 sm:$0xff]  }
 0x250   : > { %10640 = vmatprep.subr.bf16.mxu1 %v19094_v1  ;;  %v19194_v1 = vld [vmem:[%s21119_s25 + $0x1174] ss:$8 sps:$4 sm:$0xff]  }
 0x253   : > { %10641 = vmatpush1.bf16.msra.mxu1 %v19092_v2  ;;  %v19192_v2 = vld [vmem:[%s21119_s25 + $0x1170] ss:$8 sps:$4 sm:$0xff]  }
 0x254   : > { %10642 = vmatprep.subr.bf16.mxu1 %v19107_v5  ;;  %v19206_v5 = vld [vmem:[%s21119_s25 + $0x1184] ss:$8 sps:$4 sm:$0xff]  }
 0x255   : > { %10506 = vmatmul.mubr.bf16.gmra.mrb[16].mxu1 %v19055_v3  ;;  %v19151_v3 = vld [vmem:[#allocation2 + $0x12d8] ss:$200 sps:$4 sm:$0xff]  }
 0x256   : > { %12902 = vmatmul.mubr.bf16.gmra.mrb[48].mxu0 %v19059_v4  ;;  %10515 = vmatprep.mubr.bf16.mxu1 %v19063_v6  ;;  %v19155_v4 = vld [vmem:[#allocation2 + $0x6c0] ss:$200 sps:$4 sm:$0xff]   ;;  %v19159_v6 = vld [vmem:[#allocation2 + $0x146c] ss:$200 sps:$4 sm:$0xff]  }
 0x257   : > { %12911 = vmatprep.mubr.bf16.mxu0 %v19065_v7  ;;  %10643 = vmatpush1.bf16.msra.mxu1 %v19105_v8  ;;  %v19161_v7 = vld [vmem:[#allocation2 + $0x854] ss:$200 sps:$4 sm:$0xff]   ;;  %v19204_v8 = vld [vmem:[%s21119_s25 + $0x1180] ss:$8 sps:$4 sm:$0xff]  }
 0x258   : > { %10644 = vmatprep.subr.bf16.mxu1 %v19118_v9  ;;  %v19218_v9 = vld [vmem:[%s21119_s25 + $0x1194] ss:$8 sps:$4 sm:$0xff]  }
 0x25b   : > { %10645 = vmatpush1.bf16.msra.mxu1 %v19116_v10  ;;  %v19216_v10 = vld [vmem:[%s21119_s25 + $0x1190] ss:$8 sps:$4 sm:$0xff]  }
 0x25c   : > { %10646 = vmatprep.subr.bf16.mxu1 %v19130_v13  ;;  %v19230_v13 = vld [vmem:[%s21119_s25 + $0x11a4] ss:$8 sps:$4 sm:$0xff]  }
 0x25d   : > { %10516 = vmatmul.mubr.bf16.gmra.mrb[20].mxu1 %v19067_v11  ;;  %v19163_v11 = vld [vmem:[#allocation2 + $0x1468] ss:$200 sps:$4 sm:$0xff]  }
 0x25e   : > { %12912 = vmatmul.mubr.bf16.gmra.mrb[52].mxu0 %v19071_v12  ;;  %10525 = vmatprep.mubr.bf16.mxu1 %v19075_v14  ;;  %v19167_v12 = vld [vmem:[#allocation2 + $0x850] ss:$200 sps:$4 sm:$0xff]   ;;  %v19171_v14 = vld [vmem:[#allocation2 + $0x15fc] ss:$200 sps:$4 sm:$0xff]  }
 0x25f   : > { %12921 = vmatprep.mubr.bf16.mxu0 %v19077_v15  ;;  %10647 = vmatpush1.bf16.msra.mxu1 %v19128_v16  ;;  %v19173_v15 = vld [vmem:[#allocation2 + $0x9e4] ss:$200 sps:$4 sm:$0xff]   ;;  %v19228_v16 = vld [vmem:[%s21119_s25 + $0x11a0] ss:$8 sps:$4 sm:$0xff]  }
 0x260   : > { %10648 = vmatprep.subr.bf16.mxu1 %v19142_v17  ;;  %v19242_v17 = vld [vmem:[%s21119_s25 + $0x11b4] ss:$8 sps:$4 sm:$0xff]  }
 0x263   : > { %10649 = vmatpush1.bf16.msra.mxu1 %v19140_v18  ;;  %v19240_v18 = vld [vmem:[%s21119_s25 + $0x11b0] ss:$8 sps:$4 sm:$0xff]  }
 0x264   : > { %10650 = vmatprep.subr.bf16.mxu1 %v19154_v21  ;;  %v19254_v21 = vld [vmem:[%s21119_s25 + $0x11c4] ss:$8 sps:$4 sm:$0xff]  }
 0x265   : > { %10526 = vmatmul.mubr.bf16.gmra.mrb[24].mxu1 %v19079_v19  ;;  %v19175_v19 = vld [vmem:[#allocation2 + $0x15f8] ss:$200 sps:$4 sm:$0xff]  }
 0x266   : > { %12922 = vmatmul.mubr.bf16.gmra.mrb[56].mxu0 %v19083_v20  ;;  %10535 = vmatprep.mubr.bf16.mxu1 %v19087_v22  ;;  %v19179_v20 = vld [vmem:[#allocation2 + $0x9e0] ss:$200 sps:$4 sm:$0xff]   ;;  %v19183_v22 = vld [vmem:[#allocation2 + $0x178c] ss:$200 sps:$4 sm:$0xff]  }
 0x267   : > { %12931 = vmatprep.mubr.bf16.mxu0 %v19089_v23  ;;  %10651 = vmatpush1.bf16.msra.mxu1 %v19152_v24  ;;  %v19185_v23 = vld [vmem:[#allocation2 + $0xb74] ss:$200 sps:$4 sm:$0xff]   ;;  %v19252_v24 = vld [vmem:[%s21119_s25 + $0x11c0] ss:$8 sps:$4 sm:$0xff]  }
 0x268   : > { %10652 = vmatprep.subr.bf16.mxu1 %v19166_v25  ;;  %v19266_v25 = vld [vmem:[%s21119_s25 + $0x11d4] ss:$8 sps:$4 sm:$0xff]  }
 0x26b   : > { %10653 = vmatpush1.bf16.msra.mxu1 %v19164_v26  ;;  %v19264_v26 = vld [vmem:[%s21119_s25 + $0x11d0] ss:$8 sps:$4 sm:$0xff]  }
 0x26c   : > { %10654 = vmatprep.subr.bf16.mxu1 %v19178_v29  ;;  %v19278_v29 = vld [vmem:[%s21119_s25 + $0x11e4] ss:$8 sps:$4 sm:$0xff]  }
 0x26d   : > { %10536 = vmatmul.mubr.bf16.gmra.mrb[28].mxu1 %v19091_v27  ;;  %v19187_v27 = vld [vmem:[#allocation2 + $0x1788] ss:$200 sps:$4 sm:$0xff]  }
 0x26e   : > { %12932 = vmatmul.mubr.bf16.gmra.mrb[60].mxu0 %v19095_v28  ;;  %10545 = vmatprep.mubr.bf16.mxu1 %v19099_v30  ;;  %v19191_v28 = vld [vmem:[#allocation2 + $0xb70] ss:$200 sps:$4 sm:$0xff]   ;;  %v19197_v30 = vld [vmem:[#allocation2 + $0x24] ss:$200 sps:$4 sm:$0xff]  }
 0x26f   : > { %12974 = vmatprep.mubr.bf16.mxu0 %v19103_v31  ;;  %10655 = vmatpush1.bf16.msra.mxu1 %v19176_v32  ;;  %v19198_v31 = vld [vmem:[#allocation2 + $0xd04] ss:$200 sps:$4 sm:$0xff]   ;;  %v19276_v32 = vld [vmem:[%s21119_s25 + $0x11e0] ss:$8 sps:$4 sm:$0xff]  }
 0x270   : > { %10656 = vmatprep.subr.bf16.mxu1 %v19190_v33  ;;  %v19290_v33 = vld [vmem:[%s21119_s25 + $0x11f4] ss:$8 sps:$4 sm:$0xff]  }
 0x273   : > { %10657 = vmatpush1.bf16.msra.mxu1 %v19188_v36  ;;  %v19203_v36 = vld [vmem:[#allocation2 + $0xd00] ss:$200 sps:$4 sm:$0xff]  }
 0x274   : > { %10819 = vmatprep.subr.bf16.mxu1 %v19202_v37  ;;  %v19302_v37 = vld [vmem:[%s21119_s25 + $0x1204] ss:$8 sps:$4 sm:$0xff]  }
 0x275   : > { %10546 = vmatmul.mubr.bf16.gmra.mrb[32].mxu1 %v19104_v35  ;;  %v19195_v35 = vld [vmem:[#allocation2 + $0x20] ss:$200 sps:$4 sm:$0xff]  }
 0x276   : > { %12975 = vmatmul.mubr.bf16.vlgmr.msra.gmra.mrb[0].mxu0 %v19101_v34  ;;  %10555 = vmatprep.mubr.bf16.mxu1 %v19111_v39  ;;  %v19288_v34 = vld [vmem:[%s21119_s25 + $0x11f0] ss:$8 sps:$4 sm:$0xff]   ;;  %v19207_v39 = vld [vmem:[#allocation2 + $0x1b4] ss:$200 sps:$4 sm:$0xff]  }
 0x277   : > { %13136 = vmatpush1.bf16.msra.mxu0 %v19108_v38  ;;  %12984 = vmatprep.mubr.bf16.mxu0 %v19113_v40  ;;  %v19200_v38 = vld [vmem:[%s21119_s25 + $0x500] ss:$8 sps:$4 sm:$0xff]   ;;  %v19209_v40 = vld [vmem:[#allocation2 + $0xe94] ss:$200 sps:$4 sm:$0xff]  }
 0x278   : > { %13137 = vmatprep.subr.bf16.mxu0 %v19122_v41  ;;  %v19214_v41 = vld [vmem:[%s21119_s25 + $0x514] ss:$8 sps:$4 sm:$0xff]  }
 0x27b   : > { %13138 = vmatpush1.bf16.msra.mxu0 %v19120_v42  ;;  %v19212_v42 = vld [vmem:[%s21119_s25 + $0x510] ss:$8 sps:$4 sm:$0xff]  }
 0x27c   : > { %13139 = vmatprep.subr.bf16.mxu0 %v19134_v45  ;;  %v19226_v45 = vld [vmem:[%s21119_s25 + $0x524] ss:$8 sps:$4 sm:$0xff]  }
 0x27d   : > { %10556 = vmatmul.mubr.bf16.gmra.mrb[36].mxu1 %v19115_v43  ;;  %v19211_v43 = vld [vmem:[#allocation2 + $0x1b0] ss:$200 sps:$4 sm:$0xff]  }
 0x27e   : > { %12985 = vmatmul.mubr.bf16.gmra.mrb[4].mxu0 %v19119_v44  ;;  %10565 = vmatprep.mubr.bf16.mxu1 %v19123_v46  ;;  %v19215_v44 = vld [vmem:[#allocation2 + $0xe90] ss:$200 sps:$4 sm:$0xff]   ;;  %v19219_v46 = vld [vmem:[#allocation2 + $0x344] ss:$200 sps:$4 sm:$0xff]  }
 0x27f   : > { %12994 = vmatprep.mubr.bf16.mxu0 %v19125_v47  ;;  %13140 = vmatpush1.bf16.msra.mxu0 %v19132_v48  ;;  %v19221_v47 = vld [vmem:[#allocation2 + $0x1024] ss:$200 sps:$4 sm:$0xff]   ;;  %v19224_v48 = vld [vmem:[%s21119_s25 + $0x520] ss:$8 sps:$4 sm:$0xff]  }
 0x280   : > { %13141 = vmatprep.subr.bf16.mxu0 %v19146_v49  ;;  %v19238_v49 = vld [vmem:[%s21119_s25 + $0x534] ss:$8 sps:$4 sm:$0xff]  }
 0x283   : > { %13142 = vmatpush1.bf16.msra.mxu0 %v19144_v50  ;;  %v19236_v50 = vld [vmem:[%s21119_s25 + $0x530] ss:$8 sps:$4 sm:$0xff]  }
 0x284   : > { %13143 = vmatprep.subr.bf16.mxu0 %v19158_v53  ;;  %v19250_v53 = vld [vmem:[%s21119_s25 + $0x544] ss:$8 sps:$4 sm:$0xff]  }
 0x285   : > { %10566 = vmatmul.mubr.bf16.gmra.mrb[40].mxu1 %v19127_v51  ;;  %v19223_v51 = vld [vmem:[#allocation2 + $0x340] ss:$200 sps:$4 sm:$0xff]  }
 0x286   : > { %12995 = vmatmul.mubr.bf16.gmra.mrb[8].mxu0 %v19131_v52  ;;  %10575 = vmatprep.mubr.bf16.mxu1 %v19135_v54  ;;  %v19227_v52 = vld [vmem:[#allocation2 + $0x1020] ss:$200 sps:$4 sm:$0xff]   ;;  %v19231_v54 = vld [vmem:[#allocation2 + $0x4d4] ss:$200 sps:$4 sm:$0xff]  }
 0x287   : > { %13004 = vmatprep.mubr.bf16.mxu0 %v19137_v55  ;;  %13144 = vmatpush1.bf16.msra.mxu0 %v19156_v56  ;;  %v19233_v55 = vld [vmem:[#allocation2 + $0x11b4] ss:$200 sps:$4 sm:$0xff]   ;;  %v19248_v56 = vld [vmem:[%s21119_s25 + $0x540] ss:$8 sps:$4 sm:$0xff]  }
 0x288   : > { %13145 = vmatprep.subr.bf16.mxu0 %v19170_v57  ;;  %v19262_v57 = vld [vmem:[%s21119_s25 + $0x554] ss:$8 sps:$4 sm:$0xff]  }
 0x28b   : > { %13146 = vmatpush1.bf16.msra.mxu0 %v19168_v58  ;;  %v19260_v58 = vld [vmem:[%s21119_s25 + $0x550] ss:$8 sps:$4 sm:$0xff]  }
 0x28c   : > { %13147 = vmatprep.subr.bf16.mxu0 %v19182_v61  ;;  %v19274_v61 = vld [vmem:[%s21119_s25 + $0x564] ss:$8 sps:$4 sm:$0xff]  }
 0x28d   : > { %10576 = vmatmul.mubr.bf16.gmra.mrb[44].mxu1 %v19139_v59  ;;  %v19235_v59 = vld [vmem:[#allocation2 + $0x4d0] ss:$200 sps:$4 sm:$0xff]  }
 0x28e   : > { %13005 = vmatmul.mubr.bf16.gmra.mrb[12].mxu0 %v19143_v60  ;;  %10585 = vmatprep.mubr.bf16.mxu1 %v19147_v62  ;;  %v19239_v60 = vld [vmem:[#allocation2 + $0x11b0] ss:$200 sps:$4 sm:$0xff]   ;;  %v19243_v62 = vld [vmem:[#allocation2 + $0x664] ss:$200 sps:$4 sm:$0xff]  }
 0x28f   : > { %13014 = vmatprep.mubr.bf16.mxu0 %v19149_v63  ;;  %13148 = vmatpush1.bf16.msra.mxu0 %v19180_v0  ;;  %v19245_v63 = vld [vmem:[#allocation2 + $0x1344] ss:$200 sps:$4 sm:$0xff]   ;;  %v19272_v0 = vld [vmem:[%s21119_s25 + $0x560] ss:$8 sps:$4 sm:$0xff]  }
 0x290   : > { %13149 = vmatprep.subr.bf16.mxu0 %v19194_v1  ;;  %v19286_v1 = vld [vmem:[%s21119_s25 + $0x574] ss:$8 sps:$4 sm:$0xff]  }
 0x293   : > { %13150 = vmatpush1.bf16.msra.mxu0 %v19192_v2  ;;  %v19284_v2 = vld [vmem:[%s21119_s25 + $0x570] ss:$8 sps:$4 sm:$0xff]  }
 0x294   : > { %13151 = vmatprep.subr.bf16.mxu0 %v19206_v5  ;;  %v19299_v5 = vld [vmem:[%s21119_s25 + $0x584] ss:$8 sps:$4 sm:$0xff]  }
 0x295   : > { %10586 = vmatmul.mubr.bf16.gmra.mrb[48].mxu1 %v19151_v3  ;;  %v19247_v3 = vld [vmem:[#allocation2 + $0x660] ss:$200 sps:$4 sm:$0xff]  }
 0x296   : > { %13015 = vmatmul.mubr.bf16.gmra.mrb[16].mxu0 %v19155_v4  ;;  %10595 = vmatprep.mubr.bf16.mxu1 %v19159_v6  ;;  %v19251_v4 = vld [vmem:[#allocation2 + $0x1340] ss:$200 sps:$4 sm:$0xff]   ;;  %v19255_v6 = vld [vmem:[#allocation2 + $0x7f4] ss:$200 sps:$4 sm:$0xff]  }
 0x297   : > { %13024 = vmatprep.mubr.bf16.mxu0 %v19161_v7  ;;  %13152 = vmatpush1.bf16.msra.mxu0 %v19204_v8  ;;  %v19257_v7 = vld [vmem:[#allocation2 + $0x14d4] ss:$200 sps:$4 sm:$0xff]   ;;  %v19297_v8 = vld [vmem:[%s21119_s25 + $0x580] ss:$8 sps:$4 sm:$0xff]  }
 0x298   : > { %13153 = vmatprep.subr.bf16.mxu0 %v19218_v9  ;;  %v19310_v9 = vld [vmem:[%s21119_s25 + $0x594] ss:$8 sps:$4 sm:$0xff]  }
 0x29b   : > { %13154 = vmatpush1.bf16.msra.mxu0 %v19216_v10  ;;  %v19308_v10 = vld [vmem:[%s21119_s25 + $0x590] ss:$8 sps:$4 sm:$0xff]  }
 0x29c   : > { %13155 = vmatprep.subr.bf16.mxu0 %v19230_v13  ;;  %v19322_v13 = vld [vmem:[%s21119_s25 + $0x5a4] ss:$8 sps:$4 sm:$0xff]  }
 0x29d   : > { %10596 = vmatmul.mubr.bf16.gmra.mrb[52].mxu1 %v19163_v11  ;;  %v19259_v11 = vld [vmem:[#allocation2 + $0x7f0] ss:$200 sps:$4 sm:$0xff]  }
 0x29e   : > { %13025 = vmatmul.mubr.bf16.gmra.mrb[20].mxu0 %v19167_v12  ;;  %10605 = vmatprep.mubr.bf16.mxu1 %v19171_v14  ;;  %v19263_v12 = vld [vmem:[#allocation2 + $0x14d0] ss:$200 sps:$4 sm:$0xff]   ;;  %v19267_v14 = vld [vmem:[#allocation2 + $0x984] ss:$200 sps:$4 sm:$0xff]  }
 0x29f   : > { %13034 = vmatprep.mubr.bf16.mxu0 %v19173_v15  ;;  %13156 = vmatpush1.bf16.msra.mxu0 %v19228_v16  ;;  %v19269_v15 = vld [vmem:[#allocation2 + $0x1664] ss:$200 sps:$4 sm:$0xff]   ;;  %v19320_v16 = vld [vmem:[%s21119_s25 + $0x5a0] ss:$8 sps:$4 sm:$0xff]  }
 0x2a0   : > { %13157 = vmatprep.subr.bf16.mxu0 %v19242_v17  ;;  %v19334_v17 = vld [vmem:[%s21119_s25 + $0x5b4] ss:$8 sps:$4 sm:$0xff]  }
 0x2a3   : > { %13158 = vmatpush1.bf16.msra.mxu0 %v19240_v18  ;;  %v19332_v18 = vld [vmem:[%s21119_s25 + $0x5b0] ss:$8 sps:$4 sm:$0xff]  }
 0x2a4   : > { %13159 = vmatprep.subr.bf16.mxu0 %v19254_v21  ;;  %v19346_v21 = vld [vmem:[%s21119_s25 + $0x5c4] ss:$8 sps:$4 sm:$0xff]  }
 0x2a5   : > { %10606 = vmatmul.mubr.bf16.gmra.mrb[56].mxu1 %v19175_v19  ;;  %v19271_v19 = vld [vmem:[#allocation2 + $0x980] ss:$200 sps:$4 sm:$0xff]  }
 0x2a6   : > { %13035 = vmatmul.mubr.bf16.gmra.mrb[24].mxu0 %v19179_v20  ;;  %10615 = vmatprep.mubr.bf16.mxu1 %v19183_v22  ;;  %v19275_v20 = vld [vmem:[#allocation2 + $0x1660] ss:$200 sps:$4 sm:$0xff]   ;;  %v19279_v22 = vld [vmem:[#allocation2 + $0xb14] ss:$200 sps:$4 sm:$0xff]  }
 0x2a7   : > { %13044 = vmatprep.mubr.bf16.mxu0 %v19185_v23  ;;  %13160 = vmatpush1.bf16.msra.mxu0 %v19252_v24  ;;  %v19281_v23 = vld [vmem:[#allocation2 + $0x17f4] ss:$200 sps:$4 sm:$0xff]   ;;  %v19344_v24 = vld [vmem:[%s21119_s25 + $0x5c0] ss:$8 sps:$4 sm:$0xff]  }
 0x2a8   : > { %13161 = vmatprep.subr.bf16.mxu0 %v19266_v25  ;;  %v19358_v25 = vld [vmem:[%s21119_s25 + $0x5d4] ss:$8 sps:$4 sm:$0xff]  }
 0x2ab   : > { %13162 = vmatpush1.bf16.msra.mxu0 %v19264_v26  ;;  %v19356_v26 = vld [vmem:[%s21119_s25 + $0x5d0] ss:$8 sps:$4 sm:$0xff]  }
 0x2ac   : > { %13163 = vmatprep.subr.bf16.mxu0 %v19278_v29  ;;  %v19370_v29 = vld [vmem:[%s21119_s25 + $0x5e4] ss:$8 sps:$4 sm:$0xff]  }
 0x2ad   : > { %10616 = vmatmul.mubr.bf16.gmra.mrb[60].mxu1 %v19187_v27  ;;  %v19283_v27 = vld [vmem:[#allocation2 + $0xb10] ss:$200 sps:$4 sm:$0xff]  }
 0x2ae   : > { %13045 = vmatmul.mubr.bf16.gmra.mrb[28].mxu0 %v19191_v28  ;;  %10658 = vmatprep.mubr.bf16.mxu1 %v19197_v30  ;;  %v19287_v28 = vld [vmem:[#allocation2 + $0x17f0] ss:$200 sps:$4 sm:$0xff]   ;;  %v19291_v30 = vld [vmem:[#allocation2 + $0xca4] ss:$200 sps:$4 sm:$0xff]  }
 0x2af   : > { %13054 = vmatprep.mubr.bf16.mxu0 %v19198_v31  ;;  %13164 = vmatpush1.bf16.msra.mxu0 %v19276_v32  ;;  %v19295_v31 = vld [vmem:[#allocation2 + $0x8c] ss:$200 sps:$4 sm:$0xff]   ;;  %v19368_v32 = vld [vmem:[%s21119_s25 + $0x5e0] ss:$8 sps:$4 sm:$0xff]  }
 0x2b0   : > { %13165 = vmatprep.subr.bf16.mxu0 %v19290_v33  ;;  %v19382_v33 = vld [vmem:[%s21119_s25 + $0x5f4] ss:$8 sps:$4 sm:$0xff]  }
 0x2b3   : > { %13166 = vmatpush1.bf16.msra.mxu0 %v19288_v34  ;;  %v19293_v34 = vld [vmem:[#allocation2 + $0x88] ss:$200 sps:$4 sm:$0xff]  }
 0x2b4   : > { %13328 = vmatprep.subr.bf16.mxu0 %v19302_v37  ;;  %v19394_v37 = vld [vmem:[%s21119_s25 + $0x604] ss:$8 sps:$4 sm:$0xff]  }
 0x2b5   : > { %10659 = vmatmul.mubr.bf16.vlgmr.msra.gmra.mrb[0].mxu1 %v19195_v35  ;;  %v19296_v35 = vld [vmem:[#allocation2 + $0xca0] ss:$200 sps:$4 sm:$0xff]  }
 0x2b6   : > { %13055 = vmatmul.mubr.bf16.gmra.mrb[32].mxu0 %v19203_v36  ;;  %10820 = vmatpush1.bf16.msra.mxu1 %v19200_v38  ;;  %v19380_v36 = vld [vmem:[%s21119_s25 + $0x5f0] ss:$8 sps:$4 sm:$0xff]   ;;  %v19300_v38 = vld [vmem:[%s21119_s25 + $0x1200] ss:$8 sps:$4 sm:$0xff]  }
 0x2b7   : > { %10668 = vmatprep.mubr.bf16.mxu1 %v19207_v39  ;;  %13064 = vmatprep.mubr.bf16.mxu0 %v19209_v40  ;;  %v19303_v39 = vld [vmem:[#allocation2 + $0xe34] ss:$200 sps:$4 sm:$0xff]  }
 0x2b8   : > { %10821 = vmatprep.subr.bf16.mxu1 %v19214_v41  ;;  %v19305_v40 = vld [vmem:[#allocation2 + $0x21c] ss:$200 sps:$4 sm:$0xff]  }
 0x2b9   : > { %v19314_v41 = vld [vmem:[%s21119_s25 + $0x1214] ss:$8 sps:$4 sm:$0xff]  }
 0x2ba   : > { %10822 = vmatpush1.bf16.msra.mxu1 %v19212_v42  ;;  %v19312_v42 = vld [vmem:[%s21119_s25 + $0x1210] ss:$8 sps:$4 sm:$0xff]  }
 0x2bb   : > { %10823 = vmatprep.subr.bf16.mxu1 %v19226_v45  ;;  %v19326_v45 = vld [vmem:[%s21119_s25 + $0x1224] ss:$8 sps:$4 sm:$0xff]  }
 0x2bd   : > { %10669 = vmatmul.mubr.bf16.gmra.mrb[4].mxu1 %v19211_v43  ;;  %v19307_v43 = vld [vmem:[#allocation2 + $0xe30] ss:$200 sps:$4 sm:$0xff]  }
 0x2be   : > { %13065 = vmatmul.mubr.bf16.gmra.mrb[36].mxu0 %v19215_v44  ;;  %10678 = vmatprep.mubr.bf16.mxu1 %v19219_v46  ;;  %v19311_v44 = vld [vmem:[#allocation2 + $0x218] ss:$200 sps:$4 sm:$0xff]   ;;  %v19315_v46 = vld [vmem:[#allocation2 + $0xfc4] ss:$200 sps:$4 sm:$0xff]  }
 0x2bf   : > { %13074 = vmatprep.mubr.bf16.mxu0 %v19221_v47  ;;  %10824 = vmatpush1.bf16.msra.mxu1 %v19224_v48  ;;  %v19317_v47 = vld [vmem:[#allocation2 + $0x3ac] ss:$200 sps:$4 sm:$0xff]   ;;  %v19324_v48 = vld [vmem:[%s21119_s25 + $0x1220] ss:$8 sps:$4 sm:$0xff]  }
 0x2c0   : > { %10825 = vmatprep.subr.bf16.mxu1 %v19238_v49  ;;  %v19338_v49 = vld [vmem:[%s21119_s25 + $0x1234] ss:$8 sps:$4 sm:$0xff]  }
 0x2c3   : > { %10826 = vmatpush1.bf16.msra.mxu1 %v19236_v50  ;;  %v19336_v50 = vld [vmem:[%s21119_s25 + $0x1230] ss:$8 sps:$4 sm:$0xff]  }
 0x2c4   : > { %10827 = vmatprep.subr.bf16.mxu1 %v19250_v53  ;;  %v19350_v53 = vld [vmem:[%s21119_s25 + $0x1244] ss:$8 sps:$4 sm:$0xff]  }
 0x2c5   : > { %10679 = vmatmul.mubr.bf16.gmra.mrb[8].mxu1 %v19223_v51  ;;  %v19319_v51 = vld [vmem:[#allocation2 + $0xfc0] ss:$200 sps:$4 sm:$0xff]  }
 0x2c6   : > { %13075 = vmatmul.mubr.bf16.gmra.mrb[40].mxu0 %v19227_v52  ;;  %10688 = vmatprep.mubr.bf16.mxu1 %v19231_v54  ;;  %v19323_v52 = vld [vmem:[#allocation2 + $0x3a8] ss:$200 sps:$4 sm:$0xff]   ;;  %v19327_v54 = vld [vmem:[#allocation2 + $0x1154] ss:$200 sps:$4 sm:$0xff]  }
 0x2c7   : > { %13084 = vmatprep.mubr.bf16.mxu0 %v19233_v55  ;;  %10828 = vmatpush1.bf16.msra.mxu1 %v19248_v56  ;;  %v19329_v55 = vld [vmem:[#allocation2 + $0x53c] ss:$200 sps:$4 sm:$0xff]   ;;  %v19348_v56 = vld [vmem:[%s21119_s25 + $0x1240] ss:$8 sps:$4 sm:$0xff]  }
 0x2c8   : > { %10829 = vmatprep.subr.bf16.mxu1 %v19262_v57  ;;  %v19362_v57 = vld [vmem:[%s21119_s25 + $0x1254] ss:$8 sps:$4 sm:$0xff]  }
 0x2cb   : > { %10830 = vmatpush1.bf16.msra.mxu1 %v19260_v58  ;;  %v19360_v58 = vld [vmem:[%s21119_s25 + $0x1250] ss:$8 sps:$4 sm:$0xff]  }
 0x2cc   : > { %10831 = vmatprep.subr.bf16.mxu1 %v19274_v61  ;;  %v19374_v61 = vld [vmem:[%s21119_s25 + $0x1264] ss:$8 sps:$4 sm:$0xff]  }
 0x2cd   : > { %10689 = vmatmul.mubr.bf16.gmra.mrb[12].mxu1 %v19235_v59  ;;  %v19331_v59 = vld [vmem:[#allocation2 + $0x1150] ss:$200 sps:$4 sm:$0xff]  }
 0x2ce   : > { %13085 = vmatmul.mubr.bf16.gmra.mrb[44].mxu0 %v19239_v60  ;;  %10698 = vmatprep.mubr.bf16.mxu1 %v19243_v62  ;;  %v19335_v60 = vld [vmem:[#allocation2 + $0x538] ss:$200 sps:$4 sm:$0xff]   ;;  %v19339_v62 = vld [vmem:[#allocation2 + $0x12e4] ss:$200 sps:$4 sm:$0xff]  }
 0x2cf   : > { %13094 = vmatprep.mubr.bf16.mxu0 %v19245_v63  ;;  %10832 = vmatpush1.bf16.msra.mxu1 %v19272_v0  ;;  %v19341_v63 = vld [vmem:[#allocation2 + $0x6cc] ss:$200 sps:$4 sm:$0xff]   ;;  %v19372_v0 = vld [vmem:[%s21119_s25 + $0x1260] ss:$8 sps:$4 sm:$0xff]  }
 0x2d0   : > { %10833 = vmatprep.subr.bf16.mxu1 %v19286_v1  ;;  %v19386_v1 = vld [vmem:[%s21119_s25 + $0x1274] ss:$8 sps:$4 sm:$0xff]  }
 0x2d3   : > { %10834 = vmatpush1.bf16.msra.mxu1 %v19284_v2  ;;  %v19384_v2 = vld [vmem:[%s21119_s25 + $0x1270] ss:$8 sps:$4 sm:$0xff]  }
 0x2d4   : > { %10835 = vmatprep.subr.bf16.mxu1 %v19299_v5  ;;  %v19398_v5 = vld [vmem:[%s21119_s25 + $0x1284] ss:$8 sps:$4 sm:$0xff]  }
 0x2d5   : > { %10699 = vmatmul.mubr.bf16.gmra.mrb[16].mxu1 %v19247_v3  ;;  %v19343_v3 = vld [vmem:[#allocation2 + $0x12e0] ss:$200 sps:$4 sm:$0xff]  }
 0x2d6   : > { %13095 = vmatmul.mubr.bf16.gmra.mrb[48].mxu0 %v19251_v4  ;;  %10708 = vmatprep.mubr.bf16.mxu1 %v19255_v6  ;;  %v19347_v4 = vld [vmem:[#allocation2 + $0x6c8] ss:$200 sps:$4 sm:$0xff]   ;;  %v19351_v6 = vld [vmem:[#allocation2 + $0x1474] ss:$200 sps:$4 sm:$0xff]  }
 0x2d7   : > { %13104 = vmatprep.mubr.bf16.mxu0 %v19257_v7  ;;  %10836 = vmatpush1.bf16.msra.mxu1 %v19297_v8  ;;  %v19353_v7 = vld [vmem:[#allocation2 + $0x85c] ss:$200 sps:$4 sm:$0xff]   ;;  %v19396_v8 = vld [vmem:[%s21119_s25 + $0x1280] ss:$8 sps:$4 sm:$0xff]  }
 0x2d8   : > { %10837 = vmatprep.subr.bf16.mxu1 %v19310_v9  ;;  %v19410_v9 = vld [vmem:[%s21119_s25 + $0x1294] ss:$8 sps:$4 sm:$0xff]  }
 0x2db   : > { %10838 = vmatpush1.bf16.msra.mxu1 %v19308_v10  ;;  %v19408_v10 = vld [vmem:[%s21119_s25 + $0x1290] ss:$8 sps:$4 sm:$0xff]  }
 0x2dc   : > { %10839 = vmatprep.subr.bf16.mxu1 %v19322_v13  ;;  %v19422_v13 = vld [vmem:[%s21119_s25 + $0x12a4] ss:$8 sps:$4 sm:$0xff]  }
 0x2dd   : > { %10709 = vmatmul.mubr.bf16.gmra.mrb[20].mxu1 %v19259_v11  ;;  %v19355_v11 = vld [vmem:[#allocation2 + $0x1470] ss:$200 sps:$4 sm:$0xff]  }
 0x2de   : > { %13105 = vmatmul.mubr.bf16.gmra.mrb[52].mxu0 %v19263_v12  ;;  %10718 = vmatprep.mubr.bf16.mxu1 %v19267_v14  ;;  %v19359_v12 = vld [vmem:[#allocation2 + $0x858] ss:$200 sps:$4 sm:$0xff]   ;;  %v19363_v14 = vld [vmem:[#allocation2 + $0x1604] ss:$200 sps:$4 sm:$0xff]  }
 0x2df   : > { %13114 = vmatprep.mubr.bf16.mxu0 %v19269_v15  ;;  %10840 = vmatpush1.bf16.msra.mxu1 %v19320_v16  ;;  %v19365_v15 = vld [vmem:[#allocation2 + $0x9ec] ss:$200 sps:$4 sm:$0xff]   ;;  %v19420_v16 = vld [vmem:[%s21119_s25 + $0x12a0] ss:$8 sps:$4 sm:$0xff]  }
 0x2e0   : > { %10841 = vmatprep.subr.bf16.mxu1 %v19334_v17  ;;  %v19434_v17 = vld [vmem:[%s21119_s25 + $0x12b4] ss:$8 sps:$4 sm:$0xff]  }
 0x2e3   : > { %10842 = vmatpush1.bf16.msra.mxu1 %v19332_v18  ;;  %v19432_v18 = vld [vmem:[%s21119_s25 + $0x12b0] ss:$8 sps:$4 sm:$0xff]  }
 0x2e4   : > { %10843 = vmatprep.subr.bf16.mxu1 %v19346_v21  ;;  %v19446_v21 = vld [vmem:[%s21119_s25 + $0x12c4] ss:$8 sps:$4 sm:$0xff]  }
 0x2e5   : > { %10719 = vmatmul.mubr.bf16.gmra.mrb[24].mxu1 %v19271_v19  ;;  %v19367_v19 = vld [vmem:[#allocation2 + $0x1600] ss:$200 sps:$4 sm:$0xff]  }
 0x2e6   : > { %13115 = vmatmul.mubr.bf16.gmra.mrb[56].mxu0 %v19275_v20  ;;  %10728 = vmatprep.mubr.bf16.mxu1 %v19279_v22  ;;  %v19371_v20 = vld [vmem:[#allocation2 + $0x9e8] ss:$200 sps:$4 sm:$0xff]   ;;  %v19375_v22 = vld [vmem:[#allocation2 + $0x1794] ss:$200 sps:$4 sm:$0xff]  }
 0x2e7   : > { %13124 = vmatprep.mubr.bf16.mxu0 %v19281_v23  ;;  %10844 = vmatpush1.bf16.msra.mxu1 %v19344_v24  ;;  %v19377_v23 = vld [vmem:[#allocation2 + $0xb7c] ss:$200 sps:$4 sm:$0xff]   ;;  %v19444_v24 = vld [vmem:[%s21119_s25 + $0x12c0] ss:$8 sps:$4 sm:$0xff]  }
 0x2e8   : > { %10845 = vmatprep.subr.bf16.mxu1 %v19358_v25  ;;  %v19458_v25 = vld [vmem:[%s21119_s25 + $0x12d4] ss:$8 sps:$4 sm:$0xff]  }
 0x2eb   : > { %10846 = vmatpush1.bf16.msra.mxu1 %v19356_v26  ;;  %v19456_v26 = vld [vmem:[%s21119_s25 + $0x12d0] ss:$8 sps:$4 sm:$0xff]  }
 0x2ec   : > { %10847 = vmatprep.subr.bf16.mxu1 %v19370_v29  ;;  %v19470_v29 = vld [vmem:[%s21119_s25 + $0x12e4] ss:$8 sps:$4 sm:$0xff]  }
 0x2ed   : > { %10729 = vmatmul.mubr.bf16.gmra.mrb[28].mxu1 %v19283_v27  ;;  %v19379_v27 = vld [vmem:[#allocation2 + $0x1790] ss:$200 sps:$4 sm:$0xff]  }
 0x2ee   : > { %13125 = vmatmul.mubr.bf16.gmra.mrb[60].mxu0 %v19287_v28  ;;  %10738 = vmatprep.mubr.bf16.mxu1 %v19291_v30  ;;  %v19383_v28 = vld [vmem:[#allocation2 + $0xb78] ss:$200 sps:$4 sm:$0xff]   ;;  %v19389_v30 = vld [vmem:[#allocation2 + $0x2c] ss:$200 sps:$4 sm:$0xff]  }
 0x2ef   : > { %13167 = vmatprep.mubr.bf16.mxu0 %v19295_v31  ;;  %10848 = vmatpush1.bf16.msra.mxu1 %v19368_v32  ;;  %v19390_v31 = vld [vmem:[#allocation2 + $0xd0c] ss:$200 sps:$4 sm:$0xff]   ;;  %v19468_v32 = vld [vmem:[%s21119_s25 + $0x12e0] ss:$8 sps:$4 sm:$0xff]  }
 0x2f0   : > { %10849 = vmatprep.subr.bf16.mxu1 %v19382_v33  ;;  %v19482_v33 = vld [vmem:[%s21119_s25 + $0x12f4] ss:$8 sps:$4 sm:$0xff]  }
 0x2f3   : > { %10850 = vmatpush1.bf16.msra.mxu1 %v19380_v36  ;;  %v19395_v36 = vld [vmem:[#allocation2 + $0xd08] ss:$200 sps:$4 sm:$0xff]  }
 0x2f4   : > { %11012 = vmatprep.subr.bf16.mxu1 %v19394_v37  ;;  %v19494_v37 = vld [vmem:[%s21119_s25 + $0x1304] ss:$8 sps:$4 sm:$0xff]  }
 0x2f5   : > { %10739 = vmatmul.mubr.bf16.gmra.mrb[32].mxu1 %v19296_v35  ;;  %v19387_v35 = vld [vmem:[#allocation2 + $0x28] ss:$200 sps:$4 sm:$0xff]  }
 0x2f6   : > { %13168 = vmatmul.mubr.bf16.vlgmr.msra.gmra.mrb[0].mxu0 %v19293_v34  ;;  %10748 = vmatprep.mubr.bf16.mxu1 %v19303_v39  ;;  %v19480_v34 = vld [vmem:[%s21119_s25 + $0x12f0] ss:$8 sps:$4 sm:$0xff]   ;;  %v19399_v39 = vld [vmem:[#allocation2 + $0x1bc] ss:$200 sps:$4 sm:$0xff]  }
 0x2f7   : > { %13329 = vmatpush1.bf16.msra.mxu0 %v19300_v38  ;;  %13177 = vmatprep.mubr.bf16.mxu0 %v19305_v40  ;;  %v19392_v38 = vld [vmem:[%s21119_s25 + $0x600] ss:$8 sps:$4 sm:$0xff]   ;;  %v19401_v40 = vld [vmem:[#allocation2 + $0xe9c] ss:$200 sps:$4 sm:$0xff]  }
 0x2f8   : > { %13330 = vmatprep.subr.bf16.mxu0 %v19314_v41  ;;  %v19406_v41 = vld [vmem:[%s21119_s25 + $0x614] ss:$8 sps:$4 sm:$0xff]  }
 0x2fb   : > { %13331 = vmatpush1.bf16.msra.mxu0 %v19312_v42  ;;  %v19404_v42 = vld [vmem:[%s21119_s25 + $0x610] ss:$8 sps:$4 sm:$0xff]  }
 0x2fc   : > { %13332 = vmatprep.subr.bf16.mxu0 %v19326_v45  ;;  %v19418_v45 = vld [vmem:[%s21119_s25 + $0x624] ss:$8 sps:$4 sm:$0xff]  }
 0x2fd   : > { %10749 = vmatmul.mubr.bf16.gmra.mrb[36].mxu1 %v19307_v43  ;;  %v19403_v43 = vld [vmem:[#allocation2 + $0x1b8] ss:$200 sps:$4 sm:$0xff]  }
 0x2fe   : > { %13178 = vmatmul.mubr.bf16.gmra.mrb[4].mxu0 %v19311_v44  ;;  %10758 = vmatprep.mubr.bf16.mxu1 %v19315_v46  ;;  %v19407_v44 = vld [vmem:[#allocation2 + $0xe98] ss:$200 sps:$4 sm:$0xff]   ;;  %v19411_v46 = vld [vmem:[#allocation2 + $0x34c] ss:$200 sps:$4 sm:$0xff]  }
 0x2ff   : > { %13187 = vmatprep.mubr.bf16.mxu0 %v19317_v47  ;;  %13333 = vmatpush1.bf16.msra.mxu0 %v19324_v48  ;;  %v19413_v47 = vld [vmem:[#allocation2 + $0x102c] ss:$200 sps:$4 sm:$0xff]   ;;  %v19416_v48 = vld [vmem:[%s21119_s25 + $0x620] ss:$8 sps:$4 sm:$0xff]  }
 0x300   : > { %13334 = vmatprep.subr.bf16.mxu0 %v19338_v49  ;;  %v19430_v49 = vld [vmem:[%s21119_s25 + $0x634] ss:$8 sps:$4 sm:$0xff]  }
 0x303   : > { %13335 = vmatpush1.bf16.msra.mxu0 %v19336_v50  ;;  %v19428_v50 = vld [vmem:[%s21119_s25 + $0x630] ss:$8 sps:$4 sm:$0xff]  }
 0x304   : > { %13336 = vmatprep.subr.bf16.mxu0 %v19350_v53  ;;  %v19442_v53 = vld [vmem:[%s21119_s25 + $0x644] ss:$8 sps:$4 sm:$0xff]  }
 0x305   : > { %10759 = vmatmul.mubr.bf16.gmra.mrb[40].mxu1 %v19319_v51  ;;  %v19415_v51 = vld [vmem:[#allocation2 + $0x348] ss:$200 sps:$4 sm:$0xff]  }
 0x306   : > { %13188 = vmatmul.mubr.bf16.gmra.mrb[8].mxu0 %v19323_v52  ;;  %10768 = vmatprep.mubr.bf16.mxu1 %v19327_v54  ;;  %v19419_v52 = vld [vmem:[#allocation2 + $0x1028] ss:$200 sps:$4 sm:$0xff]   ;;  %v19423_v54 = vld [vmem:[#allocation2 + $0x4dc] ss:$200 sps:$4 sm:$0xff]  }
 0x307   : > { %13197 = vmatprep.mubr.bf16.mxu0 %v19329_v55  ;;  %13337 = vmatpush1.bf16.msra.mxu0 %v19348_v56  ;;  %v19425_v55 = vld [vmem:[#allocation2 + $0x11bc] ss:$200 sps:$4 sm:$0xff]   ;;  %v19440_v56 = vld [vmem:[%s21119_s25 + $0x640] ss:$8 sps:$4 sm:$0xff]  }
 0x308   : > { %13338 = vmatprep.subr.bf16.mxu0 %v19362_v57  ;;  %v19454_v57 = vld [vmem:[%s21119_s25 + $0x654] ss:$8 sps:$4 sm:$0xff]  }
 0x30b   : > { %13339 = vmatpush1.bf16.msra.mxu0 %v19360_v58  ;;  %v19452_v58 = vld [vmem:[%s21119_s25 + $0x650] ss:$8 sps:$4 sm:$0xff]  }
 0x30c   : > { %13340 = vmatprep.subr.bf16.mxu0 %v19374_v61  ;;  %v19466_v61 = vld [vmem:[%s21119_s25 + $0x664] ss:$8 sps:$4 sm:$0xff]  }
 0x30d   : > { %10769 = vmatmul.mubr.bf16.gmra.mrb[44].mxu1 %v19331_v59  ;;  %v19427_v59 = vld [vmem:[#allocation2 + $0x4d8] ss:$200 sps:$4 sm:$0xff]  }
 0x30e   : > { %13198 = vmatmul.mubr.bf16.gmra.mrb[12].mxu0 %v19335_v60  ;;  %10778 = vmatprep.mubr.bf16.mxu1 %v19339_v62  ;;  %v19431_v60 = vld [vmem:[#allocation2 + $0x11b8] ss:$200 sps:$4 sm:$0xff]   ;;  %v19435_v62 = vld [vmem:[#allocation2 + $0x66c] ss:$200 sps:$4 sm:$0xff]  }
 0x30f   : > { %13207 = vmatprep.mubr.bf16.mxu0 %v19341_v63  ;;  %13341 = vmatpush1.bf16.msra.mxu0 %v19372_v0  ;;  %v19437_v63 = vld [vmem:[#allocation2 + $0x134c] ss:$200 sps:$4 sm:$0xff]   ;;  %v19464_v0 = vld [vmem:[%s21119_s25 + $0x660] ss:$8 sps:$4 sm:$0xff]  }
 0x310   : > { %13342 = vmatprep.subr.bf16.mxu0 %v19386_v1  ;;  %v19478_v1 = vld [vmem:[%s21119_s25 + $0x674] ss:$8 sps:$4 sm:$0xff]  }
 0x313   : > { %13343 = vmatpush1.bf16.msra.mxu0 %v19384_v2  ;;  %v19476_v2 = vld [vmem:[%s21119_s25 + $0x670] ss:$8 sps:$4 sm:$0xff]  }
 0x314   : > { %13344 = vmatprep.subr.bf16.mxu0 %v19398_v5  ;;  %v19491_v5 = vld [vmem:[%s21119_s25 + $0x684] ss:$8 sps:$4 sm:$0xff]  }
 0x315   : > { %10779 = vmatmul.mubr.bf16.gmra.mrb[48].mxu1 %v19343_v3  ;;  %v19439_v3 = vld [vmem:[#allocation2 + $0x668] ss:$200 sps:$4 sm:$0xff]  }
 0x316   : > { %13208 = vmatmul.mubr.bf16.gmra.mrb[16].mxu0 %v19347_v4  ;;  %10788 = vmatprep.mubr.bf16.mxu1 %v19351_v6  ;;  %v19443_v4 = vld [vmem:[#allocation2 + $0x1348] ss:$200 sps:$4 sm:$0xff]   ;;  %v19447_v6 = vld [vmem:[#allocation2 + $0x7fc] ss:$200 sps:$4 sm:$0xff]  }
 0x317   : > { %13217 = vmatprep.mubr.bf16.mxu0 %v19353_v7  ;;  %13345 = vmatpush1.bf16.msra.mxu0 %v19396_v8  ;;  %v19449_v7 = vld [vmem:[#allocation2 + $0x14dc] ss:$200 sps:$4 sm:$0xff]   ;;  %v19489_v8 = vld [vmem:[%s21119_s25 + $0x680] ss:$8 sps:$4 sm:$0xff]  }
 0x318   : > { %13346 = vmatprep.subr.bf16.mxu0 %v19410_v9  ;;  %v19502_v9 = vld [vmem:[%s21119_s25 + $0x694] ss:$8 sps:$4 sm:$0xff]  }
 0x31b   : > { %13347 = vmatpush1.bf16.msra.mxu0 %v19408_v10  ;;  %v19500_v10 = vld [vmem:[%s21119_s25 + $0x690] ss:$8 sps:$4 sm:$0xff]  }
 0x31c   : > { %13348 = vmatprep.subr.bf16.mxu0 %v19422_v13  ;;  %v19514_v13 = vld [vmem:[%s21119_s25 + $0x6a4] ss:$8 sps:$4 sm:$0xff]  }
 0x31d   : > { %10789 = vmatmul.mubr.bf16.gmra.mrb[52].mxu1 %v19355_v11  ;;  %v19451_v11 = vld [vmem:[#allocation2 + $0x7f8] ss:$200 sps:$4 sm:$0xff]  }
 0x31e   : > { %13218 = vmatmul.mubr.bf16.gmra.mrb[20].mxu0 %v19359_v12  ;;  %10798 = vmatprep.mubr.bf16.mxu1 %v19363_v14  ;;  %v19455_v12 = vld [vmem:[#allocation2 + $0x14d8] ss:$200 sps:$4 sm:$0xff]   ;;  %v19459_v14 = vld [vmem:[#allocation2 + $0x98c] ss:$200 sps:$4 sm:$0xff]  }
 0x31f   : > { %13227 = vmatprep.mubr.bf16.mxu0 %v19365_v15  ;;  %13349 = vmatpush1.bf16.msra.mxu0 %v19420_v16  ;;  %v19461_v15 = vld [vmem:[#allocation2 + $0x166c] ss:$200 sps:$4 sm:$0xff]   ;;  %v19512_v16 = vld [vmem:[%s21119_s25 + $0x6a0] ss:$8 sps:$4 sm:$0xff]  }
 0x320   : > { %13350 = vmatprep.subr.bf16.mxu0 %v19434_v17  ;;  %v19526_v17 = vld [vmem:[%s21119_s25 + $0x6b4] ss:$8 sps:$4 sm:$0xff]  }
 0x323   : > { %13351 = vmatpush1.bf16.msra.mxu0 %v19432_v18  ;;  %v19524_v18 = vld [vmem:[%s21119_s25 + $0x6b0] ss:$8 sps:$4 sm:$0xff]  }
 0x324   : > { %13352 = vmatprep.subr.bf16.mxu0 %v19446_v21  ;;  %v19538_v21 = vld [vmem:[%s21119_s25 + $0x6c4] ss:$8 sps:$4 sm:$0xff]  }
 0x325   : > { %10799 = vmatmul.mubr.bf16.gmra.mrb[56].mxu1 %v19367_v19  ;;  %v19463_v19 = vld [vmem:[#allocation2 + $0x988] ss:$200 sps:$4 sm:$0xff]  }
 0x326   : > { %13228 = vmatmul.mubr.bf16.gmra.mrb[24].mxu0 %v19371_v20  ;;  %10808 = vmatprep.mubr.bf16.mxu1 %v19375_v22  ;;  %v19467_v20 = vld [vmem:[#allocation2 + $0x1668] ss:$200 sps:$4 sm:$0xff]   ;;  %v19471_v22 = vld [vmem:[#allocation2 + $0xb1c] ss:$200 sps:$4 sm:$0xff]  }
 0x327   : > { %13237 = vmatprep.mubr.bf16.mxu0 %v19377_v23  ;;  %13353 = vmatpush1.bf16.msra.mxu0 %v19444_v24  ;;  %v19473_v23 = vld [vmem:[#allocation2 + $0x17fc] ss:$200 sps:$4 sm:$0xff]   ;;  %v19536_v24 = vld [vmem:[%s21119_s25 + $0x6c0] ss:$8 sps:$4 sm:$0xff]  }
 0x328   : > { %13354 = vmatprep.subr.bf16.mxu0 %v19458_v25  ;;  %v19550_v25 = vld [vmem:[%s21119_s25 + $0x6d4] ss:$8 sps:$4 sm:$0xff]  }
 0x32b   : > { %13355 = vmatpush1.bf16.msra.mxu0 %v19456_v26  ;;  %v19548_v26 = vld [vmem:[%s21119_s25 + $0x6d0] ss:$8 sps:$4 sm:$0xff]  }
 0x32c   : > { %13356 = vmatprep.subr.bf16.mxu0 %v19470_v29  ;;  %v19562_v29 = vld [vmem:[%s21119_s25 + $0x6e4] ss:$8 sps:$4 sm:$0xff]  }
 0x32d   : > { %10809 = vmatmul.mubr.bf16.gmra.mrb[60].mxu1 %v19379_v27  ;;  %v19475_v27 = vld [vmem:[#allocation2 + $0xb18] ss:$200 sps:$4 sm:$0xff]  }
 0x32e   : > { %13238 = vmatmul.mubr.bf16.gmra.mrb[28].mxu0 %v19383_v28  ;;  %10851 = vmatprep.mubr.bf16.mxu1 %v19389_v30  ;;  %v19479_v28 = vld [vmem:[#allocation2 + $0x17f8] ss:$200 sps:$4 sm:$0xff]   ;;  %v19483_v30 = vld [vmem:[#allocation2 + $0xcac] ss:$200 sps:$4 sm:$0xff]  }
 0x32f   : > { %13247 = vmatprep.mubr.bf16.mxu0 %v19390_v31  ;;  %13357 = vmatpush1.bf16.msra.mxu0 %v19468_v32  ;;  %v19487_v31 = vld [vmem:[#allocation2 + $0x94] ss:$200 sps:$4 sm:$0xff]   ;;  %v19560_v32 = vld [vmem:[%s21119_s25 + $0x6e0] ss:$8 sps:$4 sm:$0xff]  }
 0x330   : > { %13358 = vmatprep.subr.bf16.mxu0 %v19482_v33  ;;  %v19574_v33 = vld [vmem:[%s21119_s25 + $0x6f4] ss:$8 sps:$4 sm:$0xff]  }
 0x333   : > { %13359 = vmatpush1.bf16.msra.mxu0 %v19480_v34  ;;  %v19485_v34 = vld [vmem:[#allocation2 + $0x90] ss:$200 sps:$4 sm:$0xff]  }
 0x334   : > { %13521 = vmatprep.subr.bf16.mxu0 %v19494_v37  ;;  %v19586_v37 = vld [vmem:[%s21119_s25 + $0x704] ss:$8 sps:$4 sm:$0xff]  }
 0x335   : > { %10852 = vmatmul.mubr.bf16.vlgmr.msra.gmra.mrb[0].mxu1 %v19387_v35  ;;  %v19488_v35 = vld [vmem:[#allocation2 + $0xca8] ss:$200 sps:$4 sm:$0xff]  }
 0x336   : > { %13248 = vmatmul.mubr.bf16.gmra.mrb[32].mxu0 %v19395_v36  ;;  %11013 = vmatpush1.bf16.msra.mxu1 %v19392_v38  ;;  %v19572_v36 = vld [vmem:[%s21119_s25 + $0x6f0] ss:$8 sps:$4 sm:$0xff]   ;;  %v19492_v38 = vld [vmem:[%s21119_s25 + $0x1300] ss:$8 sps:$4 sm:$0xff]  }
 0x337   : > { %10861 = vmatprep.mubr.bf16.mxu1 %v19399_v39  ;;  %13257 = vmatprep.mubr.bf16.mxu0 %v19401_v40  ;;  %v19495_v39 = vld [vmem:[#allocation2 + $0xe3c] ss:$200 sps:$4 sm:$0xff]  }
 0x338   : > { %11014 = vmatprep.subr.bf16.mxu1 %v19406_v41  ;;  %v19497_v40 = vld [vmem:[#allocation2 + $0x224] ss:$200 sps:$4 sm:$0xff]   ;;  %v19506_v41 = vld [vmem:[%s21119_s25 + $0x1314] ss:$8 sps:$4 sm:$0xff]  }
 0x33a   : > { %11015 = vmatpush1.bf16.msra.mxu1 %v19404_v42  ;;  %v19504_v42 = vld [vmem:[%s21119_s25 + $0x1310] ss:$8 sps:$4 sm:$0xff]  }
 0x33b   : > { %11016 = vmatprep.subr.bf16.mxu1 %v19418_v45  ;;  %v19518_v45 = vld [vmem:[%s21119_s25 + $0x1324] ss:$8 sps:$4 sm:$0xff]  }
 0x33d   : > { %10862 = vmatmul.mubr.bf16.gmra.mrb[4].mxu1 %v19403_v43  ;;  %v19499_v43 = vld [vmem:[#allocation2 + $0xe38] ss:$200 sps:$4 sm:$0xff]  }
 0x33e   : > { %13258 = vmatmul.mubr.bf16.gmra.mrb[36].mxu0 %v19407_v44  ;;  %10871 = vmatprep.mubr.bf16.mxu1 %v19411_v46  ;;  %v19503_v44 = vld [vmem:[#allocation2 + $0x220] ss:$200 sps:$4 sm:$0xff]   ;;  %v19507_v46 = vld [vmem:[#allocation2 + $0xfcc] ss:$200 sps:$4 sm:$0xff]  }
 0x33f   : > { %13267 = vmatprep.mubr.bf16.mxu0 %v19413_v47  ;;  %11017 = vmatpush1.bf16.msra.mxu1 %v19416_v48  ;;  %v19509_v47 = vld [vmem:[#allocation2 + $0x3b4] ss:$200 sps:$4 sm:$0xff]   ;;  %v19516_v48 = vld [vmem:[%s21119_s25 + $0x1320] ss:$8 sps:$4 sm:$0xff]  }
 0x340   : > { %11018 = vmatprep.subr.bf16.mxu1 %v19430_v49  ;;  %v19530_v49 = vld [vmem:[%s21119_s25 + $0x1334] ss:$8 sps:$4 sm:$0xff]  }
 0x343   : > { %11019 = vmatpush1.bf16.msra.mxu1 %v19428_v50  ;;  %v19528_v50 = vld [vmem:[%s21119_s25 + $0x1330] ss:$8 sps:$4 sm:$0xff]  }
 0x344   : > { %11020 = vmatprep.subr.bf16.mxu1 %v19442_v53  ;;  %v19542_v53 = vld [vmem:[%s21119_s25 + $0x1344] ss:$8 sps:$4 sm:$0xff]  }
 0x345   : > { %10872 = vmatmul.mubr.bf16.gmra.mrb[8].mxu1 %v19415_v51  ;;  %v19511_v51 = vld [vmem:[#allocation2 + $0xfc8] ss:$200 sps:$4 sm:$0xff]  }
 0x346   : > { %13268 = vmatmul.mubr.bf16.gmra.mrb[40].mxu0 %v19419_v52  ;;  %10881 = vmatprep.mubr.bf16.mxu1 %v19423_v54  ;;  %v19515_v52 = vld [vmem:[#allocation2 + $0x3b0] ss:$200 sps:$4 sm:$0xff]   ;;  %v19519_v54 = vld [vmem:[#allocation2 + $0x115c] ss:$200 sps:$4 sm:$0xff]  }
 0x347   : > { %13277 = vmatprep.mubr.bf16.mxu0 %v19425_v55  ;;  %11021 = vmatpush1.bf16.msra.mxu1 %v19440_v56  ;;  %v19521_v55 = vld [vmem:[#allocation2 + $0x544] ss:$200 sps:$4 sm:$0xff]   ;;  %v19540_v56 = vld [vmem:[%s21119_s25 + $0x1340] ss:$8 sps:$4 sm:$0xff]  }
 0x348   : > { %11022 = vmatprep.subr.bf16.mxu1 %v19454_v57  ;;  %v19554_v57 = vld [vmem:[%s21119_s25 + $0x1354] ss:$8 sps:$4 sm:$0xff]  }
 0x34b   : > { %11023 = vmatpush1.bf16.msra.mxu1 %v19452_v58  ;;  %v19552_v58 = vld [vmem:[%s21119_s25 + $0x1350] ss:$8 sps:$4 sm:$0xff]  }
 0x34c   : > { %11024 = vmatprep.subr.bf16.mxu1 %v19466_v61  ;;  %v19566_v61 = vld [vmem:[%s21119_s25 + $0x1364] ss:$8 sps:$4 sm:$0xff]  }
 0x34d   : > { %10882 = vmatmul.mubr.bf16.gmra.mrb[12].mxu1 %v19427_v59  ;;  %v19523_v59 = vld [vmem:[#allocation2 + $0x1158] ss:$200 sps:$4 sm:$0xff]  }
 0x34e   : > { %13278 = vmatmul.mubr.bf16.gmra.mrb[44].mxu0 %v19431_v60  ;;  %10891 = vmatprep.mubr.bf16.mxu1 %v19435_v62  ;;  %v19527_v60 = vld [vmem:[#allocation2 + $0x540] ss:$200 sps:$4 sm:$0xff]   ;;  %v19531_v62 = vld [vmem:[#allocation2 + $0x12ec] ss:$200 sps:$4 sm:$0xff]  }
 0x34f   : > { %13287 = vmatprep.mubr.bf16.mxu0 %v19437_v63  ;;  %11025 = vmatpush1.bf16.msra.mxu1 %v19464_v0  ;;  %v19533_v63 = vld [vmem:[#allocation2 + $0x6d4] ss:$200 sps:$4 sm:$0xff]   ;;  %v19564_v0 = vld [vmem:[%s21119_s25 + $0x1360] ss:$8 sps:$4 sm:$0xff]  }
 0x350   : > { %11026 = vmatprep.subr.bf16.mxu1 %v19478_v1  ;;  %v19578_v1 = vld [vmem:[%s21119_s25 + $0x1374] ss:$8 sps:$4 sm:$0xff]  }
 0x353   : > { %11027 = vmatpush1.bf16.msra.mxu1 %v19476_v2  ;;  %v19576_v2 = vld [vmem:[%s21119_s25 + $0x1370] ss:$8 sps:$4 sm:$0xff]  }
 0x354   : > { %11028 = vmatprep.subr.bf16.mxu1 %v19491_v5  ;;  %v19590_v5 = vld [vmem:[%s21119_s25 + $0x1384] ss:$8 sps:$4 sm:$0xff]  }
 0x355   : > { %10892 = vmatmul.mubr.bf16.gmra.mrb[16].mxu1 %v19439_v3  ;;  %v19535_v3 = vld [vmem:[#allocation2 + $0x12e8] ss:$200 sps:$4 sm:$0xff]  }
 0x356   : > { %13288 = vmatmul.mubr.bf16.gmra.mrb[48].mxu0 %v19443_v4  ;;  %10901 = vmatprep.mubr.bf16.mxu1 %v19447_v6  ;;  %v19539_v4 = vld [vmem:[#allocation2 + $0x6d0] ss:$200 sps:$4 sm:$0xff]   ;;  %v19543_v6 = vld [vmem:[#allocation2 + $0x147c] ss:$200 sps:$4 sm:$0xff]  }
 0x357   : > { %13297 = vmatprep.mubr.bf16.mxu0 %v19449_v7  ;;  %11029 = vmatpush1.bf16.msra.mxu1 %v19489_v8  ;;  %v19545_v7 = vld [vmem:[#allocation2 + $0x864] ss:$200 sps:$4 sm:$0xff]   ;;  %v19588_v8 = vld [vmem:[%s21119_s25 + $0x1380] ss:$8 sps:$4 sm:$0xff]  }
 0x358   : > { %11030 = vmatprep.subr.bf16.mxu1 %v19502_v9  ;;  %v19602_v9 = vld [vmem:[%s21119_s25 + $0x1394] ss:$8 sps:$4 sm:$0xff]  }
 0x35b   : > { %11031 = vmatpush1.bf16.msra.mxu1 %v19500_v10  ;;  %v19600_v10 = vld [vmem:[%s21119_s25 + $0x1390] ss:$8 sps:$4 sm:$0xff]  }
 0x35c   : > { %11032 = vmatprep.subr.bf16.mxu1 %v19514_v13  ;;  %v19614_v13 = vld [vmem:[%s21119_s25 + $0x13a4] ss:$8 sps:$4 sm:$0xff]  }
 0x35d   : > { %10902 = vmatmul.mubr.bf16.gmra.mrb[20].mxu1 %v19451_v11  ;;  %v19547_v11 = vld [vmem:[#allocation2 + $0x1478] ss:$200 sps:$4 sm:$0xff]  }
 0x35e   : > { %13298 = vmatmul.mubr.bf16.gmra.mrb[52].mxu0 %v19455_v12  ;;  %10911 = vmatprep.mubr.bf16.mxu1 %v19459_v14  ;;  %v19551_v12 = vld [vmem:[#allocation2 + $0x860] ss:$200 sps:$4 sm:$0xff]   ;;  %v19555_v14 = vld [vmem:[#allocation2 + $0x160c] ss:$200 sps:$4 sm:$0xff]  }
 0x35f   : > { %13307 = vmatprep.mubr.bf16.mxu0 %v19461_v15  ;;  %11033 = vmatpush1.bf16.msra.mxu1 %v19512_v16  ;;  %v19557_v15 = vld [vmem:[#allocation2 + $0x9f4] ss:$200 sps:$4 sm:$0xff]   ;;  %v19612_v16 = vld [vmem:[%s21119_s25 + $0x13a0] ss:$8 sps:$4 sm:$0xff]  }
 0x360   : > { %11034 = vmatprep.subr.bf16.mxu1 %v19526_v17  ;;  %v19626_v17 = vld [vmem:[%s21119_s25 + $0x13b4] ss:$8 sps:$4 sm:$0xff]  }
 0x363   : > { %11035 = vmatpush1.bf16.msra.mxu1 %v19524_v18  ;;  %v19624_v18 = vld [vmem:[%s21119_s25 + $0x13b0] ss:$8 sps:$4 sm:$0xff]  }
 0x364   : > { %11036 = vmatprep.subr.bf16.mxu1 %v19538_v21  ;;  %v19638_v21 = vld [vmem:[%s21119_s25 + $0x13c4] ss:$8 sps:$4 sm:$0xff]  }
 0x365   : > { %10912 = vmatmul.mubr.bf16.gmra.mrb[24].mxu1 %v19463_v19  ;;  %v19559_v19 = vld [vmem:[#allocation2 + $0x1608] ss:$200 sps:$4 sm:$0xff]  }
 0x366   : > { %13308 = vmatmul.mubr.bf16.gmra.mrb[56].mxu0 %v19467_v20  ;;  %10921 = vmatprep.mubr.bf16.mxu1 %v19471_v22  ;;  %v19563_v20 = vld [vmem:[#allocation2 + $0x9f0] ss:$200 sps:$4 sm:$0xff]   ;;  %v19567_v22 = vld [vmem:[#allocation2 + $0x179c] ss:$200 sps:$4 sm:$0xff]  }
 0x367   : > { %13317 = vmatprep.mubr.bf16.mxu0 %v19473_v23  ;;  %11037 = vmatpush1.bf16.msra.mxu1 %v19536_v24  ;;  %v19569_v23 = vld [vmem:[#allocation2 + $0xb84] ss:$200 sps:$4 sm:$0xff]   ;;  %v19636_v24 = vld [vmem:[%s21119_s25 + $0x13c0] ss:$8 sps:$4 sm:$0xff]  }
 0x368   : > { %11038 = vmatprep.subr.bf16.mxu1 %v19550_v25  ;;  %v19650_v25 = vld [vmem:[%s21119_s25 + $0x13d4] ss:$8 sps:$4 sm:$0xff]  }
 0x36b   : > { %11039 = vmatpush1.bf16.msra.mxu1 %v19548_v26  ;;  %v19648_v26 = vld [vmem:[%s21119_s25 + $0x13d0] ss:$8 sps:$4 sm:$0xff]  }
 0x36c   : > { %11040 = vmatprep.subr.bf16.mxu1 %v19562_v29  ;;  %v19662_v29 = vld [vmem:[%s21119_s25 + $0x13e4] ss:$8 sps:$4 sm:$0xff]  }
 0x36d   : > { %10922 = vmatmul.mubr.bf16.gmra.mrb[28].mxu1 %v19475_v27  ;;  %v19571_v27 = vld [vmem:[#allocation2 + $0x1798] ss:$200 sps:$4 sm:$0xff]  }
 0x36e   : > { %13318 = vmatmul.mubr.bf16.gmra.mrb[60].mxu0 %v19479_v28  ;;  %10931 = vmatprep.mubr.bf16.mxu1 %v19483_v30  ;;  %v19575_v28 = vld [vmem:[#allocation2 + $0xb80] ss:$200 sps:$4 sm:$0xff]   ;;  %v19581_v30 = vld [vmem:[#allocation2 + $0x34] ss:$200 sps:$4 sm:$0xff]  }
 0x36f   : > { %13360 = vmatprep.mubr.bf16.mxu0 %v19487_v31  ;;  %11041 = vmatpush1.bf16.msra.mxu1 %v19560_v32  ;;  %v19582_v31 = vld [vmem:[#allocation2 + $0xd14] ss:$200 sps:$4 sm:$0xff]   ;;  %v19660_v32 = vld [vmem:[%s21119_s25 + $0x13e0] ss:$8 sps:$4 sm:$0xff]  }
 0x370   : > { %11042 = vmatprep.subr.bf16.mxu1 %v19574_v33  ;;  %v19674_v33 = vld [vmem:[%s21119_s25 + $0x13f4] ss:$8 sps:$4 sm:$0xff]  }
 0x373   : > { %11043 = vmatpush1.bf16.msra.mxu1 %v19572_v36  ;;  %v19587_v36 = vld [vmem:[#allocation2 + $0xd10] ss:$200 sps:$4 sm:$0xff]  }
 0x374   : > { %11205 = vmatprep.subr.bf16.mxu1 %v19586_v37  ;;  %v19686_v37 = vld [vmem:[%s21119_s25 + $0x1404] ss:$8 sps:$4 sm:$0xff]  }
 0x375   : > { %10932 = vmatmul.mubr.bf16.gmra.mrb[32].mxu1 %v19488_v35  ;;  %v19579_v35 = vld [vmem:[#allocation2 + $0x30] ss:$200 sps:$4 sm:$0xff]  }
 0x376   : > { %13361 = vmatmul.mubr.bf16.vlgmr.msra.gmra.mrb[0].mxu0 %v19485_v34  ;;  %10941 = vmatprep.mubr.bf16.mxu1 %v19495_v39  ;;  %v19672_v34 = vld [vmem:[%s21119_s25 + $0x13f0] ss:$8 sps:$4 sm:$0xff]   ;;  %v19591_v39 = vld [vmem:[#allocation2 + $0x1c4] ss:$200 sps:$4 sm:$0xff]  }
 0x377   : > { %13522 = vmatpush1.bf16.msra.mxu0 %v19492_v38  ;;  %13370 = vmatprep.mubr.bf16.mxu0 %v19497_v40  ;;  %v19584_v38 = vld [vmem:[%s21119_s25 + $0x700] ss:$8 sps:$4 sm:$0xff]   ;;  %v19593_v40 = vld [vmem:[#allocation2 + $0xea4] ss:$200 sps:$4 sm:$0xff]  }
 0x378   : > { %13523 = vmatprep.subr.bf16.mxu0 %v19506_v41  ;;  %v19598_v41 = vld [vmem:[%s21119_s25 + $0x714] ss:$8 sps:$4 sm:$0xff]  }
 0x37b   : > { %13524 = vmatpush1.bf16.msra.mxu0 %v19504_v42  ;;  %v19596_v42 = vld [vmem:[%s21119_s25 + $0x710] ss:$8 sps:$4 sm:$0xff]  }
 0x37c   : > { %13525 = vmatprep.subr.bf16.mxu0 %v19518_v45  ;;  %v19610_v45 = vld [vmem:[%s21119_s25 + $0x724] ss:$8 sps:$4 sm:$0xff]  }
 0x37d   : > { %10942 = vmatmul.mubr.bf16.gmra.mrb[36].mxu1 %v19499_v43  ;;  %v19595_v43 = vld [vmem:[#allocation2 + $0x1c0] ss:$200 sps:$4 sm:$0xff]  }
 0x37e   : > { %13371 = vmatmul.mubr.bf16.gmra.mrb[4].mxu0 %v19503_v44  ;;  %10951 = vmatprep.mubr.bf16.mxu1 %v19507_v46  ;;  %v19599_v44 = vld [vmem:[#allocation2 + $0xea0] ss:$200 sps:$4 sm:$0xff]   ;;  %v19603_v46 = vld [vmem:[#allocation2 + $0x354] ss:$200 sps:$4 sm:$0xff]  }
 0x37f   : > { %13380 = vmatprep.mubr.bf16.mxu0 %v19509_v47  ;;  %13526 = vmatpush1.bf16.msra.mxu0 %v19516_v48  ;;  %v19605_v47 = vld [vmem:[#allocation2 + $0x1034] ss:$200 sps:$4 sm:$0xff]   ;;  %v19608_v48 = vld [vmem:[%s21119_s25 + $0x720] ss:$8 sps:$4 sm:$0xff]  }
 0x380   : > { %13527 = vmatprep.subr.bf16.mxu0 %v19530_v49  ;;  %v19622_v49 = vld [vmem:[%s21119_s25 + $0x734] ss:$8 sps:$4 sm:$0xff]  }
 0x383   : > { %13528 = vmatpush1.bf16.msra.mxu0 %v19528_v50  ;;  %v19620_v50 = vld [vmem:[%s21119_s25 + $0x730] ss:$8 sps:$4 sm:$0xff]  }
 0x384   : > { %13529 = vmatprep.subr.bf16.mxu0 %v19542_v53  ;;  %v19634_v53 = vld [vmem:[%s21119_s25 + $0x744] ss:$8 sps:$4 sm:$0xff]  }
 0x385   : > { %10952 = vmatmul.mubr.bf16.gmra.mrb[40].mxu1 %v19511_v51  ;;  %v19607_v51 = vld [vmem:[#allocation2 + $0x350] ss:$200 sps:$4 sm:$0xff]  }
 0x386   : > { %13381 = vmatmul.mubr.bf16.gmra.mrb[8].mxu0 %v19515_v52  ;;  %10961 = vmatprep.mubr.bf16.mxu1 %v19519_v54  ;;  %v19611_v52 = vld [vmem:[#allocation2 + $0x1030] ss:$200 sps:$4 sm:$0xff]   ;;  %v19615_v54 = vld [vmem:[#allocation2 + $0x4e4] ss:$200 sps:$4 sm:$0xff]  }
 0x387   : > { %13390 = vmatprep.mubr.bf16.mxu0 %v19521_v55  ;;  %13530 = vmatpush1.bf16.msra.mxu0 %v19540_v56  ;;  %v19617_v55 = vld [vmem:[#allocation2 + $0x11c4] ss:$200 sps:$4 sm:$0xff]   ;;  %v19632_v56 = vld [vmem:[%s21119_s25 + $0x740] ss:$8 sps:$4 sm:$0xff]  }
 0x388   : > { %13531 = vmatprep.subr.bf16.mxu0 %v19554_v57  ;;  %v19646_v57 = vld [vmem:[%s21119_s25 + $0x754] ss:$8 sps:$4 sm:$0xff]  }
 0x38b   : > { %13532 = vmatpush1.bf16.msra.mxu0 %v19552_v58  ;;  %v19644_v58 = vld [vmem:[%s21119_s25 + $0x750] ss:$8 sps:$4 sm:$0xff]  }
 0x38c   : > { %13533 = vmatprep.subr.bf16.mxu0 %v19566_v61  ;;  %v19658_v61 = vld [vmem:[%s21119_s25 + $0x764] ss:$8 sps:$4 sm:$0xff]  }
 0x38d   : > { %10962 = vmatmul.mubr.bf16.gmra.mrb[44].mxu1 %v19523_v59  ;;  %v19619_v59 = vld [vmem:[#allocation2 + $0x4e0] ss:$200 sps:$4 sm:$0xff]  }
 0x38e   : > { %13391 = vmatmul.mubr.bf16.gmra.mrb[12].mxu0 %v19527_v60  ;;  %10971 = vmatprep.mubr.bf16.mxu1 %v19531_v62  ;;  %v19623_v60 = vld [vmem:[#allocation2 + $0x11c0] ss:$200 sps:$4 sm:$0xff]   ;;  %v19627_v62 = vld [vmem:[#allocation2 + $0x674] ss:$200 sps:$4 sm:$0xff]  }
 0x38f   : > { %13400 = vmatprep.mubr.bf16.mxu0 %v19533_v63  ;;  %13534 = vmatpush1.bf16.msra.mxu0 %v19564_v0  ;;  %v19629_v63 = vld [vmem:[#allocation2 + $0x1354] ss:$200 sps:$4 sm:$0xff]   ;;  %v19656_v0 = vld [vmem:[%s21119_s25 + $0x760] ss:$8 sps:$4 sm:$0xff]  }
 0x390   : > { %13535 = vmatprep.subr.bf16.mxu0 %v19578_v1  ;;  %v19670_v1 = vld [vmem:[%s21119_s25 + $0x774] ss:$8 sps:$4 sm:$0xff]  }
 0x393   : > { %13536 = vmatpush1.bf16.msra.mxu0 %v19576_v2  ;;  %v19668_v2 = vld [vmem:[%s21119_s25 + $0x770] ss:$8 sps:$4 sm:$0xff]  }
 0x394   : > { %13537 = vmatprep.subr.bf16.mxu0 %v19590_v5  ;;  %v19683_v5 = vld [vmem:[%s21119_s25 + $0x784] ss:$8 sps:$4 sm:$0xff]  }
 0x395   : > { %10972 = vmatmul.mubr.bf16.gmra.mrb[48].mxu1 %v19535_v3  ;;  %v19631_v3 = vld [vmem:[#allocation2 + $0x670] ss:$200 sps:$4 sm:$0xff]  }
 0x396   : > { %13401 = vmatmul.mubr.bf16.gmra.mrb[16].mxu0 %v19539_v4  ;;  %10981 = vmatprep.mubr.bf16.mxu1 %v19543_v6  ;;  %v19635_v4 = vld [vmem:[#allocation2 + $0x1350] ss:$200 sps:$4 sm:$0xff]   ;;  %v19639_v6 = vld [vmem:[#allocation2 + $0x804] ss:$200 sps:$4 sm:$0xff]  }
 0x397   : > { %13410 = vmatprep.mubr.bf16.mxu0 %v19545_v7  ;;  %13538 = vmatpush1.bf16.msra.mxu0 %v19588_v8  ;;  %v19641_v7 = vld [vmem:[#allocation2 + $0x14e4] ss:$200 sps:$4 sm:$0xff]   ;;  %v19681_v8 = vld [vmem:[%s21119_s25 + $0x780] ss:$8 sps:$4 sm:$0xff]  }
 0x398   : > { %13539 = vmatprep.subr.bf16.mxu0 %v19602_v9  ;;  %v19694_v9 = vld [vmem:[%s21119_s25 + $0x794] ss:$8 sps:$4 sm:$0xff]  }
 0x39b   : > { %13540 = vmatpush1.bf16.msra.mxu0 %v19600_v10  ;;  %v19692_v10 = vld [vmem:[%s21119_s25 + $0x790] ss:$8 sps:$4 sm:$0xff]  }
 0x39c   : > { %13541 = vmatprep.subr.bf16.mxu0 %v19614_v13  ;;  %v19706_v13 = vld [vmem:[%s21119_s25 + $0x7a4] ss:$8 sps:$4 sm:$0xff]  }
 0x39d   : > { %10982 = vmatmul.mubr.bf16.gmra.mrb[52].mxu1 %v19547_v11  ;;  %v19643_v11 = vld [vmem:[#allocation2 + $0x800] ss:$200 sps:$4 sm:$0xff]  }
 0x39e   : > { %13411 = vmatmul.mubr.bf16.gmra.mrb[20].mxu0 %v19551_v12  ;;  %10991 = vmatprep.mubr.bf16.mxu1 %v19555_v14  ;;  %v19647_v12 = vld [vmem:[#allocation2 + $0x14e0] ss:$200 sps:$4 sm:$0xff]   ;;  %v19651_v14 = vld [vmem:[#allocation2 + $0x994] ss:$200 sps:$4 sm:$0xff]  }
 0x39f   : > { %13420 = vmatprep.mubr.bf16.mxu0 %v19557_v15  ;;  %13542 = vmatpush1.bf16.msra.mxu0 %v19612_v16  ;;  %v19653_v15 = vld [vmem:[#allocation2 + $0x1674] ss:$200 sps:$4 sm:$0xff]   ;;  %v19704_v16 = vld [vmem:[%s21119_s25 + $0x7a0] ss:$8 sps:$4 sm:$0xff]  }
 0x3a0   : > { %13543 = vmatprep.subr.bf16.mxu0 %v19626_v17  ;;  %v19718_v17 = vld [vmem:[%s21119_s25 + $0x7b4] ss:$8 sps:$4 sm:$0xff]  }
 0x3a3   : > { %13544 = vmatpush1.bf16.msra.mxu0 %v19624_v18  ;;  %v19716_v18 = vld [vmem:[%s21119_s25 + $0x7b0] ss:$8 sps:$4 sm:$0xff]  }
 0x3a4   : > { %13545 = vmatprep.subr.bf16.mxu0 %v19638_v21  ;;  %v19659_v21 = vld [vmem:[#allocation2 + $0x1670] ss:$200 sps:$4 sm:$0xff]  }
 0x3a5   : > { %10992 = vmatmul.mubr.bf16.gmra.mrb[56].mxu1 %v19559_v19  ;;  %v19730_v19 = vld [vmem:[%s21119_s25 + $0x7c4] ss:$8 sps:$4 sm:$0xff]  }
 0x3a6   : > { %13421 = vmatmul.mubr.bf16.gmra.mrb[24].mxu0 %v19563_v20  ;;  %11001 = vmatprep.mubr.bf16.mxu1 %v19567_v22  ;;  %v19655_v20 = vld [vmem:[#allocation2 + $0x990] ss:$200 sps:$4 sm:$0xff]   ;;  %v19663_v22 = vld [vmem:[#allocation2 + $0xb24] ss:$200 sps:$4 sm:$0xff]  }
 0x3a7   : > { %13430 = vmatprep.mubr.bf16.mxu0 %v19569_v23  ;;  %13546 = vmatpush1.bf16.msra.mxu0 %v19636_v24  ;;  %v19665_v23 = vld [vmem:[#allocation2 + $0x1804] ss:$200 sps:$4 sm:$0xff]   ;;  %v19728_v24 = vld [vmem:[%s21119_s25 + $0x7c0] ss:$8 sps:$4 sm:$0xff]  }
 0x3a8   : > { %13547 = vmatprep.subr.bf16.mxu0 %v19650_v25  ;;  %v19742_v25 = vld [vmem:[%s21119_s25 + $0x7d4] ss:$8 sps:$4 sm:$0xff]  }
 0x3ab   : > { %13548 = vmatpush1.bf16.msra.mxu0 %v19648_v26  ;;  %v19740_v26 = vld [vmem:[%s21119_s25 + $0x7d0] ss:$8 sps:$4 sm:$0xff]  }
 0x3ac   : > { %13549 = vmatprep.subr.bf16.mxu0 %v19662_v29  ;;  %v19671_v29 = vld [vmem:[#allocation2 + $0x1800] ss:$200 sps:$4 sm:$0xff]  }
 0x3ad   : > { %11002 = vmatmul.mubr.bf16.gmra.mrb[60].mxu1 %v19571_v27  ;;  %v19754_v27 = vld [vmem:[%s21119_s25 + $0x7e4] ss:$8 sps:$4 sm:$0xff]  }
 0x3ae   : > { %13431 = vmatmul.mubr.bf16.gmra.mrb[28].mxu0 %v19575_v28  ;;  %11044 = vmatprep.mubr.bf16.mxu1 %v19581_v30  ;;  %v19667_v28 = vld [vmem:[#allocation2 + $0xb20] ss:$200 sps:$4 sm:$0xff]   ;;  %v19675_v30 = vld [vmem:[#allocation2 + $0xcb4] ss:$200 sps:$4 sm:$0xff]  }
 0x3af   : > { %13440 = vmatprep.mubr.bf16.mxu0 %v19582_v31  ;;  %13550 = vmatpush1.bf16.msra.mxu0 %v19660_v32  ;;  %v19679_v31 = vld [vmem:[#allocation2 + $0x9c] ss:$200 sps:$4 sm:$0xff]   ;;  %v19752_v32 = vld [vmem:[%s21119_s25 + $0x7e0] ss:$8 sps:$4 sm:$0xff]  }
 0x3b0   : > { %13551 = vmatprep.subr.bf16.mxu0 %v19674_v33  ;;  %v19766_v33 = vld [vmem:[%s21119_s25 + $0x7f4] ss:$8 sps:$4 sm:$0xff]  }
 0x3b3   : > { %13552 = vmatpush1.bf16.msra.mxu0 %v19672_v34  ;;  %v19764_v34 = vld [vmem:[%s21119_s25 + $0x7f0] ss:$8 sps:$4 sm:$0xff]  }
 0x3b4   : > { %13714 = vmatprep.subr.bf16.mxu0 %v19686_v37  ;;  %v19680_v37 = vld [vmem:[#allocation2 + $0xcb0] ss:$200 sps:$4 sm:$0xff]  }
 0x3b5   : > { %11045 = vmatmul.mubr.bf16.vlgmr.msra.gmra.mrb[0].mxu1 %v19579_v35  ;;  %v19778_v35 = vld [vmem:[%s21119_s25 + $0x804] ss:$8 sps:$4 sm:$0xff]  }
 0x3b6   : > { %13441 = vmatmul.mubr.bf16.gmra.mrb[32].mxu0 %v19587_v36  ;;  %11206 = vmatpush1.bf16.msra.mxu1 %v19584_v38  ;;  %v19677_v36 = vld [vmem:[#allocation2 + $0x98] ss:$200 sps:$4 sm:$0xff]  }
 0x3b7   : > { %11054 = vmatprep.mubr.bf16.mxu1 %v19591_v39  ;;  %13450 = vmatprep.mubr.bf16.mxu0 %v19593_v40  ;;  %v19684_v38 = vld [vmem:[%s21119_s25 + $0x1400] ss:$8 sps:$4 sm:$0xff]   ;;  %v19687_v39 = vld [vmem:[#allocation2 + $0xe44] ss:$200 sps:$4 sm:$0xff]  }
 0x3b8   : > { %11207 = vmatprep.subr.bf16.mxu1 %v19598_v41  ;;  %v19689_v40 = vld [vmem:[#allocation2 + $0x22c] ss:$200 sps:$4 sm:$0xff]  }
 0x3b9   : > { %v19698_v41 = vld [vmem:[%s21119_s25 + $0x1414] ss:$8 sps:$4 sm:$0xff]  }
 0x3ba   : > { %11208 = vmatpush1.bf16.msra.mxu1 %v19596_v42  ;;  %v19696_v42 = vld [vmem:[%s21119_s25 + $0x1410] ss:$8 sps:$4 sm:$0xff]  }
 0x3bb   : > { %11209 = vmatprep.subr.bf16.mxu1 %v19610_v45  ;;  %v19695_v45 = vld [vmem:[#allocation2 + $0x228] ss:$200 sps:$4 sm:$0xff]  }
 0x3bd   : > { %11055 = vmatmul.mubr.bf16.gmra.mrb[4].mxu1 %v19595_v43  ;;  %v19710_v43 = vld [vmem:[%s21119_s25 + $0x1424] ss:$8 sps:$4 sm:$0xff]  }
 0x3be   : > { %13451 = vmatmul.mubr.bf16.gmra.mrb[36].mxu0 %v19599_v44  ;;  %11064 = vmatprep.mubr.bf16.mxu1 %v19603_v46  ;;  %v19691_v44 = vld [vmem:[#allocation2 + $0xe40] ss:$200 sps:$4 sm:$0xff]   ;;  %v19699_v46 = vld [vmem:[#allocation2 + $0xfd4] ss:$200 sps:$4 sm:$0xff]  }
 0x3bf   : > { %13460 = vmatprep.mubr.bf16.mxu0 %v19605_v47  ;;  %11210 = vmatpush1.bf16.msra.mxu1 %v19608_v48  ;;  %v19701_v47 = vld [vmem:[#allocation2 + $0x3bc] ss:$200 sps:$4 sm:$0xff]   ;;  %v19708_v48 = vld [vmem:[%s21119_s25 + $0x1420] ss:$8 sps:$4 sm:$0xff]  }
 0x3c0   : > { %11211 = vmatprep.subr.bf16.mxu1 %v19622_v49  ;;  %v19722_v49 = vld [vmem:[%s21119_s25 + $0x1434] ss:$8 sps:$4 sm:$0xff]  }
 0x3c3   : > { %11212 = vmatpush1.bf16.msra.mxu1 %v19620_v50  ;;  %v19720_v50 = vld [vmem:[%s21119_s25 + $0x1430] ss:$8 sps:$4 sm:$0xff]  }
 0x3c4   : > { %11213 = vmatprep.subr.bf16.mxu1 %v19634_v53  ;;  %v19707_v53 = vld [vmem:[#allocation2 + $0x3b8] ss:$200 sps:$4 sm:$0xff]  }
 0x3c5   : > { %11065 = vmatmul.mubr.bf16.gmra.mrb[8].mxu1 %v19607_v51  ;;  %v19734_v51 = vld [vmem:[%s21119_s25 + $0x1444] ss:$8 sps:$4 sm:$0xff]  }
 0x3c6   : > { %13461 = vmatmul.mubr.bf16.gmra.mrb[40].mxu0 %v19611_v52  ;;  %11074 = vmatprep.mubr.bf16.mxu1 %v19615_v54  ;;  %v19703_v52 = vld [vmem:[#allocation2 + $0xfd0] ss:$200 sps:$4 sm:$0xff]   ;;  %v19711_v54 = vld [vmem:[#allocation2 + $0x1164] ss:$200 sps:$4 sm:$0xff]  }
 0x3c7   : > { %13470 = vmatprep.mubr.bf16.mxu0 %v19617_v55  ;;  %11214 = vmatpush1.bf16.msra.mxu1 %v19632_v56  ;;  %v19713_v55 = vld [vmem:[#allocation2 + $0x54c] ss:$200 sps:$4 sm:$0xff]   ;;  %v19732_v56 = vld [vmem:[%s21119_s25 + $0x1440] ss:$8 sps:$4 sm:$0xff]  }
 0x3c8   : > { %11215 = vmatprep.subr.bf16.mxu1 %v19646_v57  ;;  %v19746_v57 = vld [vmem:[%s21119_s25 + $0x1454] ss:$8 sps:$4 sm:$0xff]  }
 0x3cb   : > { %11216 = vmatpush1.bf16.msra.mxu1 %v19644_v58  ;;  %v19744_v58 = vld [vmem:[%s21119_s25 + $0x1450] ss:$8 sps:$4 sm:$0xff]  }
 0x3cc   : > { %11217 = vmatprep.subr.bf16.mxu1 %v19658_v61  ;;  %v19719_v61 = vld [vmem:[#allocation2 + $0x548] ss:$200 sps:$4 sm:$0xff]  }
 0x3cd   : > { %11075 = vmatmul.mubr.bf16.gmra.mrb[12].mxu1 %v19619_v59  ;;  %v19758_v59 = vld [vmem:[%s21119_s25 + $0x1464] ss:$8 sps:$4 sm:$0xff]  }
 0x3ce   : > { %13471 = vmatmul.mubr.bf16.gmra.mrb[44].mxu0 %v19623_v60  ;;  %11084 = vmatprep.mubr.bf16.mxu1 %v19627_v62  ;;  %v19715_v60 = vld [vmem:[#allocation2 + $0x1160] ss:$200 sps:$4 sm:$0xff]   ;;  %v19723_v62 = vld [vmem:[#allocation2 + $0x12f4] ss:$200 sps:$4 sm:$0xff]  }
 0x3cf   : > { %13480 = vmatprep.mubr.bf16.mxu0 %v19629_v63  ;;  %11218 = vmatpush1.bf16.msra.mxu1 %v19656_v0  ;;  %v19725_v63 = vld [vmem:[#allocation2 + $0x6dc] ss:$200 sps:$4 sm:$0xff]   ;;  %v19756_v0 = vld [vmem:[%s21119_s25 + $0x1460] ss:$8 sps:$4 sm:$0xff]  }
 0x3d0   : > { %11219 = vmatprep.subr.bf16.mxu1 %v19670_v1  ;;  %v19770_v1 = vld [vmem:[%s21119_s25 + $0x1474] ss:$8 sps:$4 sm:$0xff]  }
 0x3d3   : > { %11220 = vmatpush1.bf16.msra.mxu1 %v19668_v2  ;;  %v19768_v2 = vld [vmem:[%s21119_s25 + $0x1470] ss:$8 sps:$4 sm:$0xff]  }
 0x3d4   : > { %11221 = vmatprep.subr.bf16.mxu1 %v19683_v5  ;;  %v19731_v5 = vld [vmem:[#allocation2 + $0x6d8] ss:$200 sps:$4 sm:$0xff]  }
 0x3d5   : > { %11085 = vmatmul.mubr.bf16.gmra.mrb[16].mxu1 %v19631_v3  ;;  %v19782_v3 = vld [vmem:[%s21119_s25 + $0x1484] ss:$8 sps:$4 sm:$0xff]  }
 0x3d6   : > { %13481 = vmatmul.mubr.bf16.gmra.mrb[48].mxu0 %v19635_v4  ;;  %11094 = vmatprep.mubr.bf16.mxu1 %v19639_v6  ;;  %v19727_v4 = vld [vmem:[#allocation2 + $0x12f0] ss:$200 sps:$4 sm:$0xff]   ;;  %v19735_v6 = vld [vmem:[#allocation2 + $0x1484] ss:$200 sps:$4 sm:$0xff]  }
 0x3d7   : > { %13490 = vmatprep.mubr.bf16.mxu0 %v19641_v7  ;;  %11222 = vmatpush1.bf16.msra.mxu1 %v19681_v8  ;;  %v19737_v7 = vld [vmem:[#allocation2 + $0x86c] ss:$200 sps:$4 sm:$0xff]   ;;  %v19780_v8 = vld [vmem:[%s21119_s25 + $0x1480] ss:$8 sps:$4 sm:$0xff]  }
 0x3d8   : > { %11223 = vmatprep.subr.bf16.mxu1 %v19694_v9  ;;  %v19794_v9 = vld [vmem:[%s21119_s25 + $0x1494] ss:$8 sps:$4 sm:$0xff]  }
 0x3db   : > { %11224 = vmatpush1.bf16.msra.mxu1 %v19692_v10  ;;  %v19792_v10 = vld [vmem:[%s21119_s25 + $0x1490] ss:$8 sps:$4 sm:$0xff]  }
 0x3dc   : > { %11225 = vmatprep.subr.bf16.mxu1 %v19706_v13  ;;  %v19743_v13 = vld [vmem:[#allocation2 + $0x868] ss:$200 sps:$4 sm:$0xff]  }
 0x3dd   : > { %11095 = vmatmul.mubr.bf16.gmra.mrb[20].mxu1 %v19643_v11  ;;  %v19806_v11 = vld [vmem:[%s21119_s25 + $0x14a4] ss:$8 sps:$4 sm:$0xff]  }
 0x3de   : > { %13491 = vmatmul.mubr.bf16.gmra.mrb[52].mxu0 %v19647_v12  ;;  %11104 = vmatprep.mubr.bf16.mxu1 %v19651_v14  ;;  %v19739_v12 = vld [vmem:[#allocation2 + $0x1480] ss:$200 sps:$4 sm:$0xff]   ;;  %v19747_v14 = vld [vmem:[#allocation2 + $0x1614] ss:$200 sps:$4 sm:$0xff]  }
 0x3df   : > { %13500 = vmatprep.mubr.bf16.mxu0 %v19653_v15  ;;  %11226 = vmatpush1.bf16.msra.mxu1 %v19704_v16  ;;  %v19749_v15 = vld [vmem:[#allocation2 + $0x9fc] ss:$200 sps:$4 sm:$0xff]   ;;  %v19804_v16 = vld [vmem:[%s21119_s25 + $0x14a0] ss:$8 sps:$4 sm:$0xff]  }
 0x3e0   : > { %11227 = vmatprep.subr.bf16.mxu1 %v19718_v17  ;;  %v19818_v17 = vld [vmem:[%s21119_s25 + $0x14b4] ss:$8 sps:$4 sm:$0xff]  }
 0x3e3   : > { %11228 = vmatpush1.bf16.msra.mxu1 %v19716_v18  ;;  %v19816_v18 = vld [vmem:[%s21119_s25 + $0x14b0] ss:$8 sps:$4 sm:$0xff]  }
 0x3e4   : > { %11229 = vmatprep.subr.bf16.mxu1 %v19730_v19  ;;  %v19830_v19 = vld [vmem:[%s21119_s25 + $0x14c4] ss:$8 sps:$4 sm:$0xff]  }
 0x3e5   : > { %11105 = vmatmul.mubr.bf16.gmra.mrb[24].mxu1 %v19655_v20  ;;  %v19751_v20 = vld [vmem:[#allocation2 + $0x1610] ss:$200 sps:$4 sm:$0xff]  }
 0x3e6   : > { %13501 = vmatmul.mubr.bf16.gmra.mrb[56].mxu0 %v19659_v21  ;;  %11114 = vmatprep.mubr.bf16.mxu1 %v19663_v22  ;;  %v19755_v21 = vld [vmem:[#allocation2 + $0x9f8] ss:$200 sps:$4 sm:$0xff]   ;;  %v19759_v22 = vld [vmem:[#allocation2 + $0x17a4] ss:$200 sps:$4 sm:$0xff]  }
 0x3e7   : > { %13510 = vmatprep.mubr.bf16.mxu0 %v19665_v23  ;;  %11230 = vmatpush1.bf16.msra.mxu1 %v19728_v24  ;;  %v19761_v23 = vld [vmem:[#allocation2 + $0xb8c] ss:$200 sps:$4 sm:$0xff]   ;;  %v19828_v24 = vld [vmem:[%s21119_s25 + $0x14c0] ss:$8 sps:$4 sm:$0xff]  }
 0x3e8   : > { %11231 = vmatprep.subr.bf16.mxu1 %v19742_v25  ;;  %v19842_v25 = vld [vmem:[%s21119_s25 + $0x14d4] ss:$8 sps:$4 sm:$0xff]  }
 0x3eb   : > { %11232 = vmatpush1.bf16.msra.mxu1 %v19740_v26  ;;  %v19840_v26 = vld [vmem:[%s21119_s25 + $0x14d0] ss:$8 sps:$4 sm:$0xff]  }
 0x3ec   : > { %11233 = vmatprep.subr.bf16.mxu1 %v19754_v27  ;;  %v19854_v27 = vld [vmem:[%s21119_s25 + $0x14e4] ss:$8 sps:$4 sm:$0xff]  }
 0x3ed   : > { %11115 = vmatmul.mubr.bf16.gmra.mrb[28].mxu1 %v19667_v28  ;;  %v19763_v28 = vld [vmem:[#allocation2 + $0x17a0] ss:$200 sps:$4 sm:$0xff]  }
 0x3ee   : > { %13511 = vmatmul.mubr.bf16.gmra.mrb[60].mxu0 %v19671_v29  ;;  %11124 = vmatprep.mubr.bf16.mxu1 %v19675_v30  ;;  %v19767_v29 = vld [vmem:[#allocation2 + $0xb88] ss:$200 sps:$4 sm:$0xff]   ;;  %v19773_v30 = vld [vmem:[#allocation2 + $0x3c] ss:$200 sps:$4 sm:$0xff]  }
 0x3ef   : > { %13553 = vmatprep.mubr.bf16.mxu0 %v19679_v31  ;;  %11234 = vmatpush1.bf16.msra.mxu1 %v19752_v32  ;;  %v19774_v31 = vld [vmem:[#allocation2 + $0xd1c] ss:$200 sps:$4 sm:$0xff]   ;;  %v19852_v32 = vld [vmem:[%s21119_s25 + $0x14e0] ss:$8 sps:$4 sm:$0xff]  }
 0x3f0   : > { %11235 = vmatprep.subr.bf16.mxu1 %v19766_v33  ;;  %v19866_v33 = vld [vmem:[%s21119_s25 + $0x14f4] ss:$8 sps:$4 sm:$0xff]  }
 0x3f3   : > { %11236 = vmatpush1.bf16.msra.mxu1 %v19764_v34  ;;  %v19864_v34 = vld [vmem:[%s21119_s25 + $0x14f0] ss:$8 sps:$4 sm:$0xff]  }
 0x3f4   : > { %11398 = vmatprep.subr.bf16.mxu1 %v19778_v35  ;;  %v19878_v35 = vld [vmem:[%s21119_s25 + $0x1504] ss:$8 sps:$4 sm:$0xff]  }
 0x3f5   : > { %11125 = vmatmul.mubr.bf16.gmra.mrb[32].mxu1 %v19680_v37  ;;  %v19779_v37 = vld [vmem:[#allocation2 + $0xd18] ss:$200 sps:$4 sm:$0xff]  }
 0x3f6   : > { %13554 = vmatmul.mubr.bf16.vlgmr.msra.gmra.mrb[0].mxu0 %v19677_v36  ;;  %11134 = vmatprep.mubr.bf16.mxu1 %v19687_v39  ;;  %v19771_v36 = vld [vmem:[#allocation2 + $0x38] ss:$200 sps:$4 sm:$0xff]   ;;  %v19783_v39 = vld [vmem:[#allocation2 + $0x1cc] ss:$200 sps:$4 sm:$0xff]  }
 0x3f7   : > { %13715 = vmatpush1.bf16.msra.mxu0 %v19684_v38  ;;  %13563 = vmatprep.mubr.bf16.mxu0 %v19689_v40  ;;  %v19776_v38 = vld [vmem:[%s21119_s25 + $0x800] ss:$8 sps:$4 sm:$0xff]   ;;  %v19785_v40 = vld [vmem:[#allocation2 + $0xeac] ss:$200 sps:$4 sm:$0xff]  }
 0x3f8   : > { %13716 = vmatprep.subr.bf16.mxu0 %v19698_v41  ;;  %v19790_v41 = vld [vmem:[%s21119_s25 + $0x814] ss:$8 sps:$4 sm:$0xff]  }
 0x3fb   : > { %13717 = vmatpush1.bf16.msra.mxu0 %v19696_v42  ;;  %v19788_v42 = vld [vmem:[%s21119_s25 + $0x810] ss:$8 sps:$4 sm:$0xff]  }
 0x3fc   : > { %13718 = vmatprep.subr.bf16.mxu0 %v19710_v43  ;;  %v19802_v43 = vld [vmem:[%s21119_s25 + $0x824] ss:$8 sps:$4 sm:$0xff]  }
 0x3fd   : > { %11135 = vmatmul.mubr.bf16.gmra.mrb[36].mxu1 %v19691_v44  ;;  %v19787_v44 = vld [vmem:[#allocation2 + $0x1c8] ss:$200 sps:$4 sm:$0xff]  }
 0x3fe   : > { %13564 = vmatmul.mubr.bf16.gmra.mrb[4].mxu0 %v19695_v45  ;;  %11144 = vmatprep.mubr.bf16.mxu1 %v19699_v46  ;;  %v19791_v45 = vld [vmem:[#allocation2 + $0xea8] ss:$200 sps:$4 sm:$0xff]   ;;  %v19795_v46 = vld [vmem:[#allocation2 + $0x35c] ss:$200 sps:$4 sm:$0xff]  }
 0x3ff   : > { %13573 = vmatprep.mubr.bf16.mxu0 %v19701_v47  ;;  %13719 = vmatpush1.bf16.msra.mxu0 %v19708_v48  ;;  %v19797_v47 = vld [vmem:[#allocation2 + $0x103c] ss:$200 sps:$4 sm:$0xff]   ;;  %v19800_v48 = vld [vmem:[%s21119_s25 + $0x820] ss:$8 sps:$4 sm:$0xff]  }
 0x400   : > { %13720 = vmatprep.subr.bf16.mxu0 %v19722_v49  ;;  %v19814_v49 = vld [vmem:[%s21119_s25 + $0x834] ss:$8 sps:$4 sm:$0xff]  }
 0x403   : > { %13721 = vmatpush1.bf16.msra.mxu0 %v19720_v50  ;;  %v19812_v50 = vld [vmem:[%s21119_s25 + $0x830] ss:$8 sps:$4 sm:$0xff]  }
 0x404   : > { %13722 = vmatprep.subr.bf16.mxu0 %v19734_v51  ;;  %v19826_v51 = vld [vmem:[%s21119_s25 + $0x844] ss:$8 sps:$4 sm:$0xff]  }
 0x405   : > { %11145 = vmatmul.mubr.bf16.gmra.mrb[40].mxu1 %v19703_v52  ;;  %v19799_v52 = vld [vmem:[#allocation2 + $0x358] ss:$200 sps:$4 sm:$0xff]  }
 0x406   : > { %13574 = vmatmul.mubr.bf16.gmra.mrb[8].mxu0 %v19707_v53  ;;  %11154 = vmatprep.mubr.bf16.mxu1 %v19711_v54  ;;  %v19803_v53 = vld [vmem:[#allocation2 + $0x1038] ss:$200 sps:$4 sm:$0xff]   ;;  %v19807_v54 = vld [vmem:[#allocation2 + $0x4ec] ss:$200 sps:$4 sm:$0xff]  }
 0x407   : > { %13583 = vmatprep.mubr.bf16.mxu0 %v19713_v55  ;;  %13723 = vmatpush1.bf16.msra.mxu0 %v19732_v56  ;;  %v19809_v55 = vld [vmem:[#allocation2 + $0x11cc] ss:$200 sps:$4 sm:$0xff]   ;;  %v19824_v56 = vld [vmem:[%s21119_s25 + $0x840] ss:$8 sps:$4 sm:$0xff]  }
 0x408   : > { %13724 = vmatprep.subr.bf16.mxu0 %v19746_v57  ;;  %v19838_v57 = vld [vmem:[%s21119_s25 + $0x854] ss:$8 sps:$4 sm:$0xff]  }
 0x40b   : > { %13725 = vmatpush1.bf16.msra.mxu0 %v19744_v58  ;;  %v19836_v58 = vld [vmem:[%s21119_s25 + $0x850] ss:$8 sps:$4 sm:$0xff]  }
 0x40c   : > { %13726 = vmatprep.subr.bf16.mxu0 %v19758_v59  ;;  %v19850_v59 = vld [vmem:[%s21119_s25 + $0x864] ss:$8 sps:$4 sm:$0xff]  }
 0x40d   : > { %11155 = vmatmul.mubr.bf16.gmra.mrb[44].mxu1 %v19715_v60  ;;  %v19811_v60 = vld [vmem:[#allocation2 + $0x4e8] ss:$200 sps:$4 sm:$0xff]  }
 0x40e   : > { %13584 = vmatmul.mubr.bf16.gmra.mrb[12].mxu0 %v19719_v61  ;;  %11164 = vmatprep.mubr.bf16.mxu1 %v19723_v62  ;;  %v19815_v61 = vld [vmem:[#allocation2 + $0x11c8] ss:$200 sps:$4 sm:$0xff]   ;;  %v19819_v62 = vld [vmem:[#allocation2 + $0x67c] ss:$200 sps:$4 sm:$0xff]  }
 0x40f   : > { %13593 = vmatprep.mubr.bf16.mxu0 %v19725_v63  ;;  %13727 = vmatpush1.bf16.msra.mxu0 %v19756_v0  ;;  %v19821_v63 = vld [vmem:[#allocation2 + $0x135c] ss:$200 sps:$4 sm:$0xff]   ;;  %v19848_v0 = vld [vmem:[%s21119_s25 + $0x860] ss:$8 sps:$4 sm:$0xff]  }
 0x410   : > { %13728 = vmatprep.subr.bf16.mxu0 %v19770_v1  ;;  %v19862_v1 = vld [vmem:[%s21119_s25 + $0x874] ss:$8 sps:$4 sm:$0xff]  }
 0x413   : > { %13729 = vmatpush1.bf16.msra.mxu0 %v19768_v2  ;;  %v19860_v2 = vld [vmem:[%s21119_s25 + $0x870] ss:$8 sps:$4 sm:$0xff]  }
 0x414   : > { %13730 = vmatprep.subr.bf16.mxu0 %v19782_v3  ;;  %v19875_v3 = vld [vmem:[%s21119_s25 + $0x884] ss:$8 sps:$4 sm:$0xff]  }
 0x415   : > { %11165 = vmatmul.mubr.bf16.gmra.mrb[48].mxu1 %v19727_v4  ;;  %v19823_v4 = vld [vmem:[#allocation2 + $0x678] ss:$200 sps:$4 sm:$0xff]  }
 0x416   : > { %13594 = vmatmul.mubr.bf16.gmra.mrb[16].mxu0 %v19731_v5  ;;  %11174 = vmatprep.mubr.bf16.mxu1 %v19735_v6  ;;  %v19827_v5 = vld [vmem:[#allocation2 + $0x1358] ss:$200 sps:$4 sm:$0xff]   ;;  %v19831_v6 = vld [vmem:[#allocation2 + $0x80c] ss:$200 sps:$4 sm:$0xff]  }
 0x417   : > { %13603 = vmatprep.mubr.bf16.mxu0 %v19737_v7  ;;  %13731 = vmatpush1.bf16.msra.mxu0 %v19780_v8  ;;  %v19833_v7 = vld [vmem:[#allocation2 + $0x14ec] ss:$200 sps:$4 sm:$0xff]   ;;  %v19873_v8 = vld [vmem:[%s21119_s25 + $0x880] ss:$8 sps:$4 sm:$0xff]  }
 0x418   : > { %13732 = vmatprep.subr.bf16.mxu0 %v19794_v9  ;;  %v19886_v9 = vld [vmem:[%s21119_s25 + $0x894] ss:$8 sps:$4 sm:$0xff]  }
 0x41b   : > { %13733 = vmatpush1.bf16.msra.mxu0 %v19792_v10  ;;  %v19884_v10 = vld [vmem:[%s21119_s25 + $0x890] ss:$8 sps:$4 sm:$0xff]  }
 0x41c   : > { %13734 = vmatprep.subr.bf16.mxu0 %v19806_v11  ;;  %v19898_v11 = vld [vmem:[%s21119_s25 + $0x8a4] ss:$8 sps:$4 sm:$0xff]  }
 0x41d   : > { %11175 = vmatmul.mubr.bf16.gmra.mrb[52].mxu1 %v19739_v12  ;;  %v19835_v12 = vld [vmem:[#allocation2 + $0x808] ss:$200 sps:$4 sm:$0xff]  }
 0x41e   : > { %13604 = vmatmul.mubr.bf16.gmra.mrb[20].mxu0 %v19743_v13  ;;  %11184 = vmatprep.mubr.bf16.mxu1 %v19747_v14  ;;  %v19839_v13 = vld [vmem:[#allocation2 + $0x14e8] ss:$200 sps:$4 sm:$0xff]   ;;  %v19843_v14 = vld [vmem:[#allocation2 + $0x99c] ss:$200 sps:$4 sm:$0xff]  }
 0x41f   : > { %13613 = vmatprep.mubr.bf16.mxu0 %v19749_v15  ;;  %13735 = vmatpush1.bf16.msra.mxu0 %v19804_v16  ;;  %v19845_v15 = vld [vmem:[#allocation2 + $0x167c] ss:$200 sps:$4 sm:$0xff]   ;;  %v19896_v16 = vld [vmem:[%s21119_s25 + $0x8a0] ss:$8 sps:$4 sm:$0xff]  }
 0x420   : > { %13736 = vmatprep.subr.bf16.mxu0 %v19818_v17  ;;  %v19910_v17 = vld [vmem:[%s21119_s25 + $0x8b4] ss:$8 sps:$4 sm:$0xff]  }
 0x423   : > { %13737 = vmatpush1.bf16.msra.mxu0 %v19816_v18  ;;  %v19908_v18 = vld [vmem:[%s21119_s25 + $0x8b0] ss:$8 sps:$4 sm:$0xff]  }
 0x424   : > { %13738 = vmatprep.subr.bf16.mxu0 %v19830_v19  ;;  %v19922_v19 = vld [vmem:[%s21119_s25 + $0x8c4] ss:$8 sps:$4 sm:$0xff]  }
 0x425   : > { %11185 = vmatmul.mubr.bf16.gmra.mrb[56].mxu1 %v19751_v20  ;;  %v19847_v20 = vld [vmem:[#allocation2 + $0x998] ss:$200 sps:$4 sm:$0xff]  }
 0x426   : > { %13614 = vmatmul.mubr.bf16.gmra.mrb[24].mxu0 %v19755_v21  ;;  %11194 = vmatprep.mubr.bf16.mxu1 %v19759_v22  ;;  %v19851_v21 = vld [vmem:[#allocation2 + $0x1678] ss:$200 sps:$4 sm:$0xff]   ;;  %v19855_v22 = vld [vmem:[#allocation2 + $0xb2c] ss:$200 sps:$4 sm:$0xff]  }
 0x427   : > { %13623 = vmatprep.mubr.bf16.mxu0 %v19761_v23  ;;  %13739 = vmatpush1.bf16.msra.mxu0 %v19828_v24  ;;  %v19857_v23 = vld [vmem:[#allocation2 + $0x180c] ss:$200 sps:$4 sm:$0xff]   ;;  %v19920_v24 = vld [vmem:[%s21119_s25 + $0x8c0] ss:$8 sps:$4 sm:$0xff]  }
 0x428   : > { %13740 = vmatprep.subr.bf16.mxu0 %v19842_v25  ;;  %v19934_v25 = vld [vmem:[%s21119_s25 + $0x8d4] ss:$8 sps:$4 sm:$0xff]  }
 0x42b   : > { %13741 = vmatpush1.bf16.msra.mxu0 %v19840_v26  ;;  %v19932_v26 = vld [vmem:[%s21119_s25 + $0x8d0] ss:$8 sps:$4 sm:$0xff]  }
 0x42c   : > { %13742 = vmatprep.subr.bf16.mxu0 %v19854_v27  ;;  %v19946_v27 = vld [vmem:[%s21119_s25 + $0x8e4] ss:$8 sps:$4 sm:$0xff]  }
 0x42d   : > { %11195 = vmatmul.mubr.bf16.gmra.mrb[60].mxu1 %v19763_v28  ;;  %v19859_v28 = vld [vmem:[#allocation2 + $0xb28] ss:$200 sps:$4 sm:$0xff]  }
 0x42e   : > { %13624 = vmatmul.mubr.bf16.gmra.mrb[28].mxu0 %v19767_v29  ;;  %11237 = vmatprep.mubr.bf16.mxu1 %v19773_v30  ;;  %v19863_v29 = vld [vmem:[#allocation2 + $0x1808] ss:$200 sps:$4 sm:$0xff]   ;;  %v19867_v30 = vld [vmem:[#allocation2 + $0xcbc] ss:$200 sps:$4 sm:$0xff]  }
 0x42f   : > { %13633 = vmatprep.mubr.bf16.mxu0 %v19774_v31  ;;  %13743 = vmatpush1.bf16.msra.mxu0 %v19852_v32  ;;  %v19871_v31 = vld [vmem:[#allocation2 + $0xa4] ss:$200 sps:$4 sm:$0xff]   ;;  %v19944_v32 = vld [vmem:[%s21119_s25 + $0x8e0] ss:$8 sps:$4 sm:$0xff]  }
 0x430   : > { %13744 = vmatprep.subr.bf16.mxu0 %v19866_v33  ;;  %v19958_v33 = vld [vmem:[%s21119_s25 + $0x8f4] ss:$8 sps:$4 sm:$0xff]  }
 0x433   : > { %13745 = vmatpush1.bf16.msra.mxu0 %v19864_v34  ;;  %v19956_v34 = vld [vmem:[%s21119_s25 + $0x8f0] ss:$8 sps:$4 sm:$0xff]  }
 0x434   : > { %13907 = vmatprep.subr.bf16.mxu0 %v19878_v35  ;;  %v19970_v35 = vld [vmem:[%s21119_s25 + $0x904] ss:$8 sps:$4 sm:$0xff]  }
 0x435   : > { %11238 = vmatmul.mubr.bf16.vlgmr.msra.gmra.mrb[0].mxu1 %v19771_v36  ;;  %v19869_v36 = vld [vmem:[#allocation2 + $0xa0] ss:$200 sps:$4 sm:$0xff]  }
 0x436   : > { %13634 = vmatmul.mubr.bf16.gmra.mrb[32].mxu0 %v19779_v37  ;;  %11399 = vmatpush1.bf16.msra.mxu1 %v19776_v38  ;;  %v19872_v37 = vld [vmem:[#allocation2 + $0xcb8] ss:$200 sps:$4 sm:$0xff]  }
 0x437   : > { %11247 = vmatprep.mubr.bf16.mxu1 %v19783_v39  ;;  %13643 = vmatprep.mubr.bf16.mxu0 %v19785_v40  ;;  %v19876_v38 = vld [vmem:[%s21119_s25 + $0x1500] ss:$8 sps:$4 sm:$0xff]   ;;  %v19879_v39 = vld [vmem:[#allocation2 + $0xe4c] ss:$200 sps:$4 sm:$0xff]  }
 0x438   : > { %11400 = vmatprep.subr.bf16.mxu1 %v19790_v41  ;;  %v19881_v40 = vld [vmem:[#allocation2 + $0x234] ss:$200 sps:$4 sm:$0xff]  }
 0x439   : > { %v19890_v41 = vld [vmem:[%s21119_s25 + $0x1514] ss:$8 sps:$4 sm:$0xff]  }
 0x43a   : > { %11401 = vmatpush1.bf16.msra.mxu1 %v19788_v42  ;;  %v19888_v42 = vld [vmem:[%s21119_s25 + $0x1510] ss:$8 sps:$4 sm:$0xff]  }
 0x43b   : > { %11402 = vmatprep.subr.bf16.mxu1 %v19802_v43  ;;  %v19902_v43 = vld [vmem:[%s21119_s25 + $0x1524] ss:$8 sps:$4 sm:$0xff]  }
 0x43d   : > { %11248 = vmatmul.mubr.bf16.gmra.mrb[4].mxu1 %v19787_v44  ;;  %v19883_v44 = vld [vmem:[#allocation2 + $0xe48] ss:$200 sps:$4 sm:$0xff]  }
 0x43e   : > { %13644 = vmatmul.mubr.bf16.gmra.mrb[36].mxu0 %v19791_v45  ;;  %11257 = vmatprep.mubr.bf16.mxu1 %v19795_v46  ;;  %v19887_v45 = vld [vmem:[#allocation2 + $0x230] ss:$200 sps:$4 sm:$0xff]   ;;  %v19891_v46 = vld [vmem:[#allocation2 + $0xfdc] ss:$200 sps:$4 sm:$0xff]  }
 0x43f   : > { %13653 = vmatprep.mubr.bf16.mxu0 %v19797_v47  ;;  %11403 = vmatpush1.bf16.msra.mxu1 %v19800_v48  ;;  %v19893_v47 = vld [vmem:[#allocation2 + $0x3c4] ss:$200 sps:$4 sm:$0xff]   ;;  %v19900_v48 = vld [vmem:[%s21119_s25 + $0x1520] ss:$8 sps:$4 sm:$0xff]  }
 0x440   : > { %11404 = vmatprep.subr.bf16.mxu1 %v19814_v49  ;;  %v19914_v49 = vld [vmem:[%s21119_s25 + $0x1534] ss:$8 sps:$4 sm:$0xff]  }
 0x443   : > { %11405 = vmatpush1.bf16.msra.mxu1 %v19812_v50  ;;  %v19912_v50 = vld [vmem:[%s21119_s25 + $0x1530] ss:$8 sps:$4 sm:$0xff]  }
 0x444   : > { %11406 = vmatprep.subr.bf16.mxu1 %v19826_v51  ;;  %v19926_v51 = vld [vmem:[%s21119_s25 + $0x1544] ss:$8 sps:$4 sm:$0xff]  }
 0x445   : > { %11258 = vmatmul.mubr.bf16.gmra.mrb[8].mxu1 %v19799_v52  ;;  %v19895_v52 = vld [vmem:[#allocation2 + $0xfd8] ss:$200 sps:$4 sm:$0xff]  }
 0x446   : > { %13654 = vmatmul.mubr.bf16.gmra.mrb[40].mxu0 %v19803_v53  ;;  %11267 = vmatprep.mubr.bf16.mxu1 %v19807_v54  ;;  %v19899_v53 = vld [vmem:[#allocation2 + $0x3c0] ss:$200 sps:$4 sm:$0xff]   ;;  %v19903_v54 = vld [vmem:[#allocation2 + $0x116c] ss:$200 sps:$4 sm:$0xff]  }
 0x447   : > { %13663 = vmatprep.mubr.bf16.mxu0 %v19809_v55  ;;  %11407 = vmatpush1.bf16.msra.mxu1 %v19824_v56  ;;  %v19905_v55 = vld [vmem:[#allocation2 + $0x554] ss:$200 sps:$4 sm:$0xff]   ;;  %v19924_v56 = vld [vmem:[%s21119_s25 + $0x1540] ss:$8 sps:$4 sm:$0xff]  }
 0x448   : > { %11408 = vmatprep.subr.bf16.mxu1 %v19838_v57  ;;  %v19938_v57 = vld [vmem:[%s21119_s25 + $0x1554] ss:$8 sps:$4 sm:$0xff]  }
 0x44b   : > { %11409 = vmatpush1.bf16.msra.mxu1 %v19836_v58  ;;  %v19936_v58 = vld [vmem:[%s21119_s25 + $0x1550] ss:$8 sps:$4 sm:$0xff]  }
 0x44c   : > { %11410 = vmatprep.subr.bf16.mxu1 %v19850_v59  ;;  %v19950_v59 = vld [vmem:[%s21119_s25 + $0x1564] ss:$8 sps:$4 sm:$0xff]  }
 0x44d   : > { %11268 = vmatmul.mubr.bf16.gmra.mrb[12].mxu1 %v19811_v60  ;;  %v19907_v60 = vld [vmem:[#allocation2 + $0x1168] ss:$200 sps:$4 sm:$0xff]  }
 0x44e   : > { %13664 = vmatmul.mubr.bf16.gmra.mrb[44].mxu0 %v19815_v61  ;;  %11277 = vmatprep.mubr.bf16.mxu1 %v19819_v62  ;;  %v19911_v61 = vld [vmem:[#allocation2 + $0x550] ss:$200 sps:$4 sm:$0xff]   ;;  %v19915_v62 = vld [vmem:[#allocation2 + $0x12fc] ss:$200 sps:$4 sm:$0xff]  }
 0x44f   : > { %13673 = vmatprep.mubr.bf16.mxu0 %v19821_v63  ;;  %11411 = vmatpush1.bf16.msra.mxu1 %v19848_v0  ;;  %v19917_v63 = vld [vmem:[#allocation2 + $0x6e4] ss:$200 sps:$4 sm:$0xff]   ;;  %v19948_v0 = vld [vmem:[%s21119_s25 + $0x1560] ss:$8 sps:$4 sm:$0xff]  }
 0x450   : > { %11412 = vmatprep.subr.bf16.mxu1 %v19862_v1  ;;  %v19962_v1 = vld [vmem:[%s21119_s25 + $0x1574] ss:$8 sps:$4 sm:$0xff]  }
 0x453   : > { %11413 = vmatpush1.bf16.msra.mxu1 %v19860_v2  ;;  %v19960_v2 = vld [vmem:[%s21119_s25 + $0x1570] ss:$8 sps:$4 sm:$0xff]  }
 0x454   : > { %11414 = vmatprep.subr.bf16.mxu1 %v19875_v3  ;;  %v19974_v3 = vld [vmem:[%s21119_s25 + $0x1584] ss:$8 sps:$4 sm:$0xff]  }
 0x455   : > { %11278 = vmatmul.mubr.bf16.gmra.mrb[16].mxu1 %v19823_v4  ;;  %v19919_v4 = vld [vmem:[#allocation2 + $0x12f8] ss:$200 sps:$4 sm:$0xff]  }
 0x456   : > { %13674 = vmatmul.mubr.bf16.gmra.mrb[48].mxu0 %v19827_v5  ;;  %11287 = vmatprep.mubr.bf16.mxu1 %v19831_v6  ;;  %v19923_v5 = vld [vmem:[#allocation2 + $0x6e0] ss:$200 sps:$4 sm:$0xff]   ;;  %v19927_v6 = vld [vmem:[#allocation2 + $0x148c] ss:$200 sps:$4 sm:$0xff]  }
 0x457   : > { %13683 = vmatprep.mubr.bf16.mxu0 %v19833_v7  ;;  %11415 = vmatpush1.bf16.msra.mxu1 %v19873_v8  ;;  %v19929_v7 = vld [vmem:[#allocation2 + $0x874] ss:$200 sps:$4 sm:$0xff]   ;;  %v19972_v8 = vld [vmem:[%s21119_s25 + $0x1580] ss:$8 sps:$4 sm:$0xff]  }
 0x458   : > { %11416 = vmatprep.subr.bf16.mxu1 %v19886_v9  ;;  %v19986_v9 = vld [vmem:[%s21119_s25 + $0x1594] ss:$8 sps:$4 sm:$0xff]  }
 0x45b   : > { %11417 = vmatpush1.bf16.msra.mxu1 %v19884_v10  ;;  %v19984_v10 = vld [vmem:[%s21119_s25 + $0x1590] ss:$8 sps:$4 sm:$0xff]  }
 0x45c   : > { %11418 = vmatprep.subr.bf16.mxu1 %v19898_v11  ;;  %v19998_v11 = vld [vmem:[%s21119_s25 + $0x15a4] ss:$8 sps:$4 sm:$0xff]  }
 0x45d   : > { %11288 = vmatmul.mubr.bf16.gmra.mrb[20].mxu1 %v19835_v12  ;;  %v19931_v12 = vld [vmem:[#allocation2 + $0x1488] ss:$200 sps:$4 sm:$0xff]  }
 0x45e   : > { %13684 = vmatmul.mubr.bf16.gmra.mrb[52].mxu0 %v19839_v13  ;;  %11297 = vmatprep.mubr.bf16.mxu1 %v19843_v14  ;;  %v19935_v13 = vld [vmem:[#allocation2 + $0x870] ss:$200 sps:$4 sm:$0xff]   ;;  %v19939_v14 = vld [vmem:[#allocation2 + $0x161c] ss:$200 sps:$4 sm:$0xff]  }
 0x45f   : > { %13693 = vmatprep.mubr.bf16.mxu0 %v19845_v15  ;;  %11419 = vmatpush1.bf16.msra.mxu1 %v19896_v16  ;;  %v19941_v15 = vld [vmem:[#allocation2 + $0xa04] ss:$200 sps:$4 sm:$0xff]   ;;  %v19996_v16 = vld [vmem:[%s21119_s25 + $0x15a0] ss:$8 sps:$4 sm:$0xff]  }
 0x460   : > { %11420 = vmatprep.subr.bf16.mxu1 %v19910_v17  ;;  %v20010_v17 = vld [vmem:[%s21119_s25 + $0x15b4] ss:$8 sps:$4 sm:$0xff]  }
 0x463   : > { %11421 = vmatpush1.bf16.msra.mxu1 %v19908_v18  ;;  %v20008_v18 = vld [vmem:[%s21119_s25 + $0x15b0] ss:$8 sps:$4 sm:$0xff]  }
 0x464   : > { %11422 = vmatprep.subr.bf16.mxu1 %v19922_v19  ;;  %v20022_v19 = vld [vmem:[%s21119_s25 + $0x15c4] ss:$8 sps:$4 sm:$0xff]  }
 0x465   : > { %11298 = vmatmul.mubr.bf16.gmra.mrb[24].mxu1 %v19847_v20  ;;  %v19943_v20 = vld [vmem:[#allocation2 + $0x1618] ss:$200 sps:$4 sm:$0xff]  }
 0x466   : > { %13694 = vmatmul.mubr.bf16.gmra.mrb[56].mxu0 %v19851_v21  ;;  %11307 = vmatprep.mubr.bf16.mxu1 %v19855_v22  ;;  %v19947_v21 = vld [vmem:[#allocation2 + $0xa00] ss:$200 sps:$4 sm:$0xff]   ;;  %v19951_v22 = vld [vmem:[#allocation2 + $0x17ac] ss:$200 sps:$4 sm:$0xff]  }
 0x467   : > { %13703 = vmatprep.mubr.bf16.mxu0 %v19857_v23  ;;  %11423 = vmatpush1.bf16.msra.mxu1 %v19920_v24  ;;  %v19953_v23 = vld [vmem:[#allocation2 + $0xb94] ss:$200 sps:$4 sm:$0xff]   ;;  %v20020_v24 = vld [vmem:[%s21119_s25 + $0x15c0] ss:$8 sps:$4 sm:$0xff]  }
 0x468   : > { %11424 = vmatprep.subr.bf16.mxu1 %v19934_v25  ;;  %v20034_v25 = vld [vmem:[%s21119_s25 + $0x15d4] ss:$8 sps:$4 sm:$0xff]  }
 0x46b   : > { %11425 = vmatpush1.bf16.msra.mxu1 %v19932_v26  ;;  %v20032_v26 = vld [vmem:[%s21119_s25 + $0x15d0] ss:$8 sps:$4 sm:$0xff]  }
 0x46c   : > { %11426 = vmatprep.subr.bf16.mxu1 %v19946_v27  ;;  %v20046_v27 = vld [vmem:[%s21119_s25 + $0x15e4] ss:$8 sps:$4 sm:$0xff]  }
 0x46d   : > { %11308 = vmatmul.mubr.bf16.gmra.mrb[28].mxu1 %v19859_v28  ;;  %v19955_v28 = vld [vmem:[#allocation2 + $0x17a8] ss:$200 sps:$4 sm:$0xff]  }
 0x46e   : > { %13704 = vmatmul.mubr.bf16.gmra.mrb[60].mxu0 %v19863_v29  ;;  %11317 = vmatprep.mubr.bf16.mxu1 %v19867_v30  ;;  %v19959_v29 = vld [vmem:[#allocation2 + $0xb90] ss:$200 sps:$4 sm:$0xff]   ;;  %v19965_v30 = vld [vmem:[#allocation2 + $0x44] ss:$200 sps:$4 sm:$0xff]  }
 0x46f   : > { %13746 = vmatprep.mubr.bf16.mxu0 %v19871_v31  ;;  %11427 = vmatpush1.bf16.msra.mxu1 %v19944_v32  ;;  %v19966_v31 = vld [vmem:[#allocation2 + $0xd24] ss:$200 sps:$4 sm:$0xff]   ;;  %v20044_v32 = vld [vmem:[%s21119_s25 + $0x15e0] ss:$8 sps:$4 sm:$0xff]  }
 0x470   : > { %11428 = vmatprep.subr.bf16.mxu1 %v19958_v33  ;;  %v20058_v33 = vld [vmem:[%s21119_s25 + $0x15f4] ss:$8 sps:$4 sm:$0xff]  }
 0x473   : > { %11429 = vmatpush1.bf16.msra.mxu1 %v19956_v34  ;;  %v20056_v34 = vld [vmem:[%s21119_s25 + $0x15f0] ss:$8 sps:$4 sm:$0xff]  }
 0x474   : > { %11591 = vmatprep.subr.bf16.mxu1 %v19970_v35  ;;  %v20070_v35 = vld [vmem:[%s21119_s25 + $0x1604] ss:$8 sps:$4 sm:$0xff]  }
 0x475   : > { %11318 = vmatmul.mubr.bf16.gmra.mrb[32].mxu1 %v19872_v37  ;;  %v19971_v37 = vld [vmem:[#allocation2 + $0xd20] ss:$200 sps:$4 sm:$0xff]  }
 0x476   : > { %13747 = vmatmul.mubr.bf16.vlgmr.msra.gmra.mrb[0].mxu0 %v19869_v36  ;;  %11327 = vmatprep.mubr.bf16.mxu1 %v19879_v39  ;;  %v19963_v36 = vld [vmem:[#allocation2 + $0x40] ss:$200 sps:$4 sm:$0xff]   ;;  %v19975_v39 = vld [vmem:[#allocation2 + $0x1d4] ss:$200 sps:$4 sm:$0xff]  }
 0x477   : > { %13908 = vmatpush1.bf16.msra.mxu0 %v19876_v38  ;;  %13756 = vmatprep.mubr.bf16.mxu0 %v19881_v40  ;;  %v19968_v38 = vld [vmem:[%s21119_s25 + $0x900] ss:$8 sps:$4 sm:$0xff]   ;;  %v19977_v40 = vld [vmem:[#allocation2 + $0xeb4] ss:$200 sps:$4 sm:$0xff]  }
 0x478   : > { %13909 = vmatprep.subr.bf16.mxu0 %v19890_v41  ;;  %v19982_v41 = vld [vmem:[%s21119_s25 + $0x914] ss:$8 sps:$4 sm:$0xff]  }
 0x47b   : > { %13910 = vmatpush1.bf16.msra.mxu0 %v19888_v42  ;;  %v19980_v42 = vld [vmem:[%s21119_s25 + $0x910] ss:$8 sps:$4 sm:$0xff]  }
 0x47c   : > { %13911 = vmatprep.subr.bf16.mxu0 %v19902_v43  ;;  %v19994_v43 = vld [vmem:[%s21119_s25 + $0x924] ss:$8 sps:$4 sm:$0xff]  }
 0x47d   : > { %11328 = vmatmul.mubr.bf16.gmra.mrb[36].mxu1 %v19883_v44  ;;  %v19979_v44 = vld [vmem:[#allocation2 + $0x1d0] ss:$200 sps:$4 sm:$0xff]  }
 0x47e   : > { %13757 = vmatmul.mubr.bf16.gmra.mrb[4].mxu0 %v19887_v45  ;;  %11337 = vmatprep.mubr.bf16.mxu1 %v19891_v46  ;;  %v19983_v45 = vld [vmem:[#allocation2 + $0xeb0] ss:$200 sps:$4 sm:$0xff]   ;;  %v19987_v46 = vld [vmem:[#allocation2 + $0x364] ss:$200 sps:$4 sm:$0xff]  }
 0x47f   : > { %13766 = vmatprep.mubr.bf16.mxu0 %v19893_v47  ;;  %13912 = vmatpush1.bf16.msra.mxu0 %v19900_v48  ;;  %v19989_v47 = vld [vmem:[#allocation2 + $0x1044] ss:$200 sps:$4 sm:$0xff]   ;;  %v19992_v48 = vld [vmem:[%s21119_s25 + $0x920] ss:$8 sps:$4 sm:$0xff]  }
 0x480   : > { %13913 = vmatprep.subr.bf16.mxu0 %v19914_v49  ;;  %v20006_v49 = vld [vmem:[%s21119_s25 + $0x934] ss:$8 sps:$4 sm:$0xff]  }
 0x483   : > { %13914 = vmatpush1.bf16.msra.mxu0 %v19912_v50  ;;  %v20004_v50 = vld [vmem:[%s21119_s25 + $0x930] ss:$8 sps:$4 sm:$0xff]  }
 0x484   : > { %13915 = vmatprep.subr.bf16.mxu0 %v19926_v51  ;;  %v20018_v51 = vld [vmem:[%s21119_s25 + $0x944] ss:$8 sps:$4 sm:$0xff]  }
 0x485   : > { %11338 = vmatmul.mubr.bf16.gmra.mrb[40].mxu1 %v19895_v52  ;;  %v19991_v52 = vld [vmem:[#allocation2 + $0x360] ss:$200 sps:$4 sm:$0xff]  }
 0x486   : > { %13767 = vmatmul.mubr.bf16.gmra.mrb[8].mxu0 %v19899_v53  ;;  %11347 = vmatprep.mubr.bf16.mxu1 %v19903_v54  ;;  %v19995_v53 = vld [vmem:[#allocation2 + $0x1040] ss:$200 sps:$4 sm:$0xff]   ;;  %v19999_v54 = vld [vmem:[#allocation2 + $0x4f4] ss:$200 sps:$4 sm:$0xff]  }
 0x487   : > { %13776 = vmatprep.mubr.bf16.mxu0 %v19905_v55  ;;  %13916 = vmatpush1.bf16.msra.mxu0 %v19924_v56  ;;  %v20001_v55 = vld [vmem:[#allocation2 + $0x11d4] ss:$200 sps:$4 sm:$0xff]   ;;  %v20016_v56 = vld [vmem:[%s21119_s25 + $0x940] ss:$8 sps:$4 sm:$0xff]  }
 0x488   : > { %13917 = vmatprep.subr.bf16.mxu0 %v19938_v57  ;;  %v20030_v57 = vld [vmem:[%s21119_s25 + $0x954] ss:$8 sps:$4 sm:$0xff]  }
 0x48b   : > { %13918 = vmatpush1.bf16.msra.mxu0 %v19936_v58  ;;  %v20028_v58 = vld [vmem:[%s21119_s25 + $0x950] ss:$8 sps:$4 sm:$0xff]  }
 0x48c   : > { %13919 = vmatprep.subr.bf16.mxu0 %v19950_v59  ;;  %v20042_v59 = vld [vmem:[%s21119_s25 + $0x964] ss:$8 sps:$4 sm:$0xff]  }
 0x48d   : > { %11348 = vmatmul.mubr.bf16.gmra.mrb[44].mxu1 %v19907_v60  ;;  %v20003_v60 = vld [vmem:[#allocation2 + $0x4f0] ss:$200 sps:$4 sm:$0xff]  }
 0x48e   : > { %13777 = vmatmul.mubr.bf16.gmra.mrb[12].mxu0 %v19911_v61  ;;  %11357 = vmatprep.mubr.bf16.mxu1 %v19915_v62  ;;  %v20007_v61 = vld [vmem:[#allocation2 + $0x11d0] ss:$200 sps:$4 sm:$0xff]   ;;  %v20011_v62 = vld [vmem:[#allocation2 + $0x684] ss:$200 sps:$4 sm:$0xff]  }
 0x48f   : > { %13786 = vmatprep.mubr.bf16.mxu0 %v19917_v63  ;;  %13920 = vmatpush1.bf16.msra.mxu0 %v19948_v0  ;;  %v20013_v63 = vld [vmem:[#allocation2 + $0x1364] ss:$200 sps:$4 sm:$0xff]   ;;  %v20040_v0 = vld [vmem:[%s21119_s25 + $0x960] ss:$8 sps:$4 sm:$0xff]  }
 0x490   : > { %13921 = vmatprep.subr.bf16.mxu0 %v19962_v1  ;;  %v20054_v1 = vld [vmem:[%s21119_s25 + $0x974] ss:$8 sps:$4 sm:$0xff]  }
 0x493   : > { %13922 = vmatpush1.bf16.msra.mxu0 %v19960_v2  ;;  %v20052_v2 = vld [vmem:[%s21119_s25 + $0x970] ss:$8 sps:$4 sm:$0xff]  }
 0x494   : > { %13923 = vmatprep.subr.bf16.mxu0 %v19974_v3  ;;  %v20067_v3 = vld [vmem:[%s21119_s25 + $0x984] ss:$8 sps:$4 sm:$0xff]  }
 0x495   : > { %11358 = vmatmul.mubr.bf16.gmra.mrb[48].mxu1 %v19919_v4  ;;  %v20015_v4 = vld [vmem:[#allocation2 + $0x680] ss:$200 sps:$4 sm:$0xff]  }
 0x496   : > { %13787 = vmatmul.mubr.bf16.gmra.mrb[16].mxu0 %v19923_v5  ;;  %11367 = vmatprep.mubr.bf16.mxu1 %v19927_v6  ;;  %v20019_v5 = vld [vmem:[#allocation2 + $0x1360] ss:$200 sps:$4 sm:$0xff]   ;;  %v20023_v6 = vld [vmem:[#allocation2 + $0x814] ss:$200 sps:$4 sm:$0xff]  }
 0x497   : > { %13796 = vmatprep.mubr.bf16.mxu0 %v19929_v7  ;;  %13924 = vmatpush1.bf16.msra.mxu0 %v19972_v8  ;;  %v20025_v7 = vld [vmem:[#allocation2 + $0x14f4] ss:$200 sps:$4 sm:$0xff]   ;;  %v20065_v8 = vld [vmem:[%s21119_s25 + $0x980] ss:$8 sps:$4 sm:$0xff]  }
 0x498   : > { %13925 = vmatprep.subr.bf16.mxu0 %v19986_v9  ;;  %v20078_v9 = vld [vmem:[%s21119_s25 + $0x994] ss:$8 sps:$4 sm:$0xff]  }
 0x49b   : > { %13926 = vmatpush1.bf16.msra.mxu0 %v19984_v10  ;;  %v20076_v10 = vld [vmem:[%s21119_s25 + $0x990] ss:$8 sps:$4 sm:$0xff]  }
 0x49c   : > { %13927 = vmatprep.subr.bf16.mxu0 %v19998_v11  ;;  %v20090_v11 = vld [vmem:[%s21119_s25 + $0x9a4] ss:$8 sps:$4 sm:$0xff]  }
 0x49d   : > { %11368 = vmatmul.mubr.bf16.gmra.mrb[52].mxu1 %v19931_v12  ;;  %v20027_v12 = vld [vmem:[#allocation2 + $0x810] ss:$200 sps:$4 sm:$0xff]  }
 0x49e   : > { %13797 = vmatmul.mubr.bf16.gmra.mrb[20].mxu0 %v19935_v13  ;;  %11377 = vmatprep.mubr.bf16.mxu1 %v19939_v14  ;;  %v20031_v13 = vld [vmem:[#allocation2 + $0x14f0] ss:$200 sps:$4 sm:$0xff]   ;;  %v20035_v14 = vld [vmem:[#allocation2 + $0x9a4] ss:$200 sps:$4 sm:$0xff]  }
 0x49f   : > { %13806 = vmatprep.mubr.bf16.mxu0 %v19941_v15  ;;  %13928 = vmatpush1.bf16.msra.mxu0 %v19996_v16  ;;  %v20037_v15 = vld [vmem:[#allocation2 + $0x1684] ss:$200 sps:$4 sm:$0xff]   ;;  %v20088_v16 = vld [vmem:[%s21119_s25 + $0x9a0] ss:$8 sps:$4 sm:$0xff]  }
 0x4a0   : > { %13929 = vmatprep.subr.bf16.mxu0 %v20010_v17  ;;  %v20102_v17 = vld [vmem:[%s21119_s25 + $0x9b4] ss:$8 sps:$4 sm:$0xff]  }
 0x4a3   : > { %13930 = vmatpush1.bf16.msra.mxu0 %v20008_v18  ;;  %v20100_v18 = vld [vmem:[%s21119_s25 + $0x9b0] ss:$8 sps:$4 sm:$0xff]  }
 0x4a4   : > { %13931 = vmatprep.subr.bf16.mxu0 %v20022_v19  ;;  %v20114_v19 = vld [vmem:[%s21119_s25 + $0x9c4] ss:$8 sps:$4 sm:$0xff]  }
 0x4a5   : > { %11378 = vmatmul.mubr.bf16.gmra.mrb[56].mxu1 %v19943_v20  ;;  %v20039_v20 = vld [vmem:[#allocation2 + $0x9a0] ss:$200 sps:$4 sm:$0xff]  }
 0x4a6   : > { %13807 = vmatmul.mubr.bf16.gmra.mrb[24].mxu0 %v19947_v21  ;;  %11387 = vmatprep.mubr.bf16.mxu1 %v19951_v22  ;;  %v20043_v21 = vld [vmem:[#allocation2 + $0x1680] ss:$200 sps:$4 sm:$0xff]   ;;  %v20047_v22 = vld [vmem:[#allocation2 + $0xb34] ss:$200 sps:$4 sm:$0xff]  }
 0x4a7   : > { %13816 = vmatprep.mubr.bf16.mxu0 %v19953_v23  ;;  %13932 = vmatpush1.bf16.msra.mxu0 %v20020_v24  ;;  %v20049_v23 = vld [vmem:[#allocation2 + $0x1814] ss:$200 sps:$4 sm:$0xff]   ;;  %v20112_v24 = vld [vmem:[%s21119_s25 + $0x9c0] ss:$8 sps:$4 sm:$0xff]  }
 0x4a8   : > { %13933 = vmatprep.subr.bf16.mxu0 %v20034_v25  ;;  %v20126_v25 = vld [vmem:[%s21119_s25 + $0x9d4] ss:$8 sps:$4 sm:$0xff]  }
 0x4ab   : > { %13934 = vmatpush1.bf16.msra.mxu0 %v20032_v26  ;;  %v20124_v26 = vld [vmem:[%s21119_s25 + $0x9d0] ss:$8 sps:$4 sm:$0xff]  }
 0x4ac   : > { %13935 = vmatprep.subr.bf16.mxu0 %v20046_v27  ;;  %v20138_v27 = vld [vmem:[%s21119_s25 + $0x9e4] ss:$8 sps:$4 sm:$0xff]  }
 0x4ad   : > { %11388 = vmatmul.mubr.bf16.gmra.mrb[60].mxu1 %v19955_v28  ;;  %v20051_v28 = vld [vmem:[#allocation2 + $0xb30] ss:$200 sps:$4 sm:$0xff]  }
 0x4ae   : > { %13817 = vmatmul.mubr.bf16.gmra.mrb[28].mxu0 %v19959_v29  ;;  %11430 = vmatprep.mubr.bf16.mxu1 %v19965_v30  ;;  %v20055_v29 = vld [vmem:[#allocation2 + $0x1810] ss:$200 sps:$4 sm:$0xff]   ;;  %v20059_v30 = vld [vmem:[#allocation2 + $0xcc4] ss:$200 sps:$4 sm:$0xff]  }
 0x4af   : > { %13826 = vmatprep.mubr.bf16.mxu0 %v19966_v31  ;;  %13936 = vmatpush1.bf16.msra.mxu0 %v20044_v32  ;;  %v20063_v31 = vld [vmem:[#allocation2 + $0xac] ss:$200 sps:$4 sm:$0xff]   ;;  %v20136_v32 = vld [vmem:[%s21119_s25 + $0x9e0] ss:$8 sps:$4 sm:$0xff]  }
 0x4b0   : > { %13937 = vmatprep.subr.bf16.mxu0 %v20058_v33  ;;  %v20150_v33 = vld [vmem:[%s21119_s25 + $0x9f4] ss:$8 sps:$4 sm:$0xff]  }
 0x4b3   : > { %13938 = vmatpush1.bf16.msra.mxu0 %v20056_v34  ;;  %v20148_v34 = vld [vmem:[%s21119_s25 + $0x9f0] ss:$8 sps:$4 sm:$0xff]  }
 0x4b4   : > { %14100 = vmatprep.subr.bf16.mxu0 %v20070_v35  ;;  %v20162_v35 = vld [vmem:[%s21119_s25 + $0xa04] ss:$8 sps:$4 sm:$0xff]  }
 0x4b5   : > { %11431 = vmatmul.mubr.bf16.vlgmr.msra.gmra.mrb[0].mxu1 %v19963_v36  ;;  %v20061_v36 = vld [vmem:[#allocation2 + $0xa8] ss:$200 sps:$4 sm:$0xff]  }
 0x4b6   : > { %13827 = vmatmul.mubr.bf16.gmra.mrb[32].mxu0 %v19971_v37  ;;  %11592 = vmatpush1.bf16.msra.mxu1 %v19968_v38  ;;  %v20064_v37 = vld [vmem:[#allocation2 + $0xcc0] ss:$200 sps:$4 sm:$0xff]  }
 0x4b7   : > { %11440 = vmatprep.mubr.bf16.mxu1 %v19975_v39  ;;  %13836 = vmatprep.mubr.bf16.mxu0 %v19977_v40  ;;  %v20068_v38 = vld [vmem:[%s21119_s25 + $0x1600] ss:$8 sps:$4 sm:$0xff]   ;;  %v20071_v39 = vld [vmem:[#allocation2 + $0xe54] ss:$200 sps:$4 sm:$0xff]  }
 0x4b8   : > { %11593 = vmatprep.subr.bf16.mxu1 %v19982_v41  ;;  %v20073_v40 = vld [vmem:[#allocation2 + $0x23c] ss:$200 sps:$4 sm:$0xff]  }
 0x4b9   : > { %v20082_v41 = vld [vmem:[%s21119_s25 + $0x1614] ss:$8 sps:$4 sm:$0xff]  }
 0x4ba   : > { %11594 = vmatpush1.bf16.msra.mxu1 %v19980_v42  ;;  %v20080_v42 = vld [vmem:[%s21119_s25 + $0x1610] ss:$8 sps:$4 sm:$0xff]  }
 0x4bb   : > { %11595 = vmatprep.subr.bf16.mxu1 %v19994_v43  ;;  %v20094_v43 = vld [vmem:[%s21119_s25 + $0x1624] ss:$8 sps:$4 sm:$0xff]  }
 0x4bd   : > { %11441 = vmatmul.mubr.bf16.gmra.mrb[4].mxu1 %v19979_v44  ;;  %v20075_v44 = vld [vmem:[#allocation2 + $0xe50] ss:$200 sps:$4 sm:$0xff]  }
 0x4be   : > { %13837 = vmatmul.mubr.bf16.gmra.mrb[36].mxu0 %v19983_v45  ;;  %11450 = vmatprep.mubr.bf16.mxu1 %v19987_v46  ;;  %v20079_v45 = vld [vmem:[#allocation2 + $0x238] ss:$200 sps:$4 sm:$0xff]   ;;  %v20083_v46 = vld [vmem:[#allocation2 + $0xfe4] ss:$200 sps:$4 sm:$0xff]  }
 0x4bf   : > { %13846 = vmatprep.mubr.bf16.mxu0 %v19989_v47  ;;  %11596 = vmatpush1.bf16.msra.mxu1 %v19992_v48  ;;  %v20085_v47 = vld [vmem:[#allocation2 + $0x3cc] ss:$200 sps:$4 sm:$0xff]   ;;  %v20092_v48 = vld [vmem:[%s21119_s25 + $0x1620] ss:$8 sps:$4 sm:$0xff]  }
 0x4c0   : > { %11597 = vmatprep.subr.bf16.mxu1 %v20006_v49  ;;  %v20106_v49 = vld [vmem:[%s21119_s25 + $0x1634] ss:$8 sps:$4 sm:$0xff]  }
 0x4c3   : > { %11598 = vmatpush1.bf16.msra.mxu1 %v20004_v50  ;;  %v20104_v50 = vld [vmem:[%s21119_s25 + $0x1630] ss:$8 sps:$4 sm:$0xff]  }
 0x4c4   : > { %11599 = vmatprep.subr.bf16.mxu1 %v20018_v51  ;;  %v20118_v51 = vld [vmem:[%s21119_s25 + $0x1644] ss:$8 sps:$4 sm:$0xff]  }
 0x4c5   : > { %11451 = vmatmul.mubr.bf16.gmra.mrb[8].mxu1 %v19991_v52  ;;  %v20087_v52 = vld [vmem:[#allocation2 + $0xfe0] ss:$200 sps:$4 sm:$0xff]  }
 0x4c6   : > { %13847 = vmatmul.mubr.bf16.gmra.mrb[40].mxu0 %v19995_v53  ;;  %11460 = vmatprep.mubr.bf16.mxu1 %v19999_v54  ;;  %v20091_v53 = vld [vmem:[#allocation2 + $0x3c8] ss:$200 sps:$4 sm:$0xff]   ;;  %v20095_v54 = vld [vmem:[#allocation2 + $0x1174] ss:$200 sps:$4 sm:$0xff]  }
 0x4c7   : > { %13856 = vmatprep.mubr.bf16.mxu0 %v20001_v55  ;;  %11600 = vmatpush1.bf16.msra.mxu1 %v20016_v56  ;;  %v20097_v55 = vld [vmem:[#allocation2 + $0x55c] ss:$200 sps:$4 sm:$0xff]   ;;  %v20116_v56 = vld [vmem:[%s21119_s25 + $0x1640] ss:$8 sps:$4 sm:$0xff]  }
 0x4c8   : > { %11601 = vmatprep.subr.bf16.mxu1 %v20030_v57  ;;  %v20130_v57 = vld [vmem:[%s21119_s25 + $0x1654] ss:$8 sps:$4 sm:$0xff]  }
 0x4cb   : > { %11602 = vmatpush1.bf16.msra.mxu1 %v20028_v58  ;;  %v20128_v58 = vld [vmem:[%s21119_s25 + $0x1650] ss:$8 sps:$4 sm:$0xff]  }
 0x4cc   : > { %11603 = vmatprep.subr.bf16.mxu1 %v20042_v59  ;;  %v20142_v59 = vld [vmem:[%s21119_s25 + $0x1664] ss:$8 sps:$4 sm:$0xff]  }
 0x4cd   : > { %11461 = vmatmul.mubr.bf16.gmra.mrb[12].mxu1 %v20003_v60  ;;  %v20099_v60 = vld [vmem:[#allocation2 + $0x1170] ss:$200 sps:$4 sm:$0xff]  }
 0x4ce   : > { %13857 = vmatmul.mubr.bf16.gmra.mrb[44].mxu0 %v20007_v61  ;;  %11470 = vmatprep.mubr.bf16.mxu1 %v20011_v62  ;;  %v20103_v61 = vld [vmem:[#allocation2 + $0x558] ss:$200 sps:$4 sm:$0xff]   ;;  %v20107_v62 = vld [vmem:[#allocation2 + $0x1304] ss:$200 sps:$4 sm:$0xff]  }
 0x4cf   : > { %13866 = vmatprep.mubr.bf16.mxu0 %v20013_v63  ;;  %11604 = vmatpush1.bf16.msra.mxu1 %v20040_v0  ;;  %v20109_v63 = vld [vmem:[#allocation2 + $0x6ec] ss:$200 sps:$4 sm:$0xff]   ;;  %v20140_v0 = vld [vmem:[%s21119_s25 + $0x1660] ss:$8 sps:$4 sm:$0xff]  }
 0x4d0   : > { %11605 = vmatprep.subr.bf16.mxu1 %v20054_v1  ;;  %v20154_v1 = vld [vmem:[%s21119_s25 + $0x1674] ss:$8 sps:$4 sm:$0xff]  }
 0x4d3   : > { %11606 = vmatpush1.bf16.msra.mxu1 %v20052_v2  ;;  %v20152_v2 = vld [vmem:[%s21119_s25 + $0x1670] ss:$8 sps:$4 sm:$0xff]  }
 0x4d4   : > { %11607 = vmatprep.subr.bf16.mxu1 %v20067_v3  ;;  %v20166_v3 = vld [vmem:[%s21119_s25 + $0x1684] ss:$8 sps:$4 sm:$0xff]  }
 0x4d5   : > { %11471 = vmatmul.mubr.bf16.gmra.mrb[16].mxu1 %v20015_v4  ;;  %v20111_v4 = vld [vmem:[#allocation2 + $0x1300] ss:$200 sps:$4 sm:$0xff]  }
 0x4d6   : > { %13867 = vmatmul.mubr.bf16.gmra.mrb[48].mxu0 %v20019_v5  ;;  %11480 = vmatprep.mubr.bf16.mxu1 %v20023_v6  ;;  %v20115_v5 = vld [vmem:[#allocation2 + $0x6e8] ss:$200 sps:$4 sm:$0xff]   ;;  %v20119_v6 = vld [vmem:[#allocation2 + $0x1494] ss:$200 sps:$4 sm:$0xff]  }
 0x4d7   : > { %13876 = vmatprep.mubr.bf16.mxu0 %v20025_v7  ;;  %11608 = vmatpush1.bf16.msra.mxu1 %v20065_v8  ;;  %v20121_v7 = vld [vmem:[#allocation2 + $0x87c] ss:$200 sps:$4 sm:$0xff]   ;;  %v20164_v8 = vld [vmem:[%s21119_s25 + $0x1680] ss:$8 sps:$4 sm:$0xff]  }
 0x4d8   : > { %11609 = vmatprep.subr.bf16.mxu1 %v20078_v9  ;;  %v20178_v9 = vld [vmem:[%s21119_s25 + $0x1694] ss:$8 sps:$4 sm:$0xff]  }
 0x4db   : > { %11610 = vmatpush1.bf16.msra.mxu1 %v20076_v10  ;;  %v20176_v10 = vld [vmem:[%s21119_s25 + $0x1690] ss:$8 sps:$4 sm:$0xff]  }
 0x4dc   : > { %11611 = vmatprep.subr.bf16.mxu1 %v20090_v11  ;;  %v20190_v11 = vld [vmem:[%s21119_s25 + $0x16a4] ss:$8 sps:$4 sm:$0xff]  }
 0x4dd   : > { %11481 = vmatmul.mubr.bf16.gmra.mrb[20].mxu1 %v20027_v12  ;;  %v20123_v12 = vld [vmem:[#allocation2 + $0x1490] ss:$200 sps:$4 sm:$0xff]  }
 0x4de   : > { %13877 = vmatmul.mubr.bf16.gmra.mrb[52].mxu0 %v20031_v13  ;;  %11490 = vmatprep.mubr.bf16.mxu1 %v20035_v14  ;;  %v20127_v13 = vld [vmem:[#allocation2 + $0x878] ss:$200 sps:$4 sm:$0xff]   ;;  %v20131_v14 = vld [vmem:[#allocation2 + $0x1624] ss:$200 sps:$4 sm:$0xff]  }
 0x4df   : > { %13886 = vmatprep.mubr.bf16.mxu0 %v20037_v15  ;;  %11612 = vmatpush1.bf16.msra.mxu1 %v20088_v16  ;;  %v20133_v15 = vld [vmem:[#allocation2 + $0xa0c] ss:$200 sps:$4 sm:$0xff]   ;;  %v20188_v16 = vld [vmem:[%s21119_s25 + $0x16a0] ss:$8 sps:$4 sm:$0xff]  }
 0x4e0   : > { %11613 = vmatprep.subr.bf16.mxu1 %v20102_v17  ;;  %v20202_v17 = vld [vmem:[%s21119_s25 + $0x16b4] ss:$8 sps:$4 sm:$0xff]  }
 0x4e3   : > { %11614 = vmatpush1.bf16.msra.mxu1 %v20100_v18  ;;  %v20200_v18 = vld [vmem:[%s21119_s25 + $0x16b0] ss:$8 sps:$4 sm:$0xff]  }
 0x4e4   : > { %11615 = vmatprep.subr.bf16.mxu1 %v20114_v19  ;;  %v20214_v19 = vld [vmem:[%s21119_s25 + $0x16c4] ss:$8 sps:$4 sm:$0xff]  }
 0x4e5   : > { %11491 = vmatmul.mubr.bf16.gmra.mrb[24].mxu1 %v20039_v20  ;;  %v20135_v20 = vld [vmem:[#allocation2 + $0x1620] ss:$200 sps:$4 sm:$0xff]  }
 0x4e6   : > { %13887 = vmatmul.mubr.bf16.gmra.mrb[56].mxu0 %v20043_v21  ;;  %11500 = vmatprep.mubr.bf16.mxu1 %v20047_v22  ;;  %v20139_v21 = vld [vmem:[#allocation2 + $0xa08] ss:$200 sps:$4 sm:$0xff]   ;;  %v20143_v22 = vld [vmem:[#allocation2 + $0x17b4] ss:$200 sps:$4 sm:$0xff]  }
 0x4e7   : > { %13896 = vmatprep.mubr.bf16.mxu0 %v20049_v23  ;;  %11616 = vmatpush1.bf16.msra.mxu1 %v20112_v24  ;;  %v20145_v23 = vld [vmem:[#allocation2 + $0xb9c] ss:$200 sps:$4 sm:$0xff]   ;;  %v20212_v24 = vld [vmem:[%s21119_s25 + $0x16c0] ss:$8 sps:$4 sm:$0xff]  }
 0x4e8   : > { %11617 = vmatprep.subr.bf16.mxu1 %v20126_v25  ;;  %v20226_v25 = vld [vmem:[%s21119_s25 + $0x16d4] ss:$8 sps:$4 sm:$0xff]  }
 0x4eb   : > { %11618 = vmatpush1.bf16.msra.mxu1 %v20124_v26  ;;  %v20224_v26 = vld [vmem:[%s21119_s25 + $0x16d0] ss:$8 sps:$4 sm:$0xff]  }
 0x4ec   : > { %11619 = vmatprep.subr.bf16.mxu1 %v20138_v27  ;;  %v20238_v27 = vld [vmem:[%s21119_s25 + $0x16e4] ss:$8 sps:$4 sm:$0xff]  }
 0x4ed   : > { %11501 = vmatmul.mubr.bf16.gmra.mrb[28].mxu1 %v20051_v28  ;;  %v20147_v28 = vld [vmem:[#allocation2 + $0x17b0] ss:$200 sps:$4 sm:$0xff]  }
 0x4ee   : > { %13897 = vmatmul.mubr.bf16.gmra.mrb[60].mxu0 %v20055_v29  ;;  %11510 = vmatprep.mubr.bf16.mxu1 %v20059_v30  ;;  %v20151_v29 = vld [vmem:[#allocation2 + $0xb98] ss:$200 sps:$4 sm:$0xff]   ;;  %v20157_v30 = vld [vmem:[#allocation2 + $0x4c] ss:$200 sps:$4 sm:$0xff]  }
 0x4ef   : > { %13939 = vmatprep.mubr.bf16.mxu0 %v20063_v31  ;;  %11620 = vmatpush1.bf16.msra.mxu1 %v20136_v32  ;;  %v20158_v31 = vld [vmem:[#allocation2 + $0xd2c] ss:$200 sps:$4 sm:$0xff]   ;;  %v20236_v32 = vld [vmem:[%s21119_s25 + $0x16e0] ss:$8 sps:$4 sm:$0xff]  }
 0x4f0   : > { %11621 = vmatprep.subr.bf16.mxu1 %v20150_v33  ;;  %v20250_v33 = vld [vmem:[%s21119_s25 + $0x16f4] ss:$8 sps:$4 sm:$0xff]  }
 0x4f3   : > { %11622 = vmatpush1.bf16.msra.mxu1 %v20148_v34  ;;  %v20248_v34 = vld [vmem:[%s21119_s25 + $0x16f0] ss:$8 sps:$4 sm:$0xff]  }
 0x4f4   : > { %11784 = vmatprep.subr.bf16.mxu1 %v20162_v35  ;;  %v20262_v35 = vld [vmem:[%s21119_s25 + $0x1704] ss:$8 sps:$4 sm:$0xff]  }
 0x4f5   : > { %11511 = vmatmul.mubr.bf16.gmra.mrb[32].mxu1 %v20064_v37  ;;  %v20163_v37 = vld [vmem:[#allocation2 + $0xd28] ss:$200 sps:$4 sm:$0xff]  }
 0x4f6   : > { %13940 = vmatmul.mubr.bf16.vlgmr.msra.gmra.mrb[0].mxu0 %v20061_v36  ;;  %11520 = vmatprep.mubr.bf16.mxu1 %v20071_v39  ;;  %v20155_v36 = vld [vmem:[#allocation2 + $0x48] ss:$200 sps:$4 sm:$0xff]   ;;  %v20167_v39 = vld [vmem:[#allocation2 + $0x1dc] ss:$200 sps:$4 sm:$0xff]  }
 0x4f7   : > { %14101 = vmatpush1.bf16.msra.mxu0 %v20068_v38  ;;  %13949 = vmatprep.mubr.bf16.mxu0 %v20073_v40  ;;  %v20160_v38 = vld [vmem:[%s21119_s25 + $0xa00] ss:$8 sps:$4 sm:$0xff]   ;;  %v20169_v40 = vld [vmem:[#allocation2 + $0xebc] ss:$200 sps:$4 sm:$0xff]  }
 0x4f8   : > { %14102 = vmatprep.subr.bf16.mxu0 %v20082_v41  ;;  %v20174_v41 = vld [vmem:[%s21119_s25 + $0xa14] ss:$8 sps:$4 sm:$0xff]  }
 0x4fb   : > { %14103 = vmatpush1.bf16.msra.mxu0 %v20080_v42  ;;  %v20172_v42 = vld [vmem:[%s21119_s25 + $0xa10] ss:$8 sps:$4 sm:$0xff]  }
 0x4fc   : > { %14104 = vmatprep.subr.bf16.mxu0 %v20094_v43  ;;  %v20186_v43 = vld [vmem:[%s21119_s25 + $0xa24] ss:$8 sps:$4 sm:$0xff]  }
 0x4fd   : > { %11521 = vmatmul.mubr.bf16.gmra.mrb[36].mxu1 %v20075_v44  ;;  %v20171_v44 = vld [vmem:[#allocation2 + $0x1d8] ss:$200 sps:$4 sm:$0xff]  }
 0x4fe   : > { %13950 = vmatmul.mubr.bf16.gmra.mrb[4].mxu0 %v20079_v45  ;;  %11530 = vmatprep.mubr.bf16.mxu1 %v20083_v46  ;;  %v20175_v45 = vld [vmem:[#allocation2 + $0xeb8] ss:$200 sps:$4 sm:$0xff]   ;;  %v20179_v46 = vld [vmem:[#allocation2 + $0x36c] ss:$200 sps:$4 sm:$0xff]  }
 0x4ff   : > { %13959 = vmatprep.mubr.bf16.mxu0 %v20085_v47  ;;  %14105 = vmatpush1.bf16.msra.mxu0 %v20092_v48  ;;  %v20181_v47 = vld [vmem:[#allocation2 + $0x104c] ss:$200 sps:$4 sm:$0xff]   ;;  %v20184_v48 = vld [vmem:[%s21119_s25 + $0xa20] ss:$8 sps:$4 sm:$0xff]  }
 0x500   : > { %14106 = vmatprep.subr.bf16.mxu0 %v20106_v49  ;;  %v20198_v49 = vld [vmem:[%s21119_s25 + $0xa34] ss:$8 sps:$4 sm:$0xff]  }
 0x503   : > { %14107 = vmatpush1.bf16.msra.mxu0 %v20104_v50  ;;  %v20196_v50 = vld [vmem:[%s21119_s25 + $0xa30] ss:$8 sps:$4 sm:$0xff]  }
 0x504   : > { %14108 = vmatprep.subr.bf16.mxu0 %v20118_v51  ;;  %v20210_v51 = vld [vmem:[%s21119_s25 + $0xa44] ss:$8 sps:$4 sm:$0xff]  }
 0x505   : > { %11531 = vmatmul.mubr.bf16.gmra.mrb[40].mxu1 %v20087_v52  ;;  %v20183_v52 = vld [vmem:[#allocation2 + $0x368] ss:$200 sps:$4 sm:$0xff]  }
 0x506   : > { %13960 = vmatmul.mubr.bf16.gmra.mrb[8].mxu0 %v20091_v53  ;;  %11540 = vmatprep.mubr.bf16.mxu1 %v20095_v54  ;;  %v20187_v53 = vld [vmem:[#allocation2 + $0x1048] ss:$200 sps:$4 sm:$0xff]   ;;  %v20191_v54 = vld [vmem:[#allocation2 + $0x4fc] ss:$200 sps:$4 sm:$0xff]  }
 0x507   : > { %13969 = vmatprep.mubr.bf16.mxu0 %v20097_v55  ;;  %14109 = vmatpush1.bf16.msra.mxu0 %v20116_v56  ;;  %v20193_v55 = vld [vmem:[#allocation2 + $0x11dc] ss:$200 sps:$4 sm:$0xff]   ;;  %v20208_v56 = vld [vmem:[%s21119_s25 + $0xa40] ss:$8 sps:$4 sm:$0xff]  }
 0x508   : > { %14110 = vmatprep.subr.bf16.mxu0 %v20130_v57  ;;  %v20222_v57 = vld [vmem:[%s21119_s25 + $0xa54] ss:$8 sps:$4 sm:$0xff]  }
 0x50b   : > { %14111 = vmatpush1.bf16.msra.mxu0 %v20128_v58  ;;  %v20220_v58 = vld [vmem:[%s21119_s25 + $0xa50] ss:$8 sps:$4 sm:$0xff]  }
 0x50c   : > { %14112 = vmatprep.subr.bf16.mxu0 %v20142_v59  ;;  %v20234_v59 = vld [vmem:[%s21119_s25 + $0xa64] ss:$8 sps:$4 sm:$0xff]  }
 0x50d   : > { %11541 = vmatmul.mubr.bf16.gmra.mrb[44].mxu1 %v20099_v60  ;;  %v20195_v60 = vld [vmem:[#allocation2 + $0x4f8] ss:$200 sps:$4 sm:$0xff]  }
 0x50e   : > { %13970 = vmatmul.mubr.bf16.gmra.mrb[12].mxu0 %v20103_v61  ;;  %11550 = vmatprep.mubr.bf16.mxu1 %v20107_v62  ;;  %v20199_v61 = vld [vmem:[#allocation2 + $0x11d8] ss:$200 sps:$4 sm:$0xff]   ;;  %v20203_v62 = vld [vmem:[#allocation2 + $0x68c] ss:$200 sps:$4 sm:$0xff]  }
 0x50f   : > { %13979 = vmatprep.mubr.bf16.mxu0 %v20109_v63  ;;  %14113 = vmatpush1.bf16.msra.mxu0 %v20140_v0  ;;  %v20205_v63 = vld [vmem:[#allocation2 + $0x136c] ss:$200 sps:$4 sm:$0xff]   ;;  %v20232_v0 = vld [vmem:[%s21119_s25 + $0xa60] ss:$8 sps:$4 sm:$0xff]  }
 0x510   : > { %14114 = vmatprep.subr.bf16.mxu0 %v20154_v1  ;;  %v20246_v1 = vld [vmem:[%s21119_s25 + $0xa74] ss:$8 sps:$4 sm:$0xff]  }
 0x513   : > { %14115 = vmatpush1.bf16.msra.mxu0 %v20152_v2  ;;  %v20244_v2 = vld [vmem:[%s21119_s25 + $0xa70] ss:$8 sps:$4 sm:$0xff]  }
 0x514   : > { %14116 = vmatprep.subr.bf16.mxu0 %v20166_v3  ;;  %v20259_v3 = vld [vmem:[%s21119_s25 + $0xa84] ss:$8 sps:$4 sm:$0xff]  }
 0x515   : > { %11551 = vmatmul.mubr.bf16.gmra.mrb[48].mxu1 %v20111_v4  ;;  %v20207_v4 = vld [vmem:[#allocation2 + $0x688] ss:$200 sps:$4 sm:$0xff]  }
 0x516   : > { %13980 = vmatmul.mubr.bf16.gmra.mrb[16].mxu0 %v20115_v5  ;;  %11560 = vmatprep.mubr.bf16.mxu1 %v20119_v6  ;;  %v20211_v5 = vld [vmem:[#allocation2 + $0x1368] ss:$200 sps:$4 sm:$0xff]   ;;  %v20215_v6 = vld [vmem:[#allocation2 + $0x81c] ss:$200 sps:$4 sm:$0xff]  }
 0x517   : > { %13989 = vmatprep.mubr.bf16.mxu0 %v20121_v7  ;;  %14117 = vmatpush1.bf16.msra.mxu0 %v20164_v8  ;;  %v20217_v7 = vld [vmem:[#allocation2 + $0x14fc] ss:$200 sps:$4 sm:$0xff]   ;;  %v20257_v8 = vld [vmem:[%s21119_s25 + $0xa80] ss:$8 sps:$4 sm:$0xff]  }
 0x518   : > { %14118 = vmatprep.subr.bf16.mxu0 %v20178_v9  ;;  %v20270_v9 = vld [vmem:[%s21119_s25 + $0xa94] ss:$8 sps:$4 sm:$0xff]  }
 0x51b   : > { %14119 = vmatpush1.bf16.msra.mxu0 %v20176_v10  ;;  %v20268_v10 = vld [vmem:[%s21119_s25 + $0xa90] ss:$8 sps:$4 sm:$0xff]  }
 0x51c   : > { %14120 = vmatprep.subr.bf16.mxu0 %v20190_v11  ;;  %v20282_v11 = vld [vmem:[%s21119_s25 + $0xaa4] ss:$8 sps:$4 sm:$0xff]  }
 0x51d   : > { %11561 = vmatmul.mubr.bf16.gmra.mrb[52].mxu1 %v20123_v12  ;;  %v20219_v12 = vld [vmem:[#allocation2 + $0x818] ss:$200 sps:$4 sm:$0xff]  }
 0x51e   : > { %13990 = vmatmul.mubr.bf16.gmra.mrb[20].mxu0 %v20127_v13  ;;  %11570 = vmatprep.mubr.bf16.mxu1 %v20131_v14  ;;  %v20223_v13 = vld [vmem:[#allocation2 + $0x14f8] ss:$200 sps:$4 sm:$0xff]   ;;  %v20227_v14 = vld [vmem:[#allocation2 + $0x9ac] ss:$200 sps:$4 sm:$0xff]  }
 0x51f   : > { %13999 = vmatprep.mubr.bf16.mxu0 %v20133_v15  ;;  %14121 = vmatpush1.bf16.msra.mxu0 %v20188_v16  ;;  %v20229_v15 = vld [vmem:[#allocation2 + $0x168c] ss:$200 sps:$4 sm:$0xff]   ;;  %v20280_v16 = vld [vmem:[%s21119_s25 + $0xaa0] ss:$8 sps:$4 sm:$0xff]  }
 0x520   : > { %14122 = vmatprep.subr.bf16.mxu0 %v20202_v17  ;;  %v20294_v17 = vld [vmem:[%s21119_s25 + $0xab4] ss:$8 sps:$4 sm:$0xff]  }
 0x523   : > { %14123 = vmatpush1.bf16.msra.mxu0 %v20200_v18  ;;  %v20292_v18 = vld [vmem:[%s21119_s25 + $0xab0] ss:$8 sps:$4 sm:$0xff]  }
 0x524   : > { %14124 = vmatprep.subr.bf16.mxu0 %v20214_v19  ;;  %v20306_v19 = vld [vmem:[%s21119_s25 + $0xac4] ss:$8 sps:$4 sm:$0xff]  }
 0x525   : > { %11571 = vmatmul.mubr.bf16.gmra.mrb[56].mxu1 %v20135_v20  ;;  %v20231_v20 = vld [vmem:[#allocation2 + $0x9a8] ss:$200 sps:$4 sm:$0xff]  }
 0x526   : > { %14000 = vmatmul.mubr.bf16.gmra.mrb[24].mxu0 %v20139_v21  ;;  %11580 = vmatprep.mubr.bf16.mxu1 %v20143_v22  ;;  %v20235_v21 = vld [vmem:[#allocation2 + $0x1688] ss:$200 sps:$4 sm:$0xff]   ;;  %v20239_v22 = vld [vmem:[#allocation2 + $0xb3c] ss:$200 sps:$4 sm:$0xff]  }
 0x527   : > { %14009 = vmatprep.mubr.bf16.mxu0 %v20145_v23  ;;  %14125 = vmatpush1.bf16.msra.mxu0 %v20212_v24  ;;  %v20241_v23 = vld [vmem:[#allocation2 + $0x181c] ss:$200 sps:$4 sm:$0xff]   ;;  %v20304_v24 = vld [vmem:[%s21119_s25 + $0xac0] ss:$8 sps:$4 sm:$0xff]  }
 0x528   : > { %14126 = vmatprep.subr.bf16.mxu0 %v20226_v25  ;;  %v20318_v25 = vld [vmem:[%s21119_s25 + $0xad4] ss:$8 sps:$4 sm:$0xff]  }
 0x52b   : > { %14127 = vmatpush1.bf16.msra.mxu0 %v20224_v26  ;;  %v20316_v26 = vld [vmem:[%s21119_s25 + $0xad0] ss:$8 sps:$4 sm:$0xff]  }
 0x52c   : > { %14128 = vmatprep.subr.bf16.mxu0 %v20238_v27  ;;  %v20330_v27 = vld [vmem:[%s21119_s25 + $0xae4] ss:$8 sps:$4 sm:$0xff]  }
 0x52d   : > { %11581 = vmatmul.mubr.bf16.gmra.mrb[60].mxu1 %v20147_v28  ;;  %v20243_v28 = vld [vmem:[#allocation2 + $0xb38] ss:$200 sps:$4 sm:$0xff]  }
 0x52e   : > { %14010 = vmatmul.mubr.bf16.gmra.mrb[28].mxu0 %v20151_v29  ;;  %11623 = vmatprep.mubr.bf16.mxu1 %v20157_v30  ;;  %v20247_v29 = vld [vmem:[#allocation2 + $0x1818] ss:$200 sps:$4 sm:$0xff]   ;;  %v20251_v30 = vld [vmem:[#allocation2 + $0xccc] ss:$200 sps:$4 sm:$0xff]  }
 0x52f   : > { %14019 = vmatprep.mubr.bf16.mxu0 %v20158_v31  ;;  %14129 = vmatpush1.bf16.msra.mxu0 %v20236_v32  ;;  %v20255_v31 = vld [vmem:[#allocation2 + $0xb4] ss:$200 sps:$4 sm:$0xff]   ;;  %v20328_v32 = vld [vmem:[%s21119_s25 + $0xae0] ss:$8 sps:$4 sm:$0xff]  }
 0x530   : > { %14130 = vmatprep.subr.bf16.mxu0 %v20250_v33  ;;  %v20342_v33 = vld [vmem:[%s21119_s25 + $0xaf4] ss:$8 sps:$4 sm:$0xff]  }
 0x533   : > { %14131 = vmatpush1.bf16.msra.mxu0 %v20248_v34  ;;  %v20340_v34 = vld [vmem:[%s21119_s25 + $0xaf0] ss:$8 sps:$4 sm:$0xff]  }
 0x534   : > { %14293 = vmatprep.subr.bf16.mxu0 %v20262_v35  ;;  %v20354_v35 = vld [vmem:[%s21119_s25 + $0xb04] ss:$8 sps:$4 sm:$0xff]  }
 0x535   : > { %11624 = vmatmul.mubr.bf16.vlgmr.msra.gmra.mrb[0].mxu1 %v20155_v36  ;;  %v20253_v36 = vld [vmem:[#allocation2 + $0xb0] ss:$200 sps:$4 sm:$0xff]  }
 0x536   : > { %14020 = vmatmul.mubr.bf16.gmra.mrb[32].mxu0 %v20163_v37  ;;  %11785 = vmatpush1.bf16.msra.mxu1 %v20160_v38  ;;  %v20256_v37 = vld [vmem:[#allocation2 + $0xcc8] ss:$200 sps:$4 sm:$0xff]  }
 0x537   : > { %11633 = vmatprep.mubr.bf16.mxu1 %v20167_v39  ;;  %14029 = vmatprep.mubr.bf16.mxu0 %v20169_v40  ;;  %v20260_v38 = vld [vmem:[%s21119_s25 + $0x1700] ss:$8 sps:$4 sm:$0xff]   ;;  %v20263_v39 = vld [vmem:[#allocation2 + $0xe5c] ss:$200 sps:$4 sm:$0xff]  }
 0x538   : > { %11786 = vmatprep.subr.bf16.mxu1 %v20174_v41  ;;  %v20265_v40 = vld [vmem:[#allocation2 + $0x244] ss:$200 sps:$4 sm:$0xff]   ;;  %v20274_v41 = vld [vmem:[%s21119_s25 + $0x1714] ss:$8 sps:$4 sm:$0xff]  }
 0x53a   : > { %11787 = vmatpush1.bf16.msra.mxu1 %v20172_v42  ;;  %v20272_v42 = vld [vmem:[%s21119_s25 + $0x1710] ss:$8 sps:$4 sm:$0xff]  }
 0x53b   : > { %11788 = vmatprep.subr.bf16.mxu1 %v20186_v43  ;;  %v20286_v43 = vld [vmem:[%s21119_s25 + $0x1724] ss:$8 sps:$4 sm:$0xff]  }
 0x53d   : > { %11634 = vmatmul.mubr.bf16.gmra.mrb[4].mxu1 %v20171_v44  ;;  %v20267_v44 = vld [vmem:[#allocation2 + $0xe58] ss:$200 sps:$4 sm:$0xff]  }
 0x53e   : > { %14030 = vmatmul.mubr.bf16.gmra.mrb[36].mxu0 %v20175_v45  ;;  %11643 = vmatprep.mubr.bf16.mxu1 %v20179_v46  ;;  %v20271_v45 = vld [vmem:[#allocation2 + $0x240] ss:$200 sps:$4 sm:$0xff]   ;;  %v20275_v46 = vld [vmem:[#allocation2 + $0xfec] ss:$200 sps:$4 sm:$0xff]  }
 0x53f   : > { %14039 = vmatprep.mubr.bf16.mxu0 %v20181_v47  ;;  %11789 = vmatpush1.bf16.msra.mxu1 %v20184_v48  ;;  %v20277_v47 = vld [vmem:[#allocation2 + $0x3d4] ss:$200 sps:$4 sm:$0xff]   ;;  %v20284_v48 = vld [vmem:[%s21119_s25 + $0x1720] ss:$8 sps:$4 sm:$0xff]  }
 0x540   : > { %11790 = vmatprep.subr.bf16.mxu1 %v20198_v49  ;;  %v20298_v49 = vld [vmem:[%s21119_s25 + $0x1734] ss:$8 sps:$4 sm:$0xff]  }
 0x543   : > { %11791 = vmatpush1.bf16.msra.mxu1 %v20196_v50  ;;  %v20296_v50 = vld [vmem:[%s21119_s25 + $0x1730] ss:$8 sps:$4 sm:$0xff]  }
 0x544   : > { %11792 = vmatprep.subr.bf16.mxu1 %v20210_v51  ;;  %v20310_v51 = vld [vmem:[%s21119_s25 + $0x1744] ss:$8 sps:$4 sm:$0xff]  }
 0x545   : > { %11644 = vmatmul.mubr.bf16.gmra.mrb[8].mxu1 %v20183_v52  ;;  %v20279_v52 = vld [vmem:[#allocation2 + $0xfe8] ss:$200 sps:$4 sm:$0xff]  }
 0x546   : > { %14040 = vmatmul.mubr.bf16.gmra.mrb[40].mxu0 %v20187_v53  ;;  %11653 = vmatprep.mubr.bf16.mxu1 %v20191_v54  ;;  %v20283_v53 = vld [vmem:[#allocation2 + $0x3d0] ss:$200 sps:$4 sm:$0xff]   ;;  %v20287_v54 = vld [vmem:[#allocation2 + $0x117c] ss:$200 sps:$4 sm:$0xff]  }
 0x547   : > { %14049 = vmatprep.mubr.bf16.mxu0 %v20193_v55  ;;  %11793 = vmatpush1.bf16.msra.mxu1 %v20208_v56  ;;  %v20289_v55 = vld [vmem:[#allocation2 + $0x564] ss:$200 sps:$4 sm:$0xff]   ;;  %v20308_v56 = vld [vmem:[%s21119_s25 + $0x1740] ss:$8 sps:$4 sm:$0xff]  }
 0x548   : > { %11794 = vmatprep.subr.bf16.mxu1 %v20222_v57  ;;  %v20322_v57 = vld [vmem:[%s21119_s25 + $0x1754] ss:$8 sps:$4 sm:$0xff]  }
 0x54b   : > { %11795 = vmatpush1.bf16.msra.mxu1 %v20220_v58  ;;  %v20320_v58 = vld [vmem:[%s21119_s25 + $0x1750] ss:$8 sps:$4 sm:$0xff]  }
 0x54c   : > { %11796 = vmatprep.subr.bf16.mxu1 %v20234_v59  ;;  %v20334_v59 = vld [vmem:[%s21119_s25 + $0x1764] ss:$8 sps:$4 sm:$0xff]  }
 0x54d   : > { %11654 = vmatmul.mubr.bf16.gmra.mrb[12].mxu1 %v20195_v60  ;;  %v20291_v60 = vld [vmem:[#allocation2 + $0x1178] ss:$200 sps:$4 sm:$0xff]  }
 0x54e   : > { %14050 = vmatmul.mubr.bf16.gmra.mrb[44].mxu0 %v20199_v61  ;;  %11663 = vmatprep.mubr.bf16.mxu1 %v20203_v62  ;;  %v20295_v61 = vld [vmem:[#allocation2 + $0x560] ss:$200 sps:$4 sm:$0xff]   ;;  %v20299_v62 = vld [vmem:[#allocation2 + $0x130c] ss:$200 sps:$4 sm:$0xff]  }
 0x54f   : > { %14059 = vmatprep.mubr.bf16.mxu0 %v20205_v63  ;;  %11797 = vmatpush1.bf16.msra.mxu1 %v20232_v0  ;;  %v20301_v63 = vld [vmem:[#allocation2 + $0x6f4] ss:$200 sps:$4 sm:$0xff]   ;;  %v20332_v0 = vld [vmem:[%s21119_s25 + $0x1760] ss:$8 sps:$4 sm:$0xff]  }
 0x550   : > { %11798 = vmatprep.subr.bf16.mxu1 %v20246_v1  ;;  %v20346_v1 = vld [vmem:[%s21119_s25 + $0x1774] ss:$8 sps:$4 sm:$0xff]  }
 0x553   : > { %11799 = vmatpush1.bf16.msra.mxu1 %v20244_v2  ;;  %v20344_v2 = vld [vmem:[%s21119_s25 + $0x1770] ss:$8 sps:$4 sm:$0xff]  }
 0x554   : > { %11800 = vmatprep.subr.bf16.mxu1 %v20259_v3  ;;  %v20358_v3 = vld [vmem:[%s21119_s25 + $0x1784] ss:$8 sps:$4 sm:$0xff]  }
 0x555   : > { %11664 = vmatmul.mubr.bf16.gmra.mrb[16].mxu1 %v20207_v4  ;;  %v20303_v4 = vld [vmem:[#allocation2 + $0x1308] ss:$200 sps:$4 sm:$0xff]  }
 0x556   : > { %14060 = vmatmul.mubr.bf16.gmra.mrb[48].mxu0 %v20211_v5  ;;  %11673 = vmatprep.mubr.bf16.mxu1 %v20215_v6  ;;  %v20307_v5 = vld [vmem:[#allocation2 + $0x6f0] ss:$200 sps:$4 sm:$0xff]   ;;  %v20311_v6 = vld [vmem:[#allocation2 + $0x149c] ss:$200 sps:$4 sm:$0xff]  }
 0x557   : > { %14069 = vmatprep.mubr.bf16.mxu0 %v20217_v7  ;;  %11801 = vmatpush1.bf16.msra.mxu1 %v20257_v8  ;;  %v20313_v7 = vld [vmem:[#allocation2 + $0x884] ss:$200 sps:$4 sm:$0xff]   ;;  %v20356_v8 = vld [vmem:[%s21119_s25 + $0x1780] ss:$8 sps:$4 sm:$0xff]  }
 0x558   : > { %11802 = vmatprep.subr.bf16.mxu1 %v20270_v9  ;;  %v20370_v9 = vld [vmem:[%s21119_s25 + $0x1794] ss:$8 sps:$4 sm:$0xff]  }
 0x55b   : > { %11803 = vmatpush1.bf16.msra.mxu1 %v20268_v10  ;;  %v20368_v10 = vld [vmem:[%s21119_s25 + $0x1790] ss:$8 sps:$4 sm:$0xff]  }
 0x55c   : > { %11804 = vmatprep.subr.bf16.mxu1 %v20282_v11  ;;  %v20382_v11 = vld [vmem:[%s21119_s25 + $0x17a4] ss:$8 sps:$4 sm:$0xff]  }
 0x55d   : > { %11674 = vmatmul.mubr.bf16.gmra.mrb[20].mxu1 %v20219_v12  ;;  %v20315_v12 = vld [vmem:[#allocation2 + $0x1498] ss:$200 sps:$4 sm:$0xff]  }
 0x55e   : > { %14070 = vmatmul.mubr.bf16.gmra.mrb[52].mxu0 %v20223_v13  ;;  %11683 = vmatprep.mubr.bf16.mxu1 %v20227_v14  ;;  %v20319_v13 = vld [vmem:[#allocation2 + $0x880] ss:$200 sps:$4 sm:$0xff]   ;;  %v20323_v14 = vld [vmem:[#allocation2 + $0x162c] ss:$200 sps:$4 sm:$0xff]  }
 0x55f   : > { %14079 = vmatprep.mubr.bf16.mxu0 %v20229_v15  ;;  %11805 = vmatpush1.bf16.msra.mxu1 %v20280_v16  ;;  %v20325_v15 = vld [vmem:[#allocation2 + $0xa14] ss:$200 sps:$4 sm:$0xff]   ;;  %v20380_v16 = vld [vmem:[%s21119_s25 + $0x17a0] ss:$8 sps:$4 sm:$0xff]  }
 0x560   : > { %11806 = vmatprep.subr.bf16.mxu1 %v20294_v17  ;;  %v20394_v17 = vld [vmem:[%s21119_s25 + $0x17b4] ss:$8 sps:$4 sm:$0xff]  }
 0x563   : > { %11807 = vmatpush1.bf16.msra.mxu1 %v20292_v18  ;;  %v20392_v18 = vld [vmem:[%s21119_s25 + $0x17b0] ss:$8 sps:$4 sm:$0xff]  }
 0x564   : > { %11808 = vmatprep.subr.bf16.mxu1 %v20306_v19  ;;  %v20406_v19 = vld [vmem:[%s21119_s25 + $0x17c4] ss:$8 sps:$4 sm:$0xff]  }
 0x565   : > { %11684 = vmatmul.mubr.bf16.gmra.mrb[24].mxu1 %v20231_v20  ;;  %v20327_v20 = vld [vmem:[#allocation2 + $0x1628] ss:$200 sps:$4 sm:$0xff]  }
 0x566   : > { %14080 = vmatmul.mubr.bf16.gmra.mrb[56].mxu0 %v20235_v21  ;;  %11693 = vmatprep.mubr.bf16.mxu1 %v20239_v22  ;;  %v20331_v21 = vld [vmem:[#allocation2 + $0xa10] ss:$200 sps:$4 sm:$0xff]   ;;  %v20335_v22 = vld [vmem:[#allocation2 + $0x17bc] ss:$200 sps:$4 sm:$0xff]  }
 0x567   : > { %14089 = vmatprep.mubr.bf16.mxu0 %v20241_v23  ;;  %11809 = vmatpush1.bf16.msra.mxu1 %v20304_v24  ;;  %v20337_v23 = vld [vmem:[#allocation2 + $0xba4] ss:$200 sps:$4 sm:$0xff]   ;;  %v20404_v24 = vld [vmem:[%s21119_s25 + $0x17c0] ss:$8 sps:$4 sm:$0xff]  }
 0x568   : > { %11810 = vmatprep.subr.bf16.mxu1 %v20318_v25  ;;  %v20418_v25 = vld [vmem:[%s21119_s25 + $0x17d4] ss:$8 sps:$4 sm:$0xff]  }
 0x56b   : > { %11811 = vmatpush1.bf16.msra.mxu1 %v20316_v26  ;;  %v20416_v26 = vld [vmem:[%s21119_s25 + $0x17d0] ss:$8 sps:$4 sm:$0xff]  }
 0x56c   : > { %11812 = vmatprep.subr.bf16.mxu1 %v20330_v27  ;;  %v20430_v27 = vld [vmem:[%s21119_s25 + $0x17e4] ss:$8 sps:$4 sm:$0xff]  }
 0x56d   : > { %11694 = vmatmul.mubr.bf16.gmra.mrb[28].mxu1 %v20243_v28  ;;  %v20339_v28 = vld [vmem:[#allocation2 + $0x17b8] ss:$200 sps:$4 sm:$0xff]  }
 0x56e   : > { %14090 = vmatmul.mubr.bf16.gmra.mrb[60].mxu0 %v20247_v29  ;;  %11703 = vmatprep.mubr.bf16.mxu1 %v20251_v30  ;;  %v20343_v29 = vld [vmem:[#allocation2 + $0xba0] ss:$200 sps:$4 sm:$0xff]   ;;  %v20349_v30 = vld [vmem:[#allocation2 + $0x54] ss:$200 sps:$4 sm:$0xff]  }
 0x56f   : > { %14132 = vmatprep.mubr.bf16.mxu0 %v20255_v31  ;;  %11813 = vmatpush1.bf16.msra.mxu1 %v20328_v32  ;;  %v20350_v31 = vld [vmem:[#allocation2 + $0xd34] ss:$200 sps:$4 sm:$0xff]   ;;  %v20428_v32 = vld [vmem:[%s21119_s25 + $0x17e0] ss:$8 sps:$4 sm:$0xff]  }
 0x570   : > { %11814 = vmatprep.subr.bf16.mxu1 %v20342_v33  ;;  %v20442_v33 = vld [vmem:[%s21119_s25 + $0x17f4] ss:$8 sps:$4 sm:$0xff]  }
 0x573   : > { %11815 = vmatpush1.bf16.msra.mxu1 %v20340_v34  ;;  %v20440_v34 = vld [vmem:[%s21119_s25 + $0x17f0] ss:$8 sps:$4 sm:$0xff]  }
 0x574   : > { %11977 = vmatprep.subr.bf16.mxu1 %v20354_v35  ;;  %v20454_v35 = vld [vmem:[%s21119_s25 + $0x1804] ss:$8 sps:$4 sm:$0xff]  }
 0x575   : > { %11704 = vmatmul.mubr.bf16.gmra.mrb[32].mxu1 %v20256_v37  ;;  %v20355_v37 = vld [vmem:[#allocation2 + $0xd30] ss:$200 sps:$4 sm:$0xff]  }
 0x576   : > { %14133 = vmatmul.mubr.bf16.vlgmr.msra.gmra.mrb[0].mxu0 %v20253_v36  ;;  %11713 = vmatprep.mubr.bf16.mxu1 %v20263_v39  ;;  %v20347_v36 = vld [vmem:[#allocation2 + $0x50] ss:$200 sps:$4 sm:$0xff]   ;;  %v20359_v39 = vld [vmem:[#allocation2 + $0x1e4] ss:$200 sps:$4 sm:$0xff]  }
 0x577   : > { %14294 = vmatpush1.bf16.msra.mxu0 %v20260_v38  ;;  %14142 = vmatprep.mubr.bf16.mxu0 %v20265_v40  ;;  %v20352_v38 = vld [vmem:[%s21119_s25 + $0xb00] ss:$8 sps:$4 sm:$0xff]   ;;  %v20361_v40 = vld [vmem:[#allocation2 + $0xec4] ss:$200 sps:$4 sm:$0xff]  }
 0x578   : > { %14295 = vmatprep.subr.bf16.mxu0 %v20274_v41  ;;  %v20366_v41 = vld [vmem:[%s21119_s25 + $0xb14] ss:$8 sps:$4 sm:$0xff]  }
 0x57b   : > { %14296 = vmatpush1.bf16.msra.mxu0 %v20272_v42  ;;  %v20364_v42 = vld [vmem:[%s21119_s25 + $0xb10] ss:$8 sps:$4 sm:$0xff]  }
 0x57c   : > { %14297 = vmatprep.subr.bf16.mxu0 %v20286_v43  ;;  %v20378_v43 = vld [vmem:[%s21119_s25 + $0xb24] ss:$8 sps:$4 sm:$0xff]  }
 0x57d   : > { %11714 = vmatmul.mubr.bf16.gmra.mrb[36].mxu1 %v20267_v44  ;;  %v20363_v44 = vld [vmem:[#allocation2 + $0x1e0] ss:$200 sps:$4 sm:$0xff]  }
 0x57e   : > { %14143 = vmatmul.mubr.bf16.gmra.mrb[4].mxu0 %v20271_v45  ;;  %11723 = vmatprep.mubr.bf16.mxu1 %v20275_v46  ;;  %v20367_v45 = vld [vmem:[#allocation2 + $0xec0] ss:$200 sps:$4 sm:$0xff]   ;;  %v20371_v46 = vld [vmem:[#allocation2 + $0x374] ss:$200 sps:$4 sm:$0xff]  }
 0x57f   : > { %14152 = vmatprep.mubr.bf16.mxu0 %v20277_v47  ;;  %14298 = vmatpush1.bf16.msra.mxu0 %v20284_v48  ;;  %v20373_v47 = vld [vmem:[#allocation2 + $0x1054] ss:$200 sps:$4 sm:$0xff]   ;;  %v20376_v48 = vld [vmem:[%s21119_s25 + $0xb20] ss:$8 sps:$4 sm:$0xff]  }
 0x580   : > { %14299 = vmatprep.subr.bf16.mxu0 %v20298_v49  ;;  %v20390_v49 = vld [vmem:[%s21119_s25 + $0xb34] ss:$8 sps:$4 sm:$0xff]  }
 0x583   : > { %14300 = vmatpush1.bf16.msra.mxu0 %v20296_v50  ;;  %v20388_v50 = vld [vmem:[%s21119_s25 + $0xb30] ss:$8 sps:$4 sm:$0xff]  }
 0x584   : > { %14301 = vmatprep.subr.bf16.mxu0 %v20310_v51  ;;  %v20402_v51 = vld [vmem:[%s21119_s25 + $0xb44] ss:$8 sps:$4 sm:$0xff]  }
 0x585   : > { %11724 = vmatmul.mubr.bf16.gmra.mrb[40].mxu1 %v20279_v52  ;;  %v20375_v52 = vld [vmem:[#allocation2 + $0x370] ss:$200 sps:$4 sm:$0xff]  }
 0x586   : > { %14153 = vmatmul.mubr.bf16.gmra.mrb[8].mxu0 %v20283_v53  ;;  %11733 = vmatprep.mubr.bf16.mxu1 %v20287_v54  ;;  %v20379_v53 = vld [vmem:[#allocation2 + $0x1050] ss:$200 sps:$4 sm:$0xff]   ;;  %v20383_v54 = vld [vmem:[#allocation2 + $0x504] ss:$200 sps:$4 sm:$0xff]  }
 0x587   : > { %14162 = vmatprep.mubr.bf16.mxu0 %v20289_v55  ;;  %14302 = vmatpush1.bf16.msra.mxu0 %v20308_v56  ;;  %v20385_v55 = vld [vmem:[#allocation2 + $0x11e4] ss:$200 sps:$4 sm:$0xff]   ;;  %v20400_v56 = vld [vmem:[%s21119_s25 + $0xb40] ss:$8 sps:$4 sm:$0xff]  }
 0x588   : > { %14303 = vmatprep.subr.bf16.mxu0 %v20322_v57  ;;  %v20414_v57 = vld [vmem:[%s21119_s25 + $0xb54] ss:$8 sps:$4 sm:$0xff]  }
 0x58b   : > { %14304 = vmatpush1.bf16.msra.mxu0 %v20320_v58  ;;  %v20412_v58 = vld [vmem:[%s21119_s25 + $0xb50] ss:$8 sps:$4 sm:$0xff]  }
 0x58c   : > { %14305 = vmatprep.subr.bf16.mxu0 %v20334_v59  ;;  %v20426_v59 = vld [vmem:[%s21119_s25 + $0xb64] ss:$8 sps:$4 sm:$0xff]  }
 0x58d   : > { %11734 = vmatmul.mubr.bf16.gmra.mrb[44].mxu1 %v20291_v60  ;;  %v20387_v60 = vld [vmem:[#allocation2 + $0x500] ss:$200 sps:$4 sm:$0xff]  }
 0x58e   : > { %14163 = vmatmul.mubr.bf16.gmra.mrb[12].mxu0 %v20295_v61  ;;  %11743 = vmatprep.mubr.bf16.mxu1 %v20299_v62  ;;  %v20391_v61 = vld [vmem:[#allocation2 + $0x11e0] ss:$200 sps:$4 sm:$0xff]   ;;  %v20395_v62 = vld [vmem:[#allocation2 + $0x694] ss:$200 sps:$4 sm:$0xff]  }
 0x58f   : > { %14172 = vmatprep.mubr.bf16.mxu0 %v20301_v63  ;;  %14306 = vmatpush1.bf16.msra.mxu0 %v20332_v0  ;;  %v20397_v63 = vld [vmem:[#allocation2 + $0x1374] ss:$200 sps:$4 sm:$0xff]   ;;  %v20424_v0 = vld [vmem:[%s21119_s25 + $0xb60] ss:$8 sps:$4 sm:$0xff]  }
 0x590   : > { %14307 = vmatprep.subr.bf16.mxu0 %v20346_v1  ;;  %v20438_v1 = vld [vmem:[%s21119_s25 + $0xb74] ss:$8 sps:$4 sm:$0xff]  }
 0x593   : > { %14308 = vmatpush1.bf16.msra.mxu0 %v20344_v2  ;;  %v20436_v2 = vld [vmem:[%s21119_s25 + $0xb70] ss:$8 sps:$4 sm:$0xff]  }
 0x594   : > { %14309 = vmatprep.subr.bf16.mxu0 %v20358_v3  ;;  %v20451_v3 = vld [vmem:[%s21119_s25 + $0xb84] ss:$8 sps:$4 sm:$0xff]  }
 0x595   : > { %11744 = vmatmul.mubr.bf16.gmra.mrb[48].mxu1 %v20303_v4  ;;  %v20399_v4 = vld [vmem:[#allocation2 + $0x690] ss:$200 sps:$4 sm:$0xff]  }
 0x596   : > { %14173 = vmatmul.mubr.bf16.gmra.mrb[16].mxu0 %v20307_v5  ;;  %11753 = vmatprep.mubr.bf16.mxu1 %v20311_v6  ;;  %v20403_v5 = vld [vmem:[#allocation2 + $0x1370] ss:$200 sps:$4 sm:$0xff]   ;;  %v20407_v6 = vld [vmem:[#allocation2 + $0x824] ss:$200 sps:$4 sm:$0xff]  }
 0x597   : > { %14182 = vmatprep.mubr.bf16.mxu0 %v20313_v7  ;;  %14310 = vmatpush1.bf16.msra.mxu0 %v20356_v8  ;;  %v20409_v7 = vld [vmem:[#allocation2 + $0x1504] ss:$200 sps:$4 sm:$0xff]   ;;  %v20449_v8 = vld [vmem:[%s21119_s25 + $0xb80] ss:$8 sps:$4 sm:$0xff]  }
 0x598   : > { %14311 = vmatprep.subr.bf16.mxu0 %v20370_v9  ;;  %v20462_v9 = vld [vmem:[%s21119_s25 + $0xb94] ss:$8 sps:$4 sm:$0xff]  }
 0x59b   : > { %14312 = vmatpush1.bf16.msra.mxu0 %v20368_v10  ;;  %v20460_v10 = vld [vmem:[%s21119_s25 + $0xb90] ss:$8 sps:$4 sm:$0xff]  }
 0x59c   : > { %14313 = vmatprep.subr.bf16.mxu0 %v20382_v11  ;;  %v20474_v11 = vld [vmem:[%s21119_s25 + $0xba4] ss:$8 sps:$4 sm:$0xff]  }
 0x59d   : > { %11754 = vmatmul.mubr.bf16.gmra.mrb[52].mxu1 %v20315_v12  ;;  %v20411_v12 = vld [vmem:[#allocation2 + $0x820] ss:$200 sps:$4 sm:$0xff]  }
 0x59e   : > { %14183 = vmatmul.mubr.bf16.gmra.mrb[20].mxu0 %v20319_v13  ;;  %11763 = vmatprep.mubr.bf16.mxu1 %v20323_v14  ;;  %v20415_v13 = vld [vmem:[#allocation2 + $0x1500] ss:$200 sps:$4 sm:$0xff]   ;;  %v20419_v14 = vld [vmem:[#allocation2 + $0x9b4] ss:$200 sps:$4 sm:$0xff]  }
 0x59f   : > { %14192 = vmatprep.mubr.bf16.mxu0 %v20325_v15  ;;  %14314 = vmatpush1.bf16.msra.mxu0 %v20380_v16  ;;  %v20421_v15 = vld [vmem:[#allocation2 + $0x1694] ss:$200 sps:$4 sm:$0xff]   ;;  %v20472_v16 = vld [vmem:[%s21119_s25 + $0xba0] ss:$8 sps:$4 sm:$0xff]  }
 0x5a0   : > { %14315 = vmatprep.subr.bf16.mxu0 %v20394_v17  ;;  %v20486_v17 = vld [vmem:[%s21119_s25 + $0xbb4] ss:$8 sps:$4 sm:$0xff]  }
 0x5a3   : > { %14316 = vmatpush1.bf16.msra.mxu0 %v20392_v18  ;;  %v20484_v18 = vld [vmem:[%s21119_s25 + $0xbb0] ss:$8 sps:$4 sm:$0xff]  }
 0x5a4   : > { %14317 = vmatprep.subr.bf16.mxu0 %v20406_v19  ;;  %v20498_v19 = vld [vmem:[%s21119_s25 + $0xbc4] ss:$8 sps:$4 sm:$0xff]  }
 0x5a5   : > { %11764 = vmatmul.mubr.bf16.gmra.mrb[56].mxu1 %v20327_v20  ;;  %v20423_v20 = vld [vmem:[#allocation2 + $0x9b0] ss:$200 sps:$4 sm:$0xff]  }
 0x5a6   : > { %14193 = vmatmul.mubr.bf16.gmra.mrb[24].mxu0 %v20331_v21  ;;  %11773 = vmatprep.mubr.bf16.mxu1 %v20335_v22  ;;  %v20427_v21 = vld [vmem:[#allocation2 + $0x1690] ss:$200 sps:$4 sm:$0xff]   ;;  %v20431_v22 = vld [vmem:[#allocation2 + $0xb44] ss:$200 sps:$4 sm:$0xff]  }
 0x5a7   : > { %14202 = vmatprep.mubr.bf16.mxu0 %v20337_v23  ;;  %14318 = vmatpush1.bf16.msra.mxu0 %v20404_v24  ;;  %v20433_v23 = vld [vmem:[#allocation2 + $0x1824] ss:$200 sps:$4 sm:$0xff]   ;;  %v20496_v24 = vld [vmem:[%s21119_s25 + $0xbc0] ss:$8 sps:$4 sm:$0xff]  }
 0x5a8   : > { %14319 = vmatprep.subr.bf16.mxu0 %v20418_v25  ;;  %v20510_v25 = vld [vmem:[%s21119_s25 + $0xbd4] ss:$8 sps:$4 sm:$0xff]  }
 0x5ab   : > { %14320 = vmatpush1.bf16.msra.mxu0 %v20416_v26  ;;  %v20508_v26 = vld [vmem:[%s21119_s25 + $0xbd0] ss:$8 sps:$4 sm:$0xff]  }
 0x5ac   : > { %14321 = vmatprep.subr.bf16.mxu0 %v20430_v27  ;;  %v20522_v27 = vld [vmem:[%s21119_s25 + $0xbe4] ss:$8 sps:$4 sm:$0xff]  }
 0x5ad   : > { %11774 = vmatmul.mubr.bf16.gmra.mrb[60].mxu1 %v20339_v28  ;;  %v20435_v28 = vld [vmem:[#allocation2 + $0xb40] ss:$200 sps:$4 sm:$0xff]  }
 0x5ae   : > { %14203 = vmatmul.mubr.bf16.gmra.mrb[28].mxu0 %v20343_v29  ;;  %11816 = vmatprep.mubr.bf16.mxu1 %v20349_v30  ;;  %v20439_v29 = vld [vmem:[#allocation2 + $0x1820] ss:$200 sps:$4 sm:$0xff]   ;;  %v20443_v30 = vld [vmem:[#allocation2 + $0xcd4] ss:$200 sps:$4 sm:$0xff]  }
 0x5af   : > { %14212 = vmatprep.mubr.bf16.mxu0 %v20350_v31  ;;  %14322 = vmatpush1.bf16.msra.mxu0 %v20428_v32  ;;  %v20447_v31 = vld [vmem:[#allocation2 + $0xbc] ss:$200 sps:$4 sm:$0xff]   ;;  %v20520_v32 = vld [vmem:[%s21119_s25 + $0xbe0] ss:$8 sps:$4 sm:$0xff]  }
 0x5b0   : > { %14323 = vmatprep.subr.bf16.mxu0 %v20442_v33  ;;  %v20534_v33 = vld [vmem:[%s21119_s25 + $0xbf4] ss:$8 sps:$4 sm:$0xff]  }
 0x5b3   : > { %14324 = vmatpush1.bf16.msra.mxu0 %v20440_v34  ;;  %v20532_v34 = vld [vmem:[%s21119_s25 + $0xbf0] ss:$8 sps:$4 sm:$0xff]  }
 0x5b4   : > { %14486 = vmatprep.subr.bf16.mxu0 %v20454_v35  ;;  %v20445_v35 = vld [vmem:[#allocation2 + $0xb8] ss:$200 sps:$4 sm:$0xff]  }
 0x5b5   : > { %11817 = vmatmul.mubr.bf16.vlgmr.msra.gmra.mrb[0].mxu1 %v20347_v36  ;;  %v20448_v36 = vld [vmem:[#allocation2 + $0xcd0] ss:$200 sps:$4 sm:$0xff]  }
 0x5b6   : > { %14213 = vmatmul.mubr.bf16.gmra.mrb[32].mxu0 %v20355_v37  ;;  %11978 = vmatpush1.bf16.msra.mxu1 %v20352_v38  ;;  %v20452_v37 = vld [vmem:[%s21119_s25 + $0x1800] ss:$8 sps:$4 sm:$0xff]   ;;  %v20455_v38 = vld [vmem:[#allocation2 + $0xe64] ss:$200 sps:$4 sm:$0xff]  }
 0x5b7   : > { %11826 = vmatprep.mubr.bf16.mxu1 %v20359_v39  ;;  %14222 = vmatprep.mubr.bf16.mxu0 %v20361_v40  ;;  %v20457_v39 = vld [vmem:[#allocation2 + $0x24c] ss:$200 sps:$4 sm:$0xff]  }
 0x5b8   : > { %11979 = vmatprep.subr.bf16.mxu1 %v20366_v41  ;;  %v20466_v40 = vld [vmem:[%s21119_s25 + $0x1814] ss:$8 sps:$4 sm:$0xff]   ;;  %v20707_v41 = vld [vmem:[%s21119_s25 + $0xc04] ss:$8 sps:$4 sm:$0xff]  }
 0x5ba   : > { %11980 = vmatpush1.bf16.msra.mxu1 %v20364_v42  ;;  %v20464_v42 = vld [vmem:[%s21119_s25 + $0x1810] ss:$8 sps:$4 sm:$0xff]  }
 0x5bb   : > { %11981 = vmatprep.subr.bf16.mxu1 %v20378_v43  ;;  %v20478_v43 = vld [vmem:[%s21119_s25 + $0x1824] ss:$8 sps:$4 sm:$0xff]  }
 0x5bd   : > { %11827 = vmatmul.mubr.bf16.gmra.mrb[4].mxu1 %v20363_v44  ;;  %v20459_v44 = vld [vmem:[#allocation2 + $0xe60] ss:$200 sps:$4 sm:$0xff]  }
 0x5be   : > { %14223 = vmatmul.mubr.bf16.gmra.mrb[36].mxu0 %v20367_v45  ;;  %11836 = vmatprep.mubr.bf16.mxu1 %v20371_v46  ;;  %v20463_v45 = vld [vmem:[#allocation2 + $0x248] ss:$200 sps:$4 sm:$0xff]   ;;  %v20467_v46 = vld [vmem:[#allocation2 + $0xff4] ss:$200 sps:$4 sm:$0xff]  }
 0x5bf   : > { %14232 = vmatprep.mubr.bf16.mxu0 %v20373_v47  ;;  %11982 = vmatpush1.bf16.msra.mxu1 %v20376_v48  ;;  %v20469_v47 = vld [vmem:[#allocation2 + $0x3dc] ss:$200 sps:$4 sm:$0xff]   ;;  %v20476_v48 = vld [vmem:[%s21119_s25 + $0x1820] ss:$8 sps:$4 sm:$0xff]  }
 0x5c0   : > { %11983 = vmatprep.subr.bf16.mxu1 %v20390_v49  ;;  %v20490_v49 = vld [vmem:[%s21119_s25 + $0x1834] ss:$8 sps:$4 sm:$0xff]  }
 0x5c3   : > { %11984 = vmatpush1.bf16.msra.mxu1 %v20388_v50  ;;  %v20488_v50 = vld [vmem:[%s21119_s25 + $0x1830] ss:$8 sps:$4 sm:$0xff]  }
 0x5c4   : > { %11985 = vmatprep.subr.bf16.mxu1 %v20402_v51  ;;  %v20502_v51 = vld [vmem:[%s21119_s25 + $0x1844] ss:$8 sps:$4 sm:$0xff]  }
 0x5c5   : > { %11837 = vmatmul.mubr.bf16.gmra.mrb[8].mxu1 %v20375_v52  ;;  %v20471_v52 = vld [vmem:[#allocation2 + $0xff0] ss:$200 sps:$4 sm:$0xff]  }
 0x5c6   : > { %14233 = vmatmul.mubr.bf16.gmra.mrb[40].mxu0 %v20379_v53  ;;  %11846 = vmatprep.mubr.bf16.mxu1 %v20383_v54  ;;  %v20475_v53 = vld [vmem:[#allocation2 + $0x3d8] ss:$200 sps:$4 sm:$0xff]   ;;  %v20479_v54 = vld [vmem:[#allocation2 + $0x1184] ss:$200 sps:$4 sm:$0xff]  }
 0x5c7   : > { %14242 = vmatprep.mubr.bf16.mxu0 %v20385_v55  ;;  %11986 = vmatpush1.bf16.msra.mxu1 %v20400_v56  ;;  %v20481_v55 = vld [vmem:[#allocation2 + $0x56c] ss:$200 sps:$4 sm:$0xff]   ;;  %v20500_v56 = vld [vmem:[%s21119_s25 + $0x1840] ss:$8 sps:$4 sm:$0xff]  }
 0x5c8   : > { %11987 = vmatprep.subr.bf16.mxu1 %v20414_v57  ;;  %v20514_v57 = vld [vmem:[%s21119_s25 + $0x1854] ss:$8 sps:$4 sm:$0xff]  }
 0x5cb   : > { %11988 = vmatpush1.bf16.msra.mxu1 %v20412_v58  ;;  %v20512_v58 = vld [vmem:[%s21119_s25 + $0x1850] ss:$8 sps:$4 sm:$0xff]  }
 0x5cc   : > { %11989 = vmatprep.subr.bf16.mxu1 %v20426_v59  ;;  %v20526_v59 = vld [vmem:[%s21119_s25 + $0x1864] ss:$8 sps:$4 sm:$0xff]  }
 0x5cd   : > { %11847 = vmatmul.mubr.bf16.gmra.mrb[12].mxu1 %v20387_v60  ;;  %v20483_v60 = vld [vmem:[#allocation2 + $0x1180] ss:$200 sps:$4 sm:$0xff]  }
 0x5ce   : > { %14243 = vmatmul.mubr.bf16.gmra.mrb[44].mxu0 %v20391_v61  ;;  %11856 = vmatprep.mubr.bf16.mxu1 %v20395_v62  ;;  %v20487_v61 = vld [vmem:[#allocation2 + $0x568] ss:$200 sps:$4 sm:$0xff]   ;;  %v20491_v62 = vld [vmem:[#allocation2 + $0x1314] ss:$200 sps:$4 sm:$0xff]  }
 0x5cf   : > { %14252 = vmatprep.mubr.bf16.mxu0 %v20397_v63  ;;  %11990 = vmatpush1.bf16.msra.mxu1 %v20424_v0  ;;  %v20493_v63 = vld [vmem:[#allocation2 + $0x6fc] ss:$200 sps:$4 sm:$0xff]   ;;  %v20524_v0 = vld [vmem:[%s21119_s25 + $0x1860] ss:$8 sps:$4 sm:$0xff]  }
 0x5d0   : > { %11991 = vmatprep.subr.bf16.mxu1 %v20438_v1  ;;  %v20538_v1 = vld [vmem:[%s21119_s25 + $0x1874] ss:$8 sps:$4 sm:$0xff]  }
 0x5d3   : > { %11992 = vmatpush1.bf16.msra.mxu1 %v20436_v2  ;;  %v20536_v2 = vld [vmem:[%s21119_s25 + $0x1870] ss:$8 sps:$4 sm:$0xff]  }
 0x5d4   : > { %11993 = vmatprep.subr.bf16.mxu1 %v20451_v3  ;;  %v20547_v3 = vld [vmem:[%s21119_s25 + $0x1884] ss:$8 sps:$4 sm:$0xff]  }
 0x5d5   : > { %11857 = vmatmul.mubr.bf16.gmra.mrb[16].mxu1 %v20399_v4  ;;  %v20495_v4 = vld [vmem:[#allocation2 + $0x1310] ss:$200 sps:$4 sm:$0xff]  }
 0x5d6   : > { %14253 = vmatmul.mubr.bf16.gmra.mrb[48].mxu0 %v20403_v5  ;;  %11866 = vmatprep.mubr.bf16.mxu1 %v20407_v6  ;;  %v20499_v5 = vld [vmem:[#allocation2 + $0x6f8] ss:$200 sps:$4 sm:$0xff]   ;;  %v20503_v6 = vld [vmem:[#allocation2 + $0x14a4] ss:$200 sps:$4 sm:$0xff]  }
 0x5d7   : > { %14262 = vmatprep.mubr.bf16.mxu0 %v20409_v7  ;;  %11994 = vmatpush1.bf16.msra.mxu1 %v20449_v8  ;;  %v20505_v7 = vld [vmem:[#allocation2 + $0x88c] ss:$200 sps:$4 sm:$0xff]   ;;  %v20545_v8 = vld [vmem:[%s21119_s25 + $0x1880] ss:$8 sps:$4 sm:$0xff]  }
 0x5d8   : > { %11995 = vmatprep.subr.bf16.mxu1 %v20462_v9  ;;  %v20556_v9 = vld [vmem:[%s21119_s25 + $0x1894] ss:$8 sps:$4 sm:$0xff]  }
 0x5db   : > { %11996 = vmatpush1.bf16.msra.mxu1 %v20460_v10  ;;  %v20554_v10 = vld [vmem:[%s21119_s25 + $0x1890] ss:$8 sps:$4 sm:$0xff]  }
 0x5dc   : > { %11997 = vmatprep.subr.bf16.mxu1 %v20474_v11  ;;  %v20565_v11 = vld [vmem:[%s21119_s25 + $0x18a4] ss:$8 sps:$4 sm:$0xff]  }
 0x5dd   : > { %11867 = vmatmul.mubr.bf16.gmra.mrb[20].mxu1 %v20411_v12  ;;  %v20507_v12 = vld [vmem:[#allocation2 + $0x14a0] ss:$200 sps:$4 sm:$0xff]  }
 0x5de   : > { %14263 = vmatmul.mubr.bf16.gmra.mrb[52].mxu0 %v20415_v13  ;;  %11876 = vmatprep.mubr.bf16.mxu1 %v20419_v14  ;;  %v20511_v13 = vld [vmem:[#allocation2 + $0x888] ss:$200 sps:$4 sm:$0xff]   ;;  %v20515_v14 = vld [vmem:[#allocation2 + $0x1634] ss:$200 sps:$4 sm:$0xff]  }
 0x5df   : > { %14272 = vmatprep.mubr.bf16.mxu0 %v20421_v15  ;;  %11998 = vmatpush1.bf16.msra.mxu1 %v20472_v16  ;;  %v20517_v15 = vld [vmem:[#allocation2 + $0xa1c] ss:$200 sps:$4 sm:$0xff]   ;;  %v20563_v16 = vld [vmem:[%s21119_s25 + $0x18a0] ss:$8 sps:$4 sm:$0xff]  }
 0x5e0   : > { %11999 = vmatprep.subr.bf16.mxu1 %v20486_v17  ;;  %v20574_v17 = vld [vmem:[%s21119_s25 + $0x18b4] ss:$8 sps:$4 sm:$0xff]  }
 0x5e3   : > { %12000 = vmatpush1.bf16.msra.mxu1 %v20484_v18  ;;  %v20572_v18 = vld [vmem:[%s21119_s25 + $0x18b0] ss:$8 sps:$4 sm:$0xff]  }
 0x5e4   : > { %12001 = vmatprep.subr.bf16.mxu1 %v20498_v19  ;;  %v20583_v19 = vld [vmem:[%s21119_s25 + $0x18c4] ss:$8 sps:$4 sm:$0xff]  }
 0x5e5   : > { %11877 = vmatmul.mubr.bf16.gmra.mrb[24].mxu1 %v20423_v20  ;;  %v20519_v20 = vld [vmem:[#allocation2 + $0x1630] ss:$200 sps:$4 sm:$0xff]  }
 0x5e6   : > { %14273 = vmatmul.mubr.bf16.gmra.mrb[56].mxu0 %v20427_v21  ;;  %11886 = vmatprep.mubr.bf16.mxu1 %v20431_v22  ;;  %v20523_v21 = vld [vmem:[#allocation2 + $0xa18] ss:$200 sps:$4 sm:$0xff]   ;;  %v20527_v22 = vld [vmem:[#allocation2 + $0x17c4] ss:$200 sps:$4 sm:$0xff]  }
 0x5e7   : > { %14282 = vmatprep.mubr.bf16.mxu0 %v20433_v23  ;;  %12002 = vmatpush1.bf16.msra.mxu1 %v20496_v24  ;;  %v20529_v23 = vld [vmem:[#allocation2 + $0xbac] ss:$200 sps:$4 sm:$0xff]   ;;  %v20581_v24 = vld [vmem:[%s21119_s25 + $0x18c0] ss:$8 sps:$4 sm:$0xff]  }
 0x5e8   : > { %12003 = vmatprep.subr.bf16.mxu1 %v20510_v25  ;;  %v20592_v25 = vld [vmem:[%s21119_s25 + $0x18d4] ss:$8 sps:$4 sm:$0xff]  }
 0x5eb   : > { %12004 = vmatpush1.bf16.msra.mxu1 %v20508_v26  ;;  %v20590_v26 = vld [vmem:[%s21119_s25 + $0x18d0] ss:$8 sps:$4 sm:$0xff]  }
 0x5ec   : > { %12005 = vmatprep.subr.bf16.mxu1 %v20522_v27  ;;  %v20601_v27 = vld [vmem:[%s21119_s25 + $0x18e4] ss:$8 sps:$4 sm:$0xff]  }
 0x5ed   : > { %11887 = vmatmul.mubr.bf16.gmra.mrb[28].mxu1 %v20435_v28  ;;  %v20531_v28 = vld [vmem:[#allocation2 + $0x17c0] ss:$200 sps:$4 sm:$0xff]  }
 0x5ee   : > { %14283 = vmatmul.mubr.bf16.gmra.mrb[60].mxu0 %v20439_v29  ;;  %11896 = vmatprep.mubr.bf16.mxu1 %v20443_v30  ;;  %v20535_v29 = vld [vmem:[#allocation2 + $0xba8] ss:$200 sps:$4 sm:$0xff]   ;;  %v20541_v30 = vld [vmem:[#allocation2 + $0x5c] ss:$200 sps:$4 sm:$0xff]  }
 0x5ef   : > { %14325 = vmatprep.mubr.bf16.mxu0 %v20447_v31  ;;  %12006 = vmatpush1.bf16.msra.mxu1 %v20520_v32  ;;  %v20542_v31 = vld [vmem:[#allocation2 + $0xd3c] ss:$200 sps:$4 sm:$0xff]   ;;  %v20599_v32 = vld [vmem:[%s21119_s25 + $0x18e0] ss:$8 sps:$4 sm:$0xff]  }
 0x5f0   : > { %12007 = vmatprep.subr.bf16.mxu1 %v20534_v33  ;;  %v20610_v33 = vld [vmem:[%s21119_s25 + $0x18f4] ss:$8 sps:$4 sm:$0xff]  }
 0x5f3   : > { %12008 = vmatpush1.bf16.msra.mxu1 %v20532_v34  ;;  %v20608_v34 = vld [vmem:[%s21119_s25 + $0x18f0] ss:$8 sps:$4 sm:$0xff]  }
 0x5f4   : > { %16603 = vmatprep.subr.bf16.mxu1 %v20707_v41  ;;  %v20552_v41 = vld [vmem:[#allocation2 + $0x1e8] ss:$200 sps:$4 sm:$0xff]  }
 0x5f5   : > { %11897 = vmatmul.mubr.bf16.gmra.mrb[32].mxu1 %v20448_v36  ;;  %v20544_v36 = vld [vmem:[#allocation2 + $0xd38] ss:$200 sps:$4 sm:$0xff]  }
 0x5f6   : > { %14326 = vmatmul.mubr.bf16.vlgmr.msra.gmra.mrb[0].mxu0 %v20445_v35  ;;  %11906 = vmatprep.mubr.bf16.mxu1 %v20455_v38  ;;  %v20539_v35 = vld [vmem:[#allocation2 + $0x58] ss:$200 sps:$4 sm:$0xff]   ;;  %v20550_v38 = vld [vmem:[#allocation2 + $0xecc] ss:$200 sps:$4 sm:$0xff]  }
 0x5f7   : > { %14487 = vmatpush1.bf16.msra.mxu0 %v20452_v37  ;;  %14335 = vmatprep.mubr.bf16.mxu0 %v20457_v39  ;;  %v20548_v37 = vld [vmem:[#allocation2 + $0x1ec] ss:$200 sps:$4 sm:$0xff]   ;;  %v20708_v39 = vld [vmem:[%s21119_s25 + $0xc00] ss:$8 sps:$4 sm:$0xff]  }
 0x5f8   : > { %14488 = vmatprep.subr.bf16.mxu0 %v20466_v40  ;;  %v20709_v40 = vld [vmem:[%s21119_s25 + $0xc14] ss:$8 sps:$4 sm:$0xff]  }
 0x5fb   : > { %14489 = vmatpush1.bf16.msra.mxu0 %v20464_v42  ;;  %v20553_v42 = vld [vmem:[#allocation2 + $0xec8] ss:$200 sps:$4 sm:$0xff]  }
 0x5fc   : > { %14490 = vmatprep.subr.bf16.mxu0 %v20478_v43  ;;  %v20710_v43 = vld [vmem:[%s21119_s25 + $0xc10] ss:$8 sps:$4 sm:$0xff]  }
 0x5fd   : > { %11907 = vmatmul.mubr.bf16.gmra.mrb[36].mxu1 %v20459_v44  ;;  %v20557_v44 = vld [vmem:[#allocation2 + $0x37c] ss:$200 sps:$4 sm:$0xff]  }
 0x5fe   : > { %14336 = vmatmul.mubr.bf16.gmra.mrb[4].mxu0 %v20463_v45  ;;  %11916 = vmatprep.mubr.bf16.mxu1 %v20467_v46  ;;  %v20559_v45 = vld [vmem:[#allocation2 + $0x105c] ss:$200 sps:$4 sm:$0xff]  }
 0x5ff   : > { %14345 = vmatprep.mubr.bf16.mxu0 %v20469_v47  ;;  %14491 = vmatpush1.bf16.msra.mxu0 %v20476_v48  ;;  %v20711_v46 = vld [vmem:[%s21119_s25 + $0xc24] ss:$8 sps:$4 sm:$0xff]   ;;  %v20712_v47 = vld [vmem:[%s21119_s25 + $0xc20] ss:$8 sps:$4 sm:$0xff]   ;;  %v20713_v48 = vld [vmem:[%s21119_s25 + $0xc34] ss:$8 sps:$4 sm:$0xff]  }
 0x600   : > { %14492 = vmatprep.subr.bf16.mxu0 %v20490_v49  ;;  %v20561_v49 = vld [vmem:[#allocation2 + $0x378] ss:$200 sps:$4 sm:$0xff]  }
 0x603   : > { %14493 = vmatpush1.bf16.msra.mxu0 %v20488_v50  ;;  %v20562_v50 = vld [vmem:[#allocation2 + $0x1058] ss:$200 sps:$4 sm:$0xff]  }
 0x604   : > { %14494 = vmatprep.subr.bf16.mxu0 %v20502_v51  ;;  %v20566_v51 = vld [vmem:[#allocation2 + $0x50c] ss:$200 sps:$4 sm:$0xff]  }
 0x605   : > { %11917 = vmatmul.mubr.bf16.gmra.mrb[40].mxu1 %v20471_v52  ;;  %v20568_v52 = vld [vmem:[#allocation2 + $0x11ec] ss:$200 sps:$4 sm:$0xff]  }
 0x606   : > { %14346 = vmatmul.mubr.bf16.gmra.mrb[8].mxu0 %v20475_v53  ;;  %11926 = vmatprep.mubr.bf16.mxu1 %v20479_v54  ;;  %v20714_v53 = vld [vmem:[%s21119_s25 + $0xc30] ss:$8 sps:$4 sm:$0xff]   ;;  %v20715_v54 = vld [vmem:[%s21119_s25 + $0xc44] ss:$8 sps:$4 sm:$0xff]  }
 0x607   : > { %14355 = vmatprep.mubr.bf16.mxu0 %v20481_v55  ;;  %14495 = vmatpush1.bf16.msra.mxu0 %v20500_v56  ;;  %v20716_v55 = vld [vmem:[%s21119_s25 + $0xc40] ss:$8 sps:$4 sm:$0xff]   ;;  %v20717_v56 = vld [vmem:[%s21119_s25 + $0xc54] ss:$8 sps:$4 sm:$0xff]  }
 0x608   : > { %14496 = vmatprep.subr.bf16.mxu0 %v20514_v57  ;;  %v20570_v57 = vld [vmem:[#allocation2 + $0x508] ss:$200 sps:$4 sm:$0xff]  }
 0x60b   : > { %14497 = vmatpush1.bf16.msra.mxu0 %v20512_v58  ;;  %v20571_v58 = vld [vmem:[#allocation2 + $0x11e8] ss:$200 sps:$4 sm:$0xff]  }
 0x60c   : > { %14498 = vmatprep.subr.bf16.mxu0 %v20526_v59  ;;  %v20575_v59 = vld [vmem:[#allocation2 + $0x69c] ss:$200 sps:$4 sm:$0xff]  }
 0x60d   : > { %11927 = vmatmul.mubr.bf16.gmra.mrb[44].mxu1 %v20483_v60  ;;  %v20577_v60 = vld [vmem:[#allocation2 + $0x137c] ss:$200 sps:$4 sm:$0xff]  }
 0x60e   : > { %14356 = vmatmul.mubr.bf16.gmra.mrb[12].mxu0 %v20487_v61  ;;  %11936 = vmatprep.mubr.bf16.mxu1 %v20491_v62  ;;  %v20718_v61 = vld [vmem:[%s21119_s25 + $0xc50] ss:$8 sps:$4 sm:$0xff]   ;;  %v20719_v62 = vld [vmem:[%s21119_s25 + $0xc64] ss:$8 sps:$4 sm:$0xff]  }
 0x60f   : > { %14365 = vmatprep.mubr.bf16.mxu0 %v20493_v63  ;;  %14499 = vmatpush1.bf16.msra.mxu0 %v20524_v0  ;;  %v20720_v63 = vld [vmem:[%s21119_s25 + $0xc60] ss:$8 sps:$4 sm:$0xff]   ;;  %v20721_v0 = vld [vmem:[%s21119_s25 + $0xc74] ss:$8 sps:$4 sm:$0xff]  }
 0x610   : > { %14500 = vmatprep.subr.bf16.mxu0 %v20538_v1  ;;  %v20579_v1 = vld [vmem:[#allocation2 + $0x698] ss:$200 sps:$4 sm:$0xff]  }
 0x613   : > { %14501 = vmatpush1.bf16.msra.mxu0 %v20536_v2  ;;  %v20580_v2 = vld [vmem:[#allocation2 + $0x1378] ss:$200 sps:$4 sm:$0xff]  }
 0x614   : > { %14502 = vmatprep.subr.bf16.mxu0 %v20547_v3  ;;  %v20584_v3 = vld [vmem:[#allocation2 + $0x82c] ss:$200 sps:$4 sm:$0xff]  }
 0x615   : > { %11937 = vmatmul.mubr.bf16.gmra.mrb[48].mxu1 %v20495_v4  ;;  %v20586_v4 = vld [vmem:[#allocation2 + $0x150c] ss:$200 sps:$4 sm:$0xff]  }
 0x616   : > { %14366 = vmatmul.mubr.bf16.gmra.mrb[16].mxu0 %v20499_v5  ;;  %11946 = vmatprep.mubr.bf16.mxu1 %v20503_v6  ;;  %v20722_v5 = vld [vmem:[%s21119_s25 + $0xc70] ss:$8 sps:$4 sm:$0xff]   ;;  %v20723_v6 = vld [vmem:[%s21119_s25 + $0xc84] ss:$8 sps:$4 sm:$0xff]  }
 0x617   : > { %14375 = vmatprep.mubr.bf16.mxu0 %v20505_v7  ;;  %14503 = vmatpush1.bf16.msra.mxu0 %v20545_v8  ;;  %v20724_v7 = vld [vmem:[%s21119_s25 + $0xc80] ss:$8 sps:$4 sm:$0xff]   ;;  %v20725_v8 = vld [vmem:[%s21119_s25 + $0xc94] ss:$8 sps:$4 sm:$0xff]  }
 0x618   : > { %14504 = vmatprep.subr.bf16.mxu0 %v20556_v9  ;;  %v20588_v9 = vld [vmem:[#allocation2 + $0x828] ss:$200 sps:$4 sm:$0xff]  }
 0x61b   : > { %14505 = vmatpush1.bf16.msra.mxu0 %v20554_v10  ;;  %v20589_v10 = vld [vmem:[#allocation2 + $0x1508] ss:$200 sps:$4 sm:$0xff]  }
 0x61c   : > { %14506 = vmatprep.subr.bf16.mxu0 %v20565_v11  ;;  %v20593_v11 = vld [vmem:[#allocation2 + $0x9bc] ss:$200 sps:$4 sm:$0xff]  }
 0x61d   : > { %11947 = vmatmul.mubr.bf16.gmra.mrb[52].mxu1 %v20507_v12  ;;  %v20595_v12 = vld [vmem:[#allocation2 + $0x169c] ss:$200 sps:$4 sm:$0xff]  }
 0x61e   : > { %14376 = vmatmul.mubr.bf16.gmra.mrb[20].mxu0 %v20511_v13  ;;  %11956 = vmatprep.mubr.bf16.mxu1 %v20515_v14  ;;  %v20726_v13 = vld [vmem:[%s21119_s25 + $0xc90] ss:$8 sps:$4 sm:$0xff]   ;;  %v20727_v14 = vld [vmem:[%s21119_s25 + $0xca4] ss:$8 sps:$4 sm:$0xff]  }
 0x61f   : > { %14385 = vmatprep.mubr.bf16.mxu0 %v20517_v15  ;;  %14507 = vmatpush1.bf16.msra.mxu0 %v20563_v16  ;;  %v20728_v15 = vld [vmem:[%s21119_s25 + $0xca0] ss:$8 sps:$4 sm:$0xff]   ;;  %v20729_v16 = vld [vmem:[%s21119_s25 + $0xcb4] ss:$8 sps:$4 sm:$0xff]  }
 0x620   : > { %14508 = vmatprep.subr.bf16.mxu0 %v20574_v17  ;;  %v20597_v17 = vld [vmem:[#allocation2 + $0x9b8] ss:$200 sps:$4 sm:$0xff]  }
 0x623   : > { %14509 = vmatpush1.bf16.msra.mxu0 %v20572_v18  ;;  %v20598_v18 = vld [vmem:[#allocation2 + $0x1698] ss:$200 sps:$4 sm:$0xff]  }
 0x624   : > { %14510 = vmatprep.subr.bf16.mxu0 %v20583_v19  ;;  %v20602_v19 = vld [vmem:[#allocation2 + $0xb4c] ss:$200 sps:$4 sm:$0xff]  }
 0x625   : > { %11957 = vmatmul.mubr.bf16.gmra.mrb[56].mxu1 %v20519_v20  ;;  %v20604_v20 = vld [vmem:[#allocation2 + $0x182c] ss:$200 sps:$4 sm:$0xff]  }
 0x626   : > { %14386 = vmatmul.mubr.bf16.gmra.mrb[24].mxu0 %v20523_v21  ;;  %11966 = vmatprep.mubr.bf16.mxu1 %v20527_v22  ;;  %v20730_v21 = vld [vmem:[%s21119_s25 + $0xcb0] ss:$8 sps:$4 sm:$0xff]   ;;  %v20731_v22 = vld [vmem:[%s21119_s25 + $0xcc4] ss:$8 sps:$4 sm:$0xff]  }
 0x627   : > { %14395 = vmatprep.mubr.bf16.mxu0 %v20529_v23  ;;  %14511 = vmatpush1.bf16.msra.mxu0 %v20581_v24  ;;  %v20732_v23 = vld [vmem:[%s21119_s25 + $0xcc0] ss:$8 sps:$4 sm:$0xff]   ;;  %v20733_v24 = vld [vmem:[%s21119_s25 + $0xcd4] ss:$8 sps:$4 sm:$0xff]  }
 0x628   : > { %14512 = vmatprep.subr.bf16.mxu0 %v20592_v25  ;;  %v20606_v25 = vld [vmem:[#allocation2 + $0xb48] ss:$200 sps:$4 sm:$0xff]  }
 0x62b   : > { %14513 = vmatpush1.bf16.msra.mxu0 %v20590_v26  ;;  %v20607_v26 = vld [vmem:[#allocation2 + $0x1828] ss:$200 sps:$4 sm:$0xff]  }
 0x62c   : > { %14514 = vmatprep.subr.bf16.mxu0 %v20601_v27  ;;  %v20611_v27 = vld [vmem:[#allocation2 + $0xcdc] ss:$200 sps:$4 sm:$0xff]  }
 0x62d   : > { %11967 = vmatmul.mubr.bf16.gmra.mrb[60].mxu1 %v20531_v28  ;;  %v20615_v28 = vld [vmem:[#allocation2 + $0xc4] ss:$200 sps:$4 sm:$0xff]  }
 0x62e   : > { %14396 = vmatmul.mubr.bf16.gmra.mrb[28].mxu0 %v20535_v29  ;;  %12009 = vmatprep.mubr.bf16.mxu1 %v20541_v30  ;;  %v20734_v29 = vld [vmem:[%s21119_s25 + $0xcd0] ss:$8 sps:$4 sm:$0xff]   ;;  %v20735_v30 = vld [vmem:[%s21119_s25 + $0xce4] ss:$8 sps:$4 sm:$0xff]  }
 0x62f   : > { %14405 = vmatprep.mubr.bf16.mxu0 %v20542_v31  ;;  %14515 = vmatpush1.bf16.msra.mxu0 %v20599_v32  ;;  %v20736_v31 = vld [vmem:[%s21119_s25 + $0xce0] ss:$8 sps:$4 sm:$0xff]   ;;  %v20737_v32 = vld [vmem:[%s21119_s25 + $0xcf4] ss:$8 sps:$4 sm:$0xff]  }
 0x630   : > { %14516 = vmatprep.subr.bf16.mxu0 %v20610_v33  ;;  %v20613_v33 = vld [vmem:[#allocation2 + $0xc0] ss:$200 sps:$4 sm:$0xff]  }
 0x633   : > { %14517 = vmatpush1.bf16.msra.mxu0 %v20608_v34  ;;  %v20616_v34 = vld [vmem:[#allocation2 + $0xcd8] ss:$200 sps:$4 sm:$0xff]  }
 0x635   : > { %12010 = vmatmul.mubr.bf16.vlgmr.msra.gmra.mrb[0].mxu1 %v20539_v35  ;;  %v20617_v35 = vld [vmem:[#allocation2 + $0xe6c] ss:$200 sps:$4 sm:$0xff]  }
 0x636   : > { %14406 = vmatmul.mubr.bf16.gmra.mrb[32].mxu0 %v20544_v36  ;;  %16619 = vmatpush1.bf16.msra.mxu1 %v20708_v39  ;;  %v20619_v36 = vld [vmem:[#allocation2 + $0x254] ss:$200 sps:$4 sm:$0xff]   ;;  %v20622_v39 = vld [vmem:[#allocation2 + $0x250] ss:$200 sps:$4 sm:$0xff]  }
 0x637   : > { %12019 = vmatprep.mubr.bf16.mxu1 %v20548_v37  ;;  %14415 = vmatprep.mubr.bf16.mxu0 %v20550_v38  ;;  %v20738_v37 = vld [vmem:[%s21119_s25 + $0xcf0] ss:$8 sps:$4 sm:$0xff]  }
 0x638   : > { %16604 = vmatprep.subr.bf16.mxu1 %v20709_v40  ;;  %v20621_v38 = vld [vmem:[#allocation2 + $0xe68] ss:$200 sps:$4 sm:$0xff]   ;;  %v20623_v40 = vld [vmem:[#allocation2 + $0xffc] ss:$200 sps:$4 sm:$0xff]  }
 0x63a   : > { %16620 = vmatpush1.bf16.msra.mxu1 %v20710_v43  ;;  %v20628_v43 = vld [vmem:[#allocation2 + $0x3e0] ss:$200 sps:$4 sm:$0xff]  }
 0x63b   : > { %16605 = vmatprep.subr.bf16.mxu1 %v20711_v46  ;;  %v20633_v46 = vld [vmem:[#allocation2 + $0x1188] ss:$200 sps:$4 sm:$0xff]  }
 0x63d   : > { %12020 = vmatmul.mubr.bf16.gmra.mrb[4].mxu1 %v20552_v41  ;;  %v20625_v41 = vld [vmem:[#allocation2 + $0x3e4] ss:$200 sps:$4 sm:$0xff]  }
 0x63e   : > { %14416 = vmatmul.mubr.bf16.gmra.mrb[36].mxu0 %v20553_v42  ;;  %12029 = vmatprep.mubr.bf16.mxu1 %v20557_v44  ;;  %v20627_v42 = vld [vmem:[#allocation2 + $0xff8] ss:$200 sps:$4 sm:$0xff]   ;;  %v20629_v44 = vld [vmem:[#allocation2 + $0x118c] ss:$200 sps:$4 sm:$0xff]  }
 0x63f   : > { %14425 = vmatprep.mubr.bf16.mxu0 %v20559_v45  ;;  %16621 = vmatpush1.bf16.msra.mxu1 %v20712_v47  ;;  %v20631_v45 = vld [vmem:[#allocation2 + $0x574] ss:$200 sps:$4 sm:$0xff]   ;;  %v20634_v47 = vld [vmem:[#allocation2 + $0x570] ss:$200 sps:$4 sm:$0xff]  }
 0x640   : > { %16606 = vmatprep.subr.bf16.mxu1 %v20713_v48  ;;  %v20635_v48 = vld [vmem:[#allocation2 + $0x131c] ss:$200 sps:$4 sm:$0xff]  }
 0x643   : > { %16622 = vmatpush1.bf16.msra.mxu1 %v20714_v53  ;;  %v20643_v53 = vld [vmem:[#allocation2 + $0x894] ss:$200 sps:$4 sm:$0xff]  }
 0x644   : > { %16607 = vmatprep.subr.bf16.mxu1 %v20715_v54  ;;  %v20645_v54 = vld [vmem:[#allocation2 + $0x14a8] ss:$200 sps:$4 sm:$0xff]  }
 0x645   : > { %12030 = vmatmul.mubr.bf16.gmra.mrb[8].mxu1 %v20561_v49  ;;  %v20637_v49 = vld [vmem:[#allocation2 + $0x704] ss:$200 sps:$4 sm:$0xff]  }
 0x646   : > { %14426 = vmatmul.mubr.bf16.gmra.mrb[40].mxu0 %v20562_v50  ;;  %12039 = vmatprep.mubr.bf16.mxu1 %v20566_v51  ;;  %v20639_v50 = vld [vmem:[#allocation2 + $0x1318] ss:$200 sps:$4 sm:$0xff]  }
 0x647   : > { %14435 = vmatprep.mubr.bf16.mxu0 %v20568_v52  ;;  %16623 = vmatpush1.bf16.msra.mxu1 %v20716_v55  ;;  %v20640_v51 = vld [vmem:[#allocation2 + $0x700] ss:$200 sps:$4 sm:$0xff]   ;;  %v20641_v52 = vld [vmem:[#allocation2 + $0x14ac] ss:$200 sps:$4 sm:$0xff]   ;;  %v20646_v55 = vld [vmem:[#allocation2 + $0x890] ss:$200 sps:$4 sm:$0xff]  }
 0x648   : > { %16608 = vmatprep.subr.bf16.mxu1 %v20717_v56  ;;  %v20647_v56 = vld [vmem:[#allocation2 + $0x163c] ss:$200 sps:$4 sm:$0xff]  }
 0x64b   : > { %16624 = vmatpush1.bf16.msra.mxu1 %v20718_v61  ;;  %v20655_v61 = vld [vmem:[#allocation2 + $0xbb4] ss:$200 sps:$4 sm:$0xff]  }
 0x64c   : > { %16609 = vmatprep.subr.bf16.mxu1 %v20719_v62  ;;  %v20657_v62 = vld [vmem:[#allocation2 + $0x17c8] ss:$200 sps:$4 sm:$0xff]  }
 0x64d   : > { %12040 = vmatmul.mubr.bf16.gmra.mrb[12].mxu1 %v20570_v57  ;;  %v20649_v57 = vld [vmem:[#allocation2 + $0xa24] ss:$200 sps:$4 sm:$0xff]  }
 0x64e   : > { %14436 = vmatmul.mubr.bf16.gmra.mrb[44].mxu0 %v20571_v58  ;;  %12049 = vmatprep.mubr.bf16.mxu1 %v20575_v59  ;;  %v20651_v58 = vld [vmem:[#allocation2 + $0x1638] ss:$200 sps:$4 sm:$0xff]  }
 0x64f   : > { %14445 = vmatprep.mubr.bf16.mxu0 %v20577_v60  ;;  %16625 = vmatpush1.bf16.msra.mxu1 %v20720_v63  ;;  %v20652_v59 = vld [vmem:[#allocation2 + $0xa20] ss:$200 sps:$4 sm:$0xff]   ;;  %v20653_v60 = vld [vmem:[#allocation2 + $0x17cc] ss:$200 sps:$4 sm:$0xff]   ;;  %v20658_v63 = vld [vmem:[#allocation2 + $0xbb0] ss:$200 sps:$4 sm:$0xff]  }
 0x650   : > { %16610 = vmatprep.subr.bf16.mxu1 %v20721_v0  ;;  %v20661_v0 = vld [vmem:[#allocation2 + $0xce4] ss:$200 sps:$4 sm:$0xff]  }
 0x653   : > { %16626 = vmatpush1.bf16.msra.mxu1 %v20722_v5  ;;  %v20667_v5 = vld [vmem:[#allocation2 + $0xed4] ss:$200 sps:$4 sm:$0xff]  }
 0x654   : > { %16611 = vmatprep.subr.bf16.mxu1 %v20723_v6  ;;  %v20669_v6 = vld [vmem:[#allocation2 + $0xe70] ss:$200 sps:$4 sm:$0xff]  }
 0x655   : > { %12050 = vmatmul.mubr.bf16.gmra.mrb[16].mxu1 %v20579_v1  ;;  %v20662_v1 = vld [vmem:[#allocation2 + $0xd44] ss:$200 sps:$4 sm:$0xff]  }
 0x656   : > { %14446 = vmatmul.mubr.bf16.gmra.mrb[48].mxu0 %v20580_v2  ;;  %12059 = vmatprep.mubr.bf16.mxu1 %v20584_v3  ;;  %v20659_v2 = vld [vmem:[#allocation2 + $0xce0] ss:$200 sps:$4 sm:$0xff]  }
 0x657   : > { %14455 = vmatprep.mubr.bf16.mxu0 %v20586_v4  ;;  %16627 = vmatpush1.bf16.msra.mxu1 %v20724_v7  ;;  %v20664_v3 = vld [vmem:[#allocation2 + $0xd40] ss:$200 sps:$4 sm:$0xff]   ;;  %v20665_v4 = vld [vmem:[#allocation2 + $0xe74] ss:$200 sps:$4 sm:$0xff]   ;;  %v20670_v7 = vld [vmem:[#allocation2 + $0xed0] ss:$200 sps:$4 sm:$0xff]  }
 0x658   : > { %16612 = vmatprep.subr.bf16.mxu1 %v20725_v8  ;;  %v20671_v8 = vld [vmem:[#allocation2 + $0x1004] ss:$200 sps:$4 sm:$0xff]  }
 0x65b   : > { %16628 = vmatpush1.bf16.msra.mxu1 %v20726_v13  ;;  %v20679_v13 = vld [vmem:[#allocation2 + $0x11f4] ss:$200 sps:$4 sm:$0xff]  }
 0x65c   : > { %16613 = vmatprep.subr.bf16.mxu1 %v20727_v14  ;;  %v20681_v14 = vld [vmem:[#allocation2 + $0x1190] ss:$200 sps:$4 sm:$0xff]  }
 0x65d   : > { %12060 = vmatmul.mubr.bf16.gmra.mrb[20].mxu1 %v20588_v9  ;;  %v20673_v9 = vld [vmem:[#allocation2 + $0x1064] ss:$200 sps:$4 sm:$0xff]  }
 0x65e   : > { %14456 = vmatmul.mubr.bf16.gmra.mrb[52].mxu0 %v20589_v10  ;;  %12069 = vmatprep.mubr.bf16.mxu1 %v20593_v11  ;;  %v20675_v10 = vld [vmem:[#allocation2 + $0x1000] ss:$200 sps:$4 sm:$0xff]  }
 0x65f   : > { %14465 = vmatprep.mubr.bf16.mxu0 %v20595_v12  ;;  %16629 = vmatpush1.bf16.msra.mxu1 %v20728_v15  ;;  %v20676_v11 = vld [vmem:[#allocation2 + $0x1060] ss:$200 sps:$4 sm:$0xff]   ;;  %v20677_v12 = vld [vmem:[#allocation2 + $0x1194] ss:$200 sps:$4 sm:$0xff]   ;;  %v20682_v15 = vld [vmem:[#allocation2 + $0x11f0] ss:$200 sps:$4 sm:$0xff]  }
 0x660   : > { %16614 = vmatprep.subr.bf16.mxu1 %v20729_v16  ;;  %v20683_v16 = vld [vmem:[#allocation2 + $0x1324] ss:$200 sps:$4 sm:$0xff]  }
 0x663   : > { %16630 = vmatpush1.bf16.msra.mxu1 %v20730_v21  ;;  %v20691_v21 = vld [vmem:[#allocation2 + $0x1514] ss:$200 sps:$4 sm:$0xff]  }
 0x664   : > { %16615 = vmatprep.subr.bf16.mxu1 %v20731_v22  ;;  %v20693_v22 = vld [vmem:[#allocation2 + $0x14b0] ss:$200 sps:$4 sm:$0xff]  }
 0x665   : > { %12070 = vmatmul.mubr.bf16.gmra.mrb[24].mxu1 %v20597_v17  ;;  %v20685_v17 = vld [vmem:[#allocation2 + $0x1384] ss:$200 sps:$4 sm:$0xff]  }
 0x666   : > { %14466 = vmatmul.mubr.bf16.gmra.mrb[56].mxu0 %v20598_v18  ;;  %12079 = vmatprep.mubr.bf16.mxu1 %v20602_v19  ;;  %v20687_v18 = vld [vmem:[#allocation2 + $0x1320] ss:$200 sps:$4 sm:$0xff]  }
 0x667   : > { %14475 = vmatprep.mubr.bf16.mxu0 %v20604_v20  ;;  %16631 = vmatpush1.bf16.msra.mxu1 %v20732_v23  ;;  %v20688_v19 = vld [vmem:[#allocation2 + $0x1380] ss:$200 sps:$4 sm:$0xff]   ;;  %v20689_v20 = vld [vmem:[#allocation2 + $0x14b4] ss:$200 sps:$4 sm:$0xff]   ;;  %v20694_v23 = vld [vmem:[#allocation2 + $0x1510] ss:$200 sps:$4 sm:$0xff]  }
 0x668   : > { %16616 = vmatprep.subr.bf16.mxu1 %v20733_v24  ;;  %v20695_v24 = vld [vmem:[#allocation2 + $0x1644] ss:$200 sps:$4 sm:$0xff]  }
 0x66b   : > { %16632 = vmatpush1.bf16.msra.mxu1 %v20734_v29  ;;  %v20703_v29 = vld [vmem:[#allocation2 + $0x1834] ss:$200 sps:$4 sm:$0xff]  }
 0x66c   : > { %16617 = vmatprep.subr.bf16.mxu1 %v20735_v30  ;;  %v20705_v30 = vld [vmem:[#allocation2 + $0x17d0] ss:$200 sps:$4 sm:$0xff]  }
 0x66d   : > { %12080 = vmatmul.mubr.bf16.gmra.mrb[28].mxu1 %v20606_v25  ;;  %v20697_v25 = vld [vmem:[#allocation2 + $0x16a4] ss:$200 sps:$4 sm:$0xff]  }
 0x66e   : > { %14476 = vmatmul.mubr.bf16.gmra.mrb[60].mxu0 %v20607_v26  ;;  %12089 = vmatprep.mubr.bf16.mxu1 %v20611_v27  ;;  %v20699_v26 = vld [vmem:[#allocation2 + $0x1640] ss:$200 sps:$4 sm:$0xff]  }
 0x66f   : > { %14518 = vmatprep.mubr.bf16.mxu0 %v20615_v28  ;;  %16633 = vmatpush1.bf16.msra.mxu1 %v20736_v31  ;;  %v20700_v27 = vld [vmem:[#allocation2 + $0x16a0] ss:$200 sps:$4 sm:$0xff]   ;;  %v20701_v28 = vld [vmem:[#allocation2 + $0x17d4] ss:$200 sps:$4 sm:$0xff]   ;;  %v20706_v31 = vld [vmem:[#allocation2 + $0x1830] ss:$200 sps:$4 sm:$0xff]  }
 0x670   : > { %16618 = vmatprep.subr.bf16.mxu1 %v20737_v32 }
 0x673   : > { %16634 = vmatpush1.bf16.msra.mxu1 %v20738_v37 }
 0x675   : > { %12090 = vmatmul.mubr.bf16.gmra.mrb[32].mxu1 %v20616_v34 }
 0x676   : > { %14519 = vmatmul.mubr.bf16.vlgmr.msra.gmra.mrb[0].mxu0 %v20613_v33  ;;  %12099 = vmatprep.mubr.bf16.mxu1 %v20617_v35 }
 0x677   : > { %14528 = vmatprep.mubr.bf16.mxu0 %v20619_v36 }
 0x67d   : > { %12100 = vmatmul.mubr.bf16.gmra.mrb[36].mxu1 %v20621_v38 }
 0x67e   : > { %14529 = vmatmul.mubr.bf16.gmra.mrb[4].mxu0 %v20622_v39  ;;  %12109 = vmatprep.mubr.bf16.mxu1 %v20623_v40 }
 0x67f   : > { %14538 = vmatprep.mubr.bf16.mxu0 %v20625_v41 }
 0x685   : > { %12110 = vmatmul.mubr.bf16.gmra.mrb[40].mxu1 %v20627_v42 }
 0x686   : > { %14539 = vmatmul.mubr.bf16.gmra.mrb[8].mxu0 %v20628_v43  ;;  %12119 = vmatprep.mubr.bf16.mxu1 %v20629_v44 }
 0x687   : > { %14548 = vmatprep.mubr.bf16.mxu0 %v20631_v45 }
 0x68d   : > { %12120 = vmatmul.mubr.bf16.gmra.mrb[44].mxu1 %v20633_v46 }
 0x68e   : > { %14549 = vmatmul.mubr.bf16.gmra.mrb[12].mxu0 %v20634_v47  ;;  %12129 = vmatprep.mubr.bf16.mxu1 %v20635_v48 }
 0x68f   : > { %14558 = vmatprep.mubr.bf16.mxu0 %v20637_v49 }
 0x695   : > { %12130 = vmatmul.mubr.bf16.gmra.mrb[48].mxu1 %v20639_v50 }
 0x696   : > { %14559 = vmatmul.mubr.bf16.gmra.mrb[16].mxu0 %v20640_v51  ;;  %12139 = vmatprep.mubr.bf16.mxu1 %v20641_v52 }
 0x697   : > { %14568 = vmatprep.mubr.bf16.mxu0 %v20643_v53 }
 0x69d   : > { %12140 = vmatmul.mubr.bf16.gmra.mrb[52].mxu1 %v20645_v54 }
 0x69e   : > { %14569 = vmatmul.mubr.bf16.gmra.mrb[20].mxu0 %v20646_v55  ;;  %12149 = vmatprep.mubr.bf16.mxu1 %v20647_v56  ;;  %v1844_v56 = vlaneseq }
 0x69f   : > { %14578 = vmatprep.mubr.bf16.mxu0 %v20649_v57 }
 0x6a5   : > { %12150 = vmatmul.mubr.bf16.gmra.mrb[56].mxu1 %v20651_v58 }
 0x6a6   : > { %14579 = vmatmul.mubr.bf16.gmra.mrb[24].mxu0 %v20652_v59  ;;  %12159 = vmatprep.mubr.bf16.mxu1 %v20653_v60  ;;  %v1845_v60 = vshrl.u32 %v1844_v56, 7 }
 0x6a7   : > { %14588 = vmatprep.mubr.bf16.mxu0 %v20655_v61 }
 0x6ad   : > { %12160 = vmatmul.mubr.bf16.gmra.mrb[60].mxu1 %v20657_v62  ;;  %v1846_v62 = vsub.s32 0, %v1845_v60 }
 0x6ae   : > { %14589 = vmatmul.mubr.bf16.gmra.mrb[28].mxu0 %v20658_v63  ;;  %12282 = vmatprep.mubr.bf16.mxu1 %v20661_v0  ;;  %v1842_v63 = vld [vmem:[%s211_s28] sm:$0x3]  ;;  %v1850_v0 = vsub.s32 1, %v1845_v60 }
 0x6af   : > { %14598 = vmatprep.mubr.bf16.mxu0 %v20662_v1 }
 0x6b5   : > { %12283 = vmatmul.mubr.bf16.vlgmr.msra.gmra.mrb[32].mxu1 %v20659_v2 }
 0x6b6   : > { %14599 = vmatmul.mubr.bf16.gmra.mrb[32].mxu0 %v20664_v3  ;;  %12292 = vmatprep.mubr.bf16.mxu1 %v20665_v4  ;;  %v21996_v4 = vrot.slane %v1842_v63, %v1846_v62 }
 0x6b7   : > { %14608 = vmatprep.mubr.bf16.mxu0 %v20667_v5 }
 0x6bd   : > { %12293 = vmatmul.mubr.bf16.gmra.mrb[36].mxu1 %v20669_v6  ;;  %v22000_v6 = vrot.slane %v1842_v63, %v1850_v0 }
 0x6be   : > { %14609 = vmatmul.mubr.bf16.gmra.mrb[36].mxu0 %v20670_v7  ;;  %12302 = vmatprep.mubr.bf16.mxu1 %v20671_v8 }
 0x6bf   : > { %14618 = vmatprep.mubr.bf16.mxu0 %v20673_v9 }
 0x6c5   : > { %12303 = vmatmul.mubr.bf16.gmra.mrb[40].mxu1 %v20675_v10 }
 0x6c6   : > { %14619 = vmatmul.mubr.bf16.gmra.mrb[40].mxu0 %v20676_v11  ;;  %12312 = vmatprep.mubr.bf16.mxu1 %v20677_v12 }
 0x6c7   : > { %14628 = vmatprep.mubr.bf16.mxu0 %v20679_v13 }
 0x6cd   : > { %12313 = vmatmul.mubr.bf16.gmra.mrb[44].mxu1 %v20681_v14 }
 0x6ce   : > { %14629 = vmatmul.mubr.bf16.gmra.mrb[44].mxu0 %v20682_v15  ;;  %12322 = vmatprep.mubr.bf16.mxu1 %v20683_v16 }
 0x6cf   : > { %14638 = vmatprep.mubr.bf16.mxu0 %v20685_v17 }
 0x6d5   : > { %12323 = vmatmul.mubr.bf16.gmra.mrb[48].mxu1 %v20687_v18 }
 0x6d6   : > { %14639 = vmatmul.mubr.bf16.gmra.mrb[48].mxu0 %v20688_v19  ;;  %12332 = vmatprep.mubr.bf16.mxu1 %v20689_v20 }
 0x6d7   : > { %14648 = vmatprep.mubr.bf16.mxu0 %v20691_v21 }
 0x6dd   : > { %12333 = vmatmul.mubr.bf16.gmra.mrb[52].mxu1 %v20693_v22 }
 0x6de   : > { %14649 = vmatmul.mubr.bf16.gmra.mrb[52].mxu0 %v20694_v23  ;;  %12342 = vmatprep.mubr.bf16.mxu1 %v20695_v24 }
 0x6df   : > { %14658 = vmatprep.mubr.bf16.mxu0 %v20697_v25 }
 0x6e5   : > { %12343 = vmatmul.mubr.bf16.gmra.mrb[56].mxu1 %v20699_v26 }
 0x6e6   : > { %14659 = vmatmul.mubr.bf16.gmra.mrb[56].mxu0 %v20700_v27  ;;  %12352 = vmatprep.mubr.bf16.mxu1 %v20701_v28 }
 0x6e7   : > { %14668 = vmatprep.mubr.bf16.mxu0 %v20703_v29 }
 0x6ed   : > { %12353 = vmatmul.mubr.bf16.gmra.mrb[60].mxu1 %v20705_v30 }
 0x6ee   : > { %14669 = vmatmul.mubr.bf16.gmra.mrb[60].mxu0 %v20706_v31 }
 0x708   : > { %v12011_v32 = vpop.f32.mrb[0].mxu1 }
 0x709   : > { %v12013_v33 = vpop.f32.mrb[1].mxu1  ;;  %v16635_v7 = vadd.f32 %v12011_v32, %v21996_v4 }
 0x70a   : > { %v12015_v34 = vpop.f32.mrb[2].mxu1  ;;  %v16637_v8 = vadd.f32 %v12013_v33, %v22000_v6 }
 0x70b   : > { %v12017_v35 = vpop.f32.mrb[3].mxu1  ;;  %v16639_v10 = vadd.f32 %v12015_v34, %v21996_v4 }
 0x70c   : > { %v16641_v13 = vadd.f32 %v12017_v35, %v22000_v6 }
 0x710   : > { %v12021_v36 = vpop.f32.mrb[4].mxu1 }
 0x711   : > { %v12023_v37 = vpop.f32.mrb[5].mxu1  ;;  %v16643_v19 = vadd.f32 %v12021_v36, %v21996_v4 }
 0x712   : > { %v12025_v38 = vpop.f32.mrb[6].mxu1  ;;  %v16645_v20 = vadd.f32 %v12023_v37, %v22000_v6 }
 0x713   : > { %v12027_v39 = vpop.f32.mrb[7].mxu1  ;;  %v16647_v22 = vadd.f32 %v12025_v38, %v21996_v4 }
 0x714   : > { %v16649_v25 = vadd.f32 %v12027_v39, %v22000_v6 }
 0x718   : > { %v12031_v40 = vpop.f32.mrb[8].mxu1 }
 0x719   : > { %v12033_v41 = vpop.f32.mrb[9].mxu1  ;;  %v16651_v31 = vadd.f32 %v12031_v40, %v21996_v4 }
 0x71a   : > { %v12035_v42 = vpop.f32.mrb[10].mxu1  ;;  %v16653_v32 = vadd.f32 %v12033_v41, %v22000_v6 }
 0x71b   : > { %v12037_v43 = vpop.f32.mrb[11].mxu1  ;;  %v16655_v34 = vadd.f32 %v12035_v42, %v21996_v4 }
 0x71c   : > { %v16657_v37 = vadd.f32 %v12037_v43, %v22000_v6 }
 0x720   : > { %v21957_v44 = vpop.f32.mrb[12].mxu1 }
 0x721   : > { %v21959_v45 = vpop.f32.mrb[13].mxu1  ;;  %v16659_v40 = vadd.f32 %v21957_v44, %v21996_v4 }
 0x722   : > { %v21961_v46 = vpop.f32.mrb[14].mxu1  ;;  %v16661_v41 = vadd.f32 %v21959_v45, %v22000_v6 }
 0x723   : > { %v21963_v47 = vpop.f32.mrb[15].mxu1  ;;  %v16663_v63 = vadd.f32 %v21961_v46, %v21996_v4 }
 0x728   : > { %v21965_v48 = vpop.f32.mrb[16].mxu1 }
 0x729   : > { %v21967_v49 = vpop.f32.mrb[17].mxu1  ;;  %v16667_v45 = vadd.f32 %v21965_v48, %v21996_v4 }
 0x72a   : > { %v21969_v50 = vpop.f32.mrb[18].mxu1  ;;  %v16669_v46 = vadd.f32 %v21967_v49, %v22000_v6 }
 0x72b   : > { %v21971_v51 = vpop.f32.mrb[19].mxu1 }
 0x730   : > { %v21973_v52 = vpop.f32.mrb[20].mxu1 }
 0x731   : > { %v21975_v53 = vpop.f32.mrb[21].mxu1 }
 0x732   : > { %v21977_v54 = vpop.f32.mrb[22].mxu1 }
 0x733   : > { %v21979_v55 = vpop.f32.mrb[23].mxu1 }
 0x738   : > { %v21981_v57 = vpop.f32.mrb[24].mxu1 }
 0x739   : > { %v21983_v58 = vpop.f32.mrb[25].mxu1 }
 0x73a   : > { %v21986_v59 = vpop.f32.mrb[26].mxu1 }
 0x73b   : > { %v21988_v61 = vpop.f32.mrb[27].mxu1 }
 0x740   : > { %v21990_v1 = vpop.f32.mrb[28].mxu1 }
 0x741   : > { %v21992_v2 = vpop.f32.mrb[29].mxu1 }
 0x742   : > { %v21994_v3 = vpop.f32.mrb[30].mxu1 }
 0x743   : > { %v21998_v5 = vpop.f32.mrb[31].mxu1 }
 0x749   : > { %v14520_v9 = vpop.f32.mrb[0].mxu0 }
 0x74a   : > { %v16636_v11 = vadd.f32 %v16635_v7, %v14520_v9  ;;  %v14522_v12 = vpop.f32.mrb[1].mxu0  ;;  %v16665_v7 = vadd.f32 %v21963_v47, %v22000_v6 }
 0x74b   : > { %v16638_v14 = vadd.f32 %v16637_v8, %v14522_v12  ;;  %v14524_v15 = vpop.f32.mrb[2].mxu0 }
 0x74c   : > { %v22006_v16 = vadd.f32 %v16639_v10, %v14524_v15  ;;  %v14526_v17 = vpop.f32.mrb[3].mxu0  ;;  %v16671_v15 = vadd.f32 %v21969_v50, %v21996_v4 }
 0x74d   : > { %v22008_v18 = vadd.f32 %v16641_v13, %v14526_v17 }
 0x74e   : > { %v14681_v49 = vmax.f32 %v22006_v16, 0.0  ;;  %v16679_v16 = vadd.f32 %v21977_v54, %v21996_v4 }
 0x74f   : > { %v14682_v50 = vmax.f32 %v22008_v18, 0.0  ;;  %v16681_v18 = vadd.f32 %v21979_v55, %v22000_v6 }
 0x751   : > { %v14530_v21 = vpop.f32.mrb[4].mxu0 }
 0x752   : > { %v22013_v23 = vadd.f32 %v16643_v19, %v14530_v21  ;;  %v14532_v24 = vpop.f32.mrb[5].mxu0  ;;  %v16673_v19 = vadd.f32 %v21971_v51, %v22000_v6  ;;  %v16675_v51 = vadd.f32 %v21973_v52, %v21996_v4 }
 0x753   : > { %v22016_v26 = vadd.f32 %v16645_v20, %v14532_v24  ;;  %v14534_v27 = vpop.f32.mrb[6].mxu0 }
 0x754   : > { %v22018_v28 = vadd.f32 %v16647_v22, %v14534_v27  ;;  %v14536_v29 = vpop.f32.mrb[7].mxu0  ;;  %v14679_v22 = vmax.f32 %v16636_v11, 0.0  ;;  %v14683_v52 = vmax.f32 %v22013_v23, 0.0  ;;  %v16683_v23 = vadd.f32 %v21981_v57, %v21996_v4 }
 0x755   : > { %v22020_v30 = vadd.f32 %v16649_v25, %v14536_v29  ;;  %v14680_v29 = vmax.f32 %v16638_v14, 0.0  ;;  %v16677_v14 = vadd.f32 %v21975_v53, %v22000_v6  ;;  %v14684_v53 = vmax.f32 %v22016_v26, 0.0 }
 0x756   : > { %v16685_v26 = vadd.f32 %v21983_v58, %v22000_v6 }
 0x759   : > { %v14540_v33 = vpop.f32.mrb[8].mxu0 }
 0x75a   : > { %v22025_v35 = vadd.f32 %v16651_v31, %v14540_v33  ;;  %v14542_v36 = vpop.f32.mrb[9].mxu0 }
 0x75b   : > { %v22028_v38 = vadd.f32 %v16653_v32, %v14542_v36  ;;  %v14544_v39 = vpop.f32.mrb[10].mxu0 }
 0x75c   : > { %v22030_v56 = vadd.f32 %v16655_v34, %v14544_v39  ;;  %v14546_v60 = vpop.f32.mrb[11].mxu0  ;;  %v14687_v57 = vmax.f32 %v22025_v35, 0.0  ;;  %v16691_v35 = vadd.f32 %v21990_v1, %v21996_v4 }
 0x75d   : > { %v22032_v62 = vadd.f32 %v16657_v37, %v14546_v60  ;;  %v14688_v58 = vmax.f32 %v22028_v38, 0.0  ;;  %v16693_v38 = vadd.f32 %v21992_v2, %v22000_v6 }
 0x761   : > { %v14550_v42 = vpop.f32.mrb[12].mxu0 }
 0x762   : > { %v22040_v0 = vadd.f32 %v16659_v40, %v14550_v42  ;;  %v14552_v43 = vpop.f32.mrb[13].mxu0 }
 0x763   : > { %v22044_v8 = vadd.f32 %v16661_v41, %v14552_v43  ;;  %v14554_v9 = vpop.f32.mrb[14].mxu0 }
 0x764   : > { %v22046_v10 = vadd.f32 %v16663_v63, %v14554_v9  ;;  %v14556_v12 = vpop.f32.mrb[15].mxu0  ;;  %v14691_v1 = vmax.f32 %v22040_v0, 0.0 }
 0x765   : > { %v22048_v44 = vadd.f32 %v16665_v7, %v14556_v12  ;;  %v14692_v2 = vmax.f32 %v22044_v8, 0.0 }
 0x769   : > { %v14560_v13 = vpop.f32.mrb[16].mxu0 }
 0x76a   : > { %v16668_v17 = vadd.f32 %v16667_v45, %v14560_v13  ;;  %v14562_v47 = vpop.f32.mrb[17].mxu0  ;;  %v14685_v45 = vmax.f32 %v22018_v28, 0.0  ;;  %v14686_v13 = vmax.f32 %v22020_v30, 0.0  ;;  %v16687_v28 = vadd.f32 %v21986_v59, %v21996_v4 }
 0x76b   : > { %v16670_v20 = vadd.f32 %v16669_v46, %v14562_v47  ;;  %v14564_v21 = vpop.f32.mrb[18].mxu0  ;;  %v16689_v30 = vadd.f32 %v21988_v61, %v22000_v6 }
 0x76c   : > { %v14695_v24 = vmax.f32 %v16668_v17, 0.0  ;;  %v16672_v25 = vadd.f32 %v16671_v15, %v14564_v21  ;;  %v14566_v27 = vpop.f32.mrb[19].mxu0 }
 0x76d   : > { %v14696_v48 = vmax.f32 %v16670_v20, 0.0  ;;  %v16674_v31 = vadd.f32 %v16673_v19, %v14566_v27 }
 0x76e   : > { %v22059_v32 = vmax.f32 %v14679_v22, %v14695_v24  ;;  %v14697_v33 = vmax.f32 %v16672_v25, 0.0 }
 0x76f   : > { %v22062_v34 = vmax.f32 %v14680_v29, %v14696_v48  ;;  %v14698_v36 = vmax.f32 %v16674_v31, 0.0 }
 0x770   : > { %v22066_v11 = vmax.f32 %v14681_v49, %v14697_v33  ;;  %v14689_v49 = vmax.f32 %v22030_v56, 0.0  ;;  %v16695_v56 = vadd.f32 %v21994_v3, %v21996_v4 }
 0x771   : > { %v22070_v37 = vmax.f32 %v14682_v50, %v14698_v36  ;;  %v14570_v39 = vpop.f32.mrb[20].mxu0  ;;  %v14690_v50 = vmax.f32 %v22032_v62, 0.0  ;;  %v16697_v62 = vadd.f32 %v21998_v5, %v22000_v6 }
 0x772   : > { %v16676_v60 = vadd.f32 %v16675_v51, %v14570_v39  ;;  %v14572_v40 = vpop.f32.mrb[21].mxu0 }
 0x773   : > { %v16678_v41 = vadd.f32 %v16677_v14, %v14572_v40  ;;  %v14574_v42 = vpop.f32.mrb[22].mxu0 }
 0x774   : > { %v14699_v63 = vmax.f32 %v16676_v60, 0.0  ;;  %v16680_v43 = vadd.f32 %v16679_v16, %v14574_v42  ;;  %v14576_v7 = vpop.f32.mrb[23].mxu0 }
 0x775   : > { %v14700_v9 = vmax.f32 %v16678_v41, 0.0  ;;  %v16682_v12 = vadd.f32 %v16681_v18, %v14576_v7  ;;  %v14693_v7 = vmax.f32 %v22046_v10, 0.0 }
 0x776   : > { %v22079_v46 = vmax.f32 %v14683_v52, %v14699_v63  ;;  %v14701_v54 = vmax.f32 %v16680_v43, 0.0 }
 0x777   : > { %v22082_v15 = vmax.f32 %v14684_v53, %v14700_v9  ;;  %v14702_v55 = vmax.f32 %v16682_v12, 0.0  ;;  %v14694_v9 = vmax.f32 %v22048_v44, 0.0 }
 0x778   : > { %v22086_v17 = vmax.f32 %v14685_v45, %v14701_v54 }
 0x779   : > { %v22090_v47 = vmax.f32 %v14686_v13, %v14702_v55  ;;  %v14580_v19 = vpop.f32.mrb[24].mxu0 }
 0x77a   : > { %v16684_v20 = vadd.f32 %v16683_v23, %v14580_v19  ;;  %v14582_v21 = vpop.f32.mrb[25].mxu0 }
 0x77b   : > { %v16686_v22 = vadd.f32 %v16685_v26, %v14582_v21  ;;  %v14584_v24 = vpop.f32.mrb[26].mxu0 }
 0x77c   : > { %v14703_v25 = vmax.f32 %v16684_v20, 0.0  ;;  %v16688_v27 = vadd.f32 %v16687_v28, %v14584_v24  ;;  %v14586_v29 = vpop.f32.mrb[27].mxu0 }
 0x77d   : > { %v14704_v48 = vmax.f32 %v16686_v22, 0.0  ;;  %v16690_v31 = vadd.f32 %v16689_v30, %v14586_v29 }
 0x77e   : > { %v22099_v33 = vmax.f32 %v14687_v57, %v14703_v25  ;;  %v14705_v59 = vmax.f32 %v16688_v27, 0.0 }
 0x77f   : > { %v22102_v36 = vmax.f32 %v14688_v58, %v14704_v48  ;;  %v14706_v61 = vmax.f32 %v16690_v31, 0.0 }
 0x780   : > { %v22106_v51 = vmax.f32 %v14689_v49, %v14705_v59 }
 0x781   : > { %v22110_v14 = vmax.f32 %v14690_v50, %v14706_v61  ;;  %v14590_v39 = vpop.f32.mrb[28].mxu0 }
 0x782   : > { %v16692_v16 = vadd.f32 %v16691_v35, %v14590_v39  ;;  %v14592_v60 = vpop.f32.mrb[29].mxu0 }
 0x783   : > { %v16694_v40 = vadd.f32 %v16693_v38, %v14592_v60  ;;  %v14594_v18 = vpop.f32.mrb[30].mxu0 }
 0x784   : > { %v14707_v41 = vmax.f32 %v16692_v16, 0.0  ;;  %v16696_v42 = vadd.f32 %v16695_v56, %v14594_v18  ;;  %v14596_v52 = vpop.f32.mrb[31].mxu0 }
 0x785   : > { %v14708_v63 = vmax.f32 %v16694_v40, 0.0  ;;  %v16698_v43 = vadd.f32 %v16697_v62, %v14596_v52 }
 0x786   : > { %v22119_v53 = vmax.f32 %v14691_v1, %v14707_v41  ;;  %v14709_v3 = vmax.f32 %v16696_v42, 0.0 }
 0x787   : > { %v22122_v12 = vmax.f32 %v14692_v2, %v14708_v63  ;;  %v14710_v5 = vmax.f32 %v16698_v43, 0.0 }
 0x788   : > { %v22124_v45 = vmax.f32 %v14693_v7, %v14709_v3  ;;  %v12284_v54 = vpop.f32.mrb[32].mxu1 }
 0x789   : > { %v22126_v0 = vmax.f32 %v14694_v9, %v14710_v5  ;;  %v14600_v13 = vpop.f32.mrb[32].mxu0  ;;  %v16699_v8 = vadd.f32 %v12284_v54, %v21996_v4  ;;  %v12286_v55 = vpop.f32.mrb[33].mxu1 }
 0x78a   : > { %v14602_v23 = vpop.f32.mrb[33].mxu0  ;;  %v16701_v10 = vadd.f32 %v12286_v55, %v22000_v6  ;;  %v12288_v26 = vpop.f32.mrb[34].mxu1 }
 0x78b   : > { %v14604_v19 = vpop.f32.mrb[34].mxu0  ;;  %v22130_v28 = vadd.f32 %v16699_v8, %v14600_v13  ;;  %v16703_v44 = vadd.f32 %v12288_v26, %v21996_v4  ;;  %v12290_v20 = vpop.f32.mrb[35].mxu1 }
 0x78c   : > { %v14606_v21 = vpop.f32.mrb[35].mxu0  ;;  %v22133_v30 = vadd.f32 %v16701_v10, %v14602_v23  ;;  %v16705_v22 = vadd.f32 %v12290_v20, %v22000_v6 }
 0x78d   : > { %v22136_v24 = vadd.f32 %v16703_v44, %v14604_v19 }
 0x78e   : > { %v22138_v57 = vadd.f32 %v16705_v22, %v14606_v21 }
 0x790   : > { %v12294_v25 = vpop.f32.mrb[36].mxu1 }
 0x791   : > { %v14610_v27 = vpop.f32.mrb[36].mxu0  ;;  %v16707_v29 = vadd.f32 %v12294_v25, %v21996_v4  ;;  %v12296_v58 = vpop.f32.mrb[37].mxu1 }
 0x792   : > { %v14612_v48 = vpop.f32.mrb[37].mxu0  ;;  %v16709_v31 = vadd.f32 %v12296_v58, %v22000_v6  ;;  %v12298_v49 = vpop.f32.mrb[38].mxu1 }
 0x793   : > { %v14614_v59 = vpop.f32.mrb[38].mxu0  ;;  %v22142_v50 = vadd.f32 %v16707_v29, %v14610_v27  ;;  %v16711_v61 = vadd.f32 %v12298_v49, %v21996_v4  ;;  %v12300_v35 = vpop.f32.mrb[39].mxu1 }
 0x794   : > { %v14616_v38 = vpop.f32.mrb[39].mxu0  ;;  %v22145_v39 = vadd.f32 %v16709_v31, %v14612_v48  ;;  %v16713_v56 = vadd.f32 %v12300_v35, %v22000_v6 }
 0x795   : > { %v22148_v16 = vadd.f32 %v16711_v61, %v14614_v59 }
 0x796   : > { %v22150_v60 = vadd.f32 %v16713_v56, %v14616_v38 }
 0x798   : > { %v12304_v62 = vpop.f32.mrb[40].mxu1 }
 0x799   : > { %v14620_v40 = vpop.f32.mrb[40].mxu0  ;;  %v16715_v18 = vadd.f32 %v12304_v62, %v21996_v4  ;;  %v12306_v1 = vpop.f32.mrb[41].mxu1 }
 0x79a   : > { %v14622_v41 = vpop.f32.mrb[41].mxu0  ;;  %v16717_v42 = vadd.f32 %v12306_v1, %v22000_v6  ;;  %v12308_v52 = vpop.f32.mrb[42].mxu1 }
 0x79b   : > { %v14624_v2 = vpop.f32.mrb[42].mxu0  ;;  %v22154_v63 = vadd.f32 %v16715_v18, %v14620_v40  ;;  %v16719_v43 = vadd.f32 %v12308_v52, %v21996_v4  ;;  %v12310_v7 = vpop.f32.mrb[43].mxu1 }
 0x79c   : > { %v14626_v3 = vpop.f32.mrb[43].mxu0  ;;  %v22157_v9 = vadd.f32 %v16717_v42, %v14622_v41  ;;  %v16721_v5 = vadd.f32 %v12310_v7, %v22000_v6 }
 0x79d   : > { %v22160_v54 = vadd.f32 %v16719_v43, %v14624_v2  ;;  %v14711_v43 = vmax.f32 %v22130_v28, 0.0 }
 0x79e   : > { %v22162_v13 = vadd.f32 %v16721_v5, %v14626_v3  ;;  %v14712_v5 = vmax.f32 %v22133_v30, 0.0 }
 0x7a0   : > { %v12314_v8 = vpop.f32.mrb[44].mxu1 }
 0x7a1   : > { %v14630_v55 = vpop.f32.mrb[44].mxu0  ;;  %v16723_v23 = vadd.f32 %v12314_v8, %v21996_v4  ;;  %v12316_v10 = vpop.f32.mrb[45].mxu1 }
 0x7a2   : > { %v14632_v26 = vpop.f32.mrb[45].mxu0  ;;  %v16725_v19 = vadd.f32 %v12316_v10, %v22000_v6  ;;  %v12318_v44 = vpop.f32.mrb[46].mxu1 }
 0x7a3   : > { %v14634_v20 = vpop.f32.mrb[46].mxu0  ;;  %v22166_v21 = vadd.f32 %v16723_v23, %v14630_v55  ;;  %v16727_v22 = vadd.f32 %v12318_v44, %v21996_v4  ;;  %v12320_v25 = vpop.f32.mrb[47].mxu1  ;;  %v14713_v23 = vmax.f32 %v22136_v24, 0.0 }
 0x7a4   : > { %v14636_v27 = vpop.f32.mrb[47].mxu0  ;;  %v22169_v29 = vadd.f32 %v16725_v19, %v14632_v26  ;;  %v16729_v58 = vadd.f32 %v12320_v25, %v22000_v6  ;;  %v14714_v19 = vmax.f32 %v22138_v57, 0.0 }
 0x7a5   : > { %v22172_v48 = vadd.f32 %v16727_v22, %v14634_v20 }
 0x7a6   : > { %v22174_v31 = vadd.f32 %v16729_v58, %v14636_v27 }
 0x7a8   : > { %v12324_v49 = vpop.f32.mrb[48].mxu1 }
 0x7a9   : > { %v14640_v59 = vpop.f32.mrb[48].mxu0  ;;  %v16731_v61 = vadd.f32 %v12324_v49, %v21996_v4  ;;  %v12326_v35 = vpop.f32.mrb[49].mxu1 }
 0x7aa   : > { %v14642_v38 = vpop.f32.mrb[49].mxu0  ;;  %v16733_v56 = vadd.f32 %v12326_v35, %v22000_v6  ;;  %v12328_v62 = vpop.f32.mrb[50].mxu1 }
 0x7ab   : > { %v14644_v40 = vpop.f32.mrb[50].mxu0  ;;  %v16732_v18 = vadd.f32 %v16731_v61, %v14640_v59  ;;  %v16735_v1 = vadd.f32 %v12328_v62, %v21996_v4  ;;  %v12330_v41 = vpop.f32.mrb[51].mxu1 }
 0x7ac   : > { %v14646_v42 = vpop.f32.mrb[51].mxu0  ;;  %v16734_v52 = vadd.f32 %v16733_v56, %v14642_v38  ;;  %v16737_v2 = vadd.f32 %v12330_v41, %v22000_v6 }
 0x7ad   : > { %v14727_v7 = vmax.f32 %v16732_v18, 0.0  ;;  %v16736_v3 = vadd.f32 %v16735_v1, %v14644_v40 }
 0x7ae   : > { %v14728_v8 = vmax.f32 %v16734_v52, 0.0  ;;  %v16738_v55 = vadd.f32 %v16737_v2, %v14646_v42 }
 0x7af   : > { %v14759_v10 = vmax.f32 %v14711_v43, %v14727_v7  ;;  %v14729_v26 = vmax.f32 %v16736_v3, 0.0  ;;  %v14716_v43 = vmax.f32 %v22145_v39, 0.0 }
 0x7b0   : > { %v14760_v44 = vmax.f32 %v14712_v5, %v14728_v8  ;;  %v14730_v20 = vmax.f32 %v16738_v55, 0.0  ;;  %v12334_v22 = vpop.f32.mrb[52].mxu1  ;;  %v14717_v5 = vmax.f32 %v22148_v16, 0.0  ;;  %v14718_v55 = vmax.f32 %v22150_v60, 0.0 }
 0x7b1   : > { %v14650_v25 = vpop.f32.mrb[52].mxu0  ;;  %v14775_v27 = vmax.f32 %v22059_v32, %v14759_v10  ;;  %v14761_v28 = vmax.f32 %v14713_v23, %v14729_v26  ;;  %v16739_v58 = vadd.f32 %v12334_v22, %v21996_v4  ;;  %v12336_v49 = vpop.f32.mrb[53].mxu1 }
 0x7b2   : > { %v14652_v30 = vpop.f32.mrb[53].mxu0  ;;  %v14776_v59 = vmax.f32 %v22062_v34, %v14760_v44  ;;  %v14762_v61 = vmax.f32 %v14714_v19, %v14730_v20  ;;  %v16741_v24 = vadd.f32 %v12336_v49, %v22000_v6  ;;  %v12338_v35 = vpop.f32.mrb[54].mxu1  ;;  %v14715_v34 = vmax.f32 %v22142_v50, 0.0 }
 0x7b3   : > { %v14654_v38 = vpop.f32.mrb[54].mxu0  ;;  %v14777_v57 = vmax.f32 %v22066_v11, %v14761_v28  ;;  %v16740_v56 = vadd.f32 %v16739_v58, %v14650_v25  ;;  %v16743_v62 = vadd.f32 %v12338_v35, %v21996_v4  ;;  %v12340_v40 = vpop.f32.mrb[55].mxu1 }
 0x7b4   : > { %v14656_v18 = vpop.f32.mrb[55].mxu0  ;;  %v16594_v32 = vpack.c.bf16 %v14776_v59, %v14775_v27  ;;  %v14778_v1 = vmax.f32 %v22070_v37, %v14762_v61  ;;  %v16742_v41 = vadd.f32 %v16741_v24, %v14652_v30  ;;  %v16745_v42 = vadd.f32 %v12340_v40, %v22000_v6 }
 0x7b5   : > { %v14731_v52 = vmax.f32 %v16740_v56, 0.0  ;;  %v16744_v2 = vadd.f32 %v16743_v62, %v14654_v38  ;;  %v14719_v38 = vmax.f32 %v22154_v63, 0.0  ;;  %v14720_v62 = vmax.f32 %v22157_v9, 0.0 }
 0x7b6   : > { %14839 = vst [vmem:[%s22195_s17] sm:$0xff] %v16594_v32  ;;  %v16595_v11 = vpack.c.bf16 %v14778_v1, %v14777_v57  ;;  %v14732_v7 = vmax.f32 %v16742_v41, 0.0  ;;  %v16746_v3 = vadd.f32 %v16745_v42, %v14656_v18  ;;  %v14721_v32 = vmax.f32 %v22160_v54, 0.0 }
 0x7b7   : > { %v14763_v37 = vmax.f32 %v14715_v34, %v14731_v52  ;;  %v14733_v8 = vmax.f32 %v16744_v2, 0.0  ;;  %v14722_v42 = vmax.f32 %v22162_v13, 0.0 }
 0x7b8   : > { %14840 = vst [vmem:[%s22195_s17 + $0x8] sm:$0xff] %v16595_v11  ;;  %v14764_v50 = vmax.f32 %v14716_v43, %v14732_v7  ;;  %v14734_v23 = vmax.f32 %v16746_v3, 0.0  ;;  %v12344_v10 = vpop.f32.mrb[56].mxu1 }
 0x7b9   : > { %v14660_v26 = vpop.f32.mrb[56].mxu0  ;;  %v14779_v39 = vmax.f32 %v22079_v46, %v14763_v37  ;;  %v14765_v19 = vmax.f32 %v14717_v5, %v14733_v8  ;;  %v16747_v44 = vadd.f32 %v12344_v10, %v21996_v4  ;;  %v12346_v20 = vpop.f32.mrb[57].mxu1 }
 0x7ba   : > { %v14662_v22 = vpop.f32.mrb[57].mxu0  ;;  %v14780_v25 = vmax.f32 %v22082_v15, %v14764_v50  ;;  %v14766_v27 = vmax.f32 %v14718_v55, %v14734_v23  ;;  %v16749_v16 = vadd.f32 %v12346_v20, %v22000_v6  ;;  %v12348_v28 = vpop.f32.mrb[58].mxu1 }
 0x7bb   : > { %v14664_v60 = vpop.f32.mrb[58].mxu0  ;;  %v14781_v58 = vmax.f32 %v22086_v17, %v14765_v19  ;;  %v16748_v49 = vadd.f32 %v16747_v44, %v14660_v26  ;;  %v16751_v30 = vadd.f32 %v12348_v28, %v21996_v4  ;;  %v12350_v59 = vpop.f32.mrb[59].mxu1  ;;  %v14723_v19 = vmax.f32 %v22166_v21, 0.0 }
 0x7bc   : > { %v14666_v46 = vpop.f32.mrb[59].mxu0  ;;  %v16596_v61 = vpack.c.bf16 %v14780_v25, %v14779_v39  ;;  %v14782_v24 = vmax.f32 %v22090_v47, %v14766_v27  ;;  %v16750_v35 = vadd.f32 %v16749_v16, %v14662_v22  ;;  %v16753_v15 = vadd.f32 %v12350_v59, %v22000_v6 }
 0x7bd   : > { %v14735_v57 = vmax.f32 %v16748_v49, 0.0  ;;  %v16752_v56 = vadd.f32 %v16751_v30, %v14664_v60  ;;  %v14724_v22 = vmax.f32 %v22169_v29, 0.0  ;;  %v14725_v27 = vmax.f32 %v22172_v48, 0.0 }
 0x7be   : > { %14841 = vst [vmem:[%s22195_s17 + $0x10] sm:$0xff] %v16596_v61  ;;  %v16597_v17 = vpack.c.bf16 %v14782_v24, %v14781_v58  ;;  %v14736_v40 = vmax.f32 %v16750_v35, 0.0  ;;  %v16754_v18 = vadd.f32 %v16753_v15, %v14666_v46 }
 0x7bf   : > { %v14767_v1 = vmax.f32 %v14719_v38, %v14735_v57  ;;  %v14737_v41 = vmax.f32 %v16752_v56, 0.0 }
 0x7c0   : > { %14842 = vst [vmem:[%s22195_s17 + $0x18] sm:$0xff] %v16597_v17  ;;  %v14768_v47 = vmax.f32 %v14720_v62, %v14736_v40  ;;  %v14738_v34 = vmax.f32 %v16754_v18, 0.0  ;;  %v12354_v52 = vpop.f32.mrb[60].mxu1 }
 0x7c1   : > { %v14670_v2 = vpop.f32.mrb[60].mxu0  ;;  %v14783_v63 = vmax.f32 %v22099_v33, %v14767_v1  ;;  %v14769_v43 = vmax.f32 %v14721_v32, %v14737_v41  ;;  %v16755_v9 = vadd.f32 %v12354_v52, %v21996_v4  ;;  %v12356_v11 = vpop.f32.mrb[61].mxu1 }
 0x7c2   : > { %v14672_v7 = vpop.f32.mrb[61].mxu0  ;;  %v14784_v3 = vmax.f32 %v22102_v36, %v14768_v47  ;;  %v14770_v5 = vmax.f32 %v14722_v42, %v14738_v34  ;;  %v16757_v54 = vadd.f32 %v12356_v11, %v22000_v6  ;;  %v12358_v37 = vpop.f32.mrb[62].mxu1 }
 0x7c3   : > { %v14674_v13 = vpop.f32.mrb[62].mxu0  ;;  %v14785_v8 = vmax.f32 %v22106_v51, %v14769_v43  ;;  %v16756_v55 = vadd.f32 %v16755_v9, %v14670_v2  ;;  %v16759_v50 = vadd.f32 %v12358_v37, %v21996_v4  ;;  %v12360_v23 = vpop.f32.mrb[63].mxu1 }
 0x7c4   : > { %v14676_v33 = vpop.f32.mrb[63].mxu0  ;;  %v16598_v10 = vpack.c.bf16 %v14784_v3, %v14783_v63  ;;  %v14786_v26 = vmax.f32 %v22110_v14, %v14770_v5  ;;  %v16758_v39 = vadd.f32 %v16757_v54, %v14672_v7  ;;  %v16761_v36 = vadd.f32 %v12360_v23, %v22000_v6 }
 0x7c5   : > { %v14739_v44 = vmax.f32 %v16756_v55, 0.0  ;;  %v16760_v20 = vadd.f32 %v16759_v50, %v14674_v13  ;;  %v14726_v14 = vmax.f32 %v22174_v31, 0.0 }
 0x7c6   : > { %14843 = vst [vmem:[%s22195_s17 + $0x20] sm:$0xff] %v16598_v10  ;;  %v16599_v51 = vpack.c.bf16 %v14786_v26, %v14785_v8  ;;  %v14740_v4 = vmax.f32 %v16758_v39, 0.0  ;;  %v16762_v25 = vadd.f32 %v16761_v36, %v14676_v33 }
 0x7c7   : > { %v14771_v16 = vmax.f32 %v14723_v19, %v14739_v44  ;;  %v14741_v28 = vmax.f32 %v16760_v20, 0.0 }
 0x7c8   : > { %14844 = vst [vmem:[%s22195_s17 + $0x28] sm:$0xff] %v16599_v51  ;;  %v14772_v6 = vmax.f32 %v14724_v22, %v14740_v4  ;;  %v14742_v21 = vmax.f32 %v16762_v25, 0.0 }
 0x7c9   : > { %v14787_v29 = vmax.f32 %v22119_v53, %v14771_v16  ;;  %v14773_v60 = vmax.f32 %v14725_v27, %v14741_v28 }
 0x7ca   : > { %v14788_v58 = vmax.f32 %v22122_v12, %v14772_v6  ;;  %v14774_v49 = vmax.f32 %v14726_v14, %v14742_v21 }
 0x7cb   : > { %v14789_v48 = vmax.f32 %v22124_v45, %v14773_v60 }
 0x7cc   : > { %v16600_v31 = vpack.c.bf16 %v14788_v58, %v14787_v29  ;;  %v14790_v30 = vmax.f32 %v22126_v0, %v14774_v49 }
 0x7ce   : > { %14845 = vst [vmem:[%s22195_s17 + $0x30] sm:$0xff] %v16600_v31  ;;  %v16601_v53 = vpack.c.bf16 %v14790_v30, %v14789_v48 }
 0x7d0   : > { %14846 = vst [vmem:[%s22195_s17 + $0x38] sm:$0xff] %v16601_v53 }
 0x7d1   : > { %20840 = shalt.err (!%p20837_p7)
}
 0x7d2   : > { %s20841_s22 = scalar_lea.hbm %s22240_s7, 1024  ;;  %s20845_s25 = scalar_lea.hbm %s22289_s3, 2048 }
 0x7d3   : > { %p20842_p9 = scmp.ne.s32.totalorder %s22240_s7, %s20841_s22  ;;  %p20846_p3 = scmp.lt.u32.totalorder %s22240_s7, %s22289_s3 }
 0x7d4   : > { %p20847_p1 = scmp.lt.u32.totalorder %s20845_s25, %s20841_s22  ;;  %p20849_p2 = scmp.lt.u32.totalorder %s20841_s22, %s22240_s7 }
 0x7d5   : > { %p20843_p12 = pnand %p20842_p9, %p22310_p4 }
 0x7d6   : > { %p20848_p10 = por %p20847_p1, %p20846_p3 }
 0x7d7   : > { %p20844_p6 = pneg %p20843_p12 }
 0x7d8   : > { %p20850_p0 = por %p20849_p2, %p20848_p10 }
 0x7da   : > { %p20851_p11 = pnand %p20850_p0, %p20844_p6 }
 0x7dc   : > { %20854 = shalt.err (!%p20851_p11)
}
 0x7dd   : > { %s20908_s4 = smov 128   ;;  %s20909_s17 = smov 256  }
 0x7de   : > { %s20910_s5 = smov 8  }
 0x7df   : > { %18245 = dma.vmem_to_hbm [thread:$0]  (%p22310_p4), %s22234_s20, 1024, %s22240_s7, %s14848_s6, %s20908_s4, %s20909_s17, %s20910_s5  }
 0x7e0 PF: > { %s14876_s10 = sand.u32 1, %s20885_s12   ;;  %p22311_p13 = scmp.ne.s32.totalorder %s22300_s29, 0 }
 0x7e1   : > { %p22312_p8 = scmp.ge.s32.totalorder %s20897_s15, 2  ;;  %s14877_s11 = scalar_lea.sflag [#allocation4], %s14876_s10 }
 0x7e3   : > { %p18259_p5 = pnand %p22312_p8, %p22311_p13 }
 0x7e5   : > { %20880 = dma.done.wait (!%p18259_p5), %s14877_s11, 1024  }
 0x7e6   : > { %20882 = vsyncadd (!%p18259_p5), %s14877_s11, 4294966272  ;;  %p17_p7 = scmp.ge.s32.totalorder %s20952_s16, 4   ;;  %s22313_s12 = smov %s20889_s13 }
 0x7e7   : > { %s22314_s13 = smov %s20893_s14  ;;  %s22315_s14 = smov %s20963_s19 }
 0x7e8   : > { %s22316_s15 = smov %s20952_s16  ;;  %19 = sbr.rel (!%p17_p7) target bundleno = 6 (0x6), region = 93 }
 0x7ef   :  { %14882 = vsyncpa [#allocation3], 1 }
 0x7f0   :  { %14884 = vsyncpa [#allocation3 + $0x1], 1 }
 0x7f1   :  { %14885 = vsyncpa [#allocation6], 1 }
 0x7f2   :  { %14887 = vsyncpa [#allocation6 + $0x1], 1 }
 0x7f3   :  { %14888 = vsyncpa [#allocation4], 1 }
 0x7f4   :  { %14890 = vsyncpa [#allocation4 + $0x1], 1 }

</bundles_post_ra>
